<compile_context>
chip_gen: v5e
topology: v5e:2x2
jax: 0.10.0
libtpu: 0.0.40
codegen_flags: <defaults>
</compile_context>

<pallas_src>
import functools
import math

import jax
import jax.numpy as jnp
from jax.experimental import pallas as pl
from jax.experimental.pallas import tpu as pltpu

WINDOW_SIZE = 11
SIGMA = 1.5


def _gaussian_taps(window_size: int, sigma: float):
    """1D Gaussian taps as Python floats (trace-time constants)."""
    g = [math.exp(-((x - window_size // 2) ** 2) / (2.0 * sigma ** 2))
         for x in range(window_size)]
    s = sum(g)
    return tuple(v / s for v in g)


def gaussian_window_2d(window_size: int, sigma: float) -> jnp.ndarray:
    """2D window identical to create_window()[0, 0] (used by the reference)."""
    x = jnp.arange(window_size, dtype=jnp.float32)
    g = jnp.exp(-((x - window_size // 2) ** 2) / (2.0 * sigma ** 2))
    g = g / jnp.sum(g)
    return jnp.outer(g, g)


def _ssim_kernel(cvals_ref, img1_ref, img2_ref, out_ref, *, wvec):
    """One grid step == a lane-aligned tile of P flattened (B*C) planes.

    cvals_ref : SMEM (2,)      f32 -> [C1, C2]
    img1_ref  : VMEM (H, W, P) native dtype (planes on the lane axis)
    img2_ref  : VMEM (H, W, P) native dtype
    out_ref   : VMEM (1, P)    f32 -> per-plane sum(ssim_map)
    """
    H, W, P = img1_ref.shape
    win = len(wvec)
    half = win // 2
    Ho = H - win + 1
    Wo = W - win + 1
    # Tap weights are Python floats; exploit their symmetry when present.
    symmetric = all(wvec[k] == wvec[win - 1 - k] for k in range(half))

    def sep_conv(x, slicer):
        """1D 'valid' Gaussian pass along one axis (slicer picks tap k)."""
        if symmetric:
            acc = wvec[half] * slicer(x, half) if (win % 2 == 1) else None
            for k in range(half):
                term = wvec[k] * (slicer(x, k) + slicer(x, win - 1 - k))
                acc = term if acc is None else acc + term
            return acc
        acc = wvec[0] * slicer(x, 0)
        for k in range(1, win):
            acc = acc + wvec[k] * slicer(x, k)
        return acc

    def conv_w(x):  # (H, W, P) -> (H, Wo, P); slices the sublane axis only
        return sep_conv(x, lambda a, k: a[:, k:k + Wo, :])

    def conv_h(x):  # (H, Wo, P) -> (Ho, Wo, P); slices the untiled row axis
        return sep_conv(x, lambda a, k: a[k:k + Ho, :, :])

    def gconv(x):
        return conv_h(conv_w(x))

    x1 = img1_ref[...].astype(jnp.float32)
    x2 = img2_ref[...].astype(jnp.float32)

    # Each product is formed right before its own conv chain (one big f32
    # temporary live at a time instead of three).
    mu1 = gconv(x1)
    mu2 = gconv(x2)
    e11 = gconv(x1 * x1)
    e22 = gconv(x2 * x2)
    e12 = gconv(x1 * x2)

    mu1_sq = mu1 * mu1
    mu2_sq = mu2 * mu2
    mu1_mu2 = mu1 * mu2
    sigma1_sq = e11 - mu1_sq
    sigma2_sq = e22 - mu2_sq
    sigma12 = e12 - mu1_mu2

    C1 = cvals_ref[0]
    C2 = cvals_ref[1]
    v1 = 2.0 * sigma12 + C2
    v2 = sigma1_sq + sigma2_sq + C2
    num = (2.0 * mu1_mu2 + C1) * v1
    den = (mu1_sq + mu2_sq + C1) * v2

    # Division on the EUP: approximate reciprocal + one Newton-Raphson step
    # (keeps the result well inside the rtol=1e-4 check).
    inv = pl.reciprocal(den, approx=True)
    inv = inv * (2.0 - den * inv)
    ssim_map = num * inv                                   # (Ho, Wo, P)

    # Per-plane partial sums: H rows collapse with plain VPU adds, then one
    # small sublane reduction; the lane (plane) axis is preserved.
    psum = jnp.sum(ssim_map, axis=0)                       # (Wo, P)
    psum = jnp.sum(psum, axis=0, keepdims=True)            # (1, P)
    out_ref[...] = psum


def _vmem_config():
    """(vmem_limit_bytes, per-step block budget) based on chip generation."""
    cap = 128 * 1024 * 1024
    try:
        info = pltpu.get_tpu_info()
        cap = int(getattr(info, "vmem_capacity_bytes", cap))
    except Exception:
        pass
    if cap <= 64 * 1024 * 1024:           # v7x-class: 64 MiB per TensorCore
        return 48 * 1024 * 1024, 14 * 1024 * 1024
    return 64 * 1024 * 1024, 28 * 1024 * 1024   # v5e / v6e: 128 MiB physical


def _plane_tiling(N, H, W, itemsize, block_budget):
    """Pick the lane-dim plane tile P. Returns (P, num_tiles, N_pad)."""
    # Per-plane working set: double-buffered native inputs + live f32 temps.
    per_plane = H * W * (4 * itemsize + 24)
    p_fit = max(1, block_budget // per_plane)
    if N <= p_fit:
        if N >= 256 and N % 256 == 0:
            return N // 2, 2, N          # >=2 grid steps: keeps both v7x TCs busy
        return N, 1, N                   # single step, no padding
    if N <= 128:
        # Planes too big for the budget but too few for lane-aligned splits;
        # keep one block and rely on vmem_limit_bytes (see H-halo TODO above).
        return N, 1, N
    # Multi-block: P must be a multiple of 128 (lane-dense blocks).
    p = max(128, (p_fit // 128) * 128)
    for cand in range(p, 127, -128):     # prefer a divisor of N -> no jnp.pad
        if N % cand == 0:
            return cand, N // cand, N
    n_pad = pl.cdiv(N, p) * p
    return p, n_pad // p, n_pad


def ssim_pallas(img1, img2, window_size: int = WINDOW_SIZE, val_range=None):
    """SSIM(img1, img2) with size_average=True; returns a scalar f32."""
    B, C, H, W = img1.shape
    N = B * C
    assert H >= window_size and W >= window_size, "spatial dims < window_size"

    wvec = _gaussian_taps(window_size, SIGMA)
    Ho = H - window_size + 1
    Wo = W - window_size + 1

    # Dynamic range L (matches the PyTorch default path when val_range=None;
    # pass val_range explicitly to skip this extra HBM pass over img1).
    if val_range is None:
        max_val = jnp.where(jnp.max(img1).astype(jnp.float32) > 128.0, 255.0, 1.0)
        min_val = jnp.where(jnp.min(img1).astype(jnp.float32) < -0.5, -1.0, 0.0)
        L = max_val - min_val
    else:
        L = jnp.float32(val_range)
    C1 = (0.01 * L) ** 2
    C2 = (0.03 * L) ** 2
    cvals = jnp.stack([C1, C2]).astype(jnp.float32)

    # Planes-on-lanes layout: (B, C, H, W) -> (H, W, N); native dtype is kept
    # (cast to f32 happens inside the kernel, halving HBM traffic for bf16).
    x1 = jnp.transpose(img1.reshape(N, H, W), (1, 2, 0))
    x2 = jnp.transpose(img2.reshape(N, H, W), (1, 2, 0))

    vmem_limit, block_budget = _vmem_config()
    itemsize = jnp.dtype(x1.dtype).itemsize
    P, num_tiles, N_pad = _plane_tiling(N, H, W, itemsize, block_budget)
    if N_pad != N:
        pad = ((0, 0), (0, 0), (0, N_pad - N))
        x1 = jnp.pad(x1, pad)
        x2 = jnp.pad(x2, pad)

    kernel = functools.partial(_ssim_kernel, wvec=wvec)

    plane_sums = pl.pallas_call(
        kernel,
        out_shape=jax.ShapeDtypeStruct((1, N_pad), jnp.float32),
        grid=(num_tiles,),
        in_specs=[
            pl.BlockSpec(memory_space=pltpu.MemorySpace.SMEM),      # cvals (2,)
            pl.BlockSpec((H, W, P), lambda n: (0, 0, n)),
            pl.BlockSpec((H, W, P), lambda n: (0, 0, n)),
        ],
        out_specs=pl.BlockSpec((1, P), lambda n: (0, n)),
        compiler_params=pltpu.CompilerParams(
            dimension_semantics=("parallel",),
            vmem_limit_bytes=vmem_limit),
    )(cvals, x1, x2)

    total = jnp.sum(plane_sums[0, :N])        # padded planes (ssim==1) excluded
    return total / jnp.float32(N * Ho * Wo)


class SSIM:
    """Mirror of the PyTorch SSIM module (size_average=True, val_range=None)."""

    def __init__(self, window_size: int = WINDOW_SIZE, size_average: bool = True,
                 val_range=None):
        assert size_average, "only size_average=True is implemented"
        self.window_size = window_size
        self.val_range = val_range

    def __call__(self, img1, img2):
        return ssim_pallas(img1, img2, window_size=self.window_size,
                           val_range=self.val_range)


def _ssim_ref(img1, img2, window_size: int = WINDOW_SIZE):
    """Pure-JAX reference (lax conv, 2D window) for correctness checking."""
    B, C, H, W = img1.shape
    img1 = img1.astype(jnp.float32)
    img2 = img2.astype(jnp.float32)
    win = gaussian_window_2d(window_size, SIGMA)
    w4 = jnp.broadcast_to(win[None, None], (C, 1, window_size, window_size))

    def conv(x):
        return jax.lax.conv_general_dilated(
            x, w4, window_strides=(1, 1), padding="VALID",
            dimension_numbers=("NCHW", "OIHW", "NCHW"), feature_group_count=C)

    max_val = jnp.where(jnp.max(img1) > 128.0, 255.0, 1.0)
    min_val = jnp.where(jnp.min(img1) < -0.5, -1.0, 0.0)
    L = max_val - min_val
    C1 = (0.01 * L) ** 2
    C2 = (0.03 * L) ** 2

    mu1, mu2 = conv(img1), conv(img2)
    mu1_sq, mu2_sq, mu1_mu2 = mu1 * mu1, mu2 * mu2, mu1 * mu2
    sigma1_sq = conv(img1 * img1) - mu1_sq
    sigma2_sq = conv(img2 * img2) - mu2_sq
    sigma12 = conv(img1 * img2) - mu1_mu2
    v1 = 2.0 * sigma12 + C2
    v2 = sigma1_sq + sigma2_sq + C2
    ssim_map = (2.0 * mu1_mu2 + C1) * v1 / ((mu1_sq + mu2_sq + C1) * v2)
    return jnp.mean(ssim_map)


if __name__ == "__main__":
    key = jax.random.PRNGKey(0)
    k1, k2 = jax.random.split(key)
    # NCHW, 3 channels, 16x16 spatial (>= window_size=11 -> 6x6 valid output).
    img1 = jax.random.uniform(k1, (2, 3, 16, 16), dtype=jnp.float32)
    img2 = jax.random.uniform(k2, (2, 3, 16, 16), dtype=jnp.float32)

    model = SSIM()
    out = model(img1, img2)
    out = jax.block_until_ready(out)

    ref = jax.block_until_ready(_ssim_ref(img1, img2))
    assert jnp.allclose(out, ref, rtol=1e-4, atol=1e-5), (out, ref)

    print("KERNEL_OK")
</pallas_src>

<mosaic_0001>
module attributes {stable_mosaic.version = 11 : i64} {
  func.func @_ssim_kernel(%arg0: i32, %arg1: memref<2xf32, #tpu.memory_space<smem>>, %arg2: memref<16x16x6xf32, #tpu.memory_space<vmem>>, %arg3: memref<16x16x6xf32, #tpu.memory_space<vmem>>, %arg4: memref<1x6xf32, #tpu.memory_space<vmem>>) attributes {dimension_semantics = [#tpu.dimension_semantics<parallel>], iteration_bounds = array<i64: 1>, scalar_prefetch = 0 : i64, scratch_operands = 0 : i64, tpu.core_type = #tpu.core_type<tc>, window_params = [{transform_indices = @transform_0, window_bounds = array<i64: 2>}, {transform_indices = @transform_1, window_bounds = array<i64: 16, 16, 6>}, {transform_indices = @transform_2, window_bounds = array<i64: 16, 16, 6>}, {transform_indices = @transform_3, window_bounds = array<i64: 1, 6>}]} {
    %c0 = arith.constant 0 : index
    %c0_0 = arith.constant 0 : index
    %c0_1 = arith.constant 0 : index
    %0 = vector.load %arg2[%c0, %c0_0, %c0_1] : memref<16x16x6xf32, #tpu.memory_space<vmem>>, vector<16x16x6xf32>
    %c0_2 = arith.constant 0 : index
    %c0_3 = arith.constant 0 : index
    %c0_4 = arith.constant 0 : index
    %1 = vector.load %arg3[%c0_2, %c0_3, %c0_4] : memref<16x16x6xf32, #tpu.memory_space<vmem>>, vector<16x16x6xf32>
    %2 = vector.extract_strided_slice %0 {offsets = [0, 5, 0], sizes = [16, 6, 6], strides = [1, 1, 1]} : vector<16x16x6xf32> to vector<16x6x6xf32>
    %cst = arith.constant 0.266011715 : f32
    %3 = vector.broadcast %cst : f32 to vector<16x6x6xf32>
    %4 = arith.mulf %3, %2 : vector<16x6x6xf32>
    %5 = vector.extract_strided_slice %0 {offsets = [0, 0, 0], sizes = [16, 6, 6], strides = [1, 1, 1]} : vector<16x16x6xf32> to vector<16x6x6xf32>
    %6 = vector.extract_strided_slice %0 {offsets = [0, 10, 0], sizes = [16, 6, 6], strides = [1, 1, 1]} : vector<16x16x6xf32> to vector<16x6x6xf32>
    %7 = arith.addf %5, %6 : vector<16x6x6xf32>
    %cst_5 = arith.constant 0.00102838012 : f32
    %8 = vector.broadcast %cst_5 : f32 to vector<16x6x6xf32>
    %9 = arith.mulf %8, %7 : vector<16x6x6xf32>
    %10 = arith.addf %4, %9 : vector<16x6x6xf32>
    %11 = vector.extract_strided_slice %0 {offsets = [0, 1, 0], sizes = [16, 6, 6], strides = [1, 1, 1]} : vector<16x16x6xf32> to vector<16x6x6xf32>
    %12 = vector.extract_strided_slice %0 {offsets = [0, 9, 0], sizes = [16, 6, 6], strides = [1, 1, 1]} : vector<16x16x6xf32> to vector<16x6x6xf32>
    %13 = arith.addf %11, %12 : vector<16x6x6xf32>
    %cst_6 = arith.constant 0.00759875821 : f32
    %14 = vector.broadcast %cst_6 : f32 to vector<16x6x6xf32>
    %15 = arith.mulf %14, %13 : vector<16x6x6xf32>
    %16 = arith.addf %10, %15 : vector<16x6x6xf32>
    %17 = vector.extract_strided_slice %0 {offsets = [0, 2, 0], sizes = [16, 6, 6], strides = [1, 1, 1]} : vector<16x16x6xf32> to vector<16x6x6xf32>
    %18 = vector.extract_strided_slice %0 {offsets = [0, 8, 0], sizes = [16, 6, 6], strides = [1, 1, 1]} : vector<16x16x6xf32> to vector<16x6x6xf32>
    %19 = arith.addf %17, %18 : vector<16x6x6xf32>
    %cst_7 = arith.constant 0.0360007733 : f32
    %20 = vector.broadcast %cst_7 : f32 to vector<16x6x6xf32>
    %21 = arith.mulf %20, %19 : vector<16x6x6xf32>
    %22 = arith.addf %16, %21 : vector<16x6x6xf32>
    %23 = vector.extract_strided_slice %0 {offsets = [0, 3, 0], sizes = [16, 6, 6], strides = [1, 1, 1]} : vector<16x16x6xf32> to vector<16x6x6xf32>
    %24 = vector.extract_strided_slice %0 {offsets = [0, 7, 0], sizes = [16, 6, 6], strides = [1, 1, 1]} : vector<16x16x6xf32> to vector<16x6x6xf32>
    %25 = arith.addf %23, %24 : vector<16x6x6xf32>
    %cst_8 = arith.constant 0.109360687 : f32
    %26 = vector.broadcast %cst_8 : f32 to vector<16x6x6xf32>
    %27 = arith.mulf %26, %25 : vector<16x6x6xf32>
    %28 = arith.addf %22, %27 : vector<16x6x6xf32>
    %29 = vector.extract_strided_slice %0 {offsets = [0, 4, 0], sizes = [16, 6, 6], strides = [1, 1, 1]} : vector<16x16x6xf32> to vector<16x6x6xf32>
    %30 = vector.extract_strided_slice %0 {offsets = [0, 6, 0], sizes = [16, 6, 6], strides = [1, 1, 1]} : vector<16x16x6xf32> to vector<16x6x6xf32>
    %31 = arith.addf %29, %30 : vector<16x6x6xf32>
    %cst_9 = arith.constant 0.213005543 : f32
    %32 = vector.broadcast %cst_9 : f32 to vector<16x6x6xf32>
    %33 = arith.mulf %32, %31 : vector<16x6x6xf32>
    %34 = arith.addf %28, %33 : vector<16x6x6xf32>
    %35 = vector.extract_strided_slice %34 {offsets = [5, 0, 0], sizes = [6, 6, 6], strides = [1, 1, 1]} : vector<16x6x6xf32> to vector<6x6x6xf32>
    %cst_10 = arith.constant 0.266011715 : f32
    %36 = vector.broadcast %cst_10 : f32 to vector<6x6x6xf32>
    %37 = arith.mulf %36, %35 : vector<6x6x6xf32>
    %38 = vector.extract_strided_slice %34 {offsets = [0, 0, 0], sizes = [6, 6, 6], strides = [1, 1, 1]} : vector<16x6x6xf32> to vector<6x6x6xf32>
    %39 = vector.extract_strided_slice %34 {offsets = [10, 0, 0], sizes = [6, 6, 6], strides = [1, 1, 1]} : vector<16x6x6xf32> to vector<6x6x6xf32>
    %40 = arith.addf %38, %39 : vector<6x6x6xf32>
    %cst_11 = arith.constant 0.00102838012 : f32
    %41 = vector.broadcast %cst_11 : f32 to vector<6x6x6xf32>
    %42 = arith.mulf %41, %40 : vector<6x6x6xf32>
    %43 = arith.addf %37, %42 : vector<6x6x6xf32>
    %44 = vector.extract_strided_slice %34 {offsets = [1, 0, 0], sizes = [6, 6, 6], strides = [1, 1, 1]} : vector<16x6x6xf32> to vector<6x6x6xf32>
    %45 = vector.extract_strided_slice %34 {offsets = [9, 0, 0], sizes = [6, 6, 6], strides = [1, 1, 1]} : vector<16x6x6xf32> to vector<6x6x6xf32>
    %46 = arith.addf %44, %45 : vector<6x6x6xf32>
    %cst_12 = arith.constant 0.00759875821 : f32
    %47 = vector.broadcast %cst_12 : f32 to vector<6x6x6xf32>
    %48 = arith.mulf %47, %46 : vector<6x6x6xf32>
    %49 = arith.addf %43, %48 : vector<6x6x6xf32>
    %50 = vector.extract_strided_slice %34 {offsets = [2, 0, 0], sizes = [6, 6, 6], strides = [1, 1, 1]} : vector<16x6x6xf32> to vector<6x6x6xf32>
    %51 = vector.extract_strided_slice %34 {offsets = [8, 0, 0], sizes = [6, 6, 6], strides = [1, 1, 1]} : vector<16x6x6xf32> to vector<6x6x6xf32>
    %52 = arith.addf %50, %51 : vector<6x6x6xf32>
    %cst_13 = arith.constant 0.0360007733 : f32
    %53 = vector.broadcast %cst_13 : f32 to vector<6x6x6xf32>
    %54 = arith.mulf %53, %52 : vector<6x6x6xf32>
    %55 = arith.addf %49, %54 : vector<6x6x6xf32>
    %56 = vector.extract_strided_slice %34 {offsets = [3, 0, 0], sizes = [6, 6, 6], strides = [1, 1, 1]} : vector<16x6x6xf32> to vector<6x6x6xf32>
    %57 = vector.extract_strided_slice %34 {offsets = [7, 0, 0], sizes = [6, 6, 6], strides = [1, 1, 1]} : vector<16x6x6xf32> to vector<6x6x6xf32>
    %58 = arith.addf %56, %57 : vector<6x6x6xf32>
    %cst_14 = arith.constant 0.109360687 : f32
    %59 = vector.broadcast %cst_14 : f32 to vector<6x6x6xf32>
    %60 = arith.mulf %59, %58 : vector<6x6x6xf32>
    %61 = arith.addf %55, %60 : vector<6x6x6xf32>
    %62 = vector.extract_strided_slice %34 {offsets = [4, 0, 0], sizes = [6, 6, 6], strides = [1, 1, 1]} : vector<16x6x6xf32> to vector<6x6x6xf32>
    %63 = vector.extract_strided_slice %34 {offsets = [6, 0, 0], sizes = [6, 6, 6], strides = [1, 1, 1]} : vector<16x6x6xf32> to vector<6x6x6xf32>
    %64 = arith.addf %62, %63 : vector<6x6x6xf32>
    %cst_15 = arith.constant 0.213005543 : f32
    %65 = vector.broadcast %cst_15 : f32 to vector<6x6x6xf32>
    %66 = arith.mulf %65, %64 : vector<6x6x6xf32>
    %67 = arith.addf %61, %66 : vector<6x6x6xf32>
    %68 = vector.extract_strided_slice %1 {offsets = [0, 5, 0], sizes = [16, 6, 6], strides = [1, 1, 1]} : vector<16x16x6xf32> to vector<16x6x6xf32>
    %cst_16 = arith.constant 0.266011715 : f32
    %69 = vector.broadcast %cst_16 : f32 to vector<16x6x6xf32>
    %70 = arith.mulf %69, %68 : vector<16x6x6xf32>
    %71 = vector.extract_strided_slice %1 {offsets = [0, 0, 0], sizes = [16, 6, 6], strides = [1, 1, 1]} : vector<16x16x6xf32> to vector<16x6x6xf32>
    %72 = vector.extract_strided_slice %1 {offsets = [0, 10, 0], sizes = [16, 6, 6], strides = [1, 1, 1]} : vector<16x16x6xf32> to vector<16x6x6xf32>
    %73 = arith.addf %71, %72 : vector<16x6x6xf32>
    %cst_17 = arith.constant 0.00102838012 : f32
    %74 = vector.broadcast %cst_17 : f32 to vector<16x6x6xf32>
    %75 = arith.mulf %74, %73 : vector<16x6x6xf32>
    %76 = arith.addf %70, %75 : vector<16x6x6xf32>
    %77 = vector.extract_strided_slice %1 {offsets = [0, 1, 0], sizes = [16, 6, 6], strides = [1, 1, 1]} : vector<16x16x6xf32> to vector<16x6x6xf32>
    %78 = vector.extract_strided_slice %1 {offsets = [0, 9, 0], sizes = [16, 6, 6], strides = [1, 1, 1]} : vector<16x16x6xf32> to vector<16x6x6xf32>
    %79 = arith.addf %77, %78 : vector<16x6x6xf32>
    %cst_18 = arith.constant 0.00759875821 : f32
    %80 = vector.broadcast %cst_18 : f32 to vector<16x6x6xf32>
    %81 = arith.mulf %80, %79 : vector<16x6x6xf32>
    %82 = arith.addf %76, %81 : vector<16x6x6xf32>
    %83 = vector.extract_strided_slice %1 {offsets = [0, 2, 0], sizes = [16, 6, 6], strides = [1, 1, 1]} : vector<16x16x6xf32> to vector<16x6x6xf32>
    %84 = vector.extract_strided_slice %1 {offsets = [0, 8, 0], sizes = [16, 6, 6], strides = [1, 1, 1]} : vector<16x16x6xf32> to vector<16x6x6xf32>
    %85 = arith.addf %83, %84 : vector<16x6x6xf32>
    %cst_19 = arith.constant 0.0360007733 : f32
    %86 = vector.broadcast %cst_19 : f32 to vector<16x6x6xf32>
    %87 = arith.mulf %86, %85 : vector<16x6x6xf32>
    %88 = arith.addf %82, %87 : vector<16x6x6xf32>
    %89 = vector.extract_strided_slice %1 {offsets = [0, 3, 0], sizes = [16, 6, 6], strides = [1, 1, 1]} : vector<16x16x6xf32> to vector<16x6x6xf32>
    %90 = vector.extract_strided_slice %1 {offsets = [0, 7, 0], sizes = [16, 6, 6], strides = [1, 1, 1]} : vector<16x16x6xf32> to vector<16x6x6xf32>
    %91 = arith.addf %89, %90 : vector<16x6x6xf32>
    %cst_20 = arith.constant 0.109360687 : f32
    %92 = vector.broadcast %cst_20 : f32 to vector<16x6x6xf32>
    %93 = arith.mulf %92, %91 : vector<16x6x6xf32>
    %94 = arith.addf %88, %93 : vector<16x6x6xf32>
    %95 = vector.extract_strided_slice %1 {offsets = [0, 4, 0], sizes = [16, 6, 6], strides = [1, 1, 1]} : vector<16x16x6xf32> to vector<16x6x6xf32>
    %96 = vector.extract_strided_slice %1 {offsets = [0, 6, 0], sizes = [16, 6, 6], strides = [1, 1, 1]} : vector<16x16x6xf32> to vector<16x6x6xf32>
    %97 = arith.addf %95, %96 : vector<16x6x6xf32>
    %cst_21 = arith.constant 0.213005543 : f32
    %98 = vector.broadcast %cst_21 : f32 to vector<16x6x6xf32>
    %99 = arith.mulf %98, %97 : vector<16x6x6xf32>
    %100 = arith.addf %94, %99 : vector<16x6x6xf32>
    %101 = vector.extract_strided_slice %100 {offsets = [5, 0, 0], sizes = [6, 6, 6], strides = [1, 1, 1]} : vector<16x6x6xf32> to vector<6x6x6xf32>
    %cst_22 = arith.constant 0.266011715 : f32
    %102 = vector.broadcast %cst_22 : f32 to vector<6x6x6xf32>
    %103 = arith.mulf %102, %101 : vector<6x6x6xf32>
    %104 = vector.extract_strided_slice %100 {offsets = [0, 0, 0], sizes = [6, 6, 6], strides = [1, 1, 1]} : vector<16x6x6xf32> to vector<6x6x6xf32>
    %105 = vector.extract_strided_slice %100 {offsets = [10, 0, 0], sizes = [6, 6, 6], strides = [1, 1, 1]} : vector<16x6x6xf32> to vector<6x6x6xf32>
    %106 = arith.addf %104, %105 : vector<6x6x6xf32>
    %cst_23 = arith.constant 0.00102838012 : f32
    %107 = vector.broadcast %cst_23 : f32 to vector<6x6x6xf32>
    %108 = arith.mulf %107, %106 : vector<6x6x6xf32>
    %109 = arith.addf %103, %108 : vector<6x6x6xf32>
    %110 = vector.extract_strided_slice %100 {offsets = [1, 0, 0], sizes = [6, 6, 6], strides = [1, 1, 1]} : vector<16x6x6xf32> to vector<6x6x6xf32>
    %111 = vector.extract_strided_slice %100 {offsets = [9, 0, 0], sizes = [6, 6, 6], strides = [1, 1, 1]} : vector<16x6x6xf32> to vector<6x6x6xf32>
    %112 = arith.addf %110, %111 : vector<6x6x6xf32>
    %cst_24 = arith.constant 0.00759875821 : f32
    %113 = vector.broadcast %cst_24 : f32 to vector<6x6x6xf32>
    %114 = arith.mulf %113, %112 : vector<6x6x6xf32>
    %115 = arith.addf %109, %114 : vector<6x6x6xf32>
    %116 = vector.extract_strided_slice %100 {offsets = [2, 0, 0], sizes = [6, 6, 6], strides = [1, 1, 1]} : vector<16x6x6xf32> to vector<6x6x6xf32>
    %117 = vector.extract_strided_slice %100 {offsets = [8, 0, 0], sizes = [6, 6, 6], strides = [1, 1, 1]} : vector<16x6x6xf32> to vector<6x6x6xf32>
    %118 = arith.addf %116, %117 : vector<6x6x6xf32>
    %cst_25 = arith.constant 0.0360007733 : f32
    %119 = vector.broadcast %cst_25 : f32 to vector<6x6x6xf32>
    %120 = arith.mulf %119, %118 : vector<6x6x6xf32>
    %121 = arith.addf %115, %120 : vector<6x6x6xf32>
    %122 = vector.extract_strided_slice %100 {offsets = [3, 0, 0], sizes = [6, 6, 6], strides = [1, 1, 1]} : vector<16x6x6xf32> to vector<6x6x6xf32>
    %123 = vector.extract_strided_slice %100 {offsets = [7, 0, 0], sizes = [6, 6, 6], strides = [1, 1, 1]} : vector<16x6x6xf32> to vector<6x6x6xf32>
    %124 = arith.addf %122, %123 : vector<6x6x6xf32>
    %cst_26 = arith.constant 0.109360687 : f32
    %125 = vector.broadcast %cst_26 : f32 to vector<6x6x6xf32>
    %126 = arith.mulf %125, %124 : vector<6x6x6xf32>
    %127 = arith.addf %121, %126 : vector<6x6x6xf32>
    %128 = vector.extract_strided_slice %100 {offsets = [4, 0, 0], sizes = [6, 6, 6], strides = [1, 1, 1]} : vector<16x6x6xf32> to vector<6x6x6xf32>
    %129 = vector.extract_strided_slice %100 {offsets = [6, 0, 0], sizes = [6, 6, 6], strides = [1, 1, 1]} : vector<16x6x6xf32> to vector<6x6x6xf32>
    %130 = arith.addf %128, %129 : vector<6x6x6xf32>
    %cst_27 = arith.constant 0.213005543 : f32
    %131 = vector.broadcast %cst_27 : f32 to vector<6x6x6xf32>
    %132 = arith.mulf %131, %130 : vector<6x6x6xf32>
    %133 = arith.addf %127, %132 : vector<6x6x6xf32>
    %134 = arith.mulf %0, %0 : vector<16x16x6xf32>
    %135 = vector.extract_strided_slice %134 {offsets = [0, 5, 0], sizes = [16, 6, 6], strides = [1, 1, 1]} : vector<16x16x6xf32> to vector<16x6x6xf32>
    %cst_28 = arith.constant 0.266011715 : f32
    %136 = vector.broadcast %cst_28 : f32 to vector<16x6x6xf32>
    %137 = arith.mulf %136, %135 : vector<16x6x6xf32>
    %138 = vector.extract_strided_slice %134 {offsets = [0, 0, 0], sizes = [16, 6, 6], strides = [1, 1, 1]} : vector<16x16x6xf32> to vector<16x6x6xf32>
    %139 = vector.extract_strided_slice %134 {offsets = [0, 10, 0], sizes = [16, 6, 6], strides = [1, 1, 1]} : vector<16x16x6xf32> to vector<16x6x6xf32>
    %140 = arith.addf %138, %139 : vector<16x6x6xf32>
    %cst_29 = arith.constant 0.00102838012 : f32
    %141 = vector.broadcast %cst_29 : f32 to vector<16x6x6xf32>
    %142 = arith.mulf %141, %140 : vector<16x6x6xf32>
    %143 = arith.addf %137, %142 : vector<16x6x6xf32>
    %144 = vector.extract_strided_slice %134 {offsets = [0, 1, 0], sizes = [16, 6, 6], strides = [1, 1, 1]} : vector<16x16x6xf32> to vector<16x6x6xf32>
    %145 = vector.extract_strided_slice %134 {offsets = [0, 9, 0], sizes = [16, 6, 6], strides = [1, 1, 1]} : vector<16x16x6xf32> to vector<16x6x6xf32>
    %146 = arith.addf %144, %145 : vector<16x6x6xf32>
    %cst_30 = arith.constant 0.00759875821 : f32
    %147 = vector.broadcast %cst_30 : f32 to vector<16x6x6xf32>
    %148 = arith.mulf %147, %146 : vector<16x6x6xf32>
    %149 = arith.addf %143, %148 : vector<16x6x6xf32>
    %150 = vector.extract_strided_slice %134 {offsets = [0, 2, 0], sizes = [16, 6, 6], strides = [1, 1, 1]} : vector<16x16x6xf32> to vector<16x6x6xf32>
    %151 = vector.extract_strided_slice %134 {offsets = [0, 8, 0], sizes = [16, 6, 6], strides = [1, 1, 1]} : vector<16x16x6xf32> to vector<16x6x6xf32>
    %152 = arith.addf %150, %151 : vector<16x6x6xf32>
    %cst_31 = arith.constant 0.0360007733 : f32
    %153 = vector.broadcast %cst_31 : f32 to vector<16x6x6xf32>
    %154 = arith.mulf %153, %152 : vector<16x6x6xf32>
    %155 = arith.addf %149, %154 : vector<16x6x6xf32>
    %156 = vector.extract_strided_slice %134 {offsets = [0, 3, 0], sizes = [16, 6, 6], strides = [1, 1, 1]} : vector<16x16x6xf32> to vector<16x6x6xf32>
    %157 = vector.extract_strided_slice %134 {offsets = [0, 7, 0], sizes = [16, 6, 6], strides = [1, 1, 1]} : vector<16x16x6xf32> to vector<16x6x6xf32>
    %158 = arith.addf %156, %157 : vector<16x6x6xf32>
    %cst_32 = arith.constant 0.109360687 : f32
    %159 = vector.broadcast %cst_32 : f32 to vector<16x6x6xf32>
    %160 = arith.mulf %159, %158 : vector<16x6x6xf32>
    %161 = arith.addf %155, %160 : vector<16x6x6xf32>
    %162 = vector.extract_strided_slice %134 {offsets = [0, 4, 0], sizes = [16, 6, 6], strides = [1, 1, 1]} : vector<16x16x6xf32> to vector<16x6x6xf32>
    %163 = vector.extract_strided_slice %134 {offsets = [0, 6, 0], sizes = [16, 6, 6], strides = [1, 1, 1]} : vector<16x16x6xf32> to vector<16x6x6xf32>
    %164 = arith.addf %162, %163 : vector<16x6x6xf32>
    %cst_33 = arith.constant 0.213005543 : f32
    %165 = vector.broadcast %cst_33 : f32 to vector<16x6x6xf32>
    %166 = arith.mulf %165, %164 : vector<16x6x6xf32>
    %167 = arith.addf %161, %166 : vector<16x6x6xf32>
    %168 = vector.extract_strided_slice %167 {offsets = [5, 0, 0], sizes = [6, 6, 6], strides = [1, 1, 1]} : vector<16x6x6xf32> to vector<6x6x6xf32>
    %cst_34 = arith.constant 0.266011715 : f32
    %169 = vector.broadcast %cst_34 : f32 to vector<6x6x6xf32>
    %170 = arith.mulf %169, %168 : vector<6x6x6xf32>
    %171 = vector.extract_strided_slice %167 {offsets = [0, 0, 0], sizes = [6, 6, 6], strides = [1, 1, 1]} : vector<16x6x6xf32> to vector<6x6x6xf32>
    %172 = vector.extract_strided_slice %167 {offsets = [10, 0, 0], sizes = [6, 6, 6], strides = [1, 1, 1]} : vector<16x6x6xf32> to vector<6x6x6xf32>
    %173 = arith.addf %171, %172 : vector<6x6x6xf32>
    %cst_35 = arith.constant 0.00102838012 : f32
    %174 = vector.broadcast %cst_35 : f32 to vector<6x6x6xf32>
    %175 = arith.mulf %174, %173 : vector<6x6x6xf32>
    %176 = arith.addf %170, %175 : vector<6x6x6xf32>
    %177 = vector.extract_strided_slice %167 {offsets = [1, 0, 0], sizes = [6, 6, 6], strides = [1, 1, 1]} : vector<16x6x6xf32> to vector<6x6x6xf32>
    %178 = vector.extract_strided_slice %167 {offsets = [9, 0, 0], sizes = [6, 6, 6], strides = [1, 1, 1]} : vector<16x6x6xf32> to vector<6x6x6xf32>
    %179 = arith.addf %177, %178 : vector<6x6x6xf32>
    %cst_36 = arith.constant 0.00759875821 : f32
    %180 = vector.broadcast %cst_36 : f32 to vector<6x6x6xf32>
    %181 = arith.mulf %180, %179 : vector<6x6x6xf32>
    %182 = arith.addf %176, %181 : vector<6x6x6xf32>
    %183 = vector.extract_strided_slice %167 {offsets = [2, 0, 0], sizes = [6, 6, 6], strides = [1, 1, 1]} : vector<16x6x6xf32> to vector<6x6x6xf32>
    %184 = vector.extract_strided_slice %167 {offsets = [8, 0, 0], sizes = [6, 6, 6], strides = [1, 1, 1]} : vector<16x6x6xf32> to vector<6x6x6xf32>
    %185 = arith.addf %183, %184 : vector<6x6x6xf32>
    %cst_37 = arith.constant 0.0360007733 : f32
    %186 = vector.broadcast %cst_37 : f32 to vector<6x6x6xf32>
    %187 = arith.mulf %186, %185 : vector<6x6x6xf32>
    %188 = arith.addf %182, %187 : vector<6x6x6xf32>
    %189 = vector.extract_strided_slice %167 {offsets = [3, 0, 0], sizes = [6, 6, 6], strides = [1, 1, 1]} : vector<16x6x6xf32> to vector<6x6x6xf32>
    %190 = vector.extract_strided_slice %167 {offsets = [7, 0, 0], sizes = [6, 6, 6], strides = [1, 1, 1]} : vector<16x6x6xf32> to vector<6x6x6xf32>
    %191 = arith.addf %189, %190 : vector<6x6x6xf32>
    %cst_38 = arith.constant 0.109360687 : f32
    %192 = vector.broadcast %cst_38 : f32 to vector<6x6x6xf32>
    %193 = arith.mulf %192, %191 : vector<6x6x6xf32>
    %194 = arith.addf %188, %193 : vector<6x6x6xf32>
    %195 = vector.extract_strided_slice %167 {offsets = [4, 0, 0], sizes = [6, 6, 6], strides = [1, 1, 1]} : vector<16x6x6xf32> to vector<6x6x6xf32>
    %196 = vector.extract_strided_slice %167 {offsets = [6, 0, 0], sizes = [6, 6, 6], strides = [1, 1, 1]} : vector<16x6x6xf32> to vector<6x6x6xf32>
    %197 = arith.addf %195, %196 : vector<6x6x6xf32>
    %cst_39 = arith.constant 0.213005543 : f32
    %198 = vector.broadcast %cst_39 : f32 to vector<6x6x6xf32>
    %199 = arith.mulf %198, %197 : vector<6x6x6xf32>
    %200 = arith.addf %194, %199 : vector<6x6x6xf32>
    %201 = arith.mulf %1, %1 : vector<16x16x6xf32>
    %202 = vector.extract_strided_slice %201 {offsets = [0, 5, 0], sizes = [16, 6, 6], strides = [1, 1, 1]} : vector<16x16x6xf32> to vector<16x6x6xf32>
    %cst_40 = arith.constant 0.266011715 : f32
    %203 = vector.broadcast %cst_40 : f32 to vector<16x6x6xf32>
    %204 = arith.mulf %203, %202 : vector<16x6x6xf32>
    %205 = vector.extract_strided_slice %201 {offsets = [0, 0, 0], sizes = [16, 6, 6], strides = [1, 1, 1]} : vector<16x16x6xf32> to vector<16x6x6xf32>
    %206 = vector.extract_strided_slice %201 {offsets = [0, 10, 0], sizes = [16, 6, 6], strides = [1, 1, 1]} : vector<16x16x6xf32> to vector<16x6x6xf32>
    %207 = arith.addf %205, %206 : vector<16x6x6xf32>
    %cst_41 = arith.constant 0.00102838012 : f32
    %208 = vector.broadcast %cst_41 : f32 to vector<16x6x6xf32>
    %209 = arith.mulf %208, %207 : vector<16x6x6xf32>
    %210 = arith.addf %204, %209 : vector<16x6x6xf32>
    %211 = vector.extract_strided_slice %201 {offsets = [0, 1, 0], sizes = [16, 6, 6], strides = [1, 1, 1]} : vector<16x16x6xf32> to vector<16x6x6xf32>
    %212 = vector.extract_strided_slice %201 {offsets = [0, 9, 0], sizes = [16, 6, 6], strides = [1, 1, 1]} : vector<16x16x6xf32> to vector<16x6x6xf32>
    %213 = arith.addf %211, %212 : vector<16x6x6xf32>
    %cst_42 = arith.constant 0.00759875821 : f32
    %214 = vector.broadcast %cst_42 : f32 to vector<16x6x6xf32>
    %215 = arith.mulf %214, %213 : vector<16x6x6xf32>
    %216 = arith.addf %210, %215 : vector<16x6x6xf32>
    %217 = vector.extract_strided_slice %201 {offsets = [0, 2, 0], sizes = [16, 6, 6], strides = [1, 1, 1]} : vector<16x16x6xf32> to vector<16x6x6xf32>
    %218 = vector.extract_strided_slice %201 {offsets = [0, 8, 0], sizes = [16, 6, 6], strides = [1, 1, 1]} : vector<16x16x6xf32> to vector<16x6x6xf32>
    %219 = arith.addf %217, %218 : vector<16x6x6xf32>
    %cst_43 = arith.constant 0.0360007733 : f32
    %220 = vector.broadcast %cst_43 : f32 to vector<16x6x6xf32>
    %221 = arith.mulf %220, %219 : vector<16x6x6xf32>
    %222 = arith.addf %216, %221 : vector<16x6x6xf32>
    %223 = vector.extract_strided_slice %201 {offsets = [0, 3, 0], sizes = [16, 6, 6], strides = [1, 1, 1]} : vector<16x16x6xf32> to vector<16x6x6xf32>
    %224 = vector.extract_strided_slice %201 {offsets = [0, 7, 0], sizes = [16, 6, 6], strides = [1, 1, 1]} : vector<16x16x6xf32> to vector<16x6x6xf32>
    %225 = arith.addf %223, %224 : vector<16x6x6xf32>
    %cst_44 = arith.constant 0.109360687 : f32
    %226 = vector.broadcast %cst_44 : f32 to vector<16x6x6xf32>
    %227 = arith.mulf %226, %225 : vector<16x6x6xf32>
    %228 = arith.addf %222, %227 : vector<16x6x6xf32>
    %229 = vector.extract_strided_slice %201 {offsets = [0, 4, 0], sizes = [16, 6, 6], strides = [1, 1, 1]} : vector<16x16x6xf32> to vector<16x6x6xf32>
    %230 = vector.extract_strided_slice %201 {offsets = [0, 6, 0], sizes = [16, 6, 6], strides = [1, 1, 1]} : vector<16x16x6xf32> to vector<16x6x6xf32>
    %231 = arith.addf %229, %230 : vector<16x6x6xf32>
    %cst_45 = arith.constant 0.213005543 : f32
    %232 = vector.broadcast %cst_45 : f32 to vector<16x6x6xf32>
    %233 = arith.mulf %232, %231 : vector<16x6x6xf32>
    %234 = arith.addf %228, %233 : vector<16x6x6xf32>
    %235 = vector.extract_strided_slice %234 {offsets = [5, 0, 0], sizes = [6, 6, 6], strides = [1, 1, 1]} : vector<16x6x6xf32> to vector<6x6x6xf32>
    %cst_46 = arith.constant 0.266011715 : f32
    %236 = vector.broadcast %cst_46 : f32 to vector<6x6x6xf32>
    %237 = arith.mulf %236, %235 : vector<6x6x6xf32>
    %238 = vector.extract_strided_slice %234 {offsets = [0, 0, 0], sizes = [6, 6, 6], strides = [1, 1, 1]} : vector<16x6x6xf32> to vector<6x6x6xf32>
    %239 = vector.extract_strided_slice %234 {offsets = [10, 0, 0], sizes = [6, 6, 6], strides = [1, 1, 1]} : vector<16x6x6xf32> to vector<6x6x6xf32>
    %240 = arith.addf %238, %239 : vector<6x6x6xf32>
    %cst_47 = arith.constant 0.00102838012 : f32
    %241 = vector.broadcast %cst_47 : f32 to vector<6x6x6xf32>
    %242 = arith.mulf %241, %240 : vector<6x6x6xf32>
    %243 = arith.addf %237, %242 : vector<6x6x6xf32>
    %244 = vector.extract_strided_slice %234 {offsets = [1, 0, 0], sizes = [6, 6, 6], strides = [1, 1, 1]} : vector<16x6x6xf32> to vector<6x6x6xf32>
    %245 = vector.extract_strided_slice %234 {offsets = [9, 0, 0], sizes = [6, 6, 6], strides = [1, 1, 1]} : vector<16x6x6xf32> to vector<6x6x6xf32>
    %246 = arith.addf %244, %245 : vector<6x6x6xf32>
    %cst_48 = arith.constant 0.00759875821 : f32
    %247 = vector.broadcast %cst_48 : f32 to vector<6x6x6xf32>
    %248 = arith.mulf %247, %246 : vector<6x6x6xf32>
    %249 = arith.addf %243, %248 : vector<6x6x6xf32>
    %250 = vector.extract_strided_slice %234 {offsets = [2, 0, 0], sizes = [6, 6, 6], strides = [1, 1, 1]} : vector<16x6x6xf32> to vector<6x6x6xf32>
    %251 = vector.extract_strided_slice %234 {offsets = [8, 0, 0], sizes = [6, 6, 6], strides = [1, 1, 1]} : vector<16x6x6xf32> to vector<6x6x6xf32>
    %252 = arith.addf %250, %251 : vector<6x6x6xf32>
    %cst_49 = arith.constant 0.0360007733 : f32
    %253 = vector.broadcast %cst_49 : f32 to vector<6x6x6xf32>
    %254 = arith.mulf %253, %252 : vector<6x6x6xf32>
    %255 = arith.addf %249, %254 : vector<6x6x6xf32>
    %256 = vector.extract_strided_slice %234 {offsets = [3, 0, 0], sizes = [6, 6, 6], strides = [1, 1, 1]} : vector<16x6x6xf32> to vector<6x6x6xf32>
    %257 = vector.extract_strided_slice %234 {offsets = [7, 0, 0], sizes = [6, 6, 6], strides = [1, 1, 1]} : vector<16x6x6xf32> to vector<6x6x6xf32>
    %258 = arith.addf %256, %257 : vector<6x6x6xf32>
    %cst_50 = arith.constant 0.109360687 : f32
    %259 = vector.broadcast %cst_50 : f32 to vector<6x6x6xf32>
    %260 = arith.mulf %259, %258 : vector<6x6x6xf32>
    %261 = arith.addf %255, %260 : vector<6x6x6xf32>
    %262 = vector.extract_strided_slice %234 {offsets = [4, 0, 0], sizes = [6, 6, 6], strides = [1, 1, 1]} : vector<16x6x6xf32> to vector<6x6x6xf32>
    %263 = vector.extract_strided_slice %234 {offsets = [6, 0, 0], sizes = [6, 6, 6], strides = [1, 1, 1]} : vector<16x6x6xf32> to vector<6x6x6xf32>
    %264 = arith.addf %262, %263 : vector<6x6x6xf32>
    %cst_51 = arith.constant 0.213005543 : f32
    %265 = vector.broadcast %cst_51 : f32 to vector<6x6x6xf32>
    %266 = arith.mulf %265, %264 : vector<6x6x6xf32>
    %267 = arith.addf %261, %266 : vector<6x6x6xf32>
    %268 = arith.mulf %0, %1 : vector<16x16x6xf32>
    %269 = vector.extract_strided_slice %268 {offsets = [0, 5, 0], sizes = [16, 6, 6], strides = [1, 1, 1]} : vector<16x16x6xf32> to vector<16x6x6xf32>
    %cst_52 = arith.constant 0.266011715 : f32
    %270 = vector.broadcast %cst_52 : f32 to vector<16x6x6xf32>
    %271 = arith.mulf %270, %269 : vector<16x6x6xf32>
    %272 = vector.extract_strided_slice %268 {offsets = [0, 0, 0], sizes = [16, 6, 6], strides = [1, 1, 1]} : vector<16x16x6xf32> to vector<16x6x6xf32>
    %273 = vector.extract_strided_slice %268 {offsets = [0, 10, 0], sizes = [16, 6, 6], strides = [1, 1, 1]} : vector<16x16x6xf32> to vector<16x6x6xf32>
    %274 = arith.addf %272, %273 : vector<16x6x6xf32>
    %cst_53 = arith.constant 0.00102838012 : f32
    %275 = vector.broadcast %cst_53 : f32 to vector<16x6x6xf32>
    %276 = arith.mulf %275, %274 : vector<16x6x6xf32>
    %277 = arith.addf %271, %276 : vector<16x6x6xf32>
    %278 = vector.extract_strided_slice %268 {offsets = [0, 1, 0], sizes = [16, 6, 6], strides = [1, 1, 1]} : vector<16x16x6xf32> to vector<16x6x6xf32>
    %279 = vector.extract_strided_slice %268 {offsets = [0, 9, 0], sizes = [16, 6, 6], strides = [1, 1, 1]} : vector<16x16x6xf32> to vector<16x6x6xf32>
    %280 = arith.addf %278, %279 : vector<16x6x6xf32>
    %cst_54 = arith.constant 0.00759875821 : f32
    %281 = vector.broadcast %cst_54 : f32 to vector<16x6x6xf32>
    %282 = arith.mulf %281, %280 : vector<16x6x6xf32>
    %283 = arith.addf %277, %282 : vector<16x6x6xf32>
    %284 = vector.extract_strided_slice %268 {offsets = [0, 2, 0], sizes = [16, 6, 6], strides = [1, 1, 1]} : vector<16x16x6xf32> to vector<16x6x6xf32>
    %285 = vector.extract_strided_slice %268 {offsets = [0, 8, 0], sizes = [16, 6, 6], strides = [1, 1, 1]} : vector<16x16x6xf32> to vector<16x6x6xf32>
    %286 = arith.addf %284, %285 : vector<16x6x6xf32>
    %cst_55 = arith.constant 0.0360007733 : f32
    %287 = vector.broadcast %cst_55 : f32 to vector<16x6x6xf32>
    %288 = arith.mulf %287, %286 : vector<16x6x6xf32>
    %289 = arith.addf %283, %288 : vector<16x6x6xf32>
    %290 = vector.extract_strided_slice %268 {offsets = [0, 3, 0], sizes = [16, 6, 6], strides = [1, 1, 1]} : vector<16x16x6xf32> to vector<16x6x6xf32>
    %291 = vector.extract_strided_slice %268 {offsets = [0, 7, 0], sizes = [16, 6, 6], strides = [1, 1, 1]} : vector<16x16x6xf32> to vector<16x6x6xf32>
    %292 = arith.addf %290, %291 : vector<16x6x6xf32>
    %cst_56 = arith.constant 0.109360687 : f32
    %293 = vector.broadcast %cst_56 : f32 to vector<16x6x6xf32>
    %294 = arith.mulf %293, %292 : vector<16x6x6xf32>
    %295 = arith.addf %289, %294 : vector<16x6x6xf32>
    %296 = vector.extract_strided_slice %268 {offsets = [0, 4, 0], sizes = [16, 6, 6], strides = [1, 1, 1]} : vector<16x16x6xf32> to vector<16x6x6xf32>
    %297 = vector.extract_strided_slice %268 {offsets = [0, 6, 0], sizes = [16, 6, 6], strides = [1, 1, 1]} : vector<16x16x6xf32> to vector<16x6x6xf32>
    %298 = arith.addf %296, %297 : vector<16x6x6xf32>
    %cst_57 = arith.constant 0.213005543 : f32
    %299 = vector.broadcast %cst_57 : f32 to vector<16x6x6xf32>
    %300 = arith.mulf %299, %298 : vector<16x6x6xf32>
    %301 = arith.addf %295, %300 : vector<16x6x6xf32>
    %302 = vector.extract_strided_slice %301 {offsets = [5, 0, 0], sizes = [6, 6, 6], strides = [1, 1, 1]} : vector<16x6x6xf32> to vector<6x6x6xf32>
    %cst_58 = arith.constant 0.266011715 : f32
    %303 = vector.broadcast %cst_58 : f32 to vector<6x6x6xf32>
    %304 = arith.mulf %303, %302 : vector<6x6x6xf32>
    %305 = vector.extract_strided_slice %301 {offsets = [0, 0, 0], sizes = [6, 6, 6], strides = [1, 1, 1]} : vector<16x6x6xf32> to vector<6x6x6xf32>
    %306 = vector.extract_strided_slice %301 {offsets = [10, 0, 0], sizes = [6, 6, 6], strides = [1, 1, 1]} : vector<16x6x6xf32> to vector<6x6x6xf32>
    %307 = arith.addf %305, %306 : vector<6x6x6xf32>
    %cst_59 = arith.constant 0.00102838012 : f32
    %308 = vector.broadcast %cst_59 : f32 to vector<6x6x6xf32>
    %309 = arith.mulf %308, %307 : vector<6x6x6xf32>
    %310 = arith.addf %304, %309 : vector<6x6x6xf32>
    %311 = vector.extract_strided_slice %301 {offsets = [1, 0, 0], sizes = [6, 6, 6], strides = [1, 1, 1]} : vector<16x6x6xf32> to vector<6x6x6xf32>
    %312 = vector.extract_strided_slice %301 {offsets = [9, 0, 0], sizes = [6, 6, 6], strides = [1, 1, 1]} : vector<16x6x6xf32> to vector<6x6x6xf32>
    %313 = arith.addf %311, %312 : vector<6x6x6xf32>
    %cst_60 = arith.constant 0.00759875821 : f32
    %314 = vector.broadcast %cst_60 : f32 to vector<6x6x6xf32>
    %315 = arith.mulf %314, %313 : vector<6x6x6xf32>
    %316 = arith.addf %310, %315 : vector<6x6x6xf32>
    %317 = vector.extract_strided_slice %301 {offsets = [2, 0, 0], sizes = [6, 6, 6], strides = [1, 1, 1]} : vector<16x6x6xf32> to vector<6x6x6xf32>
    %318 = vector.extract_strided_slice %301 {offsets = [8, 0, 0], sizes = [6, 6, 6], strides = [1, 1, 1]} : vector<16x6x6xf32> to vector<6x6x6xf32>
    %319 = arith.addf %317, %318 : vector<6x6x6xf32>
    %cst_61 = arith.constant 0.0360007733 : f32
    %320 = vector.broadcast %cst_61 : f32 to vector<6x6x6xf32>
    %321 = arith.mulf %320, %319 : vector<6x6x6xf32>
    %322 = arith.addf %316, %321 : vector<6x6x6xf32>
    %323 = vector.extract_strided_slice %301 {offsets = [3, 0, 0], sizes = [6, 6, 6], strides = [1, 1, 1]} : vector<16x6x6xf32> to vector<6x6x6xf32>
    %324 = vector.extract_strided_slice %301 {offsets = [7, 0, 0], sizes = [6, 6, 6], strides = [1, 1, 1]} : vector<16x6x6xf32> to vector<6x6x6xf32>
    %325 = arith.addf %323, %324 : vector<6x6x6xf32>
    %cst_62 = arith.constant 0.109360687 : f32
    %326 = vector.broadcast %cst_62 : f32 to vector<6x6x6xf32>
    %327 = arith.mulf %326, %325 : vector<6x6x6xf32>
    %328 = arith.addf %322, %327 : vector<6x6x6xf32>
    %329 = vector.extract_strided_slice %301 {offsets = [4, 0, 0], sizes = [6, 6, 6], strides = [1, 1, 1]} : vector<16x6x6xf32> to vector<6x6x6xf32>
    %330 = vector.extract_strided_slice %301 {offsets = [6, 0, 0], sizes = [6, 6, 6], strides = [1, 1, 1]} : vector<16x6x6xf32> to vector<6x6x6xf32>
    %331 = arith.addf %329, %330 : vector<6x6x6xf32>
    %cst_63 = arith.constant 0.213005543 : f32
    %332 = vector.broadcast %cst_63 : f32 to vector<6x6x6xf32>
    %333 = arith.mulf %332, %331 : vector<6x6x6xf32>
    %334 = arith.addf %328, %333 : vector<6x6x6xf32>
    %335 = arith.mulf %67, %67 : vector<6x6x6xf32>
    %336 = arith.mulf %133, %133 : vector<6x6x6xf32>
    %337 = arith.mulf %67, %133 : vector<6x6x6xf32>
    %338 = arith.subf %200, %335 : vector<6x6x6xf32>
    %339 = arith.subf %267, %336 : vector<6x6x6xf32>
    %340 = arith.subf %334, %337 : vector<6x6x6xf32>
    %c0_64 = arith.constant 0 : index
    %341 = memref.load %arg1[%c0_64] : memref<2xf32, #tpu.memory_space<smem>>
    %c1 = arith.constant 1 : index
    %342 = memref.load %arg1[%c1] : memref<2xf32, #tpu.memory_space<smem>>
    %cst_65 = arith.constant 2.000000e+00 : f32
    %343 = vector.broadcast %cst_65 : f32 to vector<6x6x6xf32>
    %344 = arith.mulf %343, %340 : vector<6x6x6xf32>
    %345 = vector.broadcast %342 : f32 to vector<6x6x6xf32>
    %346 = arith.addf %344, %345 : vector<6x6x6xf32>
    %347 = arith.addf %338, %339 : vector<6x6x6xf32>
    %348 = vector.broadcast %342 : f32 to vector<6x6x6xf32>
    %349 = arith.addf %347, %348 : vector<6x6x6xf32>
    %cst_66 = arith.constant 2.000000e+00 : f32
    %350 = vector.broadcast %cst_66 : f32 to vector<6x6x6xf32>
    %351 = arith.mulf %350, %337 : vector<6x6x6xf32>
    %352 = vector.broadcast %341 : f32 to vector<6x6x6xf32>
    %353 = arith.addf %351, %352 : vector<6x6x6xf32>
    %354 = arith.mulf %353, %346 : vector<6x6x6xf32>
    %355 = arith.addf %335, %336 : vector<6x6x6xf32>
    %356 = vector.broadcast %341 : f32 to vector<6x6x6xf32>
    %357 = arith.addf %355, %356 : vector<6x6x6xf32>
    %358 = arith.mulf %357, %349 : vector<6x6x6xf32>
    %359 = tpu.reciprocal %358 {approx = true} : vector<6x6x6xf32> -> vector<6x6x6xf32>
    %360 = arith.mulf %358, %359 : vector<6x6x6xf32>
    %cst_67 = arith.constant 2.000000e+00 : f32
    %361 = vector.broadcast %cst_67 : f32 to vector<6x6x6xf32>
    %362 = arith.subf %361, %360 : vector<6x6x6xf32>
    %363 = arith.mulf %359, %362 : vector<6x6x6xf32>
    %364 = arith.mulf %354, %363 : vector<6x6x6xf32>
    %cst_68 = arith.constant dense<0.000000e+00> : vector<6x6xf32>
    %365 = vector.multi_reduction <add>, %364, %cst_68 [0] : vector<6x6x6xf32> to vector<6x6xf32>
    %cst_69 = arith.constant dense<0.000000e+00> : vector<6xf32>
    %366 = vector.multi_reduction <add>, %365, %cst_69 [0] : vector<6x6xf32> to vector<6xf32>
    %367 = vector.shape_cast %366 : vector<6xf32> to vector<1x6xf32>
    %c0_70 = arith.constant 0 : index
    %c0_71 = arith.constant 0 : index
    %368 = vector.load %arg4[%c0_70, %c0_71] : memref<1x6xf32, #tpu.memory_space<vmem>>, vector<1x6xf32>
    tpu.vector_store %arg4[%c0_70, %c0_71], %367 {strides = array<i32>} : memref<1x6xf32, #tpu.memory_space<vmem>>, vector<1x6xf32>,
    return
  }
  func.func @transform_0(%arg0: i32) -> i32 {
    %c0_i32 = arith.constant 0 : i32
    %c0_i32_0 = arith.constant 0 : i32
    return %c0_i32 : i32
  }
  func.func @transform_1(%arg0: i32) -> (i32, i32, i32) {
    %c0_i32 = arith.constant 0 : i32
    %c0_i32_0 = arith.constant 0 : i32
    %c0_i32_1 = arith.constant 0 : i32
    return %c0_i32, %c0_i32_0, %arg0 : i32, i32, i32
  }
  func.func @transform_2(%arg0: i32) -> (i32, i32, i32) {
    %c0_i32 = arith.constant 0 : i32
    %c0_i32_0 = arith.constant 0 : i32
    %c0_i32_1 = arith.constant 0 : i32
    return %c0_i32, %c0_i32_0, %arg0 : i32, i32, i32
  }
  func.func @transform_3(%arg0: i32) -> (i32, i32) {
    %c0_i32 = arith.constant 0 : i32
    %c0_i32_0 = arith.constant 0 : i32
    return %c0_i32, %arg0 : i32, i32
  }
}

</mosaic_0001>

<bundles_post_ra>
// kernel: tpu_custom_call.1
= control target key start
LH: loop header
LB: loop body
LE: loop exit
PB: predicated region body
PF: predicated region fallthrough
CT: control target
= control target key end

     0   :  { %8 = vsyncpa [#allocation4], 0  ;;  %s14507_s0 = inlined_call_operand.vmem [shape: f32[2], index: 0, kind: input, shape index: {}]   ;;  %s14508_s1 = inlined_call_operand.vmem [shape: f32[16,16,6], index: 1, kind: input, shape index: {}]   ;;  %s14509_s2 = inlined_call_operand.vmem [shape: f32[16,16,6], index: 2, kind: input, shape index: {}]   ;;  %s14510_s3 = inlined_call_operand.hbm [shape: f32[1,6], index: 3, kind: output, shape index: {}]  }
   0x1   :  { %9 = vsyncpa [#allocation3], 0  ;;  %s15_s14 = sshll.u32 %s14507_s0, 4  ;;  %s6757_s15 = smov [#allocation2]   ;;  %s16_s14 = int_to_ptr.vmem [resolvable:$true] %s15_s14 }
   0x2   :  { %18 = dma.vmem_to_smem %s16_s14, 16, %s6757_s15, [#allocation4]  }
   0x3   :  { %6753 = dma.done.wait [#allocation4], 16  }
   0x4   :  { %6754 = vsyncadd [#allocation4], 4294967280 }
   0x5   :  { %27 = sfence }
   0x6   :  { %v6785_v0 = vld [vmem:[%s14508_s1 + $0x8] sm:$0xff]  ;;  %v6790_v1 = vld [vmem:[%s14508_s1 + $0x18] sm:$0xff]  ;;  %v6808_v5 = vld [vmem:[%s14508_s1] sm:$0xff]  ;;  %vm556_vm0 = vcmask 1043456   ;;  %vm733_vm1 = vcmask 1041408   ;;  %vm846_vm2 = vcmask 1045504  }
   0x7   :  { %15119 = vst [vmem:[#allocation8_spill] sm:$0xff] %v6785_v0  ;;  %v6795_v2 = vld [vmem:[%s14508_s1 + $0x28] sm:$0xff]  ;;  %v6800_v3 = vld [vmem:[%s14508_s1 + $0x38] sm:$0xff]  ;;  %v6803_v4 = vrot.slane %v6785_v0, 2  ;;  %v6816_v7 = vrot.slane %v6790_v1, 2  ;;  %v6821_v8 = vld [vmem:[%s14508_s1 + $0x10] sm:$0xff]  ;;  %v6892_v26 = vadd.f32 %v6785_v0, %v6808_v5 }
   0x8   :  { %15120 = vst [vmem:[#allocation9_spill] sm:$0xff] %v6790_v1  ;;  %v6813_v6 = vld [vmem:[%s14508_s1 + $0x48] sm:$0xff]  ;;  %v6826_v9 = vld [vmem:[%s14508_s1 + $0x58] sm:$0xff]  ;;  %v6829_v10 = vrot.slane %v6795_v2, 2  ;;  %v6834_v11 = vld [vmem:[%s14508_s1 + $0x20] sm:$0xff]  ;;  %v6850_v15 = vrot.slane %v6800_v3, 2  ;;  %v6916_v32 = vadd.f32 %v6790_v1, %v6821_v8 }
   0x9   :  { %15121 = vst [vmem:[#allocation10_spill] sm:$0xff] %v6795_v2  ;;  %v6839_v12 = vld [vmem:[%s14508_s1 + $0x30] sm:$0xff]  ;;  %v6844_v13 = vld [vmem:[%s14508_s1 + $0x68] sm:$0xff]  ;;  %v6847_v14 = vmul.f32 0.26601171, %v6808_v5  ;;  %v6855_v16 = vld [vmem:[%s14508_s1 + $0x78] sm:$0xff]  ;;  %v6868_v20 = vadd.f32 %v6803_v4, %v6808_v5  ;;  %v6888_v25 = vadd.f32 %v6816_v7, %v6821_v8  ;;  %v6940_v38 = vadd.f32 %v6795_v2, %v6834_v11 }
   0xa   :  { %15122 = vst [vmem:[#allocation11_spill] sm:$0xff] %v6800_v3  ;;  %v6858_v17 = vmul.f32 0.26601171, %v6785_v0  ;;  %v6861_v18 = vmul.f32 0.26601171, %v6821_v8  ;;  %v6864_v19 = vrot.slane %v6813_v6, 2  ;;  %v6912_v31 = vadd.f32 %v6829_v10, %v6834_v11 }
   0xb   :  { %15123 = vst [vmem:[#allocation12_spill] sm:$0xff] %v6803_v4  ;;  %v6873_v21 = vld [vmem:[%s14508_s1 + $0x40] sm:$0xff]  ;;  %v6878_v22 = vld [vmem:[%s14508_s1 + $0x88] sm:$0xff]  ;;  %v6881_v23 = vmul.f32 0.26601171, %v6790_v1  ;;  %v6884_v24 = vrot.slane %v6826_v9, 2  ;;  %v6936_v37 = vadd.f32 %v6850_v15, %v6839_v12  ;;  %v6988_v50 = vadd.f32 %v6800_v3, %v6839_v12 }
   0xc   :  { %15124 = vst [vmem:[#allocation13_spill] sm:$0xff] %v6808_v5  ;;  %v6897_v27 = vld [vmem:[%s14508_s1 + $0x50] sm:$0xff]  ;;  %v6902_v28 = vld [vmem:[%s14508_s1 + $0x98] sm:$0xff]  ;;  %v6905_v29 = vmul.f32 0.26601171, %v6834_v11  ;;  %v6908_v30 = vrot.slane %v6844_v13, 2  ;;  %v6960_v43 = vadd.f32 %v6864_v19, %v6873_v21  ;;  %v7029_v61 = vadd.f32 %v6813_v6, %v6873_v21 }
   0xd   :  { %15125 = vst [vmem:[#allocation14_spill] sm:$0xff] %v6813_v6  ;;  %v6921_v33 = vld [vmem:[%s14508_s1 + $0x60] sm:$0xff]  ;;  %v6926_v34 = vld [vmem:[%s14508_s1 + $0xa8] sm:$0xff]  ;;  %v6929_v35 = vmul.f32 0.26601171, %v6795_v2  ;;  %v6932_v36 = vrot.slane %v6855_v16, 2  ;;  %v6964_v44 = vadd.f32 %v6826_v9, %v6897_v27  ;;  %v6984_v49 = vadd.f32 %v6884_v24, %v6897_v27 }
   0xe   :  { %15126 = vst [vmem:[#allocation15_spill] sm:$0xff] %v6816_v7  ;;  %v6945_v39 = vld [vmem:[%s14508_s1 + $0x70] sm:$0xff]  ;;  %v6950_v40 = vld [vmem:[%s14508_s1 + $0xb8] sm:$0xff]  ;;  %v6953_v41 = vmul.f32 0.26601171, %v6839_v12  ;;  %v6956_v42 = vrot.slane %v6878_v22, 2  ;;  %v7003_v54 = vadd.f32 %v6908_v30, %v6921_v33  ;;  %v7007_v55 = vadd.f32 %v6844_v13, %v6921_v33 }
   0xf   :  { %15127 = vst [vmem:[#allocation16_spill] sm:$0xff] %v6821_v8  ;;  %v6969_v45 = vld [vmem:[%s14508_s1 + $0x80] sm:$0xff]  ;;  %v6974_v46 = vld [vmem:[%s14508_s1 + $0xc8] sm:$0xff]  ;;  %v6977_v47 = vmul.f32 0.26601171, %v6800_v3  ;;  %v6980_v48 = vrot.slane %v6902_v28, 2  ;;  %v179_v60 = vadd.f32 %v6932_v36, %v6945_v39 }
  0x10   :  { %15128 = vst [vmem:[#allocation17_spill] sm:$0xff] %v6826_v9  ;;  %v6993_v51 = vld [vmem:[%s14508_s1 + $0x90] sm:$0xff]  ;;  %v6996_v52 = vmul.f32 0.26601171, %v6873_v21  ;;  %v6999_v53 = vrot.slane %v6926_v34, 2  ;;  %v7012_v56 = vld [vmem:[%s14508_s1 + $0xa0] sm:$0xff] }
  0x11   :  { %15129 = vst [vmem:[#allocation18_spill] sm:$0xff] %v6829_v10  ;;  %v7017_v57 = vld [vmem:[%s14508_s1 + $0xd8] sm:$0xff]  ;;  %v7020_v58 = vmul.f32 0.26601171, %v6813_v6  ;;  %v7023_v59 = vrot.slane %v6950_v40, 2  ;;  %v7034_v62 = vld [vmem:[%s14508_s1 + $0xb0] sm:$0xff]  ;;  %v181_v4 = vadd.f32 %v6980_v48, %v6993_v51 }
  0x12   :  { %15130 = vst [vmem:[#allocation19_spill] sm:$0xff] %v6834_v11  ;;  %v7039_v63 = vld [vmem:[%s14508_s1 + $0xe8] sm:$0xff]  ;;  %v7059_v10 = vmul.f32 0.26601171, %v6826_v9  ;;  %v7062_v7 = vmul.f32 0.26601171, %v6921_v33 }
  0x13   :  { %15131 = vst [vmem:[#allocation20_spill] sm:$0xff] %v6839_v12  ;;  %v7079_v12 = vrot.slane %v7017_v57, 2  ;;  %v7090_v9 = vld [vmem:[%s14508_s1 + $0xd0] sm:$0xff]  ;;  %v7093_v6 = vmul.f32 0.26601171, %v6945_v39  ;;  %v183_v3 = vadd.f32 %v7023_v59, %v7034_v62  ;;  %vm991_vm3 = vcmask 1040384  }
  0x14   :  { %15132 = vst [vmem:[#allocation21_spill] sm:$0xff] %v6844_v13  ;;  %v7105_v11 = vmul.f32 0.26601171, %v6855_v16  ;;  %v7108_v8 = vmul.f32 0.26601171, %v6969_v45  ;;  %vm6448_vm4 = vcmask 48133  }
  0x15   :  { %15133 = vst [vmem:[#allocation22_spill] sm:$0xff] %v6850_v15  ;;  %v7056_v15 = vld [vmem:[%s14508_s1 + $0xc0] sm:$0xff]  ;;  %v7121_v5 = vmul.f32 0.26601171, %v6993_v51  ;;  %v185_v2 = vadd.f32 %v7079_v12, %v7090_v9  ;;  %vm6460_vm5 = vcmask 43008   ;;  %vm6474_vm6 = vcmask 1042432  }
  0x16   :  { %15134 = vst [vmem:[#allocation23_spill] sm:$0xff] %v6855_v16  ;;  %v7150_v0 = vmul.f32 0.26601171, %v7056_v15  ;;  %vm6479_vm7 = vcmask 46080   ;;  %s6758_s8 = smov [#allocation5]   ;;  %s6496_s12 = sshll.u32 %s14510_s3, 4  ;;  %s6497_s12 = int_to_ptr.hbm [resolvable:$true] %s6496_s12 }
  0x17   :  { %15135 = vst [vmem:[#allocation24_spill] sm:$0xff] %v6864_v19  ;;  %v7051_v19 = vadd.f32 %v6855_v16, %v6945_v39  ;;  %v7124_v16 = vmul.f32 0.26601171, %v6902_v28  ;;  %s6494_s9 = sshll.u32 %s6758_s8, 4  ;;  %vm6487_vm8 = vcmask 40960   ;;  %s6495_s9 = int_to_ptr.vmem [resolvable:$true] %s6494_s9 }
  0x18   :  { %15136 = vst [vmem:[#allocation25_spill] sm:$0xff] %v6873_v21  ;;  %v7076_v21 = vmul.f32 0.26601171, %v6844_v13  ;;  %v7096_v13 = vrot.slane %v7039_v63, 2 }
  0x19   :  { %15137 = vst [vmem:[#allocation26_spill] sm:$0xff] %v6878_v22 }
  0x1a   :  { %15138 = vst [vmem:[#allocation27_spill] sm:$0xff] %v6884_v24  ;;  %v7045_v24 = vrot.slane %v6974_v46, 2 }
  0x1b   :  { %15139 = vst [vmem:[#allocation28_spill] sm:$0xff] %v6892_v26 }
  0x1c   :  { %15140 = vst [vmem:[#allocation29_spill] sm:$0xff] %v6897_v27 }
  0x1d   :  { %15141 = vst [vmem:[#allocation30_spill] sm:$0xff] %v6902_v28 }
  0x1e   :  { %15142 = vst [vmem:[#allocation31_spill] sm:$0xff] %v6908_v30  ;;  %v7042_v30 = vmul.f32 0.26601171, %v6897_v27  ;;  %v7073_v27 = vld [vmem:[%s14508_s1 + $0xf8] sm:$0xff] }
  0x1f   :  { %15143 = vst [vmem:[#allocation32_spill] sm:$0xff] %v6916_v32  ;;  %v191_v32 = vmul.f32 0.0010283801, %v6936_v37 }
  0x20   :  { %15144 = vst [vmem:[#allocation33_spill] sm:$0xff] %v6921_v33  ;;  %v182_v33 = vadd.f32 %v6999_v53, %v7012_v56 }
  0x21   :  { %15145 = vst [vmem:[#allocation34_spill] sm:$0xff] %v6926_v34 }
  0x22   :  { %15146 = vst [vmem:[#allocation35_spill] sm:$0xff] %v6932_v36  ;;  %v180_v36 = vadd.f32 %v6956_v42, %v6969_v45  ;;  %v198_v26 = vmul.f32 0.0010283801, %v182_v33 }
  0x23   :  { %15147 = vst [vmem:[#allocation36_spill] sm:$0xff] %v6940_v38  ;;  %v190_v38 = vmul.f32 0.0010283801, %v6912_v31  ;;  %v199_v31 = vmul.f32 0.0010283801, %v183_v3 }
  0x24   :  { %15148 = vst [vmem:[#allocation37_spill] sm:$0xff] %v6945_v39  ;;  %v184_v39 = vadd.f32 %v7045_v24, %v7056_v15 }
  0x25   :  { %15149 = vst [vmem:[#allocation38_spill] sm:$0xff] %v6950_v40  ;;  %v231_v3 = vrot.slane %v199_v31, 3 }
  0x26   :  { %15150 = vst [vmem:[#allocation39_spill] sm:$0xff] %v6956_v42  ;;  %v7068_v42 = vadd.f32 %v6878_v22, %v6969_v45  ;;  %v200_v37 = vmul.f32 0.0010283801, %v184_v39 }
  0x27   :  { %15151 = vst [vmem:[#allocation40_spill] sm:$0xff] %v6964_v44 }
  0x28   :  { %15152 = vst [vmem:[#allocation41_spill] sm:$0xff] %v6969_v45  ;;  %v7127_v45 = vrot.slane %v7073_v27, 2  ;;  %v232_v39 = vrot.slane %v200_v37, 3 }
  0x29   :  { %15153 = vst [vmem:[#allocation42_spill] sm:$0xff] %v6974_v46 }
  0x2a   :  { %15154 = vst [vmem:[#allocation43_spill] sm:$0xff] %v6980_v48  ;;  %v7085_v48 = vadd.f32 %v6902_v28, %v6993_v51  ;;  %v7163_v28 = vmul.f32 0.26601171, %v7017_v57 }
  0x2b   :  { %15155 = vst [vmem:[#allocation44_spill] sm:$0xff] %v6988_v50 }
  0x2c   :  { %15156 = vst [vmem:[#allocation45_spill] sm:$0xff] %v6993_v51  ;;  %v7160_v51 = vmul.f32 0.26601171, %v7090_v9 }
  0x2d   :  { %15157 = vst [vmem:[#allocation46_spill] sm:$0xff] %v6999_v53  ;;  %v7102_v53 = vadd.f32 %v6926_v34, %v7012_v56 }
  0x2e   :  { %15158 = vst [vmem:[#allocation47_spill] sm:$0xff] %v7007_v55  ;;  %v7171_v55 = vmul.f32 0.26601171, %v7039_v63 }
  0x2f   :  { %15159 = vst [vmem:[#allocation48_spill] sm:$0xff] %v7012_v56 }
  0x30   :  { %15160 = vst [vmem:[#allocation49_spill] sm:$0xff] %v7017_v57 }
  0x31   :  { %15161 = vst [vmem:[#allocation50_spill] sm:$0xff] %v7023_v59  ;;  %v7118_v59 = vld [vmem:[%s14508_s1 + $0xe0] sm:$0xff] }
  0x32   :  { %15162 = vst [vmem:[#allocation51_spill] sm:$0xff] %v7029_v61  ;;  %v7168_v1 = vmul.f32 0.26601171, %v7118_v59  ;;  %v186_v44 = vadd.f32 %v7096_v13, %v7118_v59  ;;  %v189_v61 = vmul.f32 0.0010283801, %v6888_v25 }
  0x33   :  { %15163 = vst [vmem:[#allocation52_spill] sm:$0xff] %v7034_v62  ;;  %v197_v25 = vmul.f32 0.0010283801, %v181_v4 }
  0x34   :  { %15164 = vst [vmem:[#allocation53_spill] sm:$0xff] %v7039_v63 }
  0x35   :  { %15165 = vst [vmem:[#allocation54_spill] sm:$0xff] %v7045_v24  ;;  %v7133_v24 = vld [vmem:[%s14508_s1 + $0xf0] sm:$0xff] }
  0x36   :  { %15166 = vst [vmem:[#allocation55_spill] sm:$0xff] %v7051_v19  ;;  %v7144_v19 = vmul.f32 0.26601171, %v7034_v62  ;;  %v187_v50 = vadd.f32 %v7127_v45, %v7133_v24 }
  0x37   :  { %15167 = vst [vmem:[#allocation56_spill] sm:$0xff] %v7056_v15 }
  0x38   :  { %15168 = vst [vmem:[#allocation57_spill] sm:$0xff] %v7068_v42  ;;  %v7139_v42 = vmul.f32 0.26601171, %v6926_v34  ;;  %v7157_v34 = vmul.f32 0.26601171, %v6974_v46 }
  0x39   :  { %15169 = vst [vmem:[#allocation58_spill] sm:$0xff] %v7073_v27 }
  0x3a   :  { %15170 = vst [vmem:[#allocation59_spill] sm:$0xff] %v7079_v12  ;;  %v188_v12 = vmul.f32 0.0010283801, %v6868_v20  ;;  %v196_v20 = vmul.f32 0.0010283801, %v180_v36 }
  0x3b   :  { %15171 = vst [vmem:[#allocation60_spill] sm:$0xff] %v7085_v48  ;;  %v7111_v48 = vmul.f32 0.26601171, %v6878_v22  ;;  %v7147_v22 = vmul.f32 0.26601171, %v6950_v40 }
  0x3c   :  { %15172 = vst [vmem:[#allocation61_spill] sm:$0xff] %v7090_v9 }
  0x3d   :  { %15173 = vst [vmem:[#allocation62_spill] sm:$0xff] %v7096_v13  ;;  %v7196_v13 = vadd.f32 %v7017_v57, %v7090_v9  ;;  %v222_v9 = vrot.slane %v190_v38, 3  ;;  %v223_v57 = vrot.slane %v191_v32, 3  ;;  %v15203_v37 = vld [vmem:[#allocation55_spill] sm:$0xff] }
  0x3e   :  { %15174 = vst [vmem:[#allocation63_spill] sm:$0xff] %v7102_v53  ;;  %v7136_v53 = vmul.f32 0.26601171, %v7012_v56  ;;  %v7154_v56 = vadd.f32 %v6950_v40, %v7034_v62  ;;  %v7174_v62 = vmul.f32 0.26601171, %v7133_v24  ;;  %v7178_v40 = vadd.f32 %v6974_v46, %v7056_v15 }
  0x3f   :  { %15175 = vst [vmem:[#allocation64_spill] sm:$0xff] %v7118_v59  ;;  %v192_v15 = vmul.f32 0.0010283801, %v6960_v43  ;;  %v193_v46 = vmul.f32 0.0010283801, %v6984_v49  ;;  %v7204_v43 = vadd.f32 %v7073_v27, %v7133_v24  ;;  %v7219_v38 = vadd.f32 %v222_v9, %v6905_v29 }
  0x40   :  { %15176 = vst [vmem:[#allocation65_spill] sm:$0xff] %v7127_v45  ;;  %v7200_v45 = vadd.f32 %v7039_v63, %v7118_v59  ;;  %v202_v49 = vmul.f32 0.0010283801, %v186_v44  ;;  %v229_v59 = vrot.slane %v197_v25, 3  ;;  %v230_v63 = vrot.slane %v198_v26, 3 }
  0x41   :  { %15177 = vst [vmem:[#allocation66_spill] sm:$0xff] %v7133_v24  ;;  %v224_v36 = vrot.slane %v192_v15, 3  ;;  %v225_v4 = vrot.slane %v193_v46, 3  ;;  %v7222_v26 = vadd.f32 %v222_v9, %v6929_v35 }
  0x42   :  { %15178 = vst [vmem:[#allocation67_spill] sm:$0xff] %v7154_v56  ;;  %v7181_v56 = vmul.f32 0.26601171, %v7073_v27 }
  0x43   :  { %15179 = vst [vmem:[#allocation68_spill] sm:$0xff] %v7163_v28  ;;  %v7240_v29 = vadd.f32 %v225_v4, %v7059_v10  ;;  %v7261_v10 = vadd.f32 %v229_v59, %v7121_v5  ;;  %v7282_v5 = vadd.f32 %v232_v39, %v7157_v34 }
  0x44   :  { %15180 = vst [vmem:[#allocation69_spill] sm:$0xff] %v7168_v1  ;;  %v228_v1 = vrot.slane %v196_v20, 3  ;;  %v15201_v20 = vld [vmem:[#allocation40_spill] sm:$0xff] }
  0x45   :  { %15181 = vst [vmem:[#allocation70_spill] sm:$0xff] %v7171_v55  ;;  %v221_v55 = vrot.slane %v189_v61, 3  ;;  %v305_v25 = vmul.f32 0.007598758, %v15201_v20 }
  0x46   :  { %15182 = vst [vmem:[#allocation71_spill] sm:$0xff] %v7174_v62  ;;  %v201_v62 = vmul.f32 0.0010283801, %v185_v2  ;;  %v7255_v46 = vadd.f32 %v228_v1, %v7108_v8  ;;  %v7276_v8 = vadd.f32 %v231_v3, %v7147_v22 }
  0x47   :  { %15183 = vst [vmem:[#allocation72_spill] sm:$0xff] %v7178_v40  ;;  %v194_v40 = vmul.f32 0.0010283801, %v7003_v54  ;;  %v203_v54 = vmul.f32 0.0010283801, %v187_v50  ;;  %v7213_v32 = vadd.f32 %v221_v55, %v6861_v18  ;;  %v7216_v15 = vadd.f32 %v221_v55, %v6881_v23  ;;  %v15195_v55 = vld [vmem:[#allocation32_spill] sm:$0xff] }
  0x48   :  { %15184 = vst [vmem:[#allocation73_spill] sm:$0xff] %v7181_v56  ;;  %v195_v56 = vmul.f32 0.0010283801, %v179_v60  ;;  %v220_v60 = vrot.slane %v188_v12, 3  ;;  %v233_v2 = vrot.slane %v201_v62, 3  ;;  %v7234_v18 = vadd.f32 %v224_v36, %v7020_v58  ;;  %v15200_v62 = vld [vmem:[#allocation51_spill] sm:$0xff] }
  0x49   :  { %15185 = vst [vmem:[#allocation74_spill] sm:$0xff] %v7196_v13  ;;  %v226_v33 = vrot.slane %v194_v40, 3  ;;  %v235_v28 = vrot.slane %v203_v54, 3  ;;  %v7225_v40 = vadd.f32 %v223_v57, %v6953_v41  ;;  %v7237_v23 = vadd.f32 %v225_v4, %v7042_v30  ;;  %v15204_v54 = vld [vmem:[#allocation57_spill] sm:$0xff]  ;;  %v15206_v4 = vld [vmem:[#allocation8_spill] sm:$0xff] }
  0x4a   :  { %15186 = vst [vmem:[#allocation75_spill] sm:$0xff] %v7200_v45  ;;  %v227_v13 = vrot.slane %v195_v56, 3  ;;  %v234_v45 = vrot.slane %v202_v49, 3  ;;  %v7207_v24 = vadd.f32 %v220_v60, %v6847_v14  ;;  %v7210_v12 = vadd.f32 %v220_v60, %v6858_v17  ;;  %v15196_v56 = vld [vmem:[#allocation36_spill] sm:$0xff] }
  0x4b   :  { %v7228_v14 = vadd.f32 %v223_v57, %v6977_v47  ;;  %v7231_v17 = vadd.f32 %v224_v36, %v6996_v52  ;;  %v7243_v9 = vadd.f32 %v226_v33, %v7062_v7  ;;  %v7246_v35 = vadd.f32 %v226_v33, %v7076_v21  ;;  %v15205_v36 = vld [vmem:[#allocation13_spill] sm:$0xff] }
  0x4c   :  { %v7249_v41 = vadd.f32 %v227_v13, %v7093_v6  ;;  %v7252_v44 = vadd.f32 %v227_v13, %v7105_v11  ;;  %v7258_v30 = vadd.f32 %v228_v1, %v7111_v48  ;;  %v7264_v7 = vadd.f32 %v229_v59, %v7124_v16  ;;  %v15187_v16 = vld [vmem:[#allocation68_spill] sm:$0xff] }
  0x4d   :  { %v7267_v21 = vadd.f32 %v230_v63, %v7136_v53  ;;  %v7270_v6 = vadd.f32 %v230_v63, %v7139_v42  ;;  %v7273_v11 = vadd.f32 %v231_v3, %v7144_v19  ;;  %v7279_v1 = vadd.f32 %v232_v39, %v7150_v0  ;;  %v15188_v42 = vld [vmem:[#allocation69_spill] sm:$0xff]  ;;  %v15190_v19 = vld [vmem:[#allocation70_spill] sm:$0xff]  ;;  %v15192_v22 = vld [vmem:[#allocation71_spill] sm:$0xff] }
  0x4e   :  { %v7285_v13 = vadd.f32 %v233_v2, %v7160_v51  ;;  %v7288_v47 = vadd.f32 %v233_v2, %v15187_v16  ;;  %v7291_v48 = vadd.f32 %v234_v45, %v15188_v42  ;;  %v7294_v50 = vadd.f32 %v234_v45, %v15190_v19  ;;  %v15194_v0 = vld [vmem:[#allocation28_spill] sm:$0xff]  ;;  %v15202_v45 = vld [vmem:[#allocation47_spill] sm:$0xff] }
  0x4f   :  { %v7297_v52 = vadd.f32 %v235_v28, %v15192_v22  ;;  %v300_v53 = vmul.f32 0.007598758, %v15194_v0  ;;  %v301_v34 = vmul.f32 0.007598758, %v15195_v55  ;;  %v302_v57 = vmul.f32 0.007598758, %v15196_v56 }
  0x50   :  { %15189 = vst [vmem:[#allocation68_spill] sm:$0xff] %v7291_v48  ;;  %v15197_v51 = vld [vmem:[#allocation73_spill] sm:$0xff]  ;;  %v15199_v59 = vld [vmem:[#allocation44_spill] sm:$0xff]  ;;  %v304_v63 = vmul.f32 0.007598758, %v15200_v62  ;;  %v15207_v33 = vrot.slane %v15206_v4, 6 }
  0x51   :  { %15191 = vst [vmem:[#allocation69_spill] sm:$0xff] %v7294_v50  ;;  %v7303_v58 = vadd.f32 %v235_v28, %v15197_v51  ;;  %v303_v61 = vmul.f32 0.007598758, %v15199_v59  ;;  %v306_v31 = vmul.f32 0.007598758, %v15202_v45  ;;  %v15209_v39 = vld [vmem:[#allocation60_spill] sm:$0xff] }
  0x52   :  { %15193 = vst [vmem:[#allocation70_spill] sm:$0xff] %v7297_v52  ;;  %v307_v49 = vmul.f32 0.007598758, %v15203_v37  ;;  %v308_v60 = vmul.f32 0.007598758, %v15204_v54  ;;  %v7314_v3 = vadd.f32 %v15207_v33, %v15205_v36  ;;  %v15210_v2 = vld [vmem:[#allocation63_spill] sm:$0xff] }
  0x53   :  { %15198 = vst [vmem:[#allocation71_spill] sm:$0xff] %v7303_v58  ;;  %v309_v28 = vmul.f32 0.007598758, %v15209_v39  ;;  %v310_v16 = vmul.f32 0.007598758, %v15210_v2  ;;  %v15211_v42 = vld [vmem:[#allocation67_spill] sm:$0xff] }
  0x54   :  { %15208 = vst [vmem:[#allocation28_spill] sm:$0xff] %v7314_v3  ;;  %v311_v19 = vmul.f32 0.007598758, %v15211_v42  ;;  %v15212_v22 = vld [vmem:[#allocation16_spill] sm:$0xff]  ;;  %v15213_v0 = vld [vmem:[#allocation9_spill] sm:$0xff]  ;;  %v15217_v62 = vld [vmem:[#allocation74_spill] sm:$0xff] }
  0x55   :  { %v15214_v55 = vrot.slane %v15213_v0, 6  ;;  %v15216_v51 = vld [vmem:[#allocation72_spill] sm:$0xff]  ;;  %v313_v20 = vmul.f32 0.007598758, %v15217_v62  ;;  %v15218_v45 = vld [vmem:[#allocation75_spill] sm:$0xff]  ;;  %v15220_v33 = vld [vmem:[#allocation10_spill] sm:$0xff] }
  0x56   :  { %v312_v59 = vmul.f32 0.007598758, %v15216_v51  ;;  %v7327_v37 = vmul.f32 0.007598758, %v15218_v45  ;;  %v15219_v54 = vld [vmem:[#allocation19_spill] sm:$0xff]  ;;  %v15221_v4 = vrot.slane %v15220_v33, 6 }
  0x57   :  { %v7322_v56 = vadd.f32 %v15214_v55, %v15212_v22  ;;  %v7335_v2 = vmul.f32 0.007598758, %v7204_v43  ;;  %v332_v42 = vrot.slane %v300_v53, 4  ;;  %v333_v36 = vrot.slane %v301_v34, 4 }
  0x58   :  { %v7332_v39 = vadd.f32 %v15221_v4, %v15219_v54  ;;  %v334_v0 = vrot.slane %v302_v57, 4  ;;  %v335_v55 = vrot.slane %v303_v61, 4  ;;  %v336_v22 = vrot.slane %v304_v63, 4  ;;  %v15238_v4 = vld [vmem:[#allocation20_spill] sm:$0xff] }
  0x59   :  { %15215 = vst [vmem:[#allocation32_spill] sm:$0xff] %v7322_v56  ;;  %v337_v58 = vrot.slane %v305_v25, 4  ;;  %v338_v51 = vrot.slane %v306_v31, 4  ;;  %v339_v52 = vrot.slane %v307_v49, 4  ;;  %v340_v62 = vrot.slane %v308_v60, 4  ;;  %v15227_v60 = vld [vmem:[#allocation23_spill] sm:$0xff] }
  0x5a   :  { %v341_v50 = vrot.slane %v309_v28, 4  ;;  %v342_v45 = vrot.slane %v310_v16, 4  ;;  %v343_v48 = vrot.slane %v311_v19, 4  ;;  %v344_v56 = vrot.slane %v312_v59, 4  ;;  %v15230_v19 = vld [vmem:[#allocation34_spill] sm:$0xff]  ;;  %v15247_v54 = vld [vmem:[#allocation56_spill] sm:$0xff] }
  0x5b   :  { %v345_v3 = vrot.slane %v313_v20, 4  ;;  %v7340_v43 = vadd.f32 %v332_v42, %v7207_v24  ;;  %v7343_v53 = vadd.f32 %v332_v42, %v7210_v12  ;;  %v7346_v34 = vadd.f32 %v333_v36, %v7213_v32  ;;  %v15235_v42 = vld [vmem:[#allocation49_spill] sm:$0xff] }
  0x5c   :  { %v7349_v57 = vadd.f32 %v333_v36, %v7216_v15  ;;  %v7352_v61 = vadd.f32 %v334_v0, %v7219_v38  ;;  %v7355_v63 = vadd.f32 %v334_v0, %v7222_v26  ;;  %v7358_v25 = vadd.f32 %v335_v55, %v7225_v40  ;;  %v15228_v36 = vld [vmem:[#allocation26_spill] sm:$0xff] }
  0x5d   :  { %v7361_v24 = vadd.f32 %v335_v55, %v7228_v14  ;;  %v7364_v12 = vadd.f32 %v336_v22, %v7231_v17  ;;  %v7367_v32 = vadd.f32 %v336_v22, %v7234_v18  ;;  %v7370_v15 = vadd.f32 %v337_v58, %v7237_v23 }
  0x5e   :  { %v7373_v38 = vadd.f32 %v337_v58, %v7240_v29  ;;  %v7376_v26 = vadd.f32 %v338_v51, %v7243_v9  ;;  %v7379_v40 = vadd.f32 %v338_v51, %v7246_v35  ;;  %v7382_v14 = vadd.f32 %v339_v52, %v7249_v41  ;;  %v15224_v58 = vld [vmem:[#allocation14_spill] sm:$0xff]  ;;  %v15236_v51 = vld [vmem:[#allocation53_spill] sm:$0xff] }
  0x5f   :  { %v7385_v17 = vadd.f32 %v339_v52, %v7252_v44  ;;  %v7388_v18 = vadd.f32 %v340_v62, %v7255_v46  ;;  %v7391_v23 = vadd.f32 %v340_v62, %v7258_v30  ;;  %v7394_v29 = vadd.f32 %v341_v50, %v7261_v10  ;;  %v15223_v10 = vld [vmem:[#allocation11_spill] sm:$0xff] }
  0x60   :  { %v7397_v9 = vadd.f32 %v341_v50, %v7264_v7  ;;  %v7400_v35 = vadd.f32 %v342_v45, %v7267_v21  ;;  %v7403_v41 = vadd.f32 %v342_v45, %v7270_v6  ;;  %v7406_v44 = vadd.f32 %v343_v48, %v7273_v11  ;;  %v15225_v50 = vld [vmem:[#allocation17_spill] sm:$0xff]  ;;  %v15229_v11 = vld [vmem:[#allocation30_spill] sm:$0xff] }
  0x61   :  { %v7409_v46 = vadd.f32 %v343_v48, %v7276_v8  ;;  %v7412_v30 = vadd.f32 %v344_v56, %v7279_v1  ;;  %v399_v52 = vrot.slane %v15223_v10, 6  ;;  %v400_v7 = vrot.slane %v15224_v58, 6  ;;  %v15226_v21 = vld [vmem:[#allocation21_spill] sm:$0xff]  ;;  %v15231_v48 = vld [vmem:[#allocation38_spill] sm:$0xff] }
  0x62   :  { %v401_v31 = vrot.slane %v15225_v50, 6  ;;  %v402_v49 = vrot.slane %v15226_v21, 6  ;;  %v403_v6 = vrot.slane %v15227_v60, 6  ;;  %v404_v28 = vrot.slane %v15228_v36, 6  ;;  %v15232_v1 = vld [vmem:[#allocation42_spill] sm:$0xff]  ;;  %v15242_v60 = vld [vmem:[#allocation37_spill] sm:$0xff] }
  0x63   :  { %15222 = vst [vmem:[#allocation36_spill] sm:$0xff] %v7412_v30  ;;  %v405_v16 = vrot.slane %v15229_v11, 6  ;;  %v406_v8 = vrot.slane %v15230_v19, 6  ;;  %v407_v22 = vrot.slane %v15231_v48, 6  ;;  %v408_v0 = vrot.slane %v15232_v1, 6  ;;  %v15239_v48 = vld [vmem:[#allocation25_spill] sm:$0xff] }
  0x64   :  { %v7425_v59 = vadd.f32 %v344_v56, %v7282_v5  ;;  %v7428_v20 = vadd.f32 %v345_v3, %v7285_v13  ;;  %v409_v55 = vrot.slane %v15235_v42, 6  ;;  %v410_v62 = vrot.slane %v15236_v51, 6  ;;  %v15240_v1 = vld [vmem:[#allocation29_spill] sm:$0xff]  ;;  %v15245_v51 = vld [vmem:[#allocation48_spill] sm:$0xff] }
  0x65   :  { %v7433_v45 = vadd.f32 %v345_v3, %v7288_v47  ;;  %v411_v33 = vrot.slane %v7073_v27, 6  ;;  %v431_v19 = vadd.f32 %v399_v52, %v15238_v4  ;;  %v432_v11 = vadd.f32 %v400_v7, %v15239_v48  ;;  %v15241_v5 = vld [vmem:[#allocation33_spill] sm:$0xff]  ;;  %v15246_v47 = vld [vmem:[#allocation52_spill] sm:$0xff] }
  0x66   :  { %15233 = vst [vmem:[#allocation73_spill] sm:$0xff] %v7425_v59  ;;  %v433_v36 = vadd.f32 %v401_v31, %v15240_v1  ;;  %v434_v56 = vadd.f32 %v402_v49, %v15241_v5  ;;  %v435_v13 = vadd.f32 %v403_v6, %v15242_v60  ;;  %v15243_v21 = vld [vmem:[#allocation41_spill] sm:$0xff]  ;;  %v438_v10 = vadd.f32 %v406_v8, %v15245_v51  ;;  %v15249_v4 = vld [vmem:[#allocation64_spill] sm:$0xff]  ;;  %v15252_v5 = vld [vmem:[#allocation66_spill] sm:$0xff] }
  0x67   :  { %15234 = vst [vmem:[#allocation44_spill] sm:$0xff] %v7428_v20  ;;  %v436_v50 = vadd.f32 %v404_v28, %v15243_v21  ;;  %v15244_v42 = vld [vmem:[#allocation45_spill] sm:$0xff]  ;;  %v439_v3 = vadd.f32 %v407_v22, %v15246_v47  ;;  %v440_v27 = vadd.f32 %v408_v0, %v15247_v54  ;;  %v442_v7 = vadd.f32 %v410_v62, %v15249_v4  ;;  %v15250_v48 = vld [vmem:[#allocation28_spill] sm:$0xff]  ;;  %v15260_v60 = vld [vmem:[#allocation71_spill] sm:$0xff] }
  0x68   :  { %15237 = vst [vmem:[#allocation51_spill] sm:$0xff] %v7433_v45  ;;  %v437_v58 = vadd.f32 %v405_v16, %v15244_v42  ;;  %v15248_v45 = vld [vmem:[#allocation61_spill] sm:$0xff]  ;;  %v444_v31 = vmul.f32 0.036000773, %v15250_v48  ;;  %v15251_v1 = vld [vmem:[#allocation32_spill] sm:$0xff]  ;;  %v443_v6 = vadd.f32 %v411_v33, %v15252_v5  ;;  %v15254_v8 = vrot.slane %v7327_v37, 4 }
  0x69   :  { %v441_v52 = vadd.f32 %v409_v55, %v15248_v45  ;;  %v445_v49 = vmul.f32 0.036000773, %v15251_v1  ;;  %v446_v28 = vmul.f32 0.036000773, %v7332_v39  ;;  %v447_v21 = vmul.f32 0.036000773, %v431_v19 }
  0x6a   :  { %v448_v16 = vmul.f32 0.036000773, %v432_v11  ;;  %v15253_v42 = vld [vmem:[#allocation68_spill] sm:$0xff]  ;;  %v449_v0 = vmul.f32 0.036000773, %v433_v36  ;;  %v15256_v45 = vld [vmem:[#allocation69_spill] sm:$0xff]  ;;  %v15257_v62 = vmov %v15254_v8 }
  0x6b   :  { %v7455_v22 = vadd.f32 %v15254_v8, %v15253_v42  ;;  %v450_v54 = vmul.f32 0.036000773, %v434_v56  ;;  %v451_v55 = vmul.f32 0.036000773, %v435_v13  ;;  %v393_v48 = vadd.f32 %v15257_v62, %v15256_v45  ;;  %v15258_v33 = vld [vmem:[#allocation70_spill] sm:$0xff] }
  0x6c   :  { %v452_v4 = vmul.f32 0.036000773, %v436_v50  ;;  %v453_v1 = vmul.f32 0.036000773, %v437_v58  ;;  %v454_v47 = vmul.f32 0.036000773, %v438_v10 }
  0x6d   :  { %15255 = vst [vmem:[#allocation40_spill] sm:$0xff] %v7455_v22  ;;  %v15259_v39 = vrot.slane %v7335_v2, 4  ;;  %v455_v11 = vmul.f32 0.036000773, %v439_v3  ;;  %v456_v5 = vmul.f32 0.036000773, %v440_v27 }
  0x6e   :  { %v457_v51 = vmul.f32 0.036000773, %v441_v52  ;;  %v458_v56 = vmul.f32 0.036000773, %v442_v7  ;;  %v459_v13 = vmul.f32 0.036000773, %v443_v6 }
  0x6f   :  { %v394_v19 = vadd.f32 %v15259_v39, %v15258_v33  ;;  %v15261_v42 = vmov %v15259_v39  ;;  %v476_v8 = vrot.slane %v444_v31, 5  ;;  %v477_v22 = vrot.slane %v445_v49, 5  ;;  %v15286_v7 = vld [vmem:[#allocation8_spill] sm:$0xff] }
  0x70   :  { %v395_v36 = vadd.f32 %v15261_v42, %v15260_v60  ;;  %v478_v37 = vrot.slane %v446_v28, 5  ;;  %v479_v45 = vrot.slane %v447_v21, 5  ;;  %v480_v50 = vrot.slane %v448_v16, 5  ;;  %v15296_v16 = vld [vmem:[#allocation51_spill] sm:$0xff] }
  0x71   :  { %v481_v58 = vrot.slane %v449_v0, 5  ;;  %v482_v10 = vrot.slane %v450_v54, 5  ;;  %v483_v62 = vrot.slane %v451_v55, 5  ;;  %v484_v20 = vrot.slane %v452_v4, 5 }
  0x72   :  { %v485_v59 = vrot.slane %v453_v1, 5  ;;  %v486_v33 = vrot.slane %v454_v47, 5  ;;  %v487_v3 = vrot.slane %v455_v11, 5  ;;  %v488_v27 = vrot.slane %v456_v5, 5 }
  0x73   :  { %v489_v52 = vrot.slane %v457_v51, 5  ;;  %v490_v39 = vrot.slane %v458_v56, 5  ;;  %v491_v30 = vrot.slane %v459_v13, 5  ;;  %v7467_v2 = vadd.f32 %v476_v8, %v7340_v43  ;;  %v15303_v56 = vld [vmem:[#allocation19_spill] sm:$0xff] }
  0x74   :  { %v7470_v60 = vadd.f32 %v476_v8, %v7343_v53  ;;  %v7473_v21 = vadd.f32 %v477_v22, %v7346_v34  ;;  %v7476_v54 = vadd.f32 %v477_v22, %v7349_v57  ;;  %v7479_v4 = vadd.f32 %v478_v37, %v7352_v61  ;;  %v15298_v0 = vld [vmem:[#allocation40_spill] sm:$0xff]  ;;  %v15304_v8 = vld [vmem:[#allocation10_spill] sm:$0xff] }
  0x75   :  { %15262 = vst [vmem:[#allocation47_spill] sm:$0xff] %v7467_v2  ;;  %v7482_v5 = vadd.f32 %v478_v37, %v7355_v63  ;;  %v7485_v51 = vadd.f32 %v479_v45, %v7358_v25  ;;  %v7488_v43 = vadd.f32 %v479_v45, %v7361_v24  ;;  %v7491_v53 = vadd.f32 %v480_v50, %v7364_v12  ;;  %v15305_v45 = vld [vmem:[#allocation20_spill] sm:$0xff] }
  0x76   :  { %15263 = vst [vmem:[#allocation55_spill] sm:$0xff] %v7470_v60  ;;  %v7494_v34 = vadd.f32 %v480_v50, %v7367_v32  ;;  %v7497_v57 = vadd.f32 %v481_v58, %v7370_v15  ;;  %v7500_v61 = vadd.f32 %v481_v58, %v7373_v38  ;;  %v7503_v63 = vadd.f32 %v482_v10, %v7376_v26  ;;  %v15329_v60 = vld [vmem:[#allocation66_spill] sm:$0xff] }
  0x77   :  { %15264 = vst [vmem:[#allocation57_spill] sm:$0xff] %v7473_v21  ;;  %v7506_v25 = vadd.f32 %v482_v10, %v7379_v40  ;;  %v7509_v24 = vadd.f32 %v483_v62, %v7382_v14  ;;  %v7512_v12 = vadd.f32 %v483_v62, %v7385_v17  ;;  %v7515_v32 = vadd.f32 %v484_v20, %v7388_v18  ;;  %v15285_v18 = vld [vmem:[#allocation13_spill] sm:$0xff]  ;;  %v15306_v10 = vld [vmem:[#allocation11_spill] sm:$0xff] }
  0x78   :  { %15265 = vst [vmem:[#allocation60_spill] sm:$0xff] %v7476_v54  ;;  %v7518_v15 = vadd.f32 %v484_v20, %v7391_v23  ;;  %v7521_v38 = vadd.f32 %v485_v59, %v7394_v29  ;;  %v7524_v26 = vadd.f32 %v485_v59, %v7397_v9  ;;  %v7527_v40 = vadd.f32 %v486_v33, %v7400_v35  ;;  %v15288_v29 = vld [vmem:[#allocation16_spill] sm:$0xff]  ;;  %v15289_v59 = vld [vmem:[#allocation9_spill] sm:$0xff] }
  0x79   :  { %15266 = vst [vmem:[#allocation63_spill] sm:$0xff] %v7479_v4  ;;  %v7530_v14 = vadd.f32 %v486_v33, %v7403_v41  ;;  %v7533_v17 = vadd.f32 %v487_v3, %v7406_v44  ;;  %v557_v47 = vrot.slane %v15285_v18, 4  ;;  %v558_v23 = vrot.slane %v15286_v7, 4  ;;  %v15290_v35 = vld [vmem:[#allocation36_spill] sm:$0xff]  ;;  %v15292_v41 = vld [vmem:[#allocation73_spill] sm:$0xff] }
  0x7a   :  { %15267 = vst [vmem:[#allocation67_spill] sm:$0xff] %v7482_v5  ;;  %v7538_v20 = vadd.f32 %v487_v3, %v7409_v46  ;;  %v560_v9 = vrot.slane %v15288_v29, 4  ;;  %v561_v31 = vrot.slane %v15289_v59, 4  ;;  %v7543_v49 = vadd.f32 %v488_v27, %v15290_v35  ;;  %v15294_v44 = vld [vmem:[#allocation44_spill] sm:$0xff]  ;;  %v15307_v33 = vld [vmem:[#allocation25_spill] sm:$0xff] }
  0x7b   :  { %15268 = vst [vmem:[#allocation72_spill] sm:$0xff] %v7485_v51  ;;  %v7546_v6 = vadd.f32 %v488_v27, %v15292_v41  ;;  %v7549_v28 = vadd.f32 %v489_v52, %v15294_v44  ;;  %v7552_v22 = vadd.f32 %v489_v52, %v15296_v16  ;;  %v7555_v46 = vadd.f32 %v490_v39, %v15298_v0  ;;  %v15312_v35 = vld [vmem:[#allocation21_spill] sm:$0xff]  ;;  %v15314_v0 = vld [vmem:[#allocation23_spill] sm:$0xff] }
  0x7c   :  { %15269 = vst [vmem:[#allocation74_spill] sm:$0xff] %v7488_v43  ;;  %v7557_v55 = vadd.f32 %v490_v39, %v393_v48  ;;  %v7559_v1 = vadd.f32 %v491_v30, %v394_v19  ;;  %v7561_v11 = vadd.f32 %v491_v30, %v395_v36  ;;  %v559_v42 = vsel %vm556_vm0, %v557_v47, %v558_v23  ;;  %v15308_v48 = vld [vmem:[#allocation14_spill] sm:$0xff]  ;;  %v15309_v19 = vld [vmem:[#allocation29_spill] sm:$0xff]  ;;  %v15327_v43 = vld [vmem:[#allocation64_spill] sm:$0xff] }
  0x7d   :  { %15270 = vst [vmem:[#allocation75_spill] sm:$0xff] %v7491_v53  ;;  %v563_v13 = vrot.slane %v15303_v56, 4  ;;  %v564_v37 = vrot.slane %v15304_v8, 4  ;;  %v566_v50 = vrot.slane %v15305_v45, 4  ;;  %v562_v58 = vsel %vm556_vm0, %v560_v9, %v561_v31  ;;  %v15310_v30 = vld [vmem:[#allocation17_spill] sm:$0xff] }
  0x7e   :  { %15271 = vst [vmem:[#allocation28_spill] sm:$0xff] %v7494_v34  ;;  %v567_v62 = vrot.slane %v15306_v10, 4  ;;  %v569_v3 = vrot.slane %v15307_v33, 4  ;;  %v570_v27 = vrot.slane %v15308_v48, 4  ;;  %v572_v52 = vrot.slane %v15309_v19, 4  ;;  %v15311_v39 = vld [vmem:[#allocation33_spill] sm:$0xff] }
  0x7f   :  { %15272 = vst [vmem:[#allocation32_spill] sm:$0xff] %v7497_v57  ;;  %v573_v36 = vrot.slane %v15310_v30, 4  ;;  %v575_v47 = vrot.slane %v15311_v39, 4  ;;  %v576_v41 = vrot.slane %v15312_v35, 4  ;;  %v15313_v44 = vld [vmem:[#allocation37_spill] sm:$0xff]  ;;  %v599_v51 = vrot.slane %v15327_v43, 4 }
  0x80   :  { %15273 = vst [vmem:[#allocation68_spill] sm:$0xff] %v7500_v61  ;;  %v578_v16 = vrot.slane %v15313_v44, 4  ;;  %v15325_v61 = vld [vmem:[#allocation61_spill] sm:$0xff]  ;;  %v565_v54 = vsel %vm556_vm0, %v563_v13, %v564_v37  ;;  %v568_v21 = vsel %vm556_vm0, %v566_v50, %v567_v62  ;;  %v602_v2 = vrot.slane %v15329_v60, 4 }
  0x81   :  { %15274 = vst [vmem:[#allocation69_spill] sm:$0xff] %v7503_v63  ;;  %v596_v57 = vrot.slane %v15325_v61, 4  ;;  %v15326_v34 = vld [vmem:[#allocation49_spill] sm:$0xff]  ;;  %v577_v61 = vsel %vm556_vm0, %v575_v47, %v576_v41 }
  0x82   :  { %15275 = vst [vmem:[#allocation70_spill] sm:$0xff] %v7506_v25  ;;  %v15324_v25 = vld [vmem:[#allocation42_spill] sm:$0xff]  ;;  %v597_v53 = vrot.slane %v15326_v34, 4  ;;  %v15328_v5 = vld [vmem:[#allocation53_spill] sm:$0xff] }
  0x83   :  { %15276 = vst [vmem:[#allocation71_spill] sm:$0xff] %v7509_v24  ;;  %v594_v63 = vrot.slane %v15324_v25, 4  ;;  %v600_v4 = vrot.slane %v15328_v5, 4  ;;  %v574_v25 = vsel %vm556_vm0, %v572_v52, %v573_v36  ;;  %v637_v52 = vadd.f32 %v559_v42, %v15285_v18 }
  0x84   :  { %15277 = vst [vmem:[#allocation76_spill] sm:$0xff] %v7512_v12  ;;  %v15323_v12 = vld [vmem:[#allocation56_spill] sm:$0xff]  ;;  %v646_v18 = vadd.f32 %v570_v27, %v15308_v48 }
  0x85   :  { %15278 = vst [vmem:[#allocation77_spill] sm:$0xff] %v7515_v32  ;;  %v593_v24 = vrot.slane %v15323_v12, 4  ;;  %v571_v12 = vsel %vm556_vm0, %v569_v3, %v570_v27  ;;  %v601_v3 = vsel %vm556_vm0, %v599_v51, %v600_v4  ;;  %v15333_v48 = vld [vmem:[#allocation56_spill] sm:$0xff]  ;;  %v15334_v27 = vld [vmem:[#allocation42_spill] sm:$0xff] }
  0x86   :  { %15279 = vst [vmem:[#allocation78_spill] sm:$0xff] %v7518_v15  ;;  %v15322_v15 = vld [vmem:[#allocation38_spill] sm:$0xff]  ;;  %v645_v51 = vadd.f32 %v571_v12, %v15307_v33 }
  0x87   :  { %15280 = vst [vmem:[#allocation79_spill] sm:$0xff] %v7521_v38  ;;  %v591_v32 = vrot.slane %v15322_v15, 4  ;;  %v595_v60 = vsel %vm556_vm0, %v593_v24, %v594_v63  ;;  %v643_v24 = vadd.f32 %v568_v21, %v15305_v45 }
  0x88   :  { %15281 = vst [vmem:[#allocation80_spill] sm:$0xff] %v7524_v26  ;;  %v15321_v26 = vld [vmem:[#allocation52_spill] sm:$0xff] }
  0x89   :  { %15282 = vst [vmem:[#allocation81_spill] sm:$0xff] %v7527_v40  ;;  %v590_v38 = vrot.slane %v15321_v26, 4  ;;  %v15330_v26 = vld [vmem:[#allocation58_spill] sm:$0xff] }
  0x8a   :  { %15283 = vst [vmem:[#allocation82_spill] sm:$0xff] %v7530_v14  ;;  %v15320_v14 = vld [vmem:[#allocation34_spill] sm:$0xff]  ;;  %v603_v15 = vrot.slane %v15330_v26, 4  ;;  %v598_v26 = vsel %vm556_vm0, %v596_v57, %v597_v53  ;;  %v644_v57 = vadd.f32 %v567_v62, %v15306_v10 }
  0x8b   :  { %15284 = vst [vmem:[#allocation83_spill] sm:$0xff] %v7533_v17  ;;  %v588_v40 = vrot.slane %v15320_v14, 4  ;;  %v592_v50 = vsel %vm556_vm0, %v590_v38, %v591_v32  ;;  %v642_v38 = vadd.f32 %v564_v37, %v15304_v8  ;;  %v15332_v62 = vld [vmem:[#allocation38_spill] sm:$0xff] }
  0x8c   :  { %15287 = vst [vmem:[#allocation13_spill] sm:$0xff] %v7538_v20  ;;  %v15319_v20 = vld [vmem:[#allocation48_spill] sm:$0xff]  ;;  %v604_v47 = vsel %vm556_vm0, %v602_v2, %v603_v15  ;;  %v647_v2 = vadd.f32 %v574_v25, %v15309_v19  ;;  %v660_v33 = vadd.f32 %v591_v32, %v15332_v62  ;;  %v7643_v32 = vmul.f32 0.10936069, %v644_v57  ;;  %v15342_v62 = vld [vmem:[#allocation15_spill] sm:$0xff] }
  0x8d   :  { %15291 = vst [vmem:[#allocation8_spill] sm:$0xff] %v7543_v49  ;;  %v587_v17 = vrot.slane %v15319_v20, 4  ;;  %v658_v45 = vadd.f32 %v588_v40, %v15320_v14  ;;  %v674_v14 = vmul.f32 0.10936069, %v642_v38 }
  0x8e   :  { %15293 = vst [vmem:[#allocation16_spill] sm:$0xff] %v7546_v6  ;;  %v15318_v6 = vld [vmem:[#allocation30_spill] sm:$0xff] }
  0x8f   :  { %15295 = vst [vmem:[#allocation9_spill] sm:$0xff] %v7549_v28  ;;  %v585_v49 = vrot.slane %v15318_v6, 4  ;;  %v589_v13 = vsel %vm556_vm0, %v587_v17, %v588_v40  ;;  %v641_v17 = vadd.f32 %v565_v54, %v15303_v56 }
  0x90   :  { %15297 = vst [vmem:[#allocation36_spill] sm:$0xff] %v7552_v22  ;;  %v15317_v22 = vld [vmem:[#allocation45_spill] sm:$0xff]  ;;  %v657_v25 = vadd.f32 %v589_v13, %v15319_v20  ;;  %v7650_v13 = vmul.f32 0.10936069, %v647_v2 }
  0x91   :  { %15299 = vst [vmem:[#allocation73_spill] sm:$0xff] %v7555_v46  ;;  %v584_v28 = vrot.slane %v15317_v22, 4  ;;  %v656_v37 = vadd.f32 %v585_v49, %v15318_v6  ;;  %v7638_v6 = vmul.f32 0.10936069, %v641_v17 }
  0x92   :  { %15300 = vst [vmem:[#allocation44_spill] sm:$0xff] %v7557_v55  ;;  %v15316_v55 = vld [vmem:[#allocation26_spill] sm:$0xff]  ;;  %v7669_v2 = vmul.f32 0.10936069, %v657_v25 }
  0x93   :  { %15301 = vst [vmem:[#allocation51_spill] sm:$0xff] %v7559_v1  ;;  %v15315_v1 = vld [vmem:[#allocation41_spill] sm:$0xff]  ;;  %v582_v46 = vrot.slane %v15316_v55, 4  ;;  %v586_v5 = vsel %vm556_vm0, %v584_v28, %v585_v49  ;;  %v640_v28 = vadd.f32 %v561_v31, %v15289_v59  ;;  %v650_v31 = vadd.f32 %v576_v41, %v15312_v35 }
  0x94   :  { %15302 = vst [vmem:[#allocation40_spill] sm:$0xff] %v7561_v11  ;;  %v579_v11 = vrot.slane %v15314_v0, 4  ;;  %v581_v9 = vrot.slane %v15315_v1, 4  ;;  %v655_v12 = vadd.f32 %v586_v5, %v15317_v22  ;;  %v7641_v35 = vmul.f32 0.10936069, %v643_v24  ;;  %v15340_v24 = vld [vmem:[#allocation58_spill] sm:$0xff] }
  0x95   :  { %v654_v56 = vadd.f32 %v582_v46, %v15316_v55  ;;  %v672_v49 = vmul.f32 0.10936069, %v640_v28  ;;  %v668_v57 = vadd.f32 %v603_v15, %v15340_v24  ;;  %v7681_v15 = vadd.f32 %v15342_v62, %v15289_v59 }
  0x96   :  { %v580_v34 = vsel %vm556_vm0, %v578_v16, %v579_v11  ;;  %v583_v43 = vsel %vm556_vm0, %v581_v9, %v582_v46  ;;  %v638_v16 = vadd.f32 %v558_v23, %v15286_v7  ;;  %v639_v9 = vadd.f32 %v562_v58, %v15288_v29  ;;  %v15331_v58 = vld [vmem:[#allocation52_spill] sm:$0xff]  ;;  %v15335_v46 = vld [vmem:[#allocation61_spill] sm:$0xff] }
  0x97   :  { %v648_v23 = vadd.f32 %v573_v36, %v15310_v30  ;;  %v649_v29 = vadd.f32 %v577_v61, %v15311_v39  ;;  %v651_v54 = vadd.f32 %v580_v34, %v15313_v44  ;;  %v652_v42 = vadd.f32 %v579_v11, %v15314_v0  ;;  %v15336_v36 = vld [vmem:[#allocation49_spill] sm:$0xff] }
  0x98   :  { %v653_v21 = vadd.f32 %v583_v43, %v15315_v1  ;;  %v659_v61 = vadd.f32 %v592_v50, %v15331_v58  ;;  %v661_v34 = vadd.f32 %v595_v60, %v15333_v48  ;;  %v662_v11 = vadd.f32 %v594_v63, %v15334_v27  ;;  %v15337_v60 = vld [vmem:[#allocation64_spill] sm:$0xff] }
  0x99   :  { %v7633_v30 = vmul.f32 0.10936069, %v637_v52  ;;  %v670_v43 = vmul.f32 0.10936069, %v638_v16  ;;  %v663_v55 = vadd.f32 %v598_v26, %v15335_v46  ;;  %v7636_v5 = vmul.f32 0.10936069, %v639_v9 }
  0x9a   :  { %v664_v40 = vadd.f32 %v597_v53, %v15336_v36  ;;  %v665_v41 = vadd.f32 %v601_v3, %v15337_v60  ;;  %v7646_v63 = vmul.f32 0.10936069, %v645_v51  ;;  %v7648_v0 = vmul.f32 0.10936069, %v646_v18  ;;  %v15338_v26 = vld [vmem:[#allocation53_spill] sm:$0xff]  ;;  %v15339_v9 = vld [vmem:[#allocation66_spill] sm:$0xff] }
  0x9b   :  { %v666_v50 = vadd.f32 %v600_v4, %v15338_v26  ;;  %v7653_v52 = vmul.f32 0.10936069, %v648_v23  ;;  %v7655_v16 = vmul.f32 0.10936069, %v649_v29  ;;  %v7657_v53 = vmul.f32 0.10936069, %v650_v31 }
  0x9c   :  { %v667_v28 = vadd.f32 %v604_v47, %v15339_v9  ;;  %v7660_v17 = vmul.f32 0.10936069, %v651_v54  ;;  %v7662_v38 = vmul.f32 0.10936069, %v652_v42  ;;  %v7664_v3 = vmul.f32 0.10936069, %v653_v21 }
  0x9d   :  { %v686_v51 = vmul.f32 0.10936069, %v654_v56  ;;  %v7667_v18 = vmul.f32 0.10936069, %v655_v12  ;;  %v688_v4 = vmul.f32 0.10936069, %v656_v37 }
  0x9e   :  { %v690_v23 = vmul.f32 0.10936069, %v658_v45  ;;  %v7671_v29 = vmul.f32 0.10936069, %v659_v61  ;;  %v15341_v31 = vld [vmem:[#allocation12_spill] sm:$0xff]  ;;  %v734_v12 = vrot.slane %v7633_v30, 6 }
  0x9f   :  { %v7675_v47 = vadd.f32 %v15341_v31, %v15286_v7  ;;  %v692_v54 = vmul.f32 0.10936069, %v660_v33  ;;  %v7677_v42 = vmul.f32 0.10936069, %v661_v34  ;;  %v694_v21 = vmul.f32 0.10936069, %v662_v11 }
  0xa0   :  { %v7683_v56 = vmul.f32 0.10936069, %v663_v55  ;;  %v735_v37 = vrot.slane %v670_v43, 6  ;;  %v737_v25 = vrot.slane %v7636_v5, 6  ;;  %v738_v45 = vrot.slane %v672_v49, 6  ;;  %v15343_v11 = vld [vmem:[#allocation18_spill] sm:$0xff] }
  0xa1   :  { %v740_v7 = vrot.slane %v7638_v6, 6  ;;  %v741_v61 = vrot.slane %v674_v14, 6  ;;  %v696_v33 = vmul.f32 0.10936069, %v664_v40  ;;  %v7688_v34 = vmul.f32 0.10936069, %v665_v41 }
  0xa2   :  { %v698_v27 = vmul.f32 0.10936069, %v666_v50  ;;  %v7692_v59 = vadd.f32 %v15343_v11, %v15304_v8  ;;  %v7694_v55 = vmul.f32 0.10936069, %v667_v28  ;;  %v700_v36 = vmul.f32 0.10936069, %v668_v57 }
  0xa3   :  { %v743_v30 = vrot.slane %v7641_v35, 6  ;;  %v15344_v43 = vld [vmem:[#allocation22_spill] sm:$0xff]  ;;  %v736_v49 = vsel %vm733_vm1, %v734_v12, %v735_v37  ;;  %v744_v6 = vrot.slane %v7643_v32, 6  ;;  %v746_v40 = vrot.slane %v7646_v63, 6 }
  0xa4   :  { %v7699_v5 = vadd.f32 %v15344_v43, %v15306_v10  ;;  %v747_v14 = vrot.slane %v7648_v0, 6  ;;  %v739_v8 = vsel %vm733_vm1, %v737_v25, %v738_v45  ;;  %v742_v41 = vsel %vm733_vm1, %v740_v7, %v741_v61 }
  0xa5   :  { %v749_v26 = vrot.slane %v7650_v13, 6  ;;  %v750_v35 = vrot.slane %v7653_v52, 6  ;;  %v752_v50 = vrot.slane %v7655_v16, 6  ;;  %v753_v10 = vrot.slane %v7657_v53, 6 }
  0xa6   :  { %v755_v28 = vrot.slane %v7660_v17, 6  ;;  %v756_v32 = vrot.slane %v7662_v38, 6  ;;  %v758_v63 = vrot.slane %v7664_v3, 6  ;;  %v759_v24 = vrot.slane %v686_v51, 6 }
  0xa7   :  { %v761_v0 = vrot.slane %v7667_v18, 6  ;;  %v762_v57 = vrot.slane %v688_v4, 6  ;;  %v764_v37 = vrot.slane %v7669_v2, 6  ;;  %v765_v45 = vrot.slane %v690_v23, 6 }
  0xa8   :  { %v767_v13 = vrot.slane %v7671_v29, 6  ;;  %v768_v52 = vrot.slane %v692_v54, 6  ;;  %v770_v16 = vrot.slane %v7677_v42, 6  ;;  %v771_v61 = vrot.slane %v694_v21, 6 }
  0xa9   :  { %v773_v53 = vrot.slane %v7683_v56, 6  ;;  %v774_v17 = vrot.slane %v696_v33, 6  ;;  %v745_v38 = vsel %vm733_vm1, %v743_v30, %v744_v6  ;;  %v748_v3 = vsel %vm733_vm1, %v746_v40, %v747_v14  ;;  %v15345_v6 = vld [vmem:[#allocation47_spill] sm:$0xff] }
  0xaa   :  { %v776_v51 = vrot.slane %v7688_v34, 6  ;;  %v777_v18 = vrot.slane %v698_v27, 6  ;;  %v751_v4 = vsel %vm733_vm1, %v749_v26, %v750_v35  ;;  %v754_v2 = vsel %vm733_vm1, %v752_v50, %v753_v10 }
  0xab   :  { %v780_v29 = vrot.slane %v700_v36, 6  ;;  %v757_v54 = vsel %vm733_vm1, %v755_v28, %v756_v32  ;;  %v760_v42 = vsel %vm733_vm1, %v758_v63, %v759_v24  ;;  %v763_v21 = vsel %vm733_vm1, %v761_v0, %v762_v57  ;;  %v15346_v36 = vld [vmem:[#allocation55_spill] sm:$0xff]  ;;  %v15347_v32 = vld [vmem:[#allocation57_spill] sm:$0xff]  ;;  %v15348_v57 = vld [vmem:[#allocation60_spill] sm:$0xff] }
  0xac   :  { %v766_v56 = vsel %vm733_vm1, %v764_v37, %v765_v45  ;;  %v769_v33 = vsel %vm733_vm1, %v767_v13, %v768_v52  ;;  %v772_v34 = vsel %vm733_vm1, %v770_v16, %v771_v61  ;;  %v775_v27 = vsel %vm733_vm1, %v773_v53, %v774_v17  ;;  %v15351_v61 = vld [vmem:[#allocation63_spill] sm:$0xff] }
  0xad   :  { %v7733_v14 = vadd.f32 %v734_v12, %v15345_v6  ;;  %v778_v35 = vsel %vm733_vm1, %v776_v51, %v777_v18  ;;  %v7737_v10 = vadd.f32 %v736_v49, %v15346_v36  ;;  %v7740_v24 = vadd.f32 %v737_v25, %v15347_v32  ;;  %v15352_v12 = vld [vmem:[#allocation67_spill] sm:$0xff]  ;;  %v15353_v18 = vld [vmem:[#allocation72_spill] sm:$0xff]  ;;  %v15354_v36 = vld [vmem:[#allocation74_spill] sm:$0xff] }
  0xae   :  { %v7743_v23 = vadd.f32 %v739_v8, %v15348_v57  ;;  %v15350_v45 = vrot.slane %v7694_v55, 6  ;;  %v7751_v17 = vadd.f32 %v740_v7, %v15351_v61  ;;  %v7754_v6 = vadd.f32 %v742_v41, %v15352_v12  ;;  %v15355_v32 = vld [vmem:[#allocation75_spill] sm:$0xff]  ;;  %v15356_v57 = vld [vmem:[#allocation28_spill] sm:$0xff]  ;;  %v15359_v41 = vld [vmem:[#allocation69_spill] sm:$0xff] }
  0xaf   :  { %v7757_v49 = vadd.f32 %v743_v30, %v15353_v18  ;;  %v7760_v25 = vadd.f32 %v745_v38, %v15354_v36  ;;  %v7763_v8 = vadd.f32 %v746_v40, %v15355_v32  ;;  %v15358_v7 = vld [vmem:[#allocation68_spill] sm:$0xff]  ;;  %v7775_v12 = vadd.f32 %v752_v50, %v15359_v41  ;;  %v15360_v30 = vld [vmem:[#allocation70_spill] sm:$0xff]  ;;  %v15361_v38 = vld [vmem:[#allocation71_spill] sm:$0xff] }
  0xb0   :  { %15349 = vst [vmem:[#allocation19_spill] sm:$0xff] %v7743_v23  ;;  %v7748_v52 = vsel %vm733_vm1, %v15350_v45, %v780_v29  ;;  %v7766_v23 = vadd.f32 %v748_v3, %v15356_v57  ;;  %v15357_v29 = vld [vmem:[#allocation32_spill] sm:$0xff]  ;;  %v7772_v61 = vadd.f32 %v751_v4, %v15358_v7  ;;  %v7778_v18 = vadd.f32 %v754_v2, %v15360_v30  ;;  %v15363_v3 = vld [vmem:[#allocation77_spill] sm:$0xff]  ;;  %v15367_v4 = vld [vmem:[#allocation79_spill] sm:$0xff] }
  0xb1   :  { %v7769_v45 = vadd.f32 %v749_v26, %v15357_v29  ;;  %v7781_v36 = vadd.f32 %v755_v28, %v15361_v38  ;;  %v15362_v40 = vld [vmem:[#allocation76_spill] sm:$0xff]  ;;  %v7787_v57 = vadd.f32 %v758_v63, %v15363_v3  ;;  %v15365_v26 = vld [vmem:[#allocation78_spill] sm:$0xff]  ;;  %v7793_v7 = vadd.f32 %v761_v0, %v15367_v4  ;;  %v15371_v2 = vld [vmem:[#allocation81_spill] sm:$0xff] }
  0xb2   :  { %v7784_v32 = vadd.f32 %v757_v54, %v15362_v40  ;;  %v7790_v29 = vadd.f32 %v760_v42, %v15365_v26  ;;  %v15369_v50 = vld [vmem:[#allocation80_spill] sm:$0xff]  ;;  %v7799_v30 = vadd.f32 %v764_v37, %v15371_v2  ;;  %v15373_v28 = vld [vmem:[#allocation82_spill] sm:$0xff]  ;;  %v15375_v54 = vld [vmem:[#allocation83_spill] sm:$0xff] }
  0xb3   :  { %15364 = vst [vmem:[#allocation10_spill] sm:$0xff] %v7787_v57  ;;  %v7796_v41 = vadd.f32 %v763_v21, %v15369_v50  ;;  %v7802_v38 = vadd.f32 %v766_v56, %v15373_v28  ;;  %v7805_v40 = vadd.f32 %v767_v13, %v15375_v54  ;;  %v15377_v63 = vld [vmem:[#allocation13_spill] sm:$0xff]  ;;  %v15379_v42 = vld [vmem:[#allocation8_spill] sm:$0xff] }
  0xb4   :  { %15366 = vst [vmem:[#allocation20_spill] sm:$0xff] %v7790_v29  ;;  %v7808_v3 = vadd.f32 %v769_v33, %v15377_v63  ;;  %v7811_v26 = vadd.f32 %v770_v16, %v15379_v42  ;;  %v15381_v0 = vld [vmem:[#allocation16_spill] sm:$0xff]  ;;  %v15383_v21 = vld [vmem:[#allocation9_spill] sm:$0xff] }
  0xb5   :  { %15368 = vst [vmem:[#allocation11_spill] sm:$0xff] %v7793_v7  ;;  %v7814_v4 = vadd.f32 %v772_v34, %v15381_v0  ;;  %v7817_v50 = vadd.f32 %v773_v53, %v15383_v21  ;;  %v15385_v37 = vld [vmem:[#allocation36_spill] sm:$0xff]  ;;  %v15387_v56 = vld [vmem:[#allocation73_spill] sm:$0xff]  ;;  %v857_v21 = vrot.slane %v15309_v19, 2  ;;  %v877_v19 = vrot.slane %v15339_v9, 2 }
  0xb6   :  { %15370 = vst [vmem:[#allocation25_spill] sm:$0xff] %v7796_v41  ;;  %v7820_v2 = vadd.f32 %v775_v27, %v15385_v37  ;;  %v7823_v28 = vadd.f32 %v776_v51, %v15387_v56  ;;  %v15389_v13 = vld [vmem:[#allocation44_spill] sm:$0xff]  ;;  %v6534_v53 = vld [vmem:[%s14508_s1 + $0x10] sm:$0xff]  ;;  %v859_v37 = vrot.slane %v15311_v39, 2  ;;  %v861_v56 = vrot.slane %v15313_v44, 2 }
  0xb7   :  { %15372 = vst [vmem:[#allocation14_spill] sm:$0xff] %v7799_v30  ;;  %v7826_v54 = vadd.f32 %v778_v35, %v15389_v13  ;;  %v6533_v16 = vld [vmem:[%s14508_s1] sm:$0xff]  ;;  %v849_v34 = vrot.slane %v6534_v53, 2  ;;  %v6536_v35 = vld [vmem:[%s14508_s1 + $0x30] sm:$0xff]  ;;  %v863_v13 = vrot.slane %v15315_v1, 2 }
  0xb8   :  { %15374 = vst [vmem:[#allocation29_spill] sm:$0xff] %v7802_v38  ;;  %v847_v33 = vrot.slane %v6533_v16, 2  ;;  %v6535_v27 = vld [vmem:[%s14508_s1 + $0x20] sm:$0xff]  ;;  %v853_v63 = vrot.slane %v6536_v35, 2  ;;  %v15401_v30 = vld [vmem:[#allocation62_spill] sm:$0xff]  ;;  %v15402_v41 = vld [vmem:[#allocation65_spill] sm:$0xff] }
  0xb9   :  { %15376 = vst [vmem:[#allocation17_spill] sm:$0xff] %v7805_v40  ;;  %v851_v51 = vrot.slane %v6535_v27, 2  ;;  %v6537_v42 = vld [vmem:[%s14508_s1 + $0x40] sm:$0xff]  ;;  %v850_v1 = vsel %vm846_vm2, %v849_v34, %v15342_v62  ;;  %v15399_v40 = vld [vmem:[#allocation54_spill] sm:$0xff] }
  0xba   :  { %15378 = vst [vmem:[#allocation33_spill] sm:$0xff] %v7808_v3  ;;  %v855_v0 = vrot.slane %v6537_v42, 2  ;;  %v848_v39 = vsel %vm846_vm2, %v847_v33, %v15341_v31  ;;  %v15391_v44 = vld [vmem:[#allocation24_spill] sm:$0xff]  ;;  %v15394_v3 = vld [vmem:[#allocation35_spill] sm:$0xff]  ;;  %v897_v7 = vadd.f32 %v6534_v53, %v850_v1 }
  0xbb   :  { %15380 = vst [vmem:[#allocation21_spill] sm:$0xff] %v7811_v26  ;;  %v875_v26 = vrot.slane %v15337_v60, 2  ;;  %v15393_v60 = vld [vmem:[#allocation31_spill] sm:$0xff]  ;;  %v862_v31 = vsel %vm846_vm2, %v861_v56, %v15394_v3 }
  0xbc   :  { %15382 = vst [vmem:[#allocation37_spill] sm:$0xff] %v7814_v4  ;;  %v873_v4 = vrot.slane %v15335_v46, 2  ;;  %v860_v9 = vsel %vm846_vm2, %v859_v37, %v15393_v60  ;;  %v15395_v33 = vld [vmem:[#allocation39_spill] sm:$0xff] }
  0xbd   :  { %15384 = vst [vmem:[#allocation23_spill] sm:$0xff] %v7817_v50  ;;  %v871_v50 = vrot.slane %v15333_v48, 2  ;;  %v15392_v48 = vld [vmem:[#allocation27_spill] sm:$0xff]  ;;  %v864_v62 = vsel %vm846_vm2, %v863_v13, %v15395_v33  ;;  %v876_v56 = vsel %vm846_vm2, %v875_v26, %v15401_v30  ;;  %v7886_v13 = vsel %vm846_vm2, %v877_v19, %v15402_v41 }
  0xbe   :  { %15386 = vst [vmem:[#allocation41_spill] sm:$0xff] %v7820_v2  ;;  %v869_v2 = vrot.slane %v15331_v58, 2  ;;  %v856_v58 = vsel %vm846_vm2, %v855_v0, %v15391_v44  ;;  %v858_v46 = vsel %vm846_vm2, %v857_v21, %v15392_v48  ;;  %v15396_v34 = vld [vmem:[#allocation43_spill] sm:$0xff] }
  0xbf   :  { %15388 = vst [vmem:[#allocation26_spill] sm:$0xff] %v7823_v28  ;;  %v867_v28 = vrot.slane %v15319_v20, 2  ;;  %v854_v20 = vsel %vm846_vm2, %v853_v63, %v15344_v43  ;;  %v15398_v63 = vld [vmem:[#allocation50_spill] sm:$0xff]  ;;  %v872_v21 = vsel %vm846_vm2, %v871_v50, %v15399_v40  ;;  %v15400_v38 = vld [vmem:[#allocation59_spill] sm:$0xff]  ;;  %v903_v57 = vadd.f32 %v6537_v42, %v856_v58 }
  0xc0   :  { %15390 = vst [vmem:[#allocation45_spill] sm:$0xff] %v7826_v54  ;;  %v865_v54 = vrot.slane %v15317_v22, 2  ;;  %v852_v22 = vsel %vm846_vm2, %v851_v51, %v15343_v11  ;;  %v15397_v51 = vld [vmem:[#allocation46_spill] sm:$0xff]  ;;  %v870_v0 = vsel %vm846_vm2, %v869_v2, %v15398_v63  ;;  %v874_v37 = vsel %vm846_vm2, %v873_v4, %v15400_v38  ;;  %v6538_v2 = vld [vmem:[%s14508_s1 + $0x48] sm:$0xff]  ;;  %v6541_v53 = vld [vmem:[%s14508_s1 + $0x60] sm:$0xff] }
  0xc1   :  { %v868_v43 = vsel %vm846_vm2, %v867_v28, %v15397_v51  ;;  %v899_v29 = vadd.f32 %v6535_v27, %v852_v22  ;;  %v901_v28 = vadd.f32 %v6536_v35, %v854_v20  ;;  %v904_v50 = vadd.f32 %v6538_v2, %v15391_v44  ;;  %v6539_v4 = vld [vmem:[%s14508_s1 + $0x50] sm:$0xff]  ;;  %v6540_v19 = vld [vmem:[%s14508_s1 + $0x58] sm:$0xff]  ;;  %v6542_v35 = vld [vmem:[%s14508_s1 + $0x68] sm:$0xff] }
  0xc2   :  { %v866_v11 = vsel %vm846_vm2, %v865_v54, %v15396_v34  ;;  %v895_v54 = vadd.f32 %v6533_v16, %v848_v39  ;;  %v905_v26 = vadd.f32 %v6539_v4, %v858_v46  ;;  %v906_v16 = vadd.f32 %v6540_v19, %v15392_v48  ;;  %v6543_v39 = vld [vmem:[%s14508_s1 + $0x70] sm:$0xff]  ;;  %v6544_v22 = vld [vmem:[%s14508_s1 + $0x78] sm:$0xff]  ;;  %v6545_v44 = vld [vmem:[%s14508_s1 + $0x80] sm:$0xff] }
  0xc3   :  { %v907_v27 = vadd.f32 %v6541_v53, %v860_v9  ;;  %v908_v42 = vadd.f32 %v6542_v35, %v15393_v60  ;;  %v909_v1 = vadd.f32 %v6543_v39, %v862_v31  ;;  %v910_v20 = vadd.f32 %v6544_v22, %v15394_v3  ;;  %v6546_v48 = vld [vmem:[%s14508_s1 + $0x88] sm:$0xff]  ;;  %v6547_v60 = vld [vmem:[%s14508_s1 + $0x90] sm:$0xff]  ;;  %v6548_v3 = vld [vmem:[%s14508_s1 + $0x98] sm:$0xff] }
  0xc4   :  { %v911_v58 = vadd.f32 %v6545_v44, %v864_v62  ;;  %v912_v46 = vadd.f32 %v6546_v48, %v15395_v33  ;;  %v913_v9 = vadd.f32 %v6547_v60, %v866_v11  ;;  %v914_v31 = vadd.f32 %v6548_v3, %v15396_v34  ;;  %v6549_v62 = vld [vmem:[%s14508_s1 + $0xa0] sm:$0xff]  ;;  %v6550_v33 = vld [vmem:[%s14508_s1 + $0xa8] sm:$0xff]  ;;  %v6551_v11 = vld [vmem:[%s14508_s1 + $0xb0] sm:$0xff] }
  0xc5   :  { %v915_v2 = vadd.f32 %v6549_v62, %v868_v43  ;;  %v916_v4 = vadd.f32 %v6550_v33, %v15397_v51  ;;  %v917_v19 = vadd.f32 %v6551_v11, %v870_v0  ;;  %v6552_v34 = vld [vmem:[%s14508_s1 + $0xb8] sm:$0xff]  ;;  %v6553_v43 = vld [vmem:[%s14508_s1 + $0xc0] sm:$0xff]  ;;  %v7944_v39 = vmul.f32 0.21300554, %v895_v54  ;;  %v6554_v0 = vld [vmem:[%s14508_s1 + $0xc8] sm:$0xff] }
  0xc6   :  { %v918_v53 = vadd.f32 %v6552_v34, %v15398_v63  ;;  %v919_v35 = vadd.f32 %v6553_v43, %v872_v21  ;;  %v928_v51 = vmul.f32 0.21300554, %v7675_v47  ;;  %v7947_v22 = vmul.f32 0.21300554, %v897_v7  ;;  %v6555_v21 = vld [vmem:[%s14508_s1 + $0xd0] sm:$0xff] }
  0xc7   :  { %v920_v44 = vadd.f32 %v6554_v0, %v15399_v40  ;;  %v930_v48 = vmul.f32 0.21300554, %v7681_v15  ;;  %v7954_v63 = vmul.f32 0.21300554, %v899_v29  ;;  %v932_v60 = vmul.f32 0.21300554, %v7692_v59 }
  0xc8   :  { %v921_v54 = vadd.f32 %v6555_v21, %v874_v37  ;;  %v7960_v47 = vmul.f32 0.21300554, %v901_v28  ;;  %v7963_v7 = vmul.f32 0.21300554, %v7699_v5  ;;  %v7965_v3 = vmul.f32 0.21300554, %v903_v57 }
  0xc9   :  { %v6556_v15 = vld [vmem:[%s14508_s1 + $0xd8] sm:$0xff]  ;;  %v7971_v40 = vmul.f32 0.21300554, %v904_v50  ;;  %v7973_v59 = vmul.f32 0.21300554, %v905_v26  ;;  %v6557_v37 = vld [vmem:[%s14508_s1 + $0xe0] sm:$0xff] }
  0xca   :  { %v922_v29 = vadd.f32 %v6556_v15, %v15400_v38  ;;  %v7975_v62 = vmul.f32 0.21300554, %v906_v16  ;;  %v923_v5 = vadd.f32 %v6557_v37, %v876_v56  ;;  %v7980_v28 = vmul.f32 0.21300554, %v907_v27  ;;  %v6558_v38 = vld [vmem:[%s14508_s1 + $0xe8] sm:$0xff]  ;;  %v6559_v56 = vld [vmem:[%s14508_s1 + $0xf0] sm:$0xff] }
  0xcb   :  { %v7982_v57 = vmul.f32 0.21300554, %v908_v42  ;;  %v7984_v33 = vmul.f32 0.21300554, %v909_v1  ;;  %v924_v50 = vadd.f32 %v6558_v38, %v15401_v30  ;;  %v7990_v26 = vmul.f32 0.21300554, %v910_v20 }
  0xcc   :  { %v7992_v16 = vmul.f32 0.21300554, %v911_v58  ;;  %v7994_v11 = vmul.f32 0.21300554, %v912_v46  ;;  %v925_v27 = vadd.f32 %v6559_v56, %v7886_v13  ;;  %v8000_v42 = vmul.f32 0.21300554, %v913_v9 }
  0xcd   :  { %v946_v1 = vmul.f32 0.21300554, %v914_v31  ;;  %v8002_v34 = vmul.f32 0.21300554, %v915_v2  ;;  %v6560_v30 = vld [vmem:[%s14508_s1 + $0xf8] sm:$0xff]  ;;  %v992_v13 = vrot.slane %v7944_v39, 7 }
  0xce   :  { %v926_v20 = vadd.f32 %v6560_v30, %v15402_v41  ;;  %v948_v58 = vmul.f32 0.21300554, %v916_v4  ;;  %v8008_v46 = vmul.f32 0.21300554, %v917_v19  ;;  %v950_v43 = vmul.f32 0.21300554, %v918_v53 }
  0xcf   :  { %v8010_v0 = vmul.f32 0.21300554, %v919_v35  ;;  %v993_v9 = vrot.slane %v928_v51, 7  ;;  %v995_v31 = vrot.slane %v7947_v22, 7  ;;  %v996_v2 = vrot.slane %v930_v48, 7  ;;  %v15403_v37 = vld [vmem:[#allocation51_spill] sm:$0xff] }
  0xd0   :  { %v998_v21 = vrot.slane %v7954_v63, 7  ;;  %v999_v15 = vrot.slane %v932_v60, 7  ;;  %v15404_v38 = vrot.slane %v7694_v55, 6  ;;  %v952_v4 = vmul.f32 0.21300554, %v920_v44  ;;  %v15405_v35 = vld [vmem:[#allocation40_spill] sm:$0xff] }
  0xd1   :  { %v8020_v19 = vmul.f32 0.21300554, %v921_v54  ;;  %v954_v53 = vmul.f32 0.21300554, %v922_v29  ;;  %v8024_v56 = vadd.f32 %v7748_v52, %v15405_v35  ;;  %v8026_v39 = vmul.f32 0.21300554, %v923_v5 }
  0xd2   :  { %v8018_v41 = vadd.f32 %v15404_v38, %v15403_v37  ;;  %v956_v51 = vmul.f32 0.21300554, %v924_v50  ;;  %v8028_v22 = vmul.f32 0.21300554, %v925_v27  ;;  %v958_v48 = vmul.f32 0.21300554, %v926_v20 }
  0xd3   :  { %v994_v63 = vsel %vm991_vm3, %v992_v13, %v993_v9  ;;  %v1001_v55 = vrot.slane %v7960_v47, 7  ;;  %v1002_v60 = vrot.slane %v7963_v7, 7  ;;  %v997_v44 = vsel %vm991_vm3, %v995_v31, %v996_v2 }
  0xd4   :  { %v1000_v54 = vsel %vm991_vm3, %v998_v21, %v999_v15  ;;  %v1004_v29 = vrot.slane %v7965_v3, 7  ;;  %v1005_v52 = vrot.slane %v7971_v40, 7  ;;  %v1007_v5 = vrot.slane %v7973_v59, 7 }
  0xd5   :  { %v1008_v50 = vrot.slane %v7975_v62, 7  ;;  %v1010_v27 = vrot.slane %v7980_v28, 7  ;;  %v1011_v30 = vrot.slane %v7982_v57, 7  ;;  %v1013_v47 = vrot.slane %v7984_v33, 7 }
  0xd6   :  { %v1014_v7 = vrot.slane %v7990_v26, 7  ;;  %v1016_v20 = vrot.slane %v7992_v16, 7  ;;  %v1017_v9 = vrot.slane %v7994_v11, 7  ;;  %v1019_v3 = vrot.slane %v8000_v42, 7 }
  0xd7   :  { %v1020_v2 = vrot.slane %v946_v1, 7  ;;  %v1022_v40 = vrot.slane %v8002_v34, 7  ;;  %v1023_v59 = vrot.slane %v948_v58, 7  ;;  %v1025_v62 = vrot.slane %v8008_v46, 7 }
  0xd8   :  { %v1026_v15 = vrot.slane %v950_v43, 7  ;;  %v1028_v28 = vrot.slane %v8010_v0, 7  ;;  %v1029_v57 = vrot.slane %v952_v4, 7  ;;  %v1031_v33 = vrot.slane %v8020_v19, 7 }
  0xd9   :  { %v1032_v37 = vrot.slane %v954_v53, 7  ;;  %v1034_v26 = vrot.slane %v8026_v39, 7  ;;  %v1035_v16 = vrot.slane %v956_v51, 7  ;;  %v1003_v11 = vsel %vm991_vm3, %v1001_v55, %v1002_v60 }
  0xda   :  { %v1006_v42 = vsel %vm991_vm3, %v1004_v29, %v1005_v52  ;;  %v1037_v1 = vrot.slane %v8028_v22, 7  ;;  %v1038_v34 = vrot.slane %v958_v48, 7  ;;  %v1009_v58 = vsel %vm991_vm3, %v1007_v5, %v1008_v50  ;;  %v15406_v52 = vld [vmem:[#allocation19_spill] sm:$0xff] }
  0xdb   :  { %v1012_v46 = vsel %vm991_vm3, %v1010_v27, %v1011_v30  ;;  %v1015_v43 = vsel %vm991_vm3, %v1013_v47, %v1014_v7  ;;  %v1018_v0 = vsel %vm991_vm3, %v1016_v20, %v1017_v9  ;;  %v1021_v38 = vsel %vm991_vm3, %v1019_v3, %v1020_v2 }
  0xdc   :  { %v1024_v4 = vsel %vm991_vm3, %v1022_v40, %v1023_v59  ;;  %v1027_v19 = vsel %vm991_vm3, %v1025_v62, %v1026_v15  ;;  %v1030_v53 = vsel %vm991_vm3, %v1028_v28, %v1029_v57  ;;  %v1033_v35 = vsel %vm991_vm3, %v1031_v33, %v1032_v37  ;;  %v15421_v59 = vld [vmem:[#allocation23_spill] sm:$0xff]  ;;  %v15425_v37 = vld [vmem:[#allocation26_spill] sm:$0xff] }
  0xdd   :  { %v1036_v39 = vsel %vm991_vm3, %v1034_v26, %v1035_v16  ;;  %v1072_v51 = vadd.f32 %v992_v13, %v7733_v14  ;;  %v1073_v22 = vadd.f32 %v994_v63, %v7737_v10  ;;  %v1039_v48 = vsel %vm991_vm3, %v1037_v1, %v1038_v34 }
  0xde   :  { %v1074_v60 = vadd.f32 %v995_v31, %v7740_v24  ;;  %v8069_v50 = vadd.f32 %v997_v44, %v15406_v52  ;;  %v8072_v30 = vadd.f32 %v998_v21, %v7751_v17  ;;  %v8075_v7 = vadd.f32 %v1000_v54, %v7754_v6 }
  0xdf   :  { %v8078_v9 = vadd.f32 %v1001_v55, %v7757_v49  ;;  %v8081_v14 = vadd.f32 %v1003_v11, %v7760_v25  ;;  %v8084_v10 = vadd.f32 %v1004_v29, %v7763_v8  ;;  %v8087_v24 = vadd.f32 %v1006_v42, %v7766_v23  ;;  %v15409_v23 = vld [vmem:[#allocation10_spill] sm:$0xff]  ;;  %v15426_v11 = vld [vmem:[#allocation45_spill] sm:$0xff] }
  0xe0   :  { %v8090_v13 = vadd.f32 %v1007_v5, %v7769_v45  ;;  %v8093_v17 = vadd.f32 %v1009_v58, %v7772_v61  ;;  %v8096_v6 = vadd.f32 %v1010_v27, %v7775_v12  ;;  %v8099_v49 = vadd.f32 %v1012_v46, %v7778_v18  ;;  %v15410_v45 = vld [vmem:[#allocation20_spill] sm:$0xff]  ;;  %v15412_v61 = vld [vmem:[#allocation11_spill] sm:$0xff]  ;;  %v15413_v12 = vld [vmem:[#allocation25_spill] sm:$0xff] }
  0xe1   :  { %v8102_v25 = vadd.f32 %v1013_v47, %v7781_v36  ;;  %v8105_v8 = vadd.f32 %v1015_v43, %v7784_v32  ;;  %v8108_v31 = vadd.f32 %v1016_v20, %v15409_v23  ;;  %v8111_v21 = vadd.f32 %v1018_v0, %v15410_v45  ;;  %v15414_v18 = vld [vmem:[#allocation14_spill] sm:$0xff]  ;;  %v15415_v36 = vld [vmem:[#allocation29_spill] sm:$0xff] }
  0xe2   :  { %v8114_v63 = vadd.f32 %v1019_v3, %v15412_v61  ;;  %v8117_v55 = vadd.f32 %v1021_v38, %v15413_v12  ;;  %v8120_v44 = vadd.f32 %v1022_v40, %v15414_v18  ;;  %v8123_v54 = vadd.f32 %v1024_v4, %v15415_v36  ;;  %v15416_v32 = vld [vmem:[#allocation17_spill] sm:$0xff] }
  0xe3   :  { %15407 = vst [vmem:[#allocation30_spill] sm:$0xff] %v8102_v25  ;;  %v8126_v29 = vadd.f32 %v1025_v62, %v15416_v32  ;;  %v15417_v5 = vld [vmem:[#allocation33_spill] sm:$0xff]  ;;  %v8138_v15 = vadd.f32 %v1031_v33, %v15421_v59  ;;  %v1100_v16 = vadd.f32 %v1034_v26, %v15425_v37  ;;  %v1101_v62 = vadd.f32 %v1036_v39, %v15426_v11 }
  0xe4   :  { %15408 = vst [vmem:[#allocation48_spill] sm:$0xff] %v8105_v8  ;;  %v8129_v27 = vadd.f32 %v1027_v19, %v15417_v5  ;;  %v15418_v47 = vld [vmem:[#allocation21_spill] sm:$0xff]  ;;  %v1102_v42 = vadd.f32 %v1037_v1, %v8018_v41  ;;  %v1103_v34 = vadd.f32 %v1039_v48, %v8024_v56  ;;  %v1105_v58 = vmul.f32 0.26601171, %v8093_v17 }
  0xe5   :  { %15411 = vst [vmem:[#allocation34_spill] sm:$0xff] %v8111_v21  ;;  %v8132_v20 = vadd.f32 %v1028_v28, %v15418_v47  ;;  %v15419_v3 = vld [vmem:[#allocation37_spill] sm:$0xff]  ;;  %v1104_v28 = vmul.f32 0.26601171, %v8090_v13  ;;  %v1106_v46 = vmul.f32 0.26601171, %v8096_v6  ;;  %v1116_v43 = vadd.f32 %v8120_v44, %v1072_v51 }
  0xe6   :  { %v8135_v2 = vadd.f32 %v1030_v53, %v15419_v3  ;;  %15422 = vst [vmem:[#allocation38_spill] sm:$0xff] %v8138_v15  ;;  %v15423_v40 = vld [vmem:[#allocation41_spill] sm:$0xff]  ;;  %v1107_v33 = vmul.f32 0.26601171, %v8099_v49  ;;  %v1108_v0 = vmul.f32 0.26601171, %v8102_v25  ;;  %v1117_v38 = vadd.f32 %v8123_v54, %v1073_v22 }
  0xe7   :  { %v8141_v57 = vadd.f32 %v1033_v35, %v15423_v40  ;;  %v1109_v26 = vmul.f32 0.26601171, %v8105_v8  ;;  %v1118_v41 = vadd.f32 %v8126_v29, %v1074_v60  ;;  %v1110_v56 = vmul.f32 0.26601171, %v8108_v31 }
  0xe8   :  { %15420 = vst [vmem:[#allocation52_spill] sm:$0xff] %v8135_v2  ;;  %v1111_v1 = vmul.f32 0.26601171, %v8111_v21  ;;  %v1119_v4 = vadd.f32 %v8129_v27, %v8069_v50  ;;  %v1120_v19 = vadd.f32 %v8132_v20, %v8072_v30  ;;  %v1112_v53 = vmul.f32 0.26601171, %v8114_v63 }
  0xe9   :  { %15424 = vst [vmem:[#allocation56_spill] sm:$0xff] %v8141_v57  ;;  %v1113_v35 = vmul.f32 0.26601171, %v8117_v55  ;;  %v1121_v39 = vadd.f32 %v8135_v2, %v8075_v7  ;;  %v1122_v51 = vadd.f32 %v8138_v15, %v8078_v9  ;;  %v1123_v22 = vadd.f32 %v8141_v57, %v8081_v14 }
  0xea   :  { %v1124_v48 = vadd.f32 %v1100_v16, %v8084_v10  ;;  %v1125_v52 = vadd.f32 %v1101_v62, %v8087_v24  ;;  %v1128_v23 = vmul.f32 0.0010283801, %v1116_v43  ;;  %v1126_v45 = vadd.f32 %v1102_v42, %v8090_v13 }
  0xeb   :  { %v1127_v61 = vadd.f32 %v1103_v34, %v8093_v17  ;;  %v1129_v12 = vmul.f32 0.0010283801, %v1117_v38  ;;  %v1130_v18 = vmul.f32 0.0010283801, %v1118_v41  ;;  %v1114_v36 = vmul.f32 0.26601171, %v8120_v44 }
  0xec   :  { %v1131_v32 = vmul.f32 0.0010283801, %v1119_v4  ;;  %v1132_v5 = vmul.f32 0.0010283801, %v1120_v19  ;;  %v1115_v47 = vmul.f32 0.26601171, %v8123_v54  ;;  %v1152_v40 = vadd.f32 %v8114_v63, %v1074_v60 }
  0xed   :  { %v1133_v3 = vmul.f32 0.0010283801, %v1121_v39  ;;  %v1134_v59 = vmul.f32 0.0010283801, %v1122_v51  ;;  %v1135_v37 = vmul.f32 0.0010283801, %v1123_v22  ;;  %v1140_v43 = vadd.f32 %v1128_v23, %v1104_v28 }
  0xee   :  { %v1136_v11 = vmul.f32 0.0010283801, %v1124_v48  ;;  %v1137_v8 = vmul.f32 0.0010283801, %v1125_v52  ;;  %v1138_v25 = vmul.f32 0.0010283801, %v1126_v45  ;;  %v1141_v21 = vadd.f32 %v1129_v12, %v1105_v58 }
  0xef   :  { %v1139_v42 = vmul.f32 0.0010283801, %v1127_v61  ;;  %v1142_v34 = vadd.f32 %v1130_v18, %v1106_v46  ;;  %v1143_v38 = vadd.f32 %v1131_v32, %v1107_v33  ;;  %v1144_v41 = vadd.f32 %v1132_v5, %v1108_v0 }
  0xf0   :  { %v1153_v4 = vadd.f32 %v8117_v55, %v8069_v50  ;;  %v1154_v19 = vadd.f32 %v8120_v44, %v8072_v30  ;;  %v1145_v39 = vadd.f32 %v1133_v3, %v1109_v26  ;;  %v1146_v51 = vadd.f32 %v1134_v59, %v1110_v56 }
  0xf1   :  { %v1155_v60 = vadd.f32 %v8123_v54, %v8075_v7  ;;  %v1156_v28 = vadd.f32 %v8126_v29, %v8078_v9  ;;  %v1147_v22 = vadd.f32 %v1135_v37, %v1111_v1  ;;  %v1148_v48 = vadd.f32 %v1136_v11, %v1112_v53 }
  0xf2   :  { %v1157_v58 = vadd.f32 %v8129_v27, %v8081_v14  ;;  %v1158_v46 = vadd.f32 %v8132_v20, %v8084_v10  ;;  %v1159_v50 = vadd.f32 %v8135_v2, %v8087_v24  ;;  %v1160_v33 = vadd.f32 %v8138_v15, %v8090_v13 }
  0xf3   :  { %v1161_v0 = vadd.f32 %v8141_v57, %v8093_v17  ;;  %v1164_v26 = vmul.f32 0.007598758, %v1152_v40  ;;  %v1162_v56 = vadd.f32 %v1100_v16, %v8096_v6  ;;  %v1163_v1 = vadd.f32 %v1101_v62, %v8099_v49 }
  0xf4   :  { %v1165_v53 = vmul.f32 0.007598758, %v1153_v4  ;;  %v1166_v52 = vmul.f32 0.007598758, %v1154_v19  ;;  %v1149_v23 = vadd.f32 %v1137_v8, %v1113_v35  ;;  %v1150_v45 = vadd.f32 %v1138_v25, %v1114_v36  ;;  %v15427_v25 = vld [vmem:[#allocation34_spill] sm:$0xff] }
  0xf5   :  { %v1167_v61 = vmul.f32 0.007598758, %v1155_v60  ;;  %v1168_v12 = vmul.f32 0.007598758, %v1156_v28  ;;  %v1151_v18 = vadd.f32 %v1139_v42, %v1115_v47  ;;  %v1169_v32 = vmul.f32 0.007598758, %v1157_v58 }
  0xf6   :  { %v1170_v5 = vmul.f32 0.007598758, %v1158_v46  ;;  %v1188_v3 = vadd.f32 %v8108_v31, %v8072_v30  ;;  %v1171_v59 = vmul.f32 0.007598758, %v1159_v50  ;;  %v1172_v37 = vmul.f32 0.007598758, %v1160_v33 }
  0xf7   :  { %v1173_v11 = vmul.f32 0.007598758, %v1161_v0  ;;  %v1176_v40 = vadd.f32 %v1164_v26, %v1140_v43  ;;  %v1174_v57 = vmul.f32 0.007598758, %v1162_v56  ;;  %v1175_v16 = vmul.f32 0.007598758, %v1163_v1 }
  0xf8   :  { %v1177_v15 = vadd.f32 %v1165_v53, %v1141_v21  ;;  %v1178_v62 = vadd.f32 %v1166_v52, %v1142_v34  ;;  %v1179_v4 = vadd.f32 %v1167_v61, %v1143_v38  ;;  %v1180_v19 = vadd.f32 %v1168_v12, %v1144_v41  ;;  %v15428_v28 = vld [vmem:[#allocation30_spill] sm:$0xff]  ;;  %v15430_v50 = vld [vmem:[#allocation48_spill] sm:$0xff] }
  0xf9   :  { %v1189_v8 = vadd.f32 %v15427_v25, %v8075_v7  ;;  %v1190_v35 = vadd.f32 %v8114_v63, %v8078_v9  ;;  %v1181_v36 = vadd.f32 %v1169_v32, %v1145_v39  ;;  %v1191_v30 = vadd.f32 %v8117_v55, %v8081_v14  ;;  %v15429_v58 = vld [vmem:[#allocation38_spill] sm:$0xff] }
  0xfa   :  { %v1192_v47 = vadd.f32 %v8120_v44, %v8084_v10  ;;  %v1193_v43 = vadd.f32 %v8123_v54, %v8087_v24  ;;  %v1182_v21 = vadd.f32 %v1170_v5, %v1146_v51  ;;  %v1183_v42 = vadd.f32 %v1171_v59, %v1147_v22  ;;  %v15431_v51 = vld [vmem:[#allocation56_spill] sm:$0xff] }
  0xfb   :  { %v1194_v34 = vadd.f32 %v8126_v29, %v8090_v13  ;;  %v1195_v7 = vadd.f32 %v8129_v27, %v8093_v17  ;;  %v1184_v38 = vadd.f32 %v1172_v37, %v1148_v48  ;;  %v1196_v41 = vadd.f32 %v8132_v20, %v8096_v6 }
  0xfc   :  { %v1197_v39 = vadd.f32 %v8135_v2, %v8099_v49  ;;  %v1200_v60 = vmul.f32 0.036000773, %v1188_v3  ;;  %v1198_v46 = vadd.f32 %v15429_v58, %v15428_v28  ;;  %v1199_v22 = vadd.f32 %v15431_v51, %v15430_v50 }
  0xfd   :  { %v1201_v33 = vmul.f32 0.036000773, %v1189_v8  ;;  %v1202_v0 = vmul.f32 0.036000773, %v1190_v35  ;;  %v1185_v26 = vadd.f32 %v1173_v11, %v1149_v23  ;;  %v1203_v56 = vmul.f32 0.036000773, %v1191_v30 }
  0xfe   :  { %v1204_v1 = vmul.f32 0.036000773, %v1192_v47  ;;  %v1205_v53 = vmul.f32 0.036000773, %v1193_v43  ;;  %v1186_v48 = vadd.f32 %v1174_v57, %v1150_v45  ;;  %v1187_v52 = vadd.f32 %v1175_v16, %v1151_v18  ;;  %v15432_v43 = vld [vmem:[#allocation52_spill] sm:$0xff] }
  0xff   :  { %v1206_v61 = vmul.f32 0.036000773, %v1194_v34  ;;  %v1207_v12 = vmul.f32 0.036000773, %v1195_v7  ;;  %v1208_v32 = vmul.f32 0.036000773, %v1196_v41  ;;  %v1212_v59 = vadd.f32 %v1200_v60, %v1176_v40 }
 0x100   :  { %v1209_v5 = vmul.f32 0.036000773, %v1197_v39  ;;  %v1224_v3 = vadd.f32 %v15428_v28, %v8078_v9  ;;  %v1210_v37 = vmul.f32 0.036000773, %v1198_v46  ;;  %v1211_v58 = vmul.f32 0.036000773, %v1199_v22 }
 0x101   :  { %v1213_v2 = vadd.f32 %v1201_v33, %v1177_v15  ;;  %v1214_v51 = vadd.f32 %v1202_v0, %v1178_v62  ;;  %v1215_v8 = vadd.f32 %v1203_v56, %v1179_v4  ;;  %v1216_v35 = vadd.f32 %v1204_v1, %v1180_v19 }
 0x102   :  { %v1217_v23 = vadd.f32 %v1205_v53, %v1181_v36  ;;  %v1225_v11 = vadd.f32 %v15430_v50, %v8081_v14  ;;  %v1218_v57 = vadd.f32 %v1206_v61, %v1182_v21  ;;  %v1219_v45 = vadd.f32 %v1207_v12, %v1183_v42 }
 0x103   :  { %v1226_v18 = vadd.f32 %v8108_v31, %v8084_v10  ;;  %v1227_v40 = vadd.f32 %v15427_v25, %v8087_v24  ;;  %v1220_v16 = vadd.f32 %v1208_v32, %v1184_v38  ;;  %v1228_v9 = vadd.f32 %v8114_v63, %v8090_v13 }
 0x104   :  { %v1229_v15 = vadd.f32 %v8117_v55, %v8093_v17  ;;  %v1230_v62 = vadd.f32 %v8120_v44, %v8096_v6  ;;  %v1231_v14 = vadd.f32 %v8123_v54, %v8099_v49  ;;  %v1232_v4 = vadd.f32 %v8126_v29, %v15428_v28 }
 0x105   :  { %v1233_v19 = vadd.f32 %v8129_v27, %v15430_v50  ;;  %v1236_v36 = vmul.f32 0.10936069, %v1224_v3  ;;  %v1221_v30 = vadd.f32 %v1209_v5, %v1185_v26  ;;  %v1234_v47 = vadd.f32 %v8132_v20, %v8108_v31 }
 0x106   :  { %v1235_v21 = vadd.f32 %v15432_v43, %v15427_v25  ;;  %v1237_v42 = vmul.f32 0.10936069, %v1225_v11  ;;  %v1222_v34 = vadd.f32 %v1210_v37, %v1186_v48  ;;  %v1223_v7 = vadd.f32 %v1211_v58, %v1187_v52 }
 0x107   :  { %v1238_v38 = vmul.f32 0.10936069, %v1226_v18  ;;  %v1239_v41 = vmul.f32 0.10936069, %v1227_v40  ;;  %v1240_v39 = vmul.f32 0.10936069, %v1228_v9  ;;  %v1260_v22 = vadd.f32 %v8096_v6, %v8084_v10 }
 0x108   :  { %v1241_v60 = vmul.f32 0.10936069, %v1229_v15  ;;  %v1242_v46 = vmul.f32 0.10936069, %v1230_v62  ;;  %v1243_v33 = vmul.f32 0.10936069, %v1231_v14  ;;  %v1248_v56 = vadd.f32 %v1236_v36, %v1212_v59 }
 0x109   :  { %v1244_v0 = vmul.f32 0.10936069, %v1232_v4  ;;  %v1245_v26 = vmul.f32 0.10936069, %v1233_v19  ;;  %v1246_v1 = vmul.f32 0.10936069, %v1234_v47  ;;  %v1249_v53 = vadd.f32 %v1237_v42, %v1213_v2 }
 0x10a   :  { %v1247_v20 = vmul.f32 0.10936069, %v1235_v21  ;;  %v1261_v61 = vadd.f32 %v8099_v49, %v8087_v24  ;;  %v1250_v48 = vadd.f32 %v1238_v38, %v1214_v51  ;;  %v1262_v52 = vadd.f32 %v15428_v28, %v8090_v13  ;;  %v8296_v9 = vld [vmem:[%s14509_s2 + $0x20] sm:$0xff]  ;;  %v8309_v19 = vld [vmem:[%s14509_s2 + $0x28] sm:$0xff]  ;;  %v8314_v36 = vld [vmem:[%s14509_s2 + $0x30] sm:$0xff] }
 0x10b   :  { %v1263_v12 = vadd.f32 %v15430_v50, %v8093_v17  ;;  %v1264_v10 = vadd.f32 %v8108_v31, %v8096_v6  ;;  %v1251_v32 = vadd.f32 %v1239_v41, %v1215_v8  ;;  %v1265_v5 = vadd.f32 %v15427_v25, %v8099_v49  ;;  %15439 = vst [vmem:[#allocation58_spill] sm:$0xff] %v8296_v9  ;;  %v8342_v38 = vld [vmem:[%s14509_s2 + $0x50] sm:$0xff] }
 0x10c   :  { %v1266_v2 = vadd.f32 %v8114_v63, %v15428_v28  ;;  %v1267_v24 = vadd.f32 %v8117_v55, %v15430_v50  ;;  %v1252_v59 = vadd.f32 %v1240_v39, %v1216_v35  ;;  %v1253_v3 = vadd.f32 %v1241_v60, %v1217_v23  ;;  %15444 = vst [vmem:[#allocation47_spill] sm:$0xff] %v8309_v19 }
 0x10d   :  { %v1268_v13 = vadd.f32 %v8120_v44, %v8108_v31  ;;  %v1269_v17 = vadd.f32 %v8123_v54, %v15427_v25  ;;  %v1254_v37 = vadd.f32 %v1242_v46, %v1218_v57  ;;  %v1270_v6 = vadd.f32 %v8126_v29, %v8114_v63  ;;  %v8272_v63 = vld [vmem:[%s14509_s2] sm:$0xff]  ;;  %15445 = vst [vmem:[#allocation55_spill] sm:$0xff] %v8314_v36 }
 0x10e   :  { %v1272_v58 = vmul.f32 0.21300554, %v1260_v22  ;;  %v1273_v49 = vmul.f32 0.21300554, %v1261_v61  ;;  %v1271_v28 = vadd.f32 %v8129_v27, %v8117_v55  ;;  %v1274_v51 = vmul.f32 0.21300554, %v1262_v52 }
 0x10f   :  { %v1275_v8 = vmul.f32 0.21300554, %v1263_v12  ;;  %v1276_v50 = vmul.f32 0.21300554, %v1264_v10  ;;  %v1255_v35 = vadd.f32 %v1243_v33, %v1219_v45  ;;  %v1277_v23 = vmul.f32 0.21300554, %v1265_v5 }
 0x110   :  { %v1278_v11 = vmul.f32 0.21300554, %v1266_v2  ;;  %v1279_v18 = vmul.f32 0.21300554, %v1267_v24  ;;  %v1256_v31 = vadd.f32 %v1244_v0, %v1220_v16  ;;  %v1257_v44 = vadd.f32 %v1245_v26, %v1221_v30  ;;  %15433 = vst [vmem:[#allocation42_spill] sm:$0xff] %v8272_v63  ;;  %v8277_v55 = vld [vmem:[%s14509_s2 + $0x8] sm:$0xff] }
 0x111   :  { %v1280_v40 = vmul.f32 0.21300554, %v1268_v13  ;;  %v1281_v54 = vmul.f32 0.21300554, %v1269_v17  ;;  %15434 = vst [vmem:[#allocation61_spill] sm:$0xff] %v8277_v55  ;;  %v1258_v29 = vadd.f32 %v1246_v1, %v1222_v34  ;;  %v8279_v27 = vadd.f32 %v1247_v20, %v1223_v7  ;;  %v8286_v45 = vld [vmem:[%s14509_s2 + $0x10] sm:$0xff] }
 0x112   :  { %v1282_v25 = vmul.f32 0.21300554, %v1270_v6  ;;  %v8281_v57 = vadd.f32 %v1272_v58, %v1248_v56  ;;  %15437 = vst [vmem:[#allocation53_spill] sm:$0xff] %v8286_v45  ;;  %v8291_v16 = vld [vmem:[%s14509_s2 + $0x18] sm:$0xff]  ;;  %v8298_v15 = vmul.f32 0.21300554, %v1271_v28  ;;  %v8300_v62 = vadd.f32 %v1273_v49, %v1249_v53 }
 0x113   :  { %15435 = vst [vmem:[#allocation49_spill] sm:$0xff] %v8279_v27  ;;  %v8302_v14 = vadd.f32 %v1274_v51, %v1250_v48  ;;  %v8304_v4 = vadd.f32 %v1275_v8, %v1251_v32  ;;  %v8319_v30 = vld [vmem:[%s14509_s2 + $0x38] sm:$0xff]  ;;  %v8321_v47 = vadd.f32 %v1276_v50, %v1252_v59  ;;  %v8323_v43 = vadd.f32 %v1277_v23, %v1253_v3  ;;  %v8332_v34 = vld [vmem:[%s14509_s2 + $0x40] sm:$0xff]  ;;  %v8337_v7 = vld [vmem:[%s14509_s2 + $0x48] sm:$0xff] }
 0x114   :  { %15436 = vst [vmem:[#allocation64_spill] sm:$0xff] %v8281_v57  ;;  %v8325_v21 = vadd.f32 %v1278_v11, %v1254_v37  ;;  %v8327_v42 = vadd.f32 %v1279_v18, %v1255_v35  ;;  %v8344_v41 = vadd.f32 %v1280_v40, %v1256_v31  ;;  %v8346_v39 = vadd.f32 %v1281_v54, %v1257_v44  ;;  %v8357_v22 = vld [vmem:[%s14509_s2 + $0x58] sm:$0xff]  ;;  %v8362_v33 = vld [vmem:[%s14509_s2 + $0x60] sm:$0xff]  ;;  %v8367_v0 = vld [vmem:[%s14509_s2 + $0x68] sm:$0xff] }
 0x115   :  { %15438 = vst [vmem:[#allocation66_spill] sm:$0xff] %v8291_v16  ;;  %v8349_v60 = vmul.f32 0.26601171, %v8272_v63  ;;  %v8352_v46 = vmul.f32 0.26601171, %v8277_v55  ;;  %v8369_v26 = vadd.f32 %v1282_v25, %v1258_v29  ;;  %v8383_v53 = vld [vmem:[%s14509_s2 + $0x70] sm:$0xff]  ;;  %v8406_v32 = vadd.f32 %v8277_v55, %v8272_v63 }
 0x116   :  { %15440 = vst [vmem:[#allocation12_spill] sm:$0xff] %v8298_v15  ;;  %v8372_v56 = vmul.f32 0.26601171, %v8286_v45  ;;  %v8375_v1 = vmul.f32 0.26601171, %v8291_v16  ;;  %v8388_v61 = vld [vmem:[%s14509_s2 + $0x78] sm:$0xff]  ;;  %v8434_v17 = vadd.f32 %v8291_v16, %v8286_v45  ;;  %v8462_v8 = vadd.f32 %v8309_v19, %v8296_v9 }
 0x117   :  { %15441 = vst [vmem:[#allocation15_spill] sm:$0xff] %v8300_v62  ;;  %v8378_v20 = vmul.f32 0.26601171, %v8296_v9  ;;  %v8393_v48 = vld [vmem:[%s14509_s2 + $0x80] sm:$0xff]  ;;  %v8396_v52 = vmul.f32 0.26601171, %v8309_v19  ;;  %v8490_v44 = vadd.f32 %v8319_v30, %v8314_v36  ;;  %v8546_v62 = vadd.f32 %v8357_v22, %v8342_v38 }
 0x118   :  { %15442 = vst [vmem:[#allocation18_spill] sm:$0xff] %v8302_v14  ;;  %v8399_v12 = vmul.f32 0.26601171, %v8314_v36  ;;  %v8402_v10 = vmul.f32 0.26601171, %v8319_v30  ;;  %v8411_v5 = vld [vmem:[%s14509_s2 + $0x88] sm:$0xff] }
 0x119   :  { %15443 = vst [vmem:[#allocation22_spill] sm:$0xff] %v8304_v4  ;;  %v8416_v2 = vld [vmem:[%s14509_s2 + $0x90] sm:$0xff]  ;;  %v8421_v24 = vld [vmem:[%s14509_s2 + $0x98] sm:$0xff]  ;;  %v8424_v59 = vmul.f32 0.26601171, %v8332_v34  ;;  %v8439_v37 = vld [vmem:[%s14509_s2 + $0xa0] sm:$0xff] }
 0x11a   :  { %15446 = vst [vmem:[#allocation57_spill] sm:$0xff] %v8319_v30  ;;  %v8427_v3 = vmul.f32 0.26601171, %v8337_v7  ;;  %v8430_v13 = vmul.f32 0.26601171, %v8342_v38  ;;  %v8444_v6 = vld [vmem:[%s14509_s2 + $0xa8] sm:$0xff] }
 0x11b   :  { %15447 = vst [vmem:[#allocation60_spill] sm:$0xff] %v8321_v47  ;;  %v8449_v58 = vld [vmem:[%s14509_s2 + $0xb0] sm:$0xff]  ;;  %v8452_v49 = vmul.f32 0.26601171, %v8357_v22  ;;  %v8455_v28 = vmul.f32 0.26601171, %v8362_v33 }
 0x11c   :  { %15448 = vst [vmem:[#allocation63_spill] sm:$0xff] %v8323_v43  ;;  %v8458_v51 = vmul.f32 0.26601171, %v8367_v0  ;;  %v8467_v50 = vld [vmem:[%s14509_s2 + $0xb8] sm:$0xff]  ;;  %v8472_v35 = vld [vmem:[%s14509_s2 + $0xc0] sm:$0xff]  ;;  %v8477_v23 = vld [vmem:[%s14509_s2 + $0xc8] sm:$0xff] }
 0x11d   :  { %15449 = vst [vmem:[#allocation67_spill] sm:$0xff] %v8325_v21  ;;  %v8480_v11 = vmul.f32 0.26601171, %v8383_v53  ;;  %v8483_v18 = vmul.f32 0.26601171, %v8388_v61  ;;  %v8495_v40 = vld [vmem:[%s14509_s2 + $0xd0] sm:$0xff] }
 0x11e   :  { %15450 = vst [vmem:[#allocation72_spill] sm:$0xff] %v8327_v42  ;;  %v8486_v31 = vmul.f32 0.26601171, %v8393_v48  ;;  %v8500_v54 = vld [vmem:[%s14509_s2 + $0xd8] sm:$0xff]  ;;  %v8505_v29 = vld [vmem:[%s14509_s2 + $0xe0] sm:$0xff]  ;;  %v8523_v42 = vld [vmem:[%s14509_s2 + $0xe8] sm:$0xff] }
 0x11f   :  { %15451 = vst [vmem:[#allocation74_spill] sm:$0xff] %v8332_v34  ;;  %v8508_v25 = vmul.f32 0.26601171, %v8411_v5  ;;  %v8528_v21 = vld [vmem:[%s14509_s2 + $0xf0] sm:$0xff]  ;;  %v8533_v43 = vld [vmem:[%s14509_s2 + $0xf8] sm:$0xff] }
 0x120   :  { %15452 = vst [vmem:[#allocation75_spill] sm:$0xff] %v8337_v7  ;;  %v8536_v47 = vmul.f32 0.26601171, %v8439_v37  ;;  %v8539_v4 = vmul.f32 0.26601171, %v8444_v6 }
 0x121   :  { %15453 = vst [vmem:[#allocation28_spill] sm:$0xff] %v8342_v38  ;;  %v8542_v14 = vmul.f32 0.26601171, %v8449_v58  ;;  %v8549_v57 = vmul.f32 0.26601171, %v8467_v50 }
 0x122   :  { %15454 = vst [vmem:[#allocation32_spill] sm:$0xff] %v8344_v41  ;;  %v8518_v41 = vadd.f32 %v8337_v7, %v8332_v34  ;;  %v8552_v15 = vmul.f32 0.26601171, %v8472_v35  ;;  %v8555_v27 = vmul.f32 0.26601171, %v8477_v23 }
 0x123   :  { %15455 = vst [vmem:[#allocation68_spill] sm:$0xff] %v8346_v39  ;;  %v8514_v39 = vmul.f32 0.26601171, %v8421_v24 }
 0x124   :  { %15456 = vst [vmem:[#allocation69_spill] sm:$0xff] %v8357_v22 }
 0x125   :  { %15457 = vst [vmem:[#allocation70_spill] sm:$0xff] %v8362_v33 }
 0x126   :  { %15458 = vst [vmem:[#allocation71_spill] sm:$0xff] %v8367_v0 }
 0x127   :  { %15459 = vst [vmem:[#allocation76_spill] sm:$0xff] %v8369_v26  ;;  %v8511_v26 = vmul.f32 0.26601171, %v8416_v2 }
 0x128   :  { %15460 = vst [vmem:[#allocation77_spill] sm:$0xff] %v8383_v53 }
 0x129   :  { %15461 = vst [vmem:[#allocation78_spill] sm:$0xff] %v8388_v61 }
 0x12a   :  { %15462 = vst [vmem:[#allocation79_spill] sm:$0xff] %v8393_v48 }
 0x12b   :  { %15463 = vst [vmem:[#allocation80_spill] sm:$0xff] %v8406_v32  ;;  %v8575_v32 = vmul.f32 0.26601171, %v8523_v42 }
 0x12c   :  { %15464 = vst [vmem:[#allocation81_spill] sm:$0xff] %v8411_v5 }
 0x12d   :  { %15465 = vst [vmem:[#allocation82_spill] sm:$0xff] %v8416_v2 }
 0x12e   :  { %15466 = vst [vmem:[#allocation83_spill] sm:$0xff] %v8421_v24 }
 0x12f   :  { %15467 = vst [vmem:[#allocation13_spill] sm:$0xff] %v8434_v17  ;;  %v8572_v17 = vadd.f32 %v8388_v61, %v8383_v53 }
 0x130   :  { %15468 = vst [vmem:[#allocation8_spill] sm:$0xff] %v8439_v37 }
 0x131   :  { %15469 = vst [vmem:[#allocation16_spill] sm:$0xff] %v8444_v6 }
 0x132   :  { %15470 = vst [vmem:[#allocation9_spill] sm:$0xff] %v8449_v58 }
 0x133   :  { %15471 = vst [vmem:[#allocation36_spill] sm:$0xff] %v8462_v8  ;;  %v8565_v8 = vmul.f32 0.26601171, %v8500_v54 }
 0x134   :  { %15472 = vst [vmem:[#allocation73_spill] sm:$0xff] %v8467_v50 }
 0x135   :  { %15473 = vst [vmem:[#allocation44_spill] sm:$0xff] %v8472_v35 }
 0x136   :  { %15474 = vst [vmem:[#allocation24_spill] sm:$0xff] %v8477_v23 }
 0x137   :  { %15475 = vst [vmem:[#allocation27_spill] sm:$0xff] %v8490_v44  ;;  %v8562_v44 = vmul.f32 0.26601171, %v8495_v40 }
 0x138   :  { %15476 = vst [vmem:[#allocation31_spill] sm:$0xff] %v8495_v40 }
 0x139   :  { %15477 = vst [vmem:[#allocation35_spill] sm:$0xff] %v8500_v54 }
 0x13a   :  { %15478 = vst [vmem:[#allocation39_spill] sm:$0xff] %v8505_v29 }
 0x13b   :  { %15479 = vst [vmem:[#allocation43_spill] sm:$0xff] %v8518_v41  ;;  %v8559_v41 = vadd.f32 %v8367_v0, %v8362_v33 }
 0x13c   :  { %15480 = vst [vmem:[#allocation46_spill] sm:$0xff] %v8523_v42 }
 0x13d   :  { %15481 = vst [vmem:[#allocation50_spill] sm:$0xff] %v8528_v21 }
 0x13e   :  { %15482 = vst [vmem:[#allocation54_spill] sm:$0xff] %v8533_v43 }
 0x13f   :  { %15483 = vst [vmem:[#allocation59_spill] sm:$0xff] %v8536_v47 }
 0x140   :  { %15484 = vst [vmem:[#allocation62_spill] sm:$0xff] %v8539_v4 }
 0x141   :  { %15485 = vst [vmem:[#allocation65_spill] sm:$0xff] %v8542_v14 }
 0x142   :  { %15486 = vst [vmem:[#allocation51_spill] sm:$0xff] %v8546_v62  ;;  %v8568_v62 = vmul.f32 0.26601171, %v8505_v29 }
 0x143   :  { %15487 = vst [vmem:[#allocation40_spill] sm:$0xff] %v8549_v57 }
 0x144   :  { %15488 = vst [vmem:[#allocation19_spill] sm:$0xff] %v8552_v15 }
 0x145   :  { %15489 = vst [vmem:[#allocation10_spill] sm:$0xff] %v8555_v27  ;;  %v8578_v27 = vmul.f32 0.26601171, %v8528_v21 }
 0x146   :  { %15490 = vst [vmem:[#allocation20_spill] sm:$0xff] %v8559_v41  ;;  %v8581_v41 = vmul.f32 0.26601171, %v8533_v43 }
 0x147   :  { %15491 = vst [vmem:[#allocation11_spill] sm:$0xff] %v8562_v44  ;;  %v8585_v44 = vadd.f32 %v8411_v5, %v8393_v48 }
 0x148   :  { %15492 = vst [vmem:[#allocation25_spill] sm:$0xff] %v8565_v8  ;;  %v8588_v8 = vrot.slane %v8277_v55, 2  ;;  %v8610_v55 = vrot.slane %v8367_v0, 2  ;;  %v8631_v0 = vrot.slane %v8500_v54, 2 }
 0x149   :  { %15493 = vst [vmem:[#allocation14_spill] sm:$0xff] %v8568_v62  ;;  %v8591_v62 = vrot.slane %v8291_v16, 2  ;;  %v8613_v16 = vrot.slane %v8388_v61, 2  ;;  %v8634_v61 = vrot.slane %v8523_v42, 2 }
 0x14a   :  { %15494 = vst [vmem:[#allocation29_spill] sm:$0xff] %v8572_v17  ;;  %v8594_v17 = vrot.slane %v8309_v19, 2  ;;  %v8616_v19 = vrot.slane %v8411_v5, 2  ;;  %v8637_v5 = vrot.slane %v8533_v43, 2  ;;  %v1382_v43 = vadd.f32 %v8610_v55, %v8362_v33 }
 0x14b   :  { %15495 = vst [vmem:[#allocation17_spill] sm:$0xff] %v8575_v32  ;;  %v8598_v32 = vadd.f32 %v8421_v24, %v8416_v2  ;;  %v1377_v15 = vadd.f32 %v8591_v62, %v8286_v45 }
 0x14c   :  { %15496 = vst [vmem:[#allocation33_spill] sm:$0xff] %v8578_v27  ;;  %v8601_v27 = vrot.slane %v8319_v30, 2  ;;  %v8622_v30 = vrot.slane %v8444_v6, 2  ;;  %v1378_v57 = vadd.f32 %v8594_v17, %v8296_v9 }
 0x14d   :  { %15497 = vst [vmem:[#allocation21_spill] sm:$0xff] %v8581_v41  ;;  %v8604_v41 = vrot.slane %v8337_v7, 2  ;;  %v8625_v7 = vrot.slane %v8467_v50, 2 }
 0x14e   :  { %15498 = vst [vmem:[#allocation37_spill] sm:$0xff] %v8585_v44  ;;  %v8607_v44 = vrot.slane %v8357_v22, 2  ;;  %v8628_v22 = vrot.slane %v8477_v23, 2  ;;  %v1379_v14 = vadd.f32 %v8601_v27, %v8314_v36 }
 0x14f   :  { %15499 = vst [vmem:[#allocation23_spill] sm:$0xff] %v8588_v8  ;;  %v1380_v4 = vadd.f32 %v8604_v41, %v8332_v34 }
 0x150   :  { %15500 = vst [vmem:[#allocation41_spill] sm:$0xff] %v8591_v62  ;;  %v1381_v47 = vadd.f32 %v8607_v44, %v8342_v38  ;;  %v1384_v62 = vadd.f32 %v8616_v19, %v8393_v48 }
 0x151   :  { %15501 = vst [vmem:[#allocation26_spill] sm:$0xff] %v8594_v17 }
 0x152   :  { %15502 = vst [vmem:[#allocation45_spill] sm:$0xff] %v8598_v32  ;;  %v8619_v32 = vrot.slane %v8421_v24, 2  ;;  %v1376_v24 = vadd.f32 %v8588_v8, %v8272_v63  ;;  %v1383_v8 = vadd.f32 %v8613_v16, %v8383_v53  ;;  %v1395_v53 = vmul.f32 0.0010283801, %v1379_v14 }
 0x153   :  { %15503 = vst [vmem:[#allocation34_spill] sm:$0xff] %v8601_v27  ;;  %v1386_v27 = vadd.f32 %v8622_v30, %v8439_v37  ;;  %v1397_v33 = vmul.f32 0.0010283801, %v1381_v47  ;;  %v1400_v34 = vmul.f32 0.0010283801, %v1384_v62  ;;  %v8685_v47 = vadd.f32 %v8500_v54, %v8495_v40 }
 0x154   :  { %15504 = vst [vmem:[#allocation30_spill] sm:$0xff] %v8604_v41  ;;  %v1385_v17 = vadd.f32 %v8619_v32, %v8416_v2  ;;  %v1387_v41 = vadd.f32 %v8625_v7, %v8449_v58  ;;  %v1392_v48 = vmul.f32 0.0010283801, %v1376_v24  ;;  %v1394_v2 = vmul.f32 0.0010283801, %v1378_v57 }
 0x155   :  { %15505 = vst [vmem:[#allocation38_spill] sm:$0xff] %v8607_v44  ;;  %v1388_v44 = vadd.f32 %v8628_v22, %v8472_v35  ;;  %v1399_v38 = vmul.f32 0.0010283801, %v1383_v8  ;;  %v1402_v36 = vmul.f32 0.0010283801, %v1386_v27  ;;  %v8681_v57 = vadd.f32 %v8477_v23, %v8472_v35 }
 0x156   :  { %15506 = vst [vmem:[#allocation48_spill] sm:$0xff] %v8610_v55  ;;  %v1389_v55 = vadd.f32 %v8631_v0, %v8495_v40  ;;  %v1424_v62 = vrot.slane %v1392_v48, 3  ;;  %v1426_v27 = vrot.slane %v1394_v2, 3 }
 0x157   :  { %15507 = vst [vmem:[#allocation56_spill] sm:$0xff] %v8613_v16  ;;  %v1390_v16 = vadd.f32 %v8634_v61, %v8505_v29 }
 0x158   :  { %15508 = vst [vmem:[#allocation52_spill] sm:$0xff] %v8616_v19  ;;  %v1391_v19 = vadd.f32 %v8637_v5, %v8528_v21  ;;  %v1405_v14 = vmul.f32 0.0010283801, %v1389_v55  ;;  %v8693_v48 = vadd.f32 %v1424_v62, %v8349_v60 }
 0x159   :  { %15509 = vst [vmem:[#allocation84_spill] sm:$0xff] %v8619_v32  ;;  %v1393_v32 = vmul.f32 0.0010283801, %v1377_v15  ;;  %v1404_v15 = vmul.f32 0.0010283801, %v1388_v44  ;;  %v1432_v44 = vrot.slane %v1400_v34, 3  ;;  %v8708_v34 = vadd.f32 %v1426_v27, %v8396_v52 }
 0x15a   :  { %15510 = vst [vmem:[#allocation85_spill] sm:$0xff] %v8622_v30  ;;  %v1396_v30 = vmul.f32 0.0010283801, %v1380_v4  ;;  %v1406_v4 = vmul.f32 0.0010283801, %v1390_v16  ;;  %v1434_v16 = vrot.slane %v1402_v36, 3  ;;  %v8705_v36 = vadd.f32 %v1426_v27, %v8378_v20 }
 0x15b   :  { %15511 = vst [vmem:[#allocation86_spill] sm:$0xff] %v8625_v7  ;;  %v8673_v7 = vadd.f32 %v8444_v6, %v8439_v37  ;;  %v1425_v24 = vrot.slane %v1393_v32, 3  ;;  %v1431_v37 = vrot.slane %v1399_v38, 3  ;;  %v1436_v45 = vrot.slane %v1404_v15, 3  ;;  %v15527_v27 = vld [vmem:[#allocation36_spill] sm:$0xff] }
 0x15c   :  { %15512 = vst [vmem:[#allocation87_spill] sm:$0xff] %v8628_v22  ;;  %v1398_v22 = vmul.f32 0.0010283801, %v1382_v43  ;;  %v8687_v43 = vmul.f32 0.0010283801, %v1391_v19  ;;  %v1428_v8 = vrot.slane %v1396_v30, 3  ;;  %v8696_v32 = vadd.f32 %v1424_v62, %v8352_v46 }
 0x15d   :  { %15513 = vst [vmem:[#allocation88_spill] sm:$0xff] %v8631_v0  ;;  %v8677_v0 = vadd.f32 %v8467_v50, %v8449_v58  ;;  %v1429_v58 = vrot.slane %v1397_v33, 3  ;;  %v1437_v40 = vrot.slane %v1405_v14, 3  ;;  %v1438_v63 = vrot.slane %v1406_v4, 3  ;;  %v15524_v14 = vld [vmem:[#allocation80_spill] sm:$0xff] }
 0x15e   :  { %15514 = vst [vmem:[#allocation89_spill] sm:$0xff] %v8634_v61  ;;  %v1401_v61 = vmul.f32 0.0010283801, %v1385_v17  ;;  %v1502_v17 = vadd.f32 %v8523_v42, %v8505_v29  ;;  %v1430_v35 = vrot.slane %v1398_v22, 3  ;;  %v1439_v19 = vrot.slane %v8687_v43, 3  ;;  %v15525_v43 = vld [vmem:[#allocation13_spill] sm:$0xff] }
 0x15f   :  { %15515 = vst [vmem:[#allocation90_spill] sm:$0xff] %v8637_v5  ;;  %v1403_v5 = vmul.f32 0.0010283801, %v1387_v41  ;;  %v1427_v41 = vrot.slane %v1395_v53, 3  ;;  %v8699_v30 = vadd.f32 %v1425_v24, %v8372_v56  ;;  %v8702_v38 = vadd.f32 %v1425_v24, %v8375_v1  ;;  %v15526_v24 = vld [vmem:[#allocation54_spill] sm:$0xff]  ;;  %v15539_v29 = vld [vmem:[#allocation33_spill] sm:$0xff] }
 0x160   :  { %v1433_v55 = vrot.slane %v1401_v61, 3  ;;  %v8717_v46 = vadd.f32 %v1428_v8, %v8424_v59  ;;  %v8720_v33 = vadd.f32 %v1428_v8, %v8427_v3  ;;  %v8723_v56 = vadd.f32 %v1429_v58, %v8430_v13  ;;  %v15516_v59 = vld [vmem:[#allocation59_spill] sm:$0xff]  ;;  %v15517_v13 = vld [vmem:[#allocation62_spill] sm:$0xff] }
 0x161   :  { %v1435_v9 = vrot.slane %v1403_v5, 3  ;;  %v8711_v22 = vadd.f32 %v1427_v41, %v8399_v12  ;;  %v8714_v60 = vadd.f32 %v1427_v41, %v8402_v10  ;;  %v8726_v1 = vadd.f32 %v1429_v58, %v8452_v49  ;;  %v15528_v8 = vld [vmem:[#allocation27_spill] sm:$0xff] }
 0x162   :  { %v8729_v20 = vadd.f32 %v1430_v35, %v8455_v28  ;;  %v8732_v53 = vadd.f32 %v1430_v35, %v8458_v51  ;;  %v8735_v61 = vadd.f32 %v1431_v37, %v8480_v11  ;;  %v8738_v52 = vadd.f32 %v1431_v37, %v8483_v18  ;;  %v15518_v37 = vld [vmem:[#allocation65_spill] sm:$0xff]  ;;  %v15519_v28 = vld [vmem:[#allocation40_spill] sm:$0xff]  ;;  %v15520_v35 = vld [vmem:[#allocation19_spill] sm:$0xff] }
 0x163   :  { %v8741_v12 = vadd.f32 %v1432_v44, %v8486_v31  ;;  %v8744_v10 = vadd.f32 %v1432_v44, %v8508_v25  ;;  %v8747_v5 = vadd.f32 %v1433_v55, %v8511_v26  ;;  %v8750_v2 = vadd.f32 %v1433_v55, %v8514_v39  ;;  %v15521_v26 = vld [vmem:[#allocation10_spill] sm:$0xff]  ;;  %v15522_v39 = vld [vmem:[#allocation11_spill] sm:$0xff]  ;;  %v15523_v25 = vld [vmem:[#allocation25_spill] sm:$0xff] }
 0x164   :  { %v8753_v3 = vadd.f32 %v1434_v16, %v15516_v59  ;;  %v8756_v58 = vadd.f32 %v1434_v16, %v15517_v13  ;;  %v8759_v49 = vadd.f32 %v1435_v9, %v15518_v37  ;;  %v8762_v51 = vadd.f32 %v1435_v9, %v15519_v28  ;;  %v15529_v55 = vld [vmem:[#allocation43_spill] sm:$0xff]  ;;  %v15530_v16 = vld [vmem:[#allocation14_spill] sm:$0xff] }
 0x165   :  { %v8765_v11 = vadd.f32 %v1436_v45, %v15520_v35  ;;  %v8768_v18 = vadd.f32 %v1436_v45, %v15521_v26  ;;  %v8771_v31 = vadd.f32 %v1437_v40, %v15522_v39  ;;  %v8774_v15 = vadd.f32 %v1437_v40, %v15523_v25  ;;  %v15532_v13 = vld [vmem:[#allocation51_spill] sm:$0xff]  ;;  %v15533_v40 = vld [vmem:[#allocation20_spill] sm:$0xff]  ;;  %v15534_v35 = vld [vmem:[#allocation29_spill] sm:$0xff] }
 0x166   :  { %v1504_v4 = vmul.f32 0.007598758, %v15524_v14  ;;  %v1505_v62 = vmul.f32 0.007598758, %v15525_v43  ;;  %v1503_v9 = vadd.f32 %v15526_v24, %v8528_v21  ;;  %v1506_v41 = vmul.f32 0.007598758, %v15527_v27 }
 0x167   :  { %v1507_v44 = vmul.f32 0.007598758, %v15528_v8  ;;  %v1508_v45 = vmul.f32 0.007598758, %v15529_v55  ;;  %v8784_v59 = vadd.f32 %v1438_v63, %v15530_v16  ;;  %v1509_v37 = vmul.f32 0.007598758, %v15532_v13 }
 0x168   :  { %v1510_v28 = vmul.f32 0.007598758, %v15533_v40  ;;  %v1511_v26 = vmul.f32 0.007598758, %v15534_v35  ;;  %v15535_v39 = vld [vmem:[#allocation17_spill] sm:$0xff]  ;;  %v8796_v55 = vadd.f32 %v1439_v19, %v15539_v29 }
 0x169   :  { %15531 = vst [vmem:[#allocation59_spill] sm:$0xff] %v8784_v59  ;;  %v8790_v25 = vadd.f32 %v1438_v63, %v15535_v39  ;;  %v15537_v14 = vld [vmem:[#allocation37_spill] sm:$0xff]  ;;  %v1514_v8 = vmul.f32 0.007598758, %v8673_v7  ;;  %v1515_v16 = vmul.f32 0.007598758, %v8677_v0 }
 0x16a   :  { %v1512_v43 = vmul.f32 0.007598758, %v15537_v14  ;;  %v15538_v21 = vld [vmem:[#allocation45_spill] sm:$0xff]  ;;  %15540 = vst [vmem:[#allocation65_spill] sm:$0xff] %v8796_v55  ;;  %v1516_v13 = vmul.f32 0.007598758, %v8681_v57 }
 0x16b   :  { %15536 = vst [vmem:[#allocation62_spill] sm:$0xff] %v8790_v25  ;;  %v1513_v27 = vmul.f32 0.007598758, %v15538_v21  ;;  %v1517_v40 = vmul.f32 0.007598758, %v8685_v47  ;;  %v15541_v59 = vld [vmem:[#allocation21_spill] sm:$0xff] }
 0x16c   :  { %v8802_v35 = vadd.f32 %v1439_v19, %v15541_v59  ;;  %v8804_v63 = vmul.f32 0.007598758, %v1502_v17  ;;  %v8806_v39 = vmul.f32 0.007598758, %v1503_v9  ;;  %v1536_v14 = vrot.slane %v1504_v4, 4  ;;  %v15562_v19 = vld [vmem:[#allocation53_spill] sm:$0xff] }
 0x16d   :  { %v1537_v21 = vrot.slane %v1505_v62, 4  ;;  %v1538_v25 = vrot.slane %v1506_v41, 4  ;;  %v1539_v7 = vrot.slane %v1507_v44, 4  ;;  %v1540_v24 = vrot.slane %v1508_v45, 4 }
 0x16e   :  { %v1541_v29 = vrot.slane %v1509_v37, 4  ;;  %v1542_v55 = vrot.slane %v1510_v28, 4  ;;  %v1543_v42 = vrot.slane %v1511_v26, 4  ;;  %v1544_v0 = vrot.slane %v1512_v43, 4  ;;  %v15551_v28 = vld [vmem:[#allocation75_spill] sm:$0xff]  ;;  %v15552_v26 = vld [vmem:[#allocation69_spill] sm:$0xff] }
 0x16f   :  { %v1545_v54 = vrot.slane %v1513_v27, 4  ;;  %v1546_v57 = vrot.slane %v1514_v8, 4  ;;  %v1547_v23 = vrot.slane %v1515_v16, 4  ;;  %v1548_v47 = vrot.slane %v1516_v13, 4  ;;  %v15554_v27 = vld [vmem:[#allocation78_spill] sm:$0xff]  ;;  %v15555_v8 = vld [vmem:[#allocation81_spill] sm:$0xff] }
 0x170   :  { %v1549_v50 = vrot.slane %v1517_v40, 4  ;;  %v8811_v9 = vadd.f32 %v1536_v14, %v8693_v48  ;;  %v8814_v4 = vadd.f32 %v1536_v14, %v8696_v32  ;;  %v8817_v62 = vadd.f32 %v1537_v21, %v8699_v30  ;;  %v15556_v16 = vld [vmem:[#allocation83_spill] sm:$0xff]  ;;  %v15558_v14 = vld [vmem:[#allocation24_spill] sm:$0xff] }
 0x171   :  { %v8820_v41 = vadd.f32 %v1537_v21, %v8702_v38  ;;  %v8823_v44 = vadd.f32 %v1538_v25, %v8705_v36  ;;  %v8826_v45 = vadd.f32 %v1538_v25, %v8708_v34  ;;  %v8829_v59 = vadd.f32 %v1539_v7, %v8711_v22 }
 0x172   :  { %v8832_v48 = vadd.f32 %v1539_v7, %v8714_v60  ;;  %v8835_v32 = vadd.f32 %v1540_v24, %v8717_v46  ;;  %v8838_v30 = vadd.f32 %v1540_v24, %v8720_v33  ;;  %v8841_v38 = vadd.f32 %v1541_v29, %v8723_v56  ;;  %v15559_v7 = vld [vmem:[#allocation35_spill] sm:$0xff] }
 0x173   :  { %v8844_v36 = vadd.f32 %v1541_v29, %v8726_v1  ;;  %v8847_v34 = vadd.f32 %v1542_v55, %v8729_v20  ;;  %v8850_v22 = vadd.f32 %v1542_v55, %v8732_v53  ;;  %v8853_v60 = vadd.f32 %v1543_v42, %v8735_v61 }
 0x174   :  { %v8856_v46 = vadd.f32 %v1543_v42, %v8738_v52  ;;  %v8859_v33 = vadd.f32 %v1544_v0, %v8741_v12  ;;  %v8862_v56 = vadd.f32 %v1544_v0, %v8744_v10  ;;  %v8865_v1 = vadd.f32 %v1545_v54, %v8747_v5  ;;  %v15546_v5 = vld [vmem:[#allocation61_spill] sm:$0xff]  ;;  %v15560_v0 = vld [vmem:[#allocation46_spill] sm:$0xff] }
 0x175   :  { %v8868_v20 = vadd.f32 %v1545_v54, %v8750_v2  ;;  %v8871_v53 = vadd.f32 %v1546_v57, %v8753_v3  ;;  %v8874_v61 = vadd.f32 %v1546_v57, %v8756_v58  ;;  %v8877_v42 = vadd.f32 %v1547_v23, %v8759_v49  ;;  %v15547_v3 = vld [vmem:[#allocation66_spill] sm:$0xff]  ;;  %v15549_v49 = vld [vmem:[#allocation47_spill] sm:$0xff] }
 0x176   :  { %v8880_v52 = vadd.f32 %v1547_v23, %v8762_v51  ;;  %v8883_v12 = vadd.f32 %v1548_v47, %v8765_v11  ;;  %v8886_v10 = vadd.f32 %v1548_v47, %v8768_v18  ;;  %v8889_v54 = vadd.f32 %v1549_v50, %v8771_v31  ;;  %v15550_v23 = vld [vmem:[#allocation57_spill] sm:$0xff]  ;;  %v15553_v18 = vld [vmem:[#allocation71_spill] sm:$0xff]  ;;  %v15561_v47 = vld [vmem:[#allocation42_spill] sm:$0xff] }
 0x177   :  { %v1600_v2 = vrot.slane %v15546_v5, 6  ;;  %v1601_v58 = vrot.slane %v15547_v3, 6  ;;  %v8894_v24 = vadd.f32 %v1549_v50, %v8774_v15  ;;  %v1602_v37 = vrot.slane %v15549_v49, 6  ;;  %v15557_v50 = vld [vmem:[#allocation73_spill] sm:$0xff]  ;;  %v15571_v49 = vld [vmem:[#allocation82_spill] sm:$0xff]  ;;  %v15572_v3 = vld [vmem:[#allocation8_spill] sm:$0xff] }
 0x178   :  { %15542 = vst [vmem:[#allocation40_spill] sm:$0xff] %v8880_v52  ;;  %v1603_v51 = vrot.slane %v15550_v23, 6  ;;  %v1604_v11 = vrot.slane %v15551_v28, 6  ;;  %v1605_v25 = vrot.slane %v15552_v26, 6  ;;  %v1606_v43 = vrot.slane %v15553_v18, 6  ;;  %v15563_v26 = vld [vmem:[#allocation54_spill] sm:$0xff] }
 0x179   :  { %15543 = vst [vmem:[#allocation19_spill] sm:$0xff] %v8883_v12  ;;  %v1607_v31 = vrot.slane %v15554_v27, 6  ;;  %v1608_v55 = vrot.slane %v15555_v8, 6  ;;  %v1609_v13 = vrot.slane %v15556_v16, 6  ;;  %v1610_v40 = vrot.slane %v8444_v6, 6  ;;  %v15564_v28 = vld [vmem:[#allocation58_spill] sm:$0xff] }
 0x17a   :  { %15544 = vst [vmem:[#allocation10_spill] sm:$0xff] %v8886_v10  ;;  %v1611_v15 = vrot.slane %v15557_v50, 6  ;;  %v1612_v21 = vrot.slane %v15558_v14, 6  ;;  %v1613_v29 = vrot.slane %v15559_v7, 6  ;;  %v1614_v57 = vrot.slane %v15560_v0, 6  ;;  %v15565_v23 = vld [vmem:[#allocation55_spill] sm:$0xff] }
 0x17b   :  { %15545 = vst [vmem:[#allocation11_spill] sm:$0xff] %v8889_v54  ;;  %v1632_v17 = vadd.f32 %v1600_v2, %v15561_v47  ;;  %v1633_v18 = vadd.f32 %v1601_v58, %v15562_v19  ;;  %v1615_v27 = vrot.slane %v15563_v26, 6  ;;  %v1634_v8 = vadd.f32 %v1602_v37, %v15564_v28  ;;  %v15567_v54 = vld [vmem:[#allocation28_spill] sm:$0xff]  ;;  %v15568_v10 = vld [vmem:[#allocation70_spill] sm:$0xff]  ;;  %v15569_v12 = vld [vmem:[#allocation77_spill] sm:$0xff] }
 0x17c   :  { %15548 = vst [vmem:[#allocation25_spill] sm:$0xff] %v8894_v24  ;;  %v1635_v16 = vadd.f32 %v1603_v51, %v15565_v23  ;;  %v15566_v24 = vld [vmem:[#allocation74_spill] sm:$0xff]  ;;  %v1637_v50 = vadd.f32 %v1605_v25, %v15567_v54  ;;  %v1638_v14 = vadd.f32 %v1606_v43, %v15568_v10  ;;  %v1639_v7 = vadd.f32 %v1607_v31, %v15569_v12  ;;  %v15570_v52 = vld [vmem:[#allocation79_spill] sm:$0xff]  ;;  %v15573_v19 = vld [vmem:[#allocation9_spill] sm:$0xff] }
 0x17d   :  { %v1636_v6 = vadd.f32 %v1604_v11, %v15566_v24  ;;  %v1640_v0 = vadd.f32 %v1608_v55, %v15570_v52  ;;  %v1641_v2 = vadd.f32 %v1609_v13, %v15571_v49  ;;  %v1642_v58 = vadd.f32 %v1610_v40, %v15572_v3  ;;  %v15574_v5 = vld [vmem:[#allocation44_spill] sm:$0xff]  ;;  %v15575_v28 = vld [vmem:[#allocation31_spill] sm:$0xff]  ;;  %v15577_v54 = vld [vmem:[#allocation50_spill] sm:$0xff] }
 0x17e   :  { %v1643_v26 = vadd.f32 %v1611_v15, %v15573_v19  ;;  %v1644_v37 = vadd.f32 %v1612_v21, %v15574_v5  ;;  %v1645_v51 = vadd.f32 %v1613_v29, %v15575_v28  ;;  %v15576_v23 = vld [vmem:[#allocation39_spill] sm:$0xff]  ;;  %v1648_v24 = vmul.f32 0.036000773, %v1632_v17  ;;  %v15581_v21 = vld [vmem:[#allocation62_spill] sm:$0xff] }
 0x17f   :  { %v1646_v11 = vadd.f32 %v1614_v57, %v15576_v23  ;;  %v1649_v25 = vmul.f32 0.036000773, %v1633_v18  ;;  %v1647_v43 = vadd.f32 %v1615_v27, %v15577_v54  ;;  %v1650_v10 = vmul.f32 0.036000773, %v1634_v8  ;;  %v15578_v55 = vld [vmem:[#allocation59_spill] sm:$0xff]  ;;  %v15583_v23 = vld [vmem:[#allocation65_spill] sm:$0xff] }
 0x180   :  { %v1651_v31 = vmul.f32 0.036000773, %v1635_v16  ;;  %v1652_v12 = vmul.f32 0.036000773, %v1636_v6  ;;  %v15579_v13 = vrot.slane %v8804_v63, 4  ;;  %v15584_v27 = vrot.slane %v8806_v39, 4 }
 0x181   :  { %v1653_v40 = vmul.f32 0.036000773, %v1637_v50  ;;  %v1654_v15 = vmul.f32 0.036000773, %v1638_v14  ;;  %v1655_v19 = vmul.f32 0.036000773, %v1639_v7 }
 0x182   :  { %v8929_v49 = vadd.f32 %v15579_v13, %v15578_v55  ;;  %v15582_v29 = vmov %v15579_v13  ;;  %v1656_v57 = vmul.f32 0.036000773, %v1640_v0  ;;  %v1657_v17 = vmul.f32 0.036000773, %v1641_v2 }
 0x183   :  { %v1597_v28 = vadd.f32 %v15582_v29, %v15581_v21  ;;  %v1658_v18 = vmul.f32 0.036000773, %v1642_v58  ;;  %v1598_v8 = vadd.f32 %v15584_v27, %v15583_v23  ;;  %v1659_v6 = vmul.f32 0.036000773, %v1643_v26 }
 0x184   :  { %15580 = vst [vmem:[#allocation80_spill] sm:$0xff] %v8929_v49  ;;  %v1660_v16 = vmul.f32 0.036000773, %v1644_v37  ;;  %v1661_v54 = vmul.f32 0.036000773, %v1645_v51  ;;  %v15585_v55 = vmov %v15584_v27  ;;  %v1680_v13 = vrot.slane %v1648_v24, 5 }
 0x185   :  { %v1599_v50 = vadd.f32 %v15585_v55, %v8802_v35  ;;  %v1662_v14 = vmul.f32 0.036000773, %v1646_v11  ;;  %v1663_v7 = vmul.f32 0.036000773, %v1647_v43  ;;  %v1681_v5 = vrot.slane %v1649_v25, 5  ;;  %v15612_v43 = vld [vmem:[#allocation58_spill] sm:$0xff] }
 0x186   :  { %v1682_v63 = vrot.slane %v1650_v10, 5  ;;  %v1683_v21 = vrot.slane %v1651_v31, 5  ;;  %v1684_v0 = vrot.slane %v1652_v12, 5  ;;  %v1685_v2 = vrot.slane %v1653_v40, 5 }
 0x187   :  { %v1686_v58 = vrot.slane %v1654_v15, 5  ;;  %v1687_v29 = vrot.slane %v1655_v19, 5  ;;  %v1688_v3 = vrot.slane %v1656_v57, 5  ;;  %v1689_v52 = vrot.slane %v1657_v17, 5  ;;  %v15620_v17 = vld [vmem:[#allocation11_spill] sm:$0xff] }
 0x188   :  { %v1690_v23 = vrot.slane %v1658_v18, 5  ;;  %v1691_v26 = vrot.slane %v1659_v6, 5  ;;  %v1692_v37 = vrot.slane %v1660_v16, 5  ;;  %v1693_v51 = vrot.slane %v1661_v54, 5  ;;  %v15622_v6 = vld [vmem:[#allocation25_spill] sm:$0xff] }
 0x189   :  { %v1694_v27 = vrot.slane %v1662_v14, 5  ;;  %v1695_v49 = vrot.slane %v1663_v7, 5  ;;  %v8941_v35 = vadd.f32 %v1680_v13, %v8811_v9  ;;  %v8944_v39 = vadd.f32 %v1680_v13, %v8814_v4 }
 0x18a   :  { %v8947_v10 = vadd.f32 %v1681_v5, %v8817_v62  ;;  %v8950_v12 = vadd.f32 %v1681_v5, %v8820_v41  ;;  %v8953_v19 = vadd.f32 %v1682_v63, %v8823_v44  ;;  %v8956_v24 = vadd.f32 %v1682_v63, %v8826_v45  ;;  %v15609_v5 = vld [vmem:[#allocation61_spill] sm:$0xff] }
 0x18b   :  { %15586 = vst [vmem:[#allocation13_spill] sm:$0xff] %v8941_v35  ;;  %v8959_v54 = vadd.f32 %v1683_v21, %v8829_v59  ;;  %v8962_v9 = vadd.f32 %v1683_v21, %v8832_v48  ;;  %v8965_v4 = vadd.f32 %v1684_v0, %v8835_v32  ;;  %v8968_v62 = vadd.f32 %v1684_v0, %v8838_v30  ;;  %v15624_v55 = vld [vmem:[#allocation80_spill] sm:$0xff]  ;;  %v15629_v0 = vld [vmem:[#allocation55_spill] sm:$0xff] }
 0x18c   :  { %15587 = vst [vmem:[#allocation36_spill] sm:$0xff] %v8944_v39  ;;  %v8971_v41 = vadd.f32 %v1685_v2, %v8841_v38  ;;  %v8974_v44 = vadd.f32 %v1685_v2, %v8844_v36  ;;  %v8977_v45 = vadd.f32 %v1686_v58, %v8847_v34  ;;  %v8980_v59 = vadd.f32 %v1686_v58, %v8850_v22  ;;  %v15630_v58 = vld [vmem:[#allocation57_spill] sm:$0xff]  ;;  %v15653_v39 = vld [vmem:[#allocation50_spill] sm:$0xff] }
 0x18d   :  { %15588 = vst [vmem:[#allocation27_spill] sm:$0xff] %v8947_v10  ;;  %v8983_v48 = vadd.f32 %v1687_v29, %v8853_v60  ;;  %v8986_v32 = vadd.f32 %v1687_v29, %v8856_v46  ;;  %v8989_v30 = vadd.f32 %v1688_v3, %v8859_v33  ;;  %v8992_v38 = vadd.f32 %v1688_v3, %v8862_v56  ;;  %v15610_v3 = vld [vmem:[#allocation53_spill] sm:$0xff] }
 0x18e   :  { %15589 = vst [vmem:[#allocation43_spill] sm:$0xff] %v8950_v12  ;;  %v8995_v36 = vadd.f32 %v1689_v52, %v8865_v1  ;;  %v8998_v34 = vadd.f32 %v1689_v52, %v8868_v20  ;;  %v9001_v22 = vadd.f32 %v1690_v23, %v8871_v53  ;;  %v9004_v60 = vadd.f32 %v1690_v23, %v8874_v61  ;;  %v15611_v1 = vld [vmem:[#allocation66_spill] sm:$0xff]  ;;  %v15613_v52 = vld [vmem:[#allocation47_spill] sm:$0xff]  ;;  %v15614_v53 = vld [vmem:[#allocation40_spill] sm:$0xff] }
 0x18f   :  { %15590 = vst [vmem:[#allocation14_spill] sm:$0xff] %v8953_v19  ;;  %v9007_v46 = vadd.f32 %v1691_v26, %v8877_v42  ;;  %v1760_v33 = vrot.slane %v15561_v47, 4  ;;  %v1761_v56 = vrot.slane %v15609_v5, 4  ;;  %v1763_v11 = vrot.slane %v15610_v3, 4  ;;  %v15616_v61 = vld [vmem:[#allocation19_spill] sm:$0xff]  ;;  %v15618_v42 = vld [vmem:[#allocation10_spill] sm:$0xff] }
 0x190   :  { %15591 = vst [vmem:[#allocation51_spill] sm:$0xff] %v8956_v24  ;;  %v1764_v25 = vrot.slane %v15611_v1, 4  ;;  %v1766_v20 = vrot.slane %v15612_v43, 4  ;;  %v1767_v31 = vrot.slane %v15613_v52, 4  ;;  %v9016_v40 = vadd.f32 %v1691_v26, %v15614_v53  ;;  %v15632_v53 = vld [vmem:[#allocation75_spill] sm:$0xff]  ;;  %v15652_v24 = vld [vmem:[#allocation46_spill] sm:$0xff] }
 0x191   :  { %15592 = vst [vmem:[#allocation20_spill] sm:$0xff] %v8959_v54  ;;  %v9019_v15 = vadd.f32 %v1692_v37, %v15616_v61  ;;  %v9022_v57 = vadd.f32 %v1692_v37, %v15618_v42  ;;  %v9025_v18 = vadd.f32 %v1693_v51, %v15620_v17  ;;  %v9028_v16 = vadd.f32 %v1693_v51, %v15622_v6  ;;  %v15631_v37 = vld [vmem:[#allocation74_spill] sm:$0xff]  ;;  %v15636_v17 = vld [vmem:[#allocation71_spill] sm:$0xff]  ;;  %v15637_v6 = vld [vmem:[#allocation77_spill] sm:$0xff] }
 0x192   :  { %15593 = vst [vmem:[#allocation29_spill] sm:$0xff] %v8962_v9  ;;  %v9031_v14 = vadd.f32 %v1694_v27, %v15624_v55  ;;  %v9033_v7 = vadd.f32 %v1694_v27, %v1597_v28  ;;  %v9035_v13 = vadd.f32 %v1695_v49, %v1598_v8  ;;  %v9037_v63 = vadd.f32 %v1695_v49, %v1599_v50  ;;  %v15633_v28 = vld [vmem:[#allocation28_spill] sm:$0xff]  ;;  %v15634_v8 = vld [vmem:[#allocation69_spill] sm:$0xff]  ;;  %v15635_v49 = vld [vmem:[#allocation70_spill] sm:$0xff] }
 0x193   :  { %15594 = vst [vmem:[#allocation17_spill] sm:$0xff] %v8965_v4  ;;  %v1762_v21 = vsel %vm556_vm0, %v1760_v33, %v1761_v56  ;;  %v1769_v2 = vrot.slane %v15629_v0, 4  ;;  %v1770_v29 = vrot.slane %v15630_v58, 4  ;;  %v1765_v23 = vsel %vm556_vm0, %v1763_v11, %v1764_v25  ;;  %v15651_v9 = vld [vmem:[#allocation39_spill] sm:$0xff] }
 0x194   :  { %15595 = vst [vmem:[#allocation37_spill] sm:$0xff] %v8968_v62  ;;  %v1768_v26 = vsel %vm556_vm0, %v1766_v20, %v1767_v31  ;;  %v1772_v51 = vrot.slane %v15631_v37, 4  ;;  %v1773_v61 = vrot.slane %v15632_v53, 4  ;;  %v1775_v27 = vrot.slane %v15633_v28, 4  ;;  %v15650_v62 = vld [vmem:[#allocation35_spill] sm:$0xff] }
 0x195   :  { %15596 = vst [vmem:[#allocation45_spill] sm:$0xff] %v8971_v41  ;;  %v1776_v42 = vrot.slane %v15634_v8, 4  ;;  %v1778_v50 = vrot.slane %v15635_v49, 4  ;;  %v1779_v33 = vrot.slane %v15636_v17, 4  ;;  %v1781_v55 = vrot.slane %v15637_v6, 4 }
 0x196   :  { %15597 = vst [vmem:[#allocation33_spill] sm:$0xff] %v8974_v44  ;;  %v15649_v44 = vld [vmem:[#allocation31_spill] sm:$0xff]  ;;  %v1800_v4 = vrot.slane %v15650_v62, 4  ;;  %v1802_v54 = vrot.slane %v15651_v9, 4  ;;  %v1803_v19 = vrot.slane %v15652_v24, 4  ;;  %v1771_v12 = vsel %vm556_vm0, %v1769_v2, %v1770_v29 }
 0x197   :  { %15598 = vst [vmem:[#allocation21_spill] sm:$0xff] %v8977_v45  ;;  %v1799_v41 = vrot.slane %v15649_v44, 4  ;;  %v1774_v10 = vsel %vm556_vm0, %v1772_v51, %v1773_v61  ;;  %v1805_v35 = vrot.slane %v15653_v39, 4 }
 0x198   :  { %15599 = vst [vmem:[#allocation42_spill] sm:$0xff] %v8980_v59  ;;  %v15648_v59 = vld [vmem:[#allocation24_spill] sm:$0xff] }
 0x199   :  { %15600 = vst [vmem:[#allocation59_spill] sm:$0xff] %v8983_v48  ;;  %v1797_v45 = vrot.slane %v15648_v59, 4  ;;  %v1780_v59 = vsel %vm556_vm0, %v1778_v50, %v1779_v33  ;;  %v1801_v39 = vsel %vm556_vm0, %v1799_v41, %v1800_v4  ;;  %v1841_v50 = vadd.f32 %v1761_v56, %v15609_v5 }
 0x19a   :  { %15601 = vst [vmem:[#allocation62_spill] sm:$0xff] %v8986_v32  ;;  %v15647_v32 = vld [vmem:[#allocation44_spill] sm:$0xff]  ;;  %v1847_v41 = vadd.f32 %v1770_v29, %v15630_v58 }
 0x19b   :  { %15602 = vst [vmem:[#allocation65_spill] sm:$0xff] %v8989_v30  ;;  %v1796_v48 = vrot.slane %v15647_v32, 4  ;;  %v1777_v32 = vsel %vm556_vm0, %v1775_v27, %v1776_v42  ;;  %v1840_v27 = vadd.f32 %v1762_v21, %v15561_v47  ;;  %v1849_v47 = vadd.f32 %v1773_v61, %v15632_v53  ;;  %v15657_v53 = vld [vmem:[#allocation44_spill] sm:$0xff] }
 0x19c   :  { %15603 = vst [vmem:[#allocation91_spill] sm:$0xff] %v8992_v38  ;;  %v15646_v38 = vld [vmem:[#allocation73_spill] sm:$0xff]  ;;  %v1850_v56 = vadd.f32 %v1777_v32, %v15633_v28  ;;  %v15658_v61 = vld [vmem:[#allocation24_spill] sm:$0xff] }
 0x19d   :  { %15604 = vst [vmem:[#allocation92_spill] sm:$0xff] %v8995_v36  ;;  %v1794_v30 = vrot.slane %v15646_v38, 4  ;;  %v1798_v51 = vsel %vm556_vm0, %v1796_v48, %v1797_v45  ;;  %v1846_v48 = vadd.f32 %v1771_v12, %v15629_v0 }
 0x19e   :  { %15605 = vst [vmem:[#allocation93_spill] sm:$0xff] %v8998_v34  ;;  %v15645_v34 = vld [vmem:[#allocation9_spill] sm:$0xff] }
 0x19f   :  { %15606 = vst [vmem:[#allocation94_spill] sm:$0xff] %v9001_v22  ;;  %v1793_v36 = vrot.slane %v15645_v34, 4  ;;  %v15654_v34 = vld [vmem:[#allocation54_spill] sm:$0xff] }
 0x1a0   :  { %15607 = vst [vmem:[#allocation95_spill] sm:$0xff] %v9004_v60  ;;  %v15644_v60 = vld [vmem:[#allocation16_spill] sm:$0xff]  ;;  %v1806_v38 = vrot.slane %v15654_v34, 4  ;;  %v1804_v34 = vsel %vm556_vm0, %v1802_v54, %v1803_v19  ;;  %v1848_v54 = vadd.f32 %v1774_v10, %v15631_v37 }
 0x1a1   :  { %15608 = vst [vmem:[#allocation96_spill] sm:$0xff] %v9007_v46  ;;  %v1791_v22 = vrot.slane %v15644_v60, 4  ;;  %v1795_v2 = vsel %vm556_vm0, %v1793_v36, %v1794_v30  ;;  %v1845_v36 = vadd.f32 %v1767_v31, %v15613_v52 }
 0x1a2   :  { %15615 = vst [vmem:[#allocation61_spill] sm:$0xff] %v9016_v40  ;;  %v15643_v40 = vld [vmem:[#allocation8_spill] sm:$0xff]  ;;  %v9119_v28 = vmul.f32 0.10936069, %v1848_v54 }
 0x1a3   :  { %15617 = vst [vmem:[#allocation53_spill] sm:$0xff] %v9019_v15  ;;  %v1790_v46 = vrot.slane %v15643_v40, 4  ;;  %v1861_v29 = vadd.f32 %v1791_v22, %v15644_v60 }
 0x1a4   :  { %15619 = vst [vmem:[#allocation66_spill] sm:$0xff] %v9022_v57  ;;  %v15642_v57 = vld [vmem:[#allocation83_spill] sm:$0xff] }
 0x1a5   :  { %15621 = vst [vmem:[#allocation58_spill] sm:$0xff] %v9025_v18  ;;  %v1788_v15 = vrot.slane %v15642_v57, 4  ;;  %v1792_v24 = vsel %vm556_vm0, %v1790_v46, %v1791_v22  ;;  %v1844_v46 = vadd.f32 %v1768_v26, %v15612_v43  ;;  %v15656_v26 = vld [vmem:[#allocation73_spill] sm:$0xff]  ;;  %v15660_v22 = vld [vmem:[#allocation35_spill] sm:$0xff] }
 0x1a6   :  { %15623 = vst [vmem:[#allocation47_spill] sm:$0xff] %v9028_v16  ;;  %v15641_v16 = vld [vmem:[#allocation82_spill] sm:$0xff]  ;;  %v1860_v32 = vadd.f32 %v1792_v24, %v15643_v40  ;;  %v1863_v37 = vadd.f32 %v1794_v30, %v15656_v26  ;;  %v1877_v24 = vmul.f32 0.10936069, %v1845_v36  ;;  %v1867_v60 = vadd.f32 %v1800_v4, %v15660_v22 }
 0x1a7   :  { %15625 = vst [vmem:[#allocation40_spill] sm:$0xff] %v9031_v14  ;;  %v15640_v14 = vld [vmem:[#allocation81_spill] sm:$0xff]  ;;  %v1787_v18 = vrot.slane %v15641_v16, 4  ;;  %v1859_v0 = vadd.f32 %v1788_v15, %v15642_v57  ;;  %v9112_v57 = vmul.f32 0.10936069, %v1844_v46 }
 0x1a8   :  { %15626 = vst [vmem:[#allocation19_spill] sm:$0xff] %v9033_v7  ;;  %v15639_v7 = vld [vmem:[#allocation79_spill] sm:$0xff]  ;;  %v1785_v20 = vrot.slane %v15640_v14, 4  ;;  %v9117_v30 = vmul.f32 0.10936069, %v1847_v41 }
 0x1a9   :  { %15627 = vst [vmem:[#allocation10_spill] sm:$0xff] %v9035_v13  ;;  %v1784_v11 = vrot.slane %v15639_v7, 4  ;;  %v1789_v9 = vsel %vm556_vm0, %v1787_v18, %v1788_v15  ;;  %v1843_v18 = vadd.f32 %v1764_v25, %v15611_v1  ;;  %v1853_v25 = vadd.f32 %v1779_v33, %v15636_v17 }
 0x1aa   :  { %15628 = vst [vmem:[#allocation11_spill] sm:$0xff] %v9037_v63  ;;  %v15638_v63 = vld [vmem:[#allocation78_spill] sm:$0xff]  ;;  %v1857_v21 = vadd.f32 %v1785_v20, %v15640_v14  ;;  %v1858_v10 = vadd.f32 %v1789_v9, %v15641_v16  ;;  %v15659_v9 = vld [vmem:[#allocation31_spill] sm:$0xff]  ;;  %v1891_v36 = vmul.f32 0.10936069, %v1859_v0 }
 0x1ab   :  { %v1782_v13 = vrot.slane %v15638_v63, 4  ;;  %v1786_v62 = vsel %vm556_vm0, %v1784_v11, %v1785_v20  ;;  %v1842_v11 = vadd.f32 %v1765_v23, %v15610_v3  ;;  %v1852_v3 = vadd.f32 %v1780_v59, %v15635_v49  ;;  %v15655_v23 = vld [vmem:[#allocation9_spill] sm:$0xff] }
 0x1ac   :  { %v1856_v12 = vadd.f32 %v1786_v62, %v15639_v7  ;;  %v1862_v59 = vadd.f32 %v1795_v2, %v15655_v23  ;;  %v1873_v62 = vmul.f32 0.10936069, %v1841_v50  ;;  %v1866_v16 = vadd.f32 %v1801_v39, %v15659_v9  ;;  %v15662_v39 = vld [vmem:[#allocation46_spill] sm:$0xff] }
 0x1ad   :  { %v1783_v44 = vsel %vm556_vm0, %v1781_v55, %v1782_v13  ;;  %v1807_v55 = vsel %vm556_vm0, %v1805_v35, %v1806_v38  ;;  %v1851_v35 = vadd.f32 %v1776_v42, %v15634_v8  ;;  %v1855_v31 = vadd.f32 %v1782_v13, %v15638_v63  ;;  %v15663_v2 = vld [vmem:[#allocation50_spill] sm:$0xff] }
 0x1ae   :  { %v1854_v43 = vadd.f32 %v1783_v44, %v15637_v6  ;;  %v1864_v44 = vadd.f32 %v1798_v51, %v15657_v53  ;;  %v1865_v13 = vadd.f32 %v1797_v45, %v15658_v61  ;;  %v9107_v63 = vmul.f32 0.10936069, %v1840_v27  ;;  %v15661_v45 = vld [vmem:[#allocation39_spill] sm:$0xff] }
 0x1af   :  { %v9109_v14 = vmul.f32 0.10936069, %v1842_v11  ;;  %v1875_v15 = vmul.f32 0.10936069, %v1843_v18  ;;  %v9115_v7 = vmul.f32 0.10936069, %v1846_v48  ;;  %v1868_v8 = vadd.f32 %v1804_v34, %v15661_v45 }
 0x1b0   :  { %v9122_v42 = vmul.f32 0.10936069, %v1849_v47  ;;  %v9124_v49 = vmul.f32 0.10936069, %v1850_v56  ;;  %v9126_v17 = vmul.f32 0.10936069, %v1851_v35  ;;  %v1869_v33 = vadd.f32 %v1803_v19, %v15662_v39 }
 0x1b1   :  { %v9129_v6 = vmul.f32 0.10936069, %v1852_v3  ;;  %v9131_v20 = vmul.f32 0.10936069, %v1853_v25  ;;  %v9133_v4 = vmul.f32 0.10936069, %v1854_v43  ;;  %v1870_v51 = vadd.f32 %v1807_v55, %v15663_v2 }
 0x1b2   :  { %v9136_v27 = vmul.f32 0.10936069, %v1855_v31  ;;  %v9138_v50 = vmul.f32 0.10936069, %v1856_v12  ;;  %v1889_v34 = vmul.f32 0.10936069, %v1857_v21 }
 0x1b3   :  { %v15664_v11 = vld [vmem:[#allocation54_spill] sm:$0xff]  ;;  %v9141_v46 = vmul.f32 0.10936069, %v1858_v10  ;;  %v9143_v48 = vmul.f32 0.10936069, %v1860_v32  ;;  %v15665_v47 = vld [vmem:[#allocation23_spill] sm:$0xff] }
 0x1b4   :  { %v1871_v18 = vadd.f32 %v1806_v38, %v15664_v11  ;;  %v1893_v19 = vmul.f32 0.10936069, %v1861_v29  ;;  %v9145_v41 = vmul.f32 0.10936069, %v1862_v59  ;;  %v1895_v54 = vmul.f32 0.10936069, %v1863_v37 }
 0x1b5   :  { %v9149_v56 = vadd.f32 %v15665_v47, %v15609_v5  ;;  %v9151_v55 = vmul.f32 0.10936069, %v1864_v44  ;;  %v1897_v35 = vmul.f32 0.10936069, %v1865_v13  ;;  %v1936_v3 = vrot.slane %v9107_v63, 6  ;;  %v15666_v5 = vld [vmem:[#allocation41_spill] sm:$0xff] }
 0x1b6   :  { %v1937_v25 = vrot.slane %v1873_v62, 6  ;;  %v1939_v38 = vrot.slane %v9109_v14, 6  ;;  %v1940_v43 = vrot.slane %v1875_v15, 6  ;;  %v1942_v31 = vrot.slane %v9112_v57, 6  ;;  %v15667_v37 = vld [vmem:[#allocation26_spill] sm:$0xff] }
 0x1b7   :  { %v1943_v12 = vrot.slane %v1877_v24, 6  ;;  %v9156_v21 = vmul.f32 0.10936069, %v1866_v16  ;;  %v1899_v10 = vmul.f32 0.10936069, %v1867_v60  ;;  %v9162_v32 = vadd.f32 %v15666_v5, %v15611_v1  ;;  %v15668_v62 = vld [vmem:[#allocation34_spill] sm:$0xff] }
 0x1b8   :  { %v9158_v0 = vmul.f32 0.10936069, %v1868_v8  ;;  %v1901_v29 = vmul.f32 0.10936069, %v1869_v33  ;;  %v9164_v59 = vmul.f32 0.10936069, %v1870_v51  ;;  %v9168_v44 = vadd.f32 %v15667_v37, %v15613_v52 }
 0x1b9   :  { %v1903_v26 = vmul.f32 0.10936069, %v1871_v18  ;;  %v1938_v61 = vsel %vm733_vm1, %v1936_v3, %v1937_v25  ;;  %v1945_v13 = vrot.slane %v9115_v7, 6  ;;  %v1946_v63 = vrot.slane %v9117_v30, 6 }
 0x1ba   :  { %v9175_v14 = vadd.f32 %v15668_v62, %v15630_v58  ;;  %v1941_v1 = vsel %vm733_vm1, %v1939_v38, %v1940_v43  ;;  %v1944_v16 = vsel %vm733_vm1, %v1942_v31, %v1943_v12  ;;  %v1948_v15 = vrot.slane %v9119_v28, 6 }
 0x1bb   :  { %v1949_v57 = vrot.slane %v9122_v42, 6  ;;  %v1951_v52 = vrot.slane %v9124_v49, 6  ;;  %v1952_v24 = vrot.slane %v9126_v17, 6  ;;  %v1954_v22 = vrot.slane %v9129_v6, 6 }
 0x1bc   :  { %v1955_v60 = vrot.slane %v9131_v20, 6  ;;  %v1957_v7 = vrot.slane %v9133_v4, 6  ;;  %v1958_v58 = vrot.slane %v9136_v27, 6  ;;  %v1960_v30 = vrot.slane %v9138_v50, 6 }
 0x1bd   :  { %v1961_v8 = vrot.slane %v1889_v34, 6  ;;  %v1963_v39 = vrot.slane %v9141_v46, 6  ;;  %v1964_v28 = vrot.slane %v1891_v36, 6  ;;  %v1966_v42 = vrot.slane %v9143_v48, 6 }
 0x1be   :  { %v1967_v33 = vrot.slane %v1893_v19, 6  ;;  %v1969_v49 = vrot.slane %v9145_v41, 6  ;;  %v1970_v17 = vrot.slane %v1895_v54, 6  ;;  %v1972_v6 = vrot.slane %v9151_v55, 6 }
 0x1bf   :  { %v1973_v51 = vrot.slane %v1897_v35, 6  ;;  %v1975_v20 = vrot.slane %v9156_v21, 6  ;;  %v1976_v4 = vrot.slane %v1899_v10, 6  ;;  %v1978_v27 = vrot.slane %v9158_v0, 6  ;;  %v15669_v21 = vld [vmem:[#allocation13_spill] sm:$0xff]  ;;  %v15670_v0 = vld [vmem:[#allocation36_spill] sm:$0xff] }
 0x1c0   :  { %v1979_v11 = vrot.slane %v1901_v29, 6  ;;  %v1947_v50 = vsel %vm733_vm1, %v1945_v13, %v1946_v63  ;;  %v1950_v34 = vsel %vm733_vm1, %v1948_v15, %v1949_v57  ;;  %v14723_v18 = vrot.slane %v9164_v59, 6  ;;  %v15671_v63 = vld [vmem:[#allocation27_spill] sm:$0xff] }
 0x1c1   :  { %v1982_v46 = vrot.slane %v1903_v26, 6  ;;  %v1953_v36 = vsel %vm733_vm1, %v1951_v52, %v1952_v24  ;;  %v1956_v48 = vsel %vm733_vm1, %v1954_v22, %v1955_v60  ;;  %v1959_v19 = vsel %vm733_vm1, %v1957_v7, %v1958_v58  ;;  %v15672_v24 = vld [vmem:[#allocation43_spill] sm:$0xff]  ;;  %v15673_v58 = vld [vmem:[#allocation14_spill] sm:$0xff] }
 0x1c2   :  { %v1962_v41 = vsel %vm733_vm1, %v1960_v30, %v1961_v8  ;;  %v1965_v54 = vsel %vm733_vm1, %v1963_v39, %v1964_v28  ;;  %v1968_v55 = vsel %vm733_vm1, %v1966_v42, %v1967_v33  ;;  %v1971_v35 = vsel %vm733_vm1, %v1969_v49, %v1970_v17  ;;  %v15674_v28 = vld [vmem:[#allocation51_spill] sm:$0xff]  ;;  %v15675_v33 = vld [vmem:[#allocation20_spill] sm:$0xff]  ;;  %v15676_v17 = vld [vmem:[#allocation29_spill] sm:$0xff] }
 0x1c3   :  { %v1974_v25 = vsel %vm733_vm1, %v1972_v6, %v1973_v51  ;;  %v1977_v43 = vsel %vm733_vm1, %v1975_v20, %v1976_v4  ;;  %v1980_v12 = vsel %vm733_vm1, %v1978_v27, %v1979_v11  ;;  %v9208_v10 = vadd.f32 %v1936_v3, %v15669_v21  ;;  %v15677_v4 = vld [vmem:[#allocation17_spill] sm:$0xff] }
 0x1c4   :  { %v9211_v29 = vadd.f32 %v1938_v61, %v15670_v0  ;;  %v9216_v26 = vsel %vm733_vm1, %v14723_v18, %v1982_v46  ;;  %v9219_v57 = vadd.f32 %v1939_v38, %v15671_v63  ;;  %v9222_v60 = vadd.f32 %v1941_v1, %v15672_v24  ;;  %v15679_v38 = vld [vmem:[#allocation37_spill] sm:$0xff] }
 0x1c5   :  { %v9225_v8 = vadd.f32 %v1942_v31, %v15673_v58  ;;  %v9228_v3 = vadd.f32 %v1944_v16, %v15674_v28  ;;  %v9231_v61 = vadd.f32 %v1945_v13, %v15675_v33  ;;  %v9234_v51 = vadd.f32 %v1947_v50, %v15676_v17  ;;  %v15681_v1 = vld [vmem:[#allocation45_spill] sm:$0xff]  ;;  %v15687_v13 = vld [vmem:[#allocation42_spill] sm:$0xff]  ;;  %v15689_v50 = vld [vmem:[#allocation59_spill] sm:$0xff] }
 0x1c6   :  { %v9237_v11 = vadd.f32 %v1948_v15, %v15677_v4  ;;  %v9240_v46 = vadd.f32 %v1950_v34, %v15679_v38  ;;  %v9243_v21 = vadd.f32 %v1951_v52, %v15681_v1  ;;  %v15683_v31 = vld [vmem:[#allocation33_spill] sm:$0xff]  ;;  %v9252_v24 = vadd.f32 %v1956_v48, %v15687_v13  ;;  %v15691_v15 = vld [vmem:[#allocation62_spill] sm:$0xff]  ;;  %v15695_v52 = vld [vmem:[#allocation91_spill] sm:$0xff] }
 0x1c7   :  { %v9246_v0 = vadd.f32 %v1953_v36, %v15683_v31  ;;  %v15685_v16 = vld [vmem:[#allocation21_spill] sm:$0xff]  ;;  %v9255_v58 = vadd.f32 %v1957_v7, %v15689_v50  ;;  %v9258_v28 = vadd.f32 %v1959_v19, %v15691_v15  ;;  %v9264_v17 = vadd.f32 %v1962_v41, %v15695_v52  ;;  %v15697_v36 = vld [vmem:[#allocation92_spill] sm:$0xff]  ;;  %v15701_v48 = vld [vmem:[#allocation94_spill] sm:$0xff] }
 0x1c8   :  { %15678 = vst [vmem:[#allocation25_spill] sm:$0xff] %v9237_v11  ;;  %v9249_v63 = vadd.f32 %v1954_v22, %v15685_v16  ;;  %v15693_v34 = vld [vmem:[#allocation65_spill] sm:$0xff]  ;;  %v9267_v4 = vadd.f32 %v1963_v39, %v15697_v36  ;;  %v9273_v1 = vadd.f32 %v1966_v42, %v15701_v48  ;;  %v15703_v7 = vld [vmem:[#allocation95_spill] sm:$0xff]  ;;  %v15705_v19 = vld [vmem:[#allocation96_spill] sm:$0xff] }
 0x1c9   :  { %15680 = vst [vmem:[#allocation80_spill] sm:$0xff] %v9240_v46  ;;  %v9261_v33 = vadd.f32 %v1960_v30, %v15693_v34  ;;  %v15699_v22 = vld [vmem:[#allocation93_spill] sm:$0xff]  ;;  %v9276_v31 = vadd.f32 %v1968_v55, %v15703_v7  ;;  %v9279_v16 = vadd.f32 %v1969_v49, %v15705_v19  ;;  %v15711_v39 = vld [vmem:[#allocation66_spill] sm:$0xff]  ;;  %v15715_v42 = vld [vmem:[#allocation47_spill] sm:$0xff] }
 0x1ca   :  { %15682 = vst [vmem:[#allocation55_spill] sm:$0xff] %v9243_v21  ;;  %v9270_v38 = vadd.f32 %v1965_v54, %v15699_v22  ;;  %v15707_v30 = vld [vmem:[#allocation61_spill] sm:$0xff]  ;;  %v9288_v15 = vadd.f32 %v1974_v25, %v15711_v39  ;;  %v15713_v54 = vld [vmem:[#allocation58_spill] sm:$0xff]  ;;  %v9294_v52 = vadd.f32 %v1977_v43, %v15715_v42  ;;  %v15717_v55 = vld [vmem:[#allocation40_spill] sm:$0xff] }
 0x1cb   :  { %15684 = vst [vmem:[#allocation57_spill] sm:$0xff] %v9246_v0  ;;  %v9282_v13 = vadd.f32 %v1971_v35, %v15707_v30  ;;  %v15709_v41 = vld [vmem:[#allocation53_spill] sm:$0xff]  ;;  %v9291_v34 = vadd.f32 %v1975_v20, %v15713_v54  ;;  %v9297_v36 = vadd.f32 %v1978_v27, %v15717_v55  ;;  %v15719_v49 = vld [vmem:[#allocation19_spill] sm:$0xff] }
 0x1cc   :  { %15686 = vst [vmem:[#allocation74_spill] sm:$0xff] %v9249_v63  ;;  %v9285_v50 = vadd.f32 %v1972_v6, %v15709_v41  ;;  %v9300_v22 = vadd.f32 %v1980_v12, %v15719_v49  ;;  %v6561_v6 = vld [vmem:[%s14509_s2] sm:$0xff]  ;;  %v6562_v25 = vld [vmem:[%s14509_s2 + $0x10] sm:$0xff] }
 0x1cd   :  { %15688 = vst [vmem:[#allocation75_spill] sm:$0xff] %v9252_v24  ;;  %v2048_v35 = vrot.slane %v6561_v6, 2  ;;  %v2050_v20 = vrot.slane %v6562_v25, 2  ;;  %v6563_v43 = vld [vmem:[%s14509_s2 + $0x20] sm:$0xff]  ;;  %v6564_v27 = vld [vmem:[%s14509_s2 + $0x30] sm:$0xff] }
 0x1ce   :  { %15690 = vst [vmem:[#allocation28_spill] sm:$0xff] %v9255_v58  ;;  %v2052_v48 = vrot.slane %v6563_v43, 2  ;;  %v2054_v12 = vrot.slane %v6564_v27, 2  ;;  %v6565_v7 = vld [vmem:[%s14509_s2 + $0x40] sm:$0xff]  ;;  %v6566_v30 = vld [vmem:[%s14509_s2 + $0x50] sm:$0xff] }
 0x1cf   :  { %15692 = vst [vmem:[#allocation69_spill] sm:$0xff] %v9258_v28  ;;  %v2056_v19 = vrot.slane %v6565_v7, 2  ;;  %v2058_v41 = vrot.slane %v6566_v30, 2  ;;  %v6567_v39 = vld [vmem:[%s14509_s2 + $0x60] sm:$0xff]  ;;  %v6568_v42 = vld [vmem:[%s14509_s2 + $0x70] sm:$0xff] }
 0x1d0   :  { %15694 = vst [vmem:[#allocation70_spill] sm:$0xff] %v9261_v33  ;;  %v2060_v54 = vrot.slane %v6567_v39, 2  ;;  %v2062_v55 = vrot.slane %v6568_v42, 2  ;;  %v6569_v49 = vld [vmem:[%s14509_s2 + $0x80] sm:$0xff]  ;;  %v15731_v58 = vld [vmem:[#allocation89_spill] sm:$0xff]  ;;  %v15732_v24 = vld [vmem:[#allocation90_spill] sm:$0xff] }
 0x1d1   :  { %15696 = vst [vmem:[#allocation71_spill] sm:$0xff] %v9264_v17  ;;  %v2064_v18 = vrot.slane %v6569_v49, 2  ;;  %v15727_v17 = vld [vmem:[#allocation85_spill] sm:$0xff]  ;;  %v15729_v33 = vld [vmem:[#allocation87_spill] sm:$0xff]  ;;  %v15730_v28 = vld [vmem:[#allocation88_spill] sm:$0xff] }
 0x1d2   :  { %15698 = vst [vmem:[#allocation77_spill] sm:$0xff] %v9267_v4  ;;  %v15723_v4 = vld [vmem:[#allocation48_spill] sm:$0xff] }
 0x1d3   :  { %15700 = vst [vmem:[#allocation78_spill] sm:$0xff] %v9270_v38  ;;  %v2078_v38 = vrot.slane %v15663_v2, 2 }
 0x1d4   :  { %15702 = vst [vmem:[#allocation79_spill] sm:$0xff] %v9273_v1  ;;  %v2053_v1 = vsel %vm846_vm2, %v2052_v48, %v15667_v37  ;;  %v15726_v48 = vld [vmem:[#allocation84_spill] sm:$0xff] }
 0x1d5   :  { %15704 = vst [vmem:[#allocation81_spill] sm:$0xff] %v9276_v31  ;;  %v2051_v31 = vsel %vm846_vm2, %v2050_v20, %v15666_v5  ;;  %v15725_v20 = vld [vmem:[#allocation52_spill] sm:$0xff]  ;;  %v2100_v0 = vadd.f32 %v6563_v43, %v2053_v1 }
 0x1d6   :  { %15706 = vst [vmem:[#allocation82_spill] sm:$0xff] %v9279_v16  ;;  %v2049_v16 = vsel %vm846_vm2, %v2048_v35, %v15665_v47  ;;  %v2061_v47 = vsel %vm846_vm2, %v2060_v54, %v15723_v4  ;;  %v15724_v35 = vld [vmem:[#allocation56_spill] sm:$0xff]  ;;  %v2065_v37 = vsel %vm846_vm2, %v2064_v18, %v15725_v20  ;;  %v2079_v18 = vsel %vm846_vm2, %v2078_v38, %v15732_v24 }
 0x1d7   :  { %15708 = vst [vmem:[#allocation83_spill] sm:$0xff] %v9282_v13  ;;  %v2076_v13 = vrot.slane %v15661_v45, 2  ;;  %v2063_v5 = vsel %vm846_vm2, %v2062_v55, %v15724_v35  ;;  %v2096_v63 = vadd.f32 %v6561_v6, %v2049_v16  ;;  %v2108_v11 = vadd.f32 %v6567_v39, %v2061_v47  ;;  %v6573_v38 = vld [vmem:[%s14509_s2 + $0x68] sm:$0xff]  ;;  %v6574_v16 = vld [vmem:[%s14509_s2 + $0x78] sm:$0xff]  ;;  %v6577_v39 = vld [vmem:[%s14509_s2 + $0xa0] sm:$0xff] }
 0x1d8   :  { %15710 = vst [vmem:[#allocation8_spill] sm:$0xff] %v9285_v50  ;;  %v2074_v50 = vrot.slane %v15659_v9, 2  ;;  %v15722_v9 = vld [vmem:[#allocation38_spill] sm:$0xff]  ;;  %v2109_v1 = vadd.f32 %v6573_v38, %v15723_v4  ;;  %v2111_v6 = vadd.f32 %v6574_v16, %v15724_v35  ;;  %v6575_v43 = vld [vmem:[%s14509_s2 + $0x88] sm:$0xff] }
 0x1d9   :  { %15712 = vst [vmem:[#allocation16_spill] sm:$0xff] %v9288_v15  ;;  %v2072_v15 = vrot.slane %v15657_v53, 2  ;;  %v2059_v45 = vsel %vm846_vm2, %v2058_v41, %v15722_v9  ;;  %v2077_v55 = vsel %vm846_vm2, %v2076_v13, %v15731_v58  ;;  %v9411_v35 = vmul.f32 0.21300554, %v2096_v63  ;;  %v6588_v16 = vld [vmem:[%s14509_s2 + $0xf8] sm:$0xff] }
 0x1da   :  { %15714 = vst [vmem:[#allocation9_spill] sm:$0xff] %v9291_v34  ;;  %v2070_v34 = vrot.slane %v15655_v23, 2  ;;  %v15721_v23 = vld [vmem:[#allocation30_spill] sm:$0xff]  ;;  %v2075_v54 = vsel %vm846_vm2, %v2074_v50, %v15730_v28  ;;  %v2106_v46 = vadd.f32 %v6566_v30, %v2059_v45  ;;  %v6581_v45 = vld [vmem:[%s14509_s2 + $0xc0] sm:$0xff] }
 0x1db   :  { %15716 = vst [vmem:[#allocation73_spill] sm:$0xff] %v9294_v52  ;;  %v2068_v52 = vrot.slane %v15643_v40, 2  ;;  %v2055_v40 = vsel %vm846_vm2, %v2054_v12, %v15668_v62  ;;  %v2057_v53 = vsel %vm846_vm2, %v2056_v19, %v15721_v23  ;;  %v15728_v12 = vld [vmem:[#allocation86_spill] sm:$0xff]  ;;  %v2073_v41 = vsel %vm846_vm2, %v2072_v15, %v15729_v33 }
 0x1dc   :  { %15718 = vst [vmem:[#allocation44_spill] sm:$0xff] %v9297_v36  ;;  %v2071_v19 = vsel %vm846_vm2, %v2070_v34, %v15728_v12  ;;  %v2102_v21 = vadd.f32 %v6564_v27, %v2055_v40  ;;  %v6571_v34 = vld [vmem:[%s14509_s2 + $0x48] sm:$0xff]  ;;  %v6572_v50 = vld [vmem:[%s14509_s2 + $0x58] sm:$0xff]  ;;  %v2113_v27 = vadd.f32 %v6575_v43, %v15725_v20  ;;  %v2120_v47 = vadd.f32 %v6581_v45, %v2073_v41 }
 0x1dd   :  { %15720 = vst [vmem:[#allocation24_spill] sm:$0xff] %v9300_v22  ;;  %v6570_v22 = vld [vmem:[%s14509_s2 + $0x90] sm:$0xff]  ;;  %v2069_v62 = vsel %vm846_vm2, %v2068_v52, %v15727_v17  ;;  %v2104_v52 = vadd.f32 %v6565_v7, %v2057_v53  ;;  %v2105_v15 = vadd.f32 %v6571_v34, %v15721_v23  ;;  %v2107_v13 = vadd.f32 %v6572_v50, %v15722_v9  ;;  %v6576_v30 = vld [vmem:[%s14509_s2 + $0x98] sm:$0xff] }
 0x1de   :  { %v2066_v36 = vrot.slane %v6570_v22, 2  ;;  %v2115_v4 = vadd.f32 %v6576_v30, %v15726_v48  ;;  %v6580_v53 = vld [vmem:[%s14509_s2 + $0xb8] sm:$0xff]  ;;  %v9449_v34 = vmul.f32 0.21300554, %v2109_v1  ;;  %v9474_v30 = vmul.f32 0.21300554, %v2120_v47 }
 0x1df   :  { %v2119_v9 = vadd.f32 %v6580_v53, %v15728_v12  ;;  %v2133_v12 = vmul.f32 0.21300554, %v9168_v44  ;;  %v9438_v41 = vmul.f32 0.21300554, %v2105_v15  ;;  %v6585_v44 = vld [vmem:[%s14509_s2 + $0xe0] sm:$0xff] }
 0x1e0   :  { %v2067_v2 = vsel %vm846_vm2, %v2066_v36, %v15726_v48  ;;  %v2098_v36 = vadd.f32 %v6562_v25, %v2051_v31  ;;  %v2110_v31 = vadd.f32 %v6568_v42, %v2063_v5  ;;  %v2112_v25 = vadd.f32 %v6569_v49, %v2065_v37  ;;  %v6578_v49 = vld [vmem:[%s14509_s2 + $0xa8] sm:$0xff] }
 0x1e1   :  { %v2114_v7 = vadd.f32 %v6570_v22, %v2067_v2  ;;  %v2116_v42 = vadd.f32 %v6577_v39, %v2069_v62  ;;  %v2117_v40 = vadd.f32 %v6578_v49, %v15727_v17  ;;  %v6579_v22 = vld [vmem:[%s14509_s2 + $0xb0] sm:$0xff]  ;;  %v2129_v17 = vmul.f32 0.21300554, %v9149_v56  ;;  %v6582_v5 = vld [vmem:[%s14509_s2 + $0xc8] sm:$0xff] }
 0x1e2   :  { %v2118_v23 = vadd.f32 %v6579_v22, %v2071_v19  ;;  %v2121_v20 = vadd.f32 %v6582_v5, %v15729_v33  ;;  %v9418_v37 = vmul.f32 0.21300554, %v2098_v36  ;;  %v2131_v48 = vmul.f32 0.21300554, %v9162_v32  ;;  %v6583_v62 = vld [vmem:[%s14509_s2 + $0xd0] sm:$0xff]  ;;  %v6584_v33 = vld [vmem:[%s14509_s2 + $0xd8] sm:$0xff] }
 0x1e3   :  { %v9421_v2 = vmul.f32 0.21300554, %v2100_v0  ;;  %v2122_v63 = vadd.f32 %v6583_v62, %v2075_v54  ;;  %v9427_v56 = vmul.f32 0.21300554, %v2102_v21  ;;  %v9430_v19 = vmul.f32 0.21300554, %v9175_v14 }
 0x1e4   :  { %v2123_v32 = vadd.f32 %v6584_v33, %v15730_v28  ;;  %v9436_v0 = vmul.f32 0.21300554, %v2104_v52  ;;  %v9440_v36 = vmul.f32 0.21300554, %v2106_v46  ;;  %v2124_v21 = vadd.f32 %v6585_v44, %v2077_v55  ;;  %v6586_v28 = vld [vmem:[%s14509_s2 + $0xe8] sm:$0xff]  ;;  %v6587_v55 = vld [vmem:[%s14509_s2 + $0xf0] sm:$0xff] }
 0x1e5   :  { %v9445_v54 = vmul.f32 0.21300554, %v2107_v13  ;;  %v9447_v14 = vmul.f32 0.21300554, %v2108_v11  ;;  %v2125_v52 = vadd.f32 %v6586_v28, %v15731_v58  ;;  %v9455_v15 = vmul.f32 0.21300554, %v2110_v31 }
 0x1e6   :  { %v9457_v46 = vmul.f32 0.21300554, %v2111_v6  ;;  %v9459_v50 = vmul.f32 0.21300554, %v2112_v25  ;;  %v2126_v11 = vadd.f32 %v6587_v55, %v2079_v18  ;;  %v2145_v13 = vmul.f32 0.21300554, %v2113_v27 }
 0x1e7   :  { %v9464_v38 = vmul.f32 0.21300554, %v2114_v7  ;;  %v2147_v1 = vmul.f32 0.21300554, %v2115_v4  ;;  %v2127_v58 = vadd.f32 %v6588_v16, %v15732_v24  ;;  %v9470_v31 = vmul.f32 0.21300554, %v2116_v42 }
 0x1e8   :  { %v2149_v6 = vmul.f32 0.21300554, %v2117_v40  ;;  %v9472_v25 = vmul.f32 0.21300554, %v2118_v23  ;;  %v2151_v43 = vmul.f32 0.21300554, %v2119_v9 }
 0x1e9   :  { %v2192_v18 = vrot.slane %v9411_v35, 7  ;;  %v2193_v27 = vrot.slane %v2129_v17, 7  ;;  %v2195_v7 = vrot.slane %v9418_v37, 7  ;;  %v2196_v4 = vrot.slane %v2131_v48, 7  ;;  %v15733_v22 = vld [vmem:[#allocation10_spill] sm:$0xff]  ;;  %v15735_v9 = vld [vmem:[#allocation11_spill] sm:$0xff] }
 0x1ea   :  { %v2198_v39 = vrot.slane %v9421_v2, 7  ;;  %v2199_v49 = vrot.slane %v2133_v12, 7  ;;  %v15734_v24 = vrot.slane %v9164_v59, 6  ;;  %v2153_v40 = vmul.f32 0.21300554, %v2121_v20 }
 0x1eb   :  { %v9484_v23 = vmul.f32 0.21300554, %v2122_v63  ;;  %v2155_v53 = vmul.f32 0.21300554, %v2123_v32  ;;  %v9488_v45 = vadd.f32 %v9216_v26, %v15735_v9  ;;  %v9490_v47 = vmul.f32 0.21300554, %v2124_v21 }
 0x1ec   :  { %v9482_v42 = vadd.f32 %v15734_v24, %v15733_v22  ;;  %v2157_v35 = vmul.f32 0.21300554, %v2125_v52  ;;  %v9492_v17 = vmul.f32 0.21300554, %v2126_v11  ;;  %v2159_v5 = vmul.f32 0.21300554, %v2127_v58 }
 0x1ed   :  { %v2194_v37 = vsel %vm991_vm3, %v2192_v18, %v2193_v27  ;;  %v2201_v59 = vrot.slane %v9427_v56, 7  ;;  %v2202_v48 = vrot.slane %v9430_v19, 7  ;;  %v2197_v20 = vsel %vm991_vm3, %v2195_v7, %v2196_v4 }
 0x1ee   :  { %v2200_v2 = vsel %vm991_vm3, %v2198_v39, %v2199_v49  ;;  %v2204_v62 = vrot.slane %v9436_v0, 7  ;;  %v2205_v26 = vrot.slane %v9438_v41, 7  ;;  %v2207_v63 = vrot.slane %v9440_v36, 7 }
 0x1ef   :  { %v2208_v12 = vrot.slane %v9445_v54, 7  ;;  %v2210_v33 = vrot.slane %v9447_v14, 7  ;;  %v2211_v32 = vrot.slane %v9449_v34, 7  ;;  %v2213_v56 = vrot.slane %v9455_v15, 7 }
 0x1f0   :  { %v2214_v19 = vrot.slane %v9457_v46, 7  ;;  %v2216_v44 = vrot.slane %v9459_v50, 7  ;;  %v2217_v21 = vrot.slane %v2145_v13, 7  ;;  %v2219_v28 = vrot.slane %v9464_v38, 7 }
 0x1f1   :  { %v2220_v0 = vrot.slane %v2147_v1, 7  ;;  %v2222_v41 = vrot.slane %v9470_v31, 7  ;;  %v2223_v52 = vrot.slane %v2149_v6, 7  ;;  %v2225_v36 = vrot.slane %v9472_v25, 7 }
 0x1f2   :  { %v2226_v54 = vrot.slane %v2151_v43, 7  ;;  %v2228_v14 = vrot.slane %v9474_v30, 7  ;;  %v2229_v55 = vrot.slane %v2153_v40, 7  ;;  %v2231_v34 = vrot.slane %v9484_v23, 7 }
 0x1f3   :  { %v2232_v15 = vrot.slane %v2155_v53, 7  ;;  %v2234_v46 = vrot.slane %v9490_v47, 7  ;;  %v2235_v11 = vrot.slane %v2157_v35, 7  ;;  %v2203_v50 = vsel %vm991_vm3, %v2201_v59, %v2202_v48  ;;  %v15744_v48 = vld [vmem:[#allocation69_spill] sm:$0xff] }
 0x1f4   :  { %v2206_v13 = vsel %vm991_vm3, %v2204_v62, %v2205_v26  ;;  %v2237_v38 = vrot.slane %v9492_v17, 7  ;;  %v2238_v1 = vrot.slane %v2159_v5, 7  ;;  %v2209_v16 = vsel %vm991_vm3, %v2207_v63, %v2208_v12  ;;  %v15737_v17 = vld [vmem:[#allocation80_spill] sm:$0xff]  ;;  %v15748_v26 = vld [vmem:[#allocation71_spill] sm:$0xff]  ;;  %v15750_v12 = vld [vmem:[#allocation77_spill] sm:$0xff] }
 0x1f5   :  { %v2212_v58 = vsel %vm991_vm3, %v2210_v33, %v2211_v32  ;;  %v2215_v31 = vsel %vm991_vm3, %v2213_v56, %v2214_v19  ;;  %v2218_v6 = vsel %vm991_vm3, %v2216_v44, %v2217_v21  ;;  %v2221_v25 = vsel %vm991_vm3, %v2219_v28, %v2220_v0  ;;  %v15752_v21 = vld [vmem:[#allocation79_spill] sm:$0xff] }
 0x1f6   :  { %v2224_v43 = vsel %vm991_vm3, %v2222_v41, %v2223_v52  ;;  %v2227_v30 = vsel %vm991_vm3, %v2225_v36, %v2226_v54  ;;  %v2230_v27 = vsel %vm991_vm3, %v2228_v14, %v2229_v55  ;;  %v2233_v4 = vsel %vm991_vm3, %v2231_v34, %v2232_v15  ;;  %v15754_v54 = vld [vmem:[#allocation82_spill] sm:$0xff] }
 0x1f7   :  { %v2236_v49 = vsel %vm991_vm3, %v2234_v46, %v2235_v11  ;;  %v2272_v22 = vadd.f32 %v2192_v18, %v9208_v10  ;;  %v2273_v24 = vadd.f32 %v2194_v37, %v9211_v29  ;;  %v2239_v40 = vsel %vm991_vm3, %v2237_v38, %v2238_v1  ;;  %v15736_v29 = vld [vmem:[#allocation25_spill] sm:$0xff]  ;;  %v15756_v11 = vld [vmem:[#allocation8_spill] sm:$0xff] }
 0x1f8   :  { %v2274_v23 = vadd.f32 %v2195_v7, %v9219_v57  ;;  %v9532_v53 = vadd.f32 %v2197_v20, %v9222_v60  ;;  %v9535_v9 = vadd.f32 %v2198_v39, %v9225_v8  ;;  %v9538_v47 = vadd.f32 %v2200_v2, %v9228_v3  ;;  %v15738_v60 = vld [vmem:[#allocation55_spill] sm:$0xff]  ;;  %v15739_v8 = vld [vmem:[#allocation57_spill] sm:$0xff]  ;;  %v15740_v3 = vld [vmem:[#allocation74_spill] sm:$0xff] }
 0x1f9   :  { %v9541_v35 = vadd.f32 %v2201_v59, %v9231_v61  ;;  %v9544_v10 = vadd.f32 %v2203_v50, %v9234_v51  ;;  %v9547_v18 = vadd.f32 %v2204_v62, %v15736_v29  ;;  %v9550_v57 = vadd.f32 %v2206_v13, %v15737_v17  ;;  %v15741_v61 = vld [vmem:[#allocation75_spill] sm:$0xff]  ;;  %v15742_v51 = vld [vmem:[#allocation28_spill] sm:$0xff]  ;;  %v15746_v2 = vld [vmem:[#allocation70_spill] sm:$0xff] }
 0x1fa   :  { %v9553_v7 = vadd.f32 %v2207_v63, %v15738_v60  ;;  %v9556_v39 = vadd.f32 %v2209_v16, %v15739_v8  ;;  %v9559_v5 = vadd.f32 %v2210_v33, %v15740_v3  ;;  %v9562_v37 = vadd.f32 %v2212_v58, %v15741_v61  ;;  %v15751_v33 = vld [vmem:[#allocation78_spill] sm:$0xff]  ;;  %v15759_v1 = vld [vmem:[#allocation9_spill] sm:$0xff] }
 0x1fb   :  { %v9565_v59 = vadd.f32 %v2213_v56, %v15742_v51  ;;  %v9568_v20 = vadd.f32 %v2215_v31, %v15744_v48  ;;  %v9571_v62 = vadd.f32 %v2216_v44, %v15746_v2  ;;  %v9574_v63 = vadd.f32 %v2218_v6, %v15748_v26  ;;  %v15753_v56 = vld [vmem:[#allocation81_spill] sm:$0xff]  ;;  %v15755_v44 = vld [vmem:[#allocation83_spill] sm:$0xff]  ;;  %v15763_v31 = vld [vmem:[#allocation44_spill] sm:$0xff] }
 0x1fc   :  { %v9577_v32 = vadd.f32 %v2219_v28, %v15750_v12  ;;  %v9580_v19 = vadd.f32 %v2221_v25, %v15751_v33  ;;  %v9583_v0 = vadd.f32 %v2222_v41, %v15752_v21  ;;  %v9586_v52 = vadd.f32 %v2224_v43, %v15753_v56  ;;  %v15757_v28 = vld [vmem:[#allocation16_spill] sm:$0xff]  ;;  %v15761_v41 = vld [vmem:[#allocation73_spill] sm:$0xff] }
 0x1fd   :  { %15743 = vst [vmem:[#allocation31_spill] sm:$0xff] %v9565_v59  ;;  %v9589_v55 = vadd.f32 %v2225_v36, %v15754_v54  ;;  %v9592_v15 = vadd.f32 %v2227_v30, %v15755_v44  ;;  %v9595_v50 = vadd.f32 %v2228_v14, %v15756_v11  ;;  %v9598_v13 = vadd.f32 %v2230_v27, %v15757_v28  ;;  %v15764_v25 = vld [vmem:[#allocation24_spill] sm:$0xff]  ;;  %v15765_v56 = vld [vmem:[#allocation49_spill] sm:$0xff] }
 0x1fe   :  { %15745 = vst [vmem:[#allocation35_spill] sm:$0xff] %v9568_v20  ;;  %v9601_v16 = vadd.f32 %v2231_v34, %v15759_v1  ;;  %v9604_v58 = vadd.f32 %v2233_v4, %v15761_v41  ;;  %v2300_v6 = vadd.f32 %v2234_v46, %v15763_v31  ;;  %v2301_v36 = vadd.f32 %v2236_v49, %v15764_v25  ;;  %v15766_v54 = vld [vmem:[#allocation12_spill] sm:$0xff] }
 0x1ff   :  { %15747 = vst [vmem:[#allocation39_spill] sm:$0xff] %v9571_v62  ;;  %v2302_v43 = vadd.f32 %v2237_v38, %v9482_v42  ;;  %v2303_v30 = vadd.f32 %v2239_v40, %v9488_v45  ;;  %v2304_v14 = vmul.f32 0.26601171, %v9553_v7  ;;  %v2305_v29 = vmul.f32 0.26601171, %v9556_v39 }
 0x200   :  { %15749 = vst [vmem:[#allocation46_spill] sm:$0xff] %v9574_v63  ;;  %v2306_v27 = vmul.f32 0.26601171, %v9559_v5  ;;  %v2307_v34 = vmul.f32 0.26601171, %v9562_v37  ;;  %v2316_v17 = vadd.f32 %v9583_v0, %v2272_v22  ;;  %v2317_v49 = vadd.f32 %v9586_v52, %v2273_v24 }
 0x201   :  { %15758 = vst [vmem:[#allocation50_spill] sm:$0xff] %v9598_v13  ;;  %v2308_v4 = vmul.f32 0.26601171, %v9565_v59  ;;  %v2309_v46 = vmul.f32 0.26601171, %v9568_v20  ;;  %v2318_v42 = vadd.f32 %v9589_v55, %v2274_v23  ;;  %v2319_v40 = vadd.f32 %v9592_v15, %v9532_v53 }
 0x202   :  { %15760 = vst [vmem:[#allocation54_spill] sm:$0xff] %v9601_v16  ;;  %v2310_v45 = vmul.f32 0.26601171, %v9571_v62  ;;  %v2311_v38 = vmul.f32 0.26601171, %v9574_v63  ;;  %v2320_v60 = vadd.f32 %v9595_v50, %v9535_v9  ;;  %v2321_v3 = vadd.f32 %v9598_v13, %v9538_v47 }
 0x203   :  { %15762 = vst [vmem:[#allocation23_spill] sm:$0xff] %v9604_v58  ;;  %v2312_v22 = vmul.f32 0.26601171, %v9577_v32  ;;  %v2313_v8 = vmul.f32 0.26601171, %v9580_v19  ;;  %v2322_v24 = vadd.f32 %v9601_v16, %v9541_v35  ;;  %v2323_v61 = vadd.f32 %v9604_v58, %v9544_v10 }
 0x204   :  { %v2324_v51 = vadd.f32 %v2300_v6, %v9547_v18  ;;  %v2325_v48 = vadd.f32 %v2301_v36, %v9550_v57  ;;  %v2328_v2 = vmul.f32 0.0010283801, %v2316_v17  ;;  %v2326_v26 = vadd.f32 %v2302_v43, %v9553_v7 }
 0x205   :  { %v2327_v12 = vadd.f32 %v2303_v30, %v9556_v39  ;;  %v2329_v33 = vmul.f32 0.0010283801, %v2317_v49  ;;  %v2330_v21 = vmul.f32 0.0010283801, %v2318_v42  ;;  %v9639_v44 = vadd.f32 %v15766_v54, %v15765_v56 }
 0x206   :  { %v2314_v11 = vmul.f32 0.26601171, %v9583_v0  ;;  %v2331_v28 = vmul.f32 0.0010283801, %v2319_v40  ;;  %v2332_v1 = vmul.f32 0.0010283801, %v2320_v60  ;;  %v2352_v17 = vadd.f32 %v9577_v32, %v2274_v23 }
 0x207   :  { %15767 = vst [vmem:[#allocation41_spill] sm:$0xff] %v9639_v44  ;;  %v2315_v41 = vmul.f32 0.26601171, %v9586_v52  ;;  %v2333_v31 = vmul.f32 0.0010283801, %v2321_v3  ;;  %v2340_v30 = vadd.f32 %v2328_v2, %v2304_v14  ;;  %v2341_v63 = vadd.f32 %v2329_v33, %v2305_v29 }
 0x208   :  { %v2334_v25 = vmul.f32 0.0010283801, %v2322_v24  ;;  %v2335_v20 = vmul.f32 0.0010283801, %v2323_v61  ;;  %v2336_v43 = vmul.f32 0.0010283801, %v2324_v51  ;;  %v2342_v62 = vadd.f32 %v2330_v21, %v2306_v27 }
 0x209   :  { %v2337_v59 = vmul.f32 0.0010283801, %v2325_v48  ;;  %v2338_v49 = vmul.f32 0.0010283801, %v2326_v26  ;;  %v2339_v42 = vmul.f32 0.0010283801, %v2327_v12  ;;  %v2343_v56 = vadd.f32 %v2331_v28, %v2307_v34 }
 0x20a   :  { %v2344_v54 = vadd.f32 %v2332_v1, %v2308_v4  ;;  %v2353_v40 = vadd.f32 %v9580_v19, %v9532_v53  ;;  %v2354_v60 = vadd.f32 %v9583_v0, %v9535_v9  ;;  %v2345_v3 = vadd.f32 %v2333_v31, %v2309_v46  ;;  %v15768_v1 = vld [vmem:[#allocation39_spill] sm:$0xff] }
 0x20b   :  { %v2346_v24 = vadd.f32 %v2334_v25, %v2310_v45  ;;  %v2355_v23 = vadd.f32 %v9586_v52, %v9538_v47  ;;  %v2356_v14 = vadd.f32 %v9589_v55, %v9541_v35  ;;  %v2347_v61 = vadd.f32 %v2335_v20, %v2311_v38 }
 0x20c   :  { %v2348_v51 = vadd.f32 %v2336_v43, %v2312_v22  ;;  %v2357_v29 = vadd.f32 %v9592_v15, %v9544_v10  ;;  %v2358_v27 = vadd.f32 %v9595_v50, %v9547_v18  ;;  %v2359_v53 = vadd.f32 %v9598_v13, %v9550_v57 }
 0x20d   :  { %v2360_v34 = vadd.f32 %v9601_v16, %v9553_v7  ;;  %v2361_v4 = vadd.f32 %v9604_v58, %v9556_v39  ;;  %v2364_v46 = vmul.f32 0.007598758, %v2352_v17  ;;  %v2362_v45 = vadd.f32 %v2300_v6, %v9559_v5 }
 0x20e   :  { %v2363_v20 = vadd.f32 %v2301_v36, %v9562_v37  ;;  %v2365_v38 = vmul.f32 0.007598758, %v2353_v40  ;;  %v2366_v22 = vmul.f32 0.007598758, %v2354_v60  ;;  %v2349_v48 = vadd.f32 %v2337_v59, %v2313_v8  ;;  %v15769_v59 = vld [vmem:[#allocation46_spill] sm:$0xff] }
 0x20f   :  { %v2350_v2 = vadd.f32 %v2338_v49, %v2314_v11  ;;  %v2367_v26 = vmul.f32 0.007598758, %v2355_v23  ;;  %v2368_v12 = vmul.f32 0.007598758, %v2356_v14  ;;  %v2351_v33 = vadd.f32 %v2339_v42, %v2315_v41  ;;  %v15770_v23 = vld [vmem:[#allocation31_spill] sm:$0xff]  ;;  %v15771_v14 = vld [vmem:[#allocation54_spill] sm:$0xff] }
 0x210   :  { %v2369_v21 = vmul.f32 0.007598758, %v2357_v29  ;;  %v2370_v28 = vmul.f32 0.007598758, %v2358_v27  ;;  %v2388_v31 = vadd.f32 %v15768_v1, %v9535_v9  ;;  %v2371_v25 = vmul.f32 0.007598758, %v2359_v53 }
 0x211   :  { %v2372_v43 = vmul.f32 0.007598758, %v2360_v34  ;;  %v2373_v44 = vmul.f32 0.007598758, %v2361_v4  ;;  %v2376_v17 = vadd.f32 %v2364_v46, %v2340_v30  ;;  %v2374_v58 = vmul.f32 0.007598758, %v2362_v45 }
 0x212   :  { %v2375_v6 = vmul.f32 0.007598758, %v2363_v20  ;;  %v2377_v16 = vadd.f32 %v2365_v38, %v2341_v63  ;;  %v2378_v36 = vadd.f32 %v2366_v22, %v2342_v62  ;;  %v2379_v40 = vadd.f32 %v2367_v26, %v2343_v56  ;;  %v15772_v29 = vld [vmem:[#allocation35_spill] sm:$0xff] }
 0x213   :  { %v2380_v60 = vadd.f32 %v2368_v12, %v2344_v54  ;;  %v2389_v8 = vadd.f32 %v15769_v59, %v9538_v47  ;;  %v2390_v11 = vadd.f32 %v9577_v32, %v9541_v35  ;;  %v2381_v41 = vadd.f32 %v2369_v21, %v2345_v3  ;;  %v15773_v27 = vld [vmem:[#allocation23_spill] sm:$0xff] }
 0x214   :  { %v2382_v49 = vadd.f32 %v2370_v28, %v2346_v24  ;;  %v2391_v9 = vadd.f32 %v9580_v19, %v9544_v10  ;;  %v2392_v30 = vadd.f32 %v9583_v0, %v9547_v18  ;;  %v2383_v42 = vadd.f32 %v2371_v25, %v2347_v61 }
 0x215   :  { %v2393_v62 = vadd.f32 %v9586_v52, %v9550_v57  ;;  %v2394_v63 = vadd.f32 %v9589_v55, %v9553_v7  ;;  %v2395_v47 = vadd.f32 %v9592_v15, %v9556_v39  ;;  %v2384_v56 = vadd.f32 %v2372_v43, %v2348_v51 }
 0x216   :  { %v2396_v54 = vadd.f32 %v9595_v50, %v9559_v5  ;;  %v2397_v3 = vadd.f32 %v9598_v13, %v9562_v37  ;;  %v2400_v24 = vmul.f32 0.036000773, %v2388_v31  ;;  %v2398_v61 = vadd.f32 %v15771_v14, %v15770_v23 }
 0x217   :  { %v2399_v53 = vadd.f32 %v15773_v27, %v15772_v29  ;;  %v2401_v34 = vmul.f32 0.036000773, %v2389_v8  ;;  %v2402_v4 = vmul.f32 0.036000773, %v2390_v11  ;;  %v2385_v46 = vadd.f32 %v2373_v44, %v2349_v48 }
 0x218   :  { %v2386_v45 = vadd.f32 %v2374_v58, %v2350_v2  ;;  %v2403_v20 = vmul.f32 0.036000773, %v2391_v9  ;;  %v2404_v38 = vmul.f32 0.036000773, %v2392_v30  ;;  %v2387_v51 = vadd.f32 %v2375_v6, %v2351_v33  ;;  %v15774_v9 = vld [vmem:[#allocation50_spill] sm:$0xff] }
 0x219   :  { %v2405_v22 = vmul.f32 0.036000773, %v2393_v62  ;;  %v2406_v26 = vmul.f32 0.036000773, %v2394_v63  ;;  %v2407_v12 = vmul.f32 0.036000773, %v2395_v47  ;;  %v2412_v25 = vadd.f32 %v2400_v24, %v2376_v17 }
 0x21a   :  { %v2408_v21 = vmul.f32 0.036000773, %v2396_v54  ;;  %v2409_v28 = vmul.f32 0.036000773, %v2397_v3  ;;  %v2424_v31 = vadd.f32 %v15770_v23, %v9541_v35  ;;  %v2410_v43 = vmul.f32 0.036000773, %v2398_v61 }
 0x21b   :  { %v2411_v14 = vmul.f32 0.036000773, %v2399_v53  ;;  %v2413_v13 = vadd.f32 %v2401_v34, %v2377_v16  ;;  %v2414_v27 = vadd.f32 %v2402_v4, %v2378_v36  ;;  %v2415_v8 = vadd.f32 %v2403_v20, %v2379_v40 }
 0x21c   :  { %v2416_v11 = vadd.f32 %v2404_v38, %v2380_v60  ;;  %v2425_v58 = vadd.f32 %v15772_v29, %v9544_v10  ;;  %v2426_v44 = vadd.f32 %v15768_v1, %v9547_v18  ;;  %v2417_v48 = vadd.f32 %v2405_v22, %v2381_v41 }
 0x21d   :  { %v2418_v2 = vadd.f32 %v2406_v26, %v2382_v49  ;;  %v2419_v33 = vadd.f32 %v2407_v12, %v2383_v42  ;;  %v2427_v17 = vadd.f32 %v15769_v59, %v9550_v57  ;;  %v2420_v6 = vadd.f32 %v2408_v21, %v2384_v56 }
 0x21e   :  { %v2428_v35 = vadd.f32 %v9577_v32, %v9553_v7  ;;  %v2429_v16 = vadd.f32 %v9580_v19, %v9556_v39  ;;  %v2430_v36 = vadd.f32 %v9583_v0, %v9559_v5  ;;  %v2431_v10 = vadd.f32 %v9586_v52, %v9562_v37 }
 0x21f   :  { %v2432_v40 = vadd.f32 %v9589_v55, %v15770_v23  ;;  %v2433_v60 = vadd.f32 %v9592_v15, %v15772_v29  ;;  %v2436_v41 = vmul.f32 0.10936069, %v2424_v31  ;;  %v2434_v49 = vadd.f32 %v9595_v50, %v15768_v1 }
 0x220   :  { %v2435_v30 = vadd.f32 %v15774_v9, %v15769_v59  ;;  %v2437_v42 = vmul.f32 0.10936069, %v2425_v58  ;;  %v2438_v62 = vmul.f32 0.10936069, %v2426_v44  ;;  %v2421_v63 = vadd.f32 %v2409_v28, %v2385_v46 }
 0x221   :  { %v2422_v47 = vadd.f32 %v2410_v43, %v2386_v45  ;;  %v2423_v56 = vadd.f32 %v2411_v14, %v2387_v51  ;;  %v2439_v54 = vmul.f32 0.10936069, %v2427_v17  ;;  %v2440_v3 = vmul.f32 0.10936069, %v2428_v35 }
 0x222   :  { %v2441_v24 = vmul.f32 0.10936069, %v2429_v16  ;;  %v2442_v61 = vmul.f32 0.10936069, %v2430_v36  ;;  %v2460_v53 = vadd.f32 %v9559_v5, %v9547_v18  ;;  %v2443_v34 = vmul.f32 0.10936069, %v2431_v10 }
 0x223   :  { %v2444_v4 = vmul.f32 0.10936069, %v2432_v40  ;;  %v2445_v20 = vmul.f32 0.10936069, %v2433_v60  ;;  %v2448_v38 = vadd.f32 %v2436_v41, %v2412_v25  ;;  %v2446_v50 = vmul.f32 0.10936069, %v2434_v49 }
 0x224   :  { %v2447_v22 = vmul.f32 0.10936069, %v2435_v30  ;;  %v2449_v26 = vadd.f32 %v2437_v42, %v2413_v13  ;;  %v2450_v12 = vadd.f32 %v2438_v62, %v2414_v27  ;;  %v2451_v21 = vadd.f32 %v2439_v54, %v2415_v8  ;;  %v6590_v49 = vld [vmem:[%s14508_s1 + $0x8] sm:$0xff]  ;;  %v6591_v30 = vld [vmem:[%s14508_s1 + $0x10] sm:$0xff]  ;;  %v6592_v62 = vld [vmem:[%s14508_s1 + $0x18] sm:$0xff] }
 0x225   :  { %v2461_v46 = vadd.f32 %v9562_v37, %v9550_v57  ;;  %v2462_v45 = vadd.f32 %v15770_v23, %v9553_v7  ;;  %v2463_v51 = vadd.f32 %v15772_v29, %v9556_v39  ;;  %v2452_v28 = vadd.f32 %v2440_v3, %v2416_v11  ;;  %v6594_v54 = vld [vmem:[%s14508_s1 + $0x28] sm:$0xff] }
 0x226   :  { %v2464_v18 = vadd.f32 %v15768_v1, %v9559_v5  ;;  %v2465_v25 = vadd.f32 %v15769_v59, %v9562_v37  ;;  %v2466_v13 = vadd.f32 %v9577_v32, %v15770_v23  ;;  %v2453_v31 = vadd.f32 %v2441_v24, %v2417_v48  ;;  %v6595_v24 = vld [vmem:[%s14508_s1 + $0x30] sm:$0xff] }
 0x227   :  { %v2454_v43 = vadd.f32 %v2442_v61, %v2418_v2  ;;  %v2467_v57 = vadd.f32 %v9580_v19, %v15772_v29  ;;  %v2468_v7 = vadd.f32 %v9583_v0, %v15768_v1  ;;  %v2455_v14 = vadd.f32 %v2443_v34, %v2419_v33 }
 0x228   :  { %v2469_v39 = vadd.f32 %v9586_v52, %v15769_v59  ;;  %v2470_v5 = vadd.f32 %v9589_v55, %v9577_v32  ;;  %v2472_v27 = vmul.f32 0.21300554, %v2460_v53  ;;  %v2471_v37 = vadd.f32 %v9592_v15, %v9580_v19  ;;  %v6589_v19 = vld [vmem:[%s14508_s1] sm:$0xff]  ;;  %v6596_v53 = vld [vmem:[%s14508_s1 + $0x38] sm:$0xff] }
 0x229   :  { %v2473_v23 = vmul.f32 0.21300554, %v2461_v46  ;;  %v2474_v8 = vmul.f32 0.21300554, %v2462_v45  ;;  %v2475_v11 = vmul.f32 0.21300554, %v2463_v51  ;;  %v2456_v58 = vadd.f32 %v2444_v4, %v2420_v6 }
 0x22a   :  { %v2476_v44 = vmul.f32 0.21300554, %v2464_v18  ;;  %v2477_v29 = vmul.f32 0.21300554, %v2465_v25  ;;  %v2478_v48 = vmul.f32 0.21300554, %v2466_v13  ;;  %v9736_v2 = vadd.f32 %v2445_v20, %v2421_v63 }
 0x22b   :  { %v9738_v0 = vadd.f32 %v2446_v50, %v2422_v47  ;;  %v2479_v1 = vmul.f32 0.21300554, %v2467_v57  ;;  %v2480_v52 = vmul.f32 0.21300554, %v2468_v7  ;;  %v9740_v59 = vadd.f32 %v2447_v22, %v2423_v56  ;;  %v6593_v47 = vld [vmem:[%s14508_s1 + $0x20] sm:$0xff]  ;;  %v6599_v22 = vld [vmem:[%s14508_s1 + $0x50] sm:$0xff] }
 0x22c   :  { %15775 = vst [vmem:[#allocation26_spill] sm:$0xff] %v9736_v2  ;;  %v9742_v32 = vmul.f32 0.21300554, %v2469_v39  ;;  %v9744_v55 = vadd.f32 %v2472_v27, %v2448_v38  ;;  %v9749_v15 = vmul.f32 %v6589_v19, %v6589_v19  ;;  %v9751_v33 = vmul.f32 0.21300554, %v2470_v5  ;;  %v6597_v4 = vld [vmem:[%s14508_s1 + $0x40] sm:$0xff] }
 0x22d   :  { %15776 = vst [vmem:[#allocation34_spill] sm:$0xff] %v9738_v0  ;;  %v9753_v17 = vmul.f32 0.21300554, %v2471_v37  ;;  %v9755_v6 = vadd.f32 %v2473_v23, %v2449_v26  ;;  %v9757_v35 = vadd.f32 %v2474_v8, %v2450_v12  ;;  %v9759_v16 = vadd.f32 %v2475_v11, %v2451_v21  ;;  %v6598_v38 = vld [vmem:[%s14508_s1 + $0x48] sm:$0xff]  ;;  %v6600_v12 = vld [vmem:[%s14508_s1 + $0x58] sm:$0xff]  ;;  %v6601_v46 = vld [vmem:[%s14508_s1 + $0x60] sm:$0xff] }
 0x22e   :  { %15777 = vst [vmem:[#allocation13_spill] sm:$0xff] %v9740_v59  ;;  %v9761_v36 = vadd.f32 %v2476_v44, %v2452_v28  ;;  %v9763_v10 = vadd.f32 %v2477_v29, %v2453_v31  ;;  %v9765_v40 = vadd.f32 %v2478_v48, %v2454_v43  ;;  %v9767_v60 = vadd.f32 %v2479_v1, %v2455_v14  ;;  %v6602_v51 = vld [vmem:[%s14508_s1 + $0x68] sm:$0xff]  ;;  %v6603_v18 = vld [vmem:[%s14508_s1 + $0x70] sm:$0xff]  ;;  %v6604_v13 = vld [vmem:[%s14508_s1 + $0x78] sm:$0xff] }
 0x22f   :  { %15778 = vst [vmem:[#allocation36_spill] sm:$0xff] %v9742_v32  ;;  %v9769_v41 = vadd.f32 %v2480_v52, %v2456_v58  ;;  %v9774_v9 = vmul.f32 %v6590_v49, %v6590_v49  ;;  %v9779_v42 = vmul.f32 %v6591_v30, %v6591_v30  ;;  %v9784_v63 = vmul.f32 %v6592_v62, %v6592_v62  ;;  %v6605_v43 = vld [vmem:[%s14508_s1 + $0x80] sm:$0xff]  ;;  %v6606_v7 = vld [vmem:[%s14508_s1 + $0x88] sm:$0xff]  ;;  %v6607_v39 = vld [vmem:[%s14508_s1 + $0x90] sm:$0xff] }
 0x230   :  { %15779 = vst [vmem:[#allocation27_spill] sm:$0xff] %v9744_v55  ;;  %v9789_v56 = vmul.f32 %v6593_v47, %v6593_v47  ;;  %v9794_v3 = vmul.f32 %v6594_v54, %v6594_v54  ;;  %v9799_v61 = vmul.f32 %v6595_v24, %v6595_v24  ;;  %v9804_v34 = vmul.f32 %v6596_v53, %v6596_v53  ;;  %v6608_v27 = vld [vmem:[%s14508_s1 + $0x98] sm:$0xff]  ;;  %v6609_v23 = vld [vmem:[%s14508_s1 + $0xa0] sm:$0xff]  ;;  %v6610_v11 = vld [vmem:[%s14508_s1 + $0xa8] sm:$0xff] }
 0x231   :  { %15780 = vst [vmem:[#allocation43_spill] sm:$0xff] %v9749_v15  ;;  %v9809_v20 = vmul.f32 %v6597_v4, %v6597_v4  ;;  %v9814_v50 = vmul.f32 %v6598_v38, %v6598_v38  ;;  %v9819_v26 = vmul.f32 %v6599_v22, %v6599_v22  ;;  %v9824_v21 = vmul.f32 %v6600_v12, %v6600_v12  ;;  %v6611_v44 = vld [vmem:[%s14508_s1 + $0xb0] sm:$0xff]  ;;  %v6612_v48 = vld [vmem:[%s14508_s1 + $0xb8] sm:$0xff]  ;;  %v6613_v52 = vld [vmem:[%s14508_s1 + $0xc0] sm:$0xff] }
 0x232   :  { %15781 = vst [vmem:[#allocation14_spill] sm:$0xff] %v9751_v33  ;;  %v9829_v45 = vmul.f32 %v6601_v46, %v6601_v46  ;;  %v9834_v28 = vmul.f32 %v6602_v51, %v6602_v51  ;;  %v9839_v25 = vmul.f32 %v6603_v18, %v6603_v18  ;;  %v9844_v31 = vmul.f32 %v6604_v13, %v6604_v13  ;;  %v6614_v49 = vld [vmem:[%s14508_s1 + $0xc8] sm:$0xff]  ;;  %v6615_v62 = vld [vmem:[%s14508_s1 + $0xd0] sm:$0xff]  ;;  %v6616_v54 = vld [vmem:[%s14508_s1 + $0xd8] sm:$0xff] }
 0x233   :  { %15782 = vst [vmem:[#allocation51_spill] sm:$0xff] %v9753_v17  ;;  %v9849_v57 = vmul.f32 %v6605_v43, %v6605_v43  ;;  %v9854_v14 = vmul.f32 %v6606_v7, %v6606_v7  ;;  %v9859_v5 = vmul.f32 %v6607_v39, %v6607_v39  ;;  %v9864_v37 = vmul.f32 %v6608_v27, %v6608_v27  ;;  %v6617_v53 = vld [vmem:[%s14508_s1 + $0xe0] sm:$0xff]  ;;  %v6618_v38 = vld [vmem:[%s14508_s1 + $0xe8] sm:$0xff]  ;;  %v6619_v12 = vld [vmem:[%s14508_s1 + $0xf0] sm:$0xff] }
 0x234   :  { %15783 = vst [vmem:[#allocation20_spill] sm:$0xff] %v9755_v6  ;;  %v9869_v8 = vmul.f32 %v6609_v23, %v6609_v23  ;;  %v9874_v58 = vmul.f32 %v6610_v11, %v6610_v11  ;;  %v9879_v29 = vmul.f32 %v6611_v44, %v6611_v44  ;;  %v9884_v1 = vmul.f32 %v6612_v48, %v6612_v48  ;;  %v6620_v51 = vld [vmem:[%s14508_s1 + $0xf8] sm:$0xff] }
 0x235   :  { %15784 = vst [vmem:[#allocation29_spill] sm:$0xff] %v9757_v35  ;;  %v9889_v19 = vmul.f32 %v6613_v52, %v6613_v52  ;;  %v9894_v30 = vmul.f32 %v6614_v49, %v6614_v49  ;;  %v9899_v47 = vmul.f32 %v6615_v62, %v6615_v62  ;;  %v9904_v24 = vmul.f32 %v6616_v54, %v6616_v54 }
 0x236   :  { %15785 = vst [vmem:[#allocation17_spill] sm:$0xff] %v9759_v16  ;;  %v9909_v4 = vmul.f32 %v6617_v53, %v6617_v53  ;;  %v9914_v22 = vmul.f32 %v6618_v38, %v6618_v38  ;;  %v9919_v46 = vmul.f32 %v6619_v12, %v6619_v12  ;;  %v9924_v18 = vmul.f32 %v6620_v51, %v6620_v51 }
 0x237   :  { %15786 = vst [vmem:[#allocation37_spill] sm:$0xff] %v9761_v36  ;;  %v9927_v13 = vmul.f32 0.26601171, %v9749_v15  ;;  %v9930_v43 = vmul.f32 0.26601171, %v9774_v9  ;;  %v9946_v11 = vadd.f32 %v9774_v9, %v9749_v15  ;;  %v9959_v49 = vadd.f32 %v9784_v63, %v9779_v42 }
 0x238   :  { %15787 = vst [vmem:[#allocation45_spill] sm:$0xff] %v9763_v10  ;;  %v9933_v7 = vmul.f32 0.26601171, %v9779_v42  ;;  %v9936_v39 = vmul.f32 0.26601171, %v9784_v63  ;;  %v9972_v38 = vadd.f32 %v9794_v3, %v9789_v56  ;;  %v9998_v16 = vadd.f32 %v9814_v50, %v9809_v20 }
 0x239   :  { %15788 = vst [vmem:[#allocation33_spill] sm:$0xff] %v9765_v40  ;;  %v9939_v27 = vmul.f32 0.26601171, %v9789_v56  ;;  %v9942_v23 = vmul.f32 0.26601171, %v9794_v3  ;;  %v10011_v17 = vadd.f32 %v9824_v21, %v9819_v26  ;;  %v10024_v32 = vadd.f32 %v9834_v28, %v9829_v45 }
 0x23a   :  { %15789 = vst [vmem:[#allocation21_spill] sm:$0xff] %v9767_v60  ;;  %v9949_v44 = vmul.f32 0.26601171, %v9799_v61  ;;  %v9952_v48 = vmul.f32 0.26601171, %v9804_v34  ;;  %v9985_v60 = vadd.f32 %v9804_v34, %v9799_v61 }
 0x23b   :  { %15790 = vst [vmem:[#allocation42_spill] sm:$0xff] %v9769_v41  ;;  %v9955_v52 = vmul.f32 0.26601171, %v9809_v20  ;;  %v9962_v62 = vmul.f32 0.26601171, %v9814_v50 }
 0x23c   :  { %15791 = vst [vmem:[#allocation59_spill] sm:$0xff] %v9774_v9  ;;  %v9965_v54 = vmul.f32 0.26601171, %v9819_v26  ;;  %v9968_v53 = vmul.f32 0.26601171, %v9824_v21 }
 0x23d   :  { %15792 = vst [vmem:[#allocation62_spill] sm:$0xff] %v9779_v42  ;;  %v9975_v12 = vmul.f32 0.26601171, %v9829_v45  ;;  %v9978_v51 = vmul.f32 0.26601171, %v9834_v28 }
 0x23e   :  { %15793 = vst [vmem:[#allocation65_spill] sm:$0xff] %v9784_v63  ;;  %v9981_v41 = vmul.f32 0.26601171, %v9839_v25  ;;  %v9988_v40 = vmul.f32 0.26601171, %v9844_v31 }
 0x23f   :  { %15794 = vst [vmem:[#allocation91_spill] sm:$0xff] %v9789_v56  ;;  %v9991_v10 = vmul.f32 0.26601171, %v9849_v57  ;;  %v9994_v36 = vmul.f32 0.26601171, %v9854_v14 }
 0x240   :  { %15795 = vst [vmem:[#allocation92_spill] sm:$0xff] %v9794_v3  ;;  %v10001_v35 = vmul.f32 0.26601171, %v9859_v5  ;;  %v10004_v6 = vmul.f32 0.26601171, %v9864_v37 }
 0x241   :  { %15796 = vst [vmem:[#allocation93_spill] sm:$0xff] %v9799_v61  ;;  %v10007_v55 = vmul.f32 0.26601171, %v9869_v8  ;;  %v10014_v59 = vmul.f32 0.26601171, %v9874_v58 }
 0x242   :  { %15797 = vst [vmem:[#allocation94_spill] sm:$0xff] %v9804_v34  ;;  %v10017_v33 = vmul.f32 0.26601171, %v9879_v29  ;;  %v10020_v0 = vmul.f32 0.26601171, %v9884_v1 }
 0x243   :  { %15798 = vst [vmem:[#allocation95_spill] sm:$0xff] %v9809_v20  ;;  %v10027_v2 = vmul.f32 0.26601171, %v9889_v19 }
 0x244   :  { %15799 = vst [vmem:[#allocation96_spill] sm:$0xff] %v9814_v50 }
 0x245   :  { %15800 = vst [vmem:[#allocation61_spill] sm:$0xff] %v9819_v26 }
 0x246   :  { %15801 = vst [vmem:[#allocation53_spill] sm:$0xff] %v9824_v21 }
 0x247   :  { %15802 = vst [vmem:[#allocation66_spill] sm:$0xff] %v9829_v45 }
 0x248   :  { %15803 = vst [vmem:[#allocation58_spill] sm:$0xff] %v9834_v28 }
 0x249   :  { %15804 = vst [vmem:[#allocation47_spill] sm:$0xff] %v9839_v25 }
 0x24a   :  { %15805 = vst [vmem:[#allocation40_spill] sm:$0xff] %v9844_v31 }
 0x24b   :  { %15806 = vst [vmem:[#allocation19_spill] sm:$0xff] %v9849_v57 }
 0x24c   :  { %15807 = vst [vmem:[#allocation30_spill] sm:$0xff] %v9854_v14 }
 0x24d   :  { %15808 = vst [vmem:[#allocation38_spill] sm:$0xff] %v9859_v5 }
 0x24e   :  { %15809 = vst [vmem:[#allocation48_spill] sm:$0xff] %v9864_v37 }
 0x24f   :  { %15810 = vst [vmem:[#allocation56_spill] sm:$0xff] %v9869_v8 }
 0x250   :  { %15811 = vst [vmem:[#allocation52_spill] sm:$0xff] %v9874_v58 }
 0x251   :  { %15812 = vst [vmem:[#allocation84_spill] sm:$0xff] %v9879_v29 }
 0x252   :  { %15813 = vst [vmem:[#allocation85_spill] sm:$0xff] %v9884_v1 }
 0x253   :  { %15814 = vst [vmem:[#allocation86_spill] sm:$0xff] %v9889_v19 }
 0x254   :  { %15815 = vst [vmem:[#allocation87_spill] sm:$0xff] %v9894_v30 }
 0x255   :  { %15816 = vst [vmem:[#allocation88_spill] sm:$0xff] %v9899_v47 }
 0x256   :  { %15817 = vst [vmem:[#allocation89_spill] sm:$0xff] %v9904_v24 }
 0x257   :  { %15818 = vst [vmem:[#allocation90_spill] sm:$0xff] %v9909_v4 }
 0x258   :  { %15819 = vst [vmem:[#allocation10_spill] sm:$0xff] %v9914_v22 }
 0x259   :  { %15820 = vst [vmem:[#allocation11_spill] sm:$0xff] %v9919_v46 }
 0x25a   :  { %15821 = vst [vmem:[#allocation25_spill] sm:$0xff] %v9924_v18 }
 0x25b   :  { %15822 = vst [vmem:[#allocation80_spill] sm:$0xff] %v9946_v11  ;;  %v10050_v11 = vadd.f32 %v9854_v14, %v9849_v57 }
 0x25c   :  { %15823 = vst [vmem:[#allocation55_spill] sm:$0xff] %v9959_v49  ;;  %v10043_v49 = vmul.f32 0.26601171, %v9909_v4 }
 0x25d   :  { %15824 = vst [vmem:[#allocation57_spill] sm:$0xff] %v9972_v38  ;;  %v10040_v38 = vmul.f32 0.26601171, %v9904_v24 }
 0x25e   :  { %15825 = vst [vmem:[#allocation74_spill] sm:$0xff] %v9985_v60  ;;  %v10037_v60 = vadd.f32 %v9844_v31, %v9839_v25 }
 0x25f   :  { %15826 = vst [vmem:[#allocation75_spill] sm:$0xff] %v9998_v16  ;;  %v10030_v16 = vmul.f32 0.26601171, %v9894_v30 }
 0x260   :  { %15827 = vst [vmem:[#allocation28_spill] sm:$0xff] %v10007_v55 }
 0x261   :  { %15828 = vst [vmem:[#allocation69_spill] sm:$0xff] %v10011_v17  ;;  %v10033_v17 = vmul.f32 0.26601171, %v9899_v47 }
 0x262   :  { %15829 = vst [vmem:[#allocation70_spill] sm:$0xff] %v10014_v59 }
 0x263   :  { %15830 = vst [vmem:[#allocation71_spill] sm:$0xff] %v10017_v33 }
 0x264   :  { %15831 = vst [vmem:[#allocation77_spill] sm:$0xff] %v10020_v0 }
 0x265   :  { %15832 = vst [vmem:[#allocation78_spill] sm:$0xff] %v10024_v32  ;;  %v10046_v32 = vmul.f32 0.26601171, %v9914_v22 }
 0x266   :  { %15833 = vst [vmem:[#allocation79_spill] sm:$0xff] %v10027_v2 }
 0x267   :  { %15834 = vst [vmem:[#allocation81_spill] sm:$0xff] %v10030_v16  ;;  %v10053_v16 = vmul.f32 0.26601171, %v9919_v46 }
 0x268   :  { %15835 = vst [vmem:[#allocation82_spill] sm:$0xff] %v10033_v17  ;;  %v10056_v17 = vmul.f32 0.26601171, %v9924_v18 }
 0x269   :  { %15836 = vst [vmem:[#allocation83_spill] sm:$0xff] %v10037_v60  ;;  %v10059_v60 = vrot.slane %v9774_v9, 2  ;;  %v10081_v9 = vrot.slane %v9834_v28, 2  ;;  %v10102_v28 = vrot.slane %v9904_v24, 2 }
 0x26a   :  { %15837 = vst [vmem:[#allocation8_spill] sm:$0xff] %v10040_v38  ;;  %v10063_v38 = vadd.f32 %v9864_v37, %v9859_v5 }
 0x26b   :  { %15838 = vst [vmem:[#allocation16_spill] sm:$0xff] %v10043_v49  ;;  %v10066_v49 = vrot.slane %v9784_v63, 2  ;;  %v10087_v63 = vrot.slane %v9854_v14, 2  ;;  %v10108_v14 = vrot.slane %v9924_v18, 2  ;;  %v2614_v18 = vadd.f32 %v10081_v9, %v9829_v45 }
 0x26c   :  { %15839 = vst [vmem:[#allocation9_spill] sm:$0xff] %v10046_v32  ;;  %v10069_v32 = vrot.slane %v9794_v3, 2  ;;  %v10090_v3 = vrot.slane %v9864_v37, 2  ;;  %v2608_v37 = vadd.f32 %v10059_v60, %v9749_v15 }
 0x26d   :  { %15840 = vst [vmem:[#allocation73_spill] sm:$0xff] %v10050_v11  ;;  %v10072_v11 = vrot.slane %v9804_v34, 2  ;;  %v10093_v34 = vrot.slane %v9874_v58, 2  ;;  %v2609_v2 = vadd.f32 %v10066_v49, %v9779_v42 }
 0x26e   :  { %15841 = vst [vmem:[#allocation44_spill] sm:$0xff] %v10053_v16  ;;  %v10075_v16 = vrot.slane %v9814_v50, 2  ;;  %v10096_v50 = vrot.slane %v9884_v1, 2  ;;  %v2610_v0 = vadd.f32 %v10069_v32, %v9789_v56 }
 0x26f   :  { %15842 = vst [vmem:[#allocation24_spill] sm:$0xff] %v10056_v17  ;;  %v10078_v17 = vrot.slane %v9824_v21, 2  ;;  %v10099_v21 = vrot.slane %v9894_v30, 2  ;;  %v2611_v33 = vadd.f32 %v10072_v11, %v9799_v61 }
 0x270   :  { %15843 = vst [vmem:[#allocation49_spill] sm:$0xff] %v10059_v60  ;;  %v2612_v59 = vadd.f32 %v10075_v16, %v9809_v20 }
 0x271   :  { %15844 = vst [vmem:[#allocation12_spill] sm:$0xff] %v10063_v38  ;;  %v10084_v38 = vrot.slane %v9844_v31, 2  ;;  %v10105_v31 = vrot.slane %v9914_v22, 2  ;;  %v2613_v55 = vadd.f32 %v10078_v17, %v9819_v26 }
 0x272   :  { %15845 = vst [vmem:[#allocation39_spill] sm:$0xff] %v10066_v49  ;;  %v2616_v49 = vadd.f32 %v10087_v63, %v9849_v57  ;;  %v2624_v57 = vmul.f32 0.0010283801, %v2608_v37  ;;  %v10152_v37 = vadd.f32 %v9894_v30, %v9889_v19 }
 0x273   :  { %15846 = vst [vmem:[#allocation46_spill] sm:$0xff] %v10069_v32  ;;  %v2615_v60 = vadd.f32 %v10084_v38, %v9839_v25  ;;  %v2617_v32 = vadd.f32 %v10090_v3, %v9859_v5  ;;  %v2626_v5 = vmul.f32 0.0010283801, %v2610_v0  ;;  %v2627_v25 = vmul.f32 0.0010283801, %v2611_v33 }
 0x274   :  { %15847 = vst [vmem:[#allocation31_spill] sm:$0xff] %v10072_v11  ;;  %v2618_v11 = vadd.f32 %v10093_v34, %v9869_v8  ;;  %v2629_v45 = vmul.f32 0.0010283801, %v2613_v55 }
 0x275   :  { %15848 = vst [vmem:[#allocation54_spill] sm:$0xff] %v10075_v16  ;;  %v2619_v16 = vadd.f32 %v10096_v50, %v9879_v29  ;;  %v2631_v26 = vmul.f32 0.0010283801, %v2615_v60  ;;  %v2633_v20 = vmul.f32 0.0010283801, %v2617_v32  ;;  %v10162_v60 = vadd.f32 %v9914_v22, %v9909_v4 }
 0x276   :  { %15849 = vst [vmem:[#allocation35_spill] sm:$0xff] %v10078_v17  ;;  %v2620_v17 = vadd.f32 %v10099_v21, %v9889_v19  ;;  %v2656_v32 = vrot.slane %v2624_v57, 3  ;;  %v2659_v19 = vrot.slane %v2627_v25, 3 }
 0x277   :  { %15850 = vst [vmem:[#allocation23_spill] sm:$0xff] %v10081_v9  ;;  %v2621_v9 = vadd.f32 %v10102_v28, %v9899_v47  ;;  %v2635_v0 = vmul.f32 0.0010283801, %v2619_v16  ;;  %v2665_v56 = vrot.slane %v2633_v20, 3 }
 0x278   :  { %15851 = vst [vmem:[#allocation50_spill] sm:$0xff] %v10084_v38  ;;  %v2622_v38 = vadd.f32 %v10105_v31, %v9909_v4  ;;  %v2636_v33 = vmul.f32 0.0010283801, %v2620_v17  ;;  %v2663_v17 = vrot.slane %v2631_v26, 3  ;;  %v10166_v4 = vadd.f32 %v2656_v32, %v9927_v13 }
 0x279   :  { %15852 = vst [vmem:[#allocation97_spill] sm:$0xff] %v10087_v63  ;;  %v2623_v63 = vadd.f32 %v10108_v14, %v9919_v46  ;;  %v2667_v42 = vrot.slane %v2635_v0, 3  ;;  %v10187_v25 = vadd.f32 %v2659_v19, %v9952_v48  ;;  %v15869_v0 = vld [vmem:[#allocation80_spill] sm:$0xff] }
 0x27a   :  { %15853 = vst [vmem:[#allocation98_spill] sm:$0xff] %v10090_v3  ;;  %v2625_v3 = vmul.f32 0.0010283801, %v2609_v2  ;;  %v2634_v2 = vmul.f32 0.0010283801, %v2618_v11  ;;  %v2661_v11 = vrot.slane %v2629_v45, 3  ;;  %v10184_v45 = vadd.f32 %v2659_v19, %v9949_v44 }
 0x27b   :  { %15854 = vst [vmem:[#allocation99_spill] sm:$0xff] %v10093_v34  ;;  %v10144_v34 = vadd.f32 %v9874_v58, %v9869_v8  ;;  %v2638_v55 = vmul.f32 0.0010283801, %v2622_v38  ;;  %v10208_v19 = vadd.f32 %v2663_v17, %v9981_v41  ;;  %v15860_v44 = vld [vmem:[#allocation28_spill] sm:$0xff]  ;;  %v15861_v41 = vld [vmem:[#allocation70_spill] sm:$0xff] }
 0x27c   :  { %15855 = vst [vmem:[#allocation100_spill] sm:$0xff] %v10096_v50  ;;  %v2628_v50 = vmul.f32 0.0010283801, %v2612_v59  ;;  %v2637_v59 = vmul.f32 0.0010283801, %v2621_v9  ;;  %v2668_v9 = vrot.slane %v2636_v33, 3  ;;  %v10199_v13 = vadd.f32 %v2661_v11, %v9968_v53 }
 0x27d   :  { %15856 = vst [vmem:[#allocation101_spill] sm:$0xff] %v10099_v21  ;;  %v2630_v21 = vmul.f32 0.0010283801, %v2614_v18  ;;  %v10158_v18 = vmul.f32 0.0010283801, %v2623_v63  ;;  %v2670_v63 = vrot.slane %v2638_v55, 3 }
 0x27e   :  { %15857 = vst [vmem:[#allocation102_spill] sm:$0xff] %v10102_v28  ;;  %v10148_v28 = vadd.f32 %v9884_v1, %v9879_v29  ;;  %v2658_v29 = vrot.slane %v2626_v5, 3  ;;  %v2660_v8 = vrot.slane %v2628_v50, 3  ;;  %v2669_v38 = vrot.slane %v2637_v59, 3  ;;  %v15870_v59 = vld [vmem:[#allocation55_spill] sm:$0xff]  ;;  %v15871_v55 = vld [vmem:[#allocation57_spill] sm:$0xff] }
 0x27f   :  { %15858 = vst [vmem:[#allocation103_spill] sm:$0xff] %v10105_v31  ;;  %v2632_v31 = vmul.f32 0.0010283801, %v2616_v49  ;;  %v2657_v49 = vrot.slane %v2625_v3, 3  ;;  %v2662_v16 = vrot.slane %v2630_v21, 3  ;;  %v2671_v15 = vrot.slane %v10158_v18, 3 }
 0x280   :  { %15859 = vst [vmem:[#allocation104_spill] sm:$0xff] %v10108_v14  ;;  %v10156_v14 = vadd.f32 %v9904_v24, %v9899_v47  ;;  %v2666_v47 = vrot.slane %v2634_v2, 3  ;;  %v10169_v3 = vadd.f32 %v2656_v32, %v9930_v43  ;;  %v10178_v20 = vadd.f32 %v2658_v29, %v9939_v27  ;;  %v15872_v32 = vld [vmem:[#allocation25_spill] sm:$0xff] }
 0x281   :  { %v2664_v61 = vrot.slane %v2632_v31, 3  ;;  %v10172_v50 = vadd.f32 %v2657_v49, %v9933_v7  ;;  %v10175_v26 = vadd.f32 %v2657_v49, %v9936_v39  ;;  %v10181_v21 = vadd.f32 %v2658_v29, %v9942_v23 }
 0x282   :  { %v10190_v31 = vadd.f32 %v2660_v8, %v9955_v52  ;;  %v10193_v57 = vadd.f32 %v2660_v8, %v9962_v62  ;;  %v10196_v5 = vadd.f32 %v2661_v11, %v9965_v54  ;;  %v10202_v29 = vadd.f32 %v2662_v16, %v9975_v12  ;;  %v15867_v12 = vld [vmem:[#allocation8_spill] sm:$0xff]  ;;  %v15873_v11 = vld [vmem:[#allocation74_spill] sm:$0xff] }
 0x283   :  { %v10205_v43 = vadd.f32 %v2662_v16, %v9978_v51  ;;  %v10211_v7 = vadd.f32 %v2663_v17, %v9988_v40  ;;  %v10214_v8 = vadd.f32 %v2664_v61, %v9991_v10  ;;  %v10217_v39 = vadd.f32 %v2664_v61, %v9994_v36  ;;  %v15862_v40 = vld [vmem:[#allocation71_spill] sm:$0xff]  ;;  %v15863_v10 = vld [vmem:[#allocation77_spill] sm:$0xff] }
 0x284   :  { %v10220_v27 = vadd.f32 %v2665_v56, %v10001_v35  ;;  %v10223_v23 = vadd.f32 %v2665_v56, %v10004_v6  ;;  %v10226_v48 = vadd.f32 %v2666_v47, %v15860_v44  ;;  %v10229_v52 = vadd.f32 %v2666_v47, %v15861_v41  ;;  %v15864_v36 = vld [vmem:[#allocation79_spill] sm:$0xff]  ;;  %v15865_v35 = vld [vmem:[#allocation81_spill] sm:$0xff]  ;;  %v15866_v6 = vld [vmem:[#allocation82_spill] sm:$0xff] }
 0x285   :  { %v10232_v62 = vadd.f32 %v2667_v42, %v15862_v40  ;;  %v10235_v54 = vadd.f32 %v2667_v42, %v15863_v10  ;;  %v10238_v61 = vadd.f32 %v2668_v9, %v15864_v36  ;;  %v10241_v53 = vadd.f32 %v2668_v9, %v15865_v35  ;;  %v15868_v47 = vld [vmem:[#allocation16_spill] sm:$0xff]  ;;  %v15874_v17 = vld [vmem:[#allocation75_spill] sm:$0xff]  ;;  %v15875_v44 = vld [vmem:[#allocation69_spill] sm:$0xff] }
 0x286   :  { %v10244_v56 = vadd.f32 %v2669_v38, %v15866_v6  ;;  %v10247_v51 = vadd.f32 %v2669_v38, %v15867_v12  ;;  %v10250_v2 = vadd.f32 %v2670_v63, %v15868_v47  ;;  %v2736_v33 = vmul.f32 0.007598758, %v15869_v0  ;;  %v15876_v38 = vld [vmem:[#allocation9_spill] sm:$0xff]  ;;  %v15878_v10 = vld [vmem:[#allocation78_spill] sm:$0xff]  ;;  %v15879_v35 = vld [vmem:[#allocation83_spill] sm:$0xff] }
 0x287   :  { %v2737_v42 = vmul.f32 0.007598758, %v15870_v59  ;;  %v2738_v18 = vmul.f32 0.007598758, %v15871_v55  ;;  %v2735_v49 = vadd.f32 %v15872_v32, %v9919_v46  ;;  %v2739_v16 = vmul.f32 0.007598758, %v15873_v11 }
 0x288   :  { %v2740_v9 = vmul.f32 0.007598758, %v15874_v17  ;;  %v2741_v41 = vmul.f32 0.007598758, %v15875_v44  ;;  %v10261_v40 = vadd.f32 %v2670_v63, %v15876_v38  ;;  %v2742_v36 = vmul.f32 0.007598758, %v15878_v10 }
 0x289   :  { %v2743_v6 = vmul.f32 0.007598758, %v15879_v35  ;;  %v15880_v12 = vld [vmem:[#allocation73_spill] sm:$0xff]  ;;  %v15881_v0 = vld [vmem:[#allocation44_spill] sm:$0xff]  ;;  %v2746_v11 = vmul.f32 0.007598758, %v10144_v34 }
 0x28a   :  { %15877 = vst [vmem:[#allocation28_spill] sm:$0xff] %v10261_v40  ;;  %v2744_v47 = vmul.f32 0.007598758, %v15880_v12  ;;  %v10267_v59 = vadd.f32 %v2671_v15, %v15881_v0  ;;  %v15883_v55 = vld [vmem:[#allocation12_spill] sm:$0xff]  ;;  %v2747_v17 = vmul.f32 0.007598758, %v10148_v28 }
 0x28b   :  { %v2745_v46 = vmul.f32 0.007598758, %v15883_v55  ;;  %v15884_v32 = vld [vmem:[#allocation24_spill] sm:$0xff]  ;;  %v2748_v63 = vmul.f32 0.007598758, %v10152_v37  ;;  %v2768_v12 = vrot.slane %v2736_v33, 4 }
 0x28c   :  { %15882 = vst [vmem:[#allocation70_spill] sm:$0xff] %v10267_v59  ;;  %v10273_v44 = vadd.f32 %v2671_v15, %v15884_v32  ;;  %v2749_v38 = vmul.f32 0.007598758, %v10156_v14  ;;  %v10278_v10 = vmul.f32 0.007598758, %v10162_v60  ;;  %v2769_v0 = vrot.slane %v2737_v42, 4 }
 0x28d   :  { %v10280_v35 = vmul.f32 0.007598758, %v2735_v49  ;;  %v2770_v59 = vrot.slane %v2738_v18, 4  ;;  %v2771_v55 = vrot.slane %v2739_v16, 4  ;;  %v2772_v40 = vrot.slane %v2740_v9, 4 }
 0x28e   :  { %15885 = vst [vmem:[#allocation71_spill] sm:$0xff] %v10273_v44  ;;  %v2773_v34 = vrot.slane %v2741_v41, 4  ;;  %v2774_v22 = vrot.slane %v2742_v36, 4  ;;  %v2775_v28 = vrot.slane %v2743_v6, 4  ;;  %v2776_v24 = vrot.slane %v2744_v47, 4  ;;  %v15893_v41 = vld [vmem:[#allocation92_spill] sm:$0xff] }
 0x28f   :  { %v2777_v15 = vrot.slane %v2745_v46, 4  ;;  %v2778_v32 = vrot.slane %v2746_v11, 4  ;;  %v2779_v44 = vrot.slane %v2747_v17, 4  ;;  %v2780_v37 = vrot.slane %v2748_v63, 4  ;;  %v15896_v36 = vld [vmem:[#allocation96_spill] sm:$0xff]  ;;  %v15900_v17 = vld [vmem:[#allocation30_spill] sm:$0xff] }
 0x290   :  { %v2781_v30 = vrot.slane %v2749_v38, 4  ;;  %v14837_v14 = vrot.slane %v10278_v10, 4  ;;  %v10285_v49 = vadd.f32 %v2768_v12, %v10166_v4  ;;  %v10288_v33 = vadd.f32 %v2768_v12, %v10169_v3  ;;  %v15901_v63 = vld [vmem:[#allocation48_spill] sm:$0xff] }
 0x291   :  { %v10291_v42 = vadd.f32 %v2769_v0, %v10172_v50  ;;  %v10294_v18 = vadd.f32 %v2769_v0, %v10175_v26  ;;  %v10297_v46 = vadd.f32 %v2770_v59, %v10178_v20  ;;  %v10300_v16 = vadd.f32 %v2770_v59, %v10181_v21  ;;  %v15898_v59 = vld [vmem:[#allocation58_spill] sm:$0xff] }
 0x292   :  { %v10303_v9 = vadd.f32 %v2771_v55, %v10184_v45  ;;  %v10306_v4 = vadd.f32 %v2771_v55, %v10187_v25  ;;  %v10309_v3 = vadd.f32 %v2772_v40, %v10190_v31  ;;  %v10312_v50 = vadd.f32 %v2772_v40, %v10193_v57 }
 0x293   :  { %v10315_v26 = vadd.f32 %v2773_v34, %v10196_v5  ;;  %v10318_v20 = vadd.f32 %v2773_v34, %v10199_v13  ;;  %v10321_v21 = vadd.f32 %v2774_v22, %v10202_v29  ;;  %v10324_v45 = vadd.f32 %v2774_v22, %v10205_v43  ;;  %v15903_v34 = vld [vmem:[#allocation89_spill] sm:$0xff] }
 0x294   :  { %v10327_v25 = vadd.f32 %v2775_v28, %v10208_v19  ;;  %v10330_v31 = vadd.f32 %v2775_v28, %v10211_v7  ;;  %v10333_v57 = vadd.f32 %v2776_v24, %v10214_v8  ;;  %v10336_v5 = vadd.f32 %v2776_v24, %v10217_v39 }
 0x295   :  { %v10339_v13 = vadd.f32 %v2777_v15, %v10220_v27  ;;  %v10342_v29 = vadd.f32 %v2777_v15, %v10223_v23  ;;  %v10345_v22 = vadd.f32 %v2778_v32, %v10226_v48  ;;  %v10348_v43 = vadd.f32 %v2778_v32, %v10229_v52  ;;  %v15891_v23 = vld [vmem:[#allocation59_spill] sm:$0xff]  ;;  %v15892_v52 = vld [vmem:[#allocation65_spill] sm:$0xff]  ;;  %v15904_v15 = vld [vmem:[#allocation10_spill] sm:$0xff] }
 0x296   :  { %v10351_v19 = vadd.f32 %v2779_v44, %v10232_v62  ;;  %v10354_v7 = vadd.f32 %v2779_v44, %v10235_v54  ;;  %v10357_v24 = vadd.f32 %v2780_v37, %v10238_v61  ;;  %v10360_v8 = vadd.f32 %v2780_v37, %v10241_v53  ;;  %v15895_v61 = vld [vmem:[#allocation94_spill] sm:$0xff]  ;;  %v15905_v37 = vld [vmem:[#allocation43_spill] sm:$0xff] }
 0x297   :  { %v10363_v39 = vadd.f32 %v2781_v30, %v10244_v56  ;;  %v10366_v27 = vadd.f32 %v2781_v30, %v10247_v51  ;;  %v2832_v48 = vrot.slane %v15891_v23, 6  ;;  %v2833_v62 = vrot.slane %v15892_v52, 6  ;;  %v15897_v56 = vld [vmem:[#allocation53_spill] sm:$0xff]  ;;  %v15899_v51 = vld [vmem:[#allocation40_spill] sm:$0xff] }
 0x298   :  { %15886 = vst [vmem:[#allocation77_spill] sm:$0xff] %v10354_v7  ;;  %v2834_v40 = vrot.slane %v15893_v41, 6  ;;  %v10374_v54 = vadd.f32 %v14837_v14, %v10250_v2  ;;  %v2835_v53 = vrot.slane %v15895_v61, 6  ;;  %v2836_v6 = vrot.slane %v15896_v36, 6  ;;  %v15902_v2 = vld [vmem:[#allocation87_spill] sm:$0xff]  ;;  %v15906_v14 = vld [vmem:[#allocation62_spill] sm:$0xff] }
 0x299   :  { %15887 = vst [vmem:[#allocation79_spill] sm:$0xff] %v10357_v24  ;;  %v2837_v47 = vrot.slane %v15897_v56, 6  ;;  %v2838_v30 = vrot.slane %v15898_v59, 6  ;;  %v2839_v11 = vrot.slane %v15899_v51, 6  ;;  %v2840_v44 = vrot.slane %v15900_v17, 6  ;;  %v15907_v56 = vld [vmem:[#allocation91_spill] sm:$0xff] }
 0x29a   :  { %15888 = vst [vmem:[#allocation81_spill] sm:$0xff] %v10360_v8  ;;  %v2841_v38 = vrot.slane %v15901_v63, 6  ;;  %v2842_v12 = vrot.slane %v9874_v58, 6  ;;  %v2843_v0 = vrot.slane %v9884_v1, 6  ;;  %v2844_v55 = vrot.slane %v15902_v2, 6  ;;  %v15908_v36 = vld [vmem:[#allocation25_spill] sm:$0xff] }
 0x29b   :  { %15889 = vst [vmem:[#allocation82_spill] sm:$0xff] %v10363_v39  ;;  %v2845_v28 = vrot.slane %v15903_v34, 6  ;;  %v2846_v32 = vrot.slane %v15904_v15, 6  ;;  %v2864_v60 = vadd.f32 %v2832_v48, %v15905_v37  ;;  %v2865_v59 = vadd.f32 %v2833_v62, %v15906_v14  ;;  %v15909_v61 = vld [vmem:[#allocation93_spill] sm:$0xff]  ;;  %v15912_v39 = vld [vmem:[#allocation66_spill] sm:$0xff]  ;;  %v15913_v8 = vld [vmem:[#allocation47_spill] sm:$0xff] }
 0x29c   :  { %15890 = vst [vmem:[#allocation8_spill] sm:$0xff] %v10366_v27  ;;  %v2866_v51 = vadd.f32 %v2834_v40, %v15907_v56  ;;  %v2847_v17 = vrot.slane %v15908_v36, 6  ;;  %v2867_v63 = vadd.f32 %v2835_v53, %v15909_v61  ;;  %v15911_v27 = vld [vmem:[#allocation61_spill] sm:$0xff]  ;;  %v2870_v2 = vadd.f32 %v2838_v30, %v15912_v39  ;;  %v15914_v41 = vld [vmem:[#allocation19_spill] sm:$0xff]  ;;  %v15915_v24 = vld [vmem:[#allocation38_spill] sm:$0xff] }
 0x29d   :  { %15894 = vst [vmem:[#allocation16_spill] sm:$0xff] %v10374_v54  ;;  %v15910_v54 = vld [vmem:[#allocation95_spill] sm:$0xff]  ;;  %v2869_v1 = vadd.f32 %v2837_v47, %v15911_v27  ;;  %v2871_v34 = vadd.f32 %v2839_v11, %v15913_v8  ;;  %v2872_v15 = vadd.f32 %v2840_v44, %v15914_v41  ;;  %v2873_v48 = vadd.f32 %v2841_v38, %v15915_v24  ;;  %v15916_v7 = vld [vmem:[#allocation56_spill] sm:$0xff]  ;;  %v15918_v56 = vld [vmem:[#allocation86_spill] sm:$0xff] }
 0x29e   :  { %v2868_v58 = vadd.f32 %v2836_v6, %v15910_v54  ;;  %v2874_v62 = vadd.f32 %v2842_v12, %v15916_v7  ;;  %v15917_v52 = vld [vmem:[#allocation84_spill] sm:$0xff]  ;;  %v2876_v36 = vadd.f32 %v2844_v55, %v15918_v56  ;;  %v15920_v61 = vld [vmem:[#allocation90_spill] sm:$0xff]  ;;  %v2880_v54 = vmul.f32 0.036000773, %v2864_v60  ;;  %v15921_v30 = vld [vmem:[#allocation11_spill] sm:$0xff] }
 0x29f   :  { %v2875_v40 = vadd.f32 %v2843_v0, %v15917_v52  ;;  %v15919_v14 = vld [vmem:[#allocation88_spill] sm:$0xff]  ;;  %v2878_v6 = vadd.f32 %v2846_v32, %v15920_v61  ;;  %v2881_v47 = vmul.f32 0.036000773, %v2865_v59  ;;  %v2882_v27 = vmul.f32 0.036000773, %v2866_v51  ;;  %v15925_v56 = vld [vmem:[#allocation70_spill] sm:$0xff] }
 0x2a0   :  { %v2877_v53 = vadd.f32 %v2845_v28, %v15919_v14  ;;  %v2879_v39 = vadd.f32 %v2847_v17, %v15921_v30  ;;  %v2883_v11 = vmul.f32 0.036000773, %v2867_v63  ;;  %v2884_v8 = vmul.f32 0.036000773, %v2868_v58  ;;  %v15922_v41 = vld [vmem:[#allocation28_spill] sm:$0xff]  ;;  %v15927_v61 = vld [vmem:[#allocation71_spill] sm:$0xff] }
 0x2a1   :  { %v2885_v44 = vmul.f32 0.036000773, %v2869_v1  ;;  %v15923_v38 = vrot.slane %v10278_v10, 4  ;;  %v2886_v0 = vmul.f32 0.036000773, %v2870_v2  ;;  %v15926_v28 = vrot.slane %v10280_v35, 4 }
 0x2a2   :  { %v2887_v52 = vmul.f32 0.036000773, %v2871_v34  ;;  %v2888_v55 = vmul.f32 0.036000773, %v2872_v15  ;;  %v2889_v60 = vmul.f32 0.036000773, %v2873_v48 }
 0x2a3   :  { %v10408_v12 = vadd.f32 %v15923_v38, %v15922_v41  ;;  %v2830_v32 = vadd.f32 %v15926_v28, %v15925_v56  ;;  %v2890_v59 = vmul.f32 0.036000773, %v2874_v62  ;;  %v2891_v51 = vmul.f32 0.036000773, %v2875_v40 }
 0x2a4   :  { %v15928_v17 = vmov %v15926_v28  ;;  %v2892_v1 = vmul.f32 0.036000773, %v2876_v36  ;;  %v2893_v63 = vmul.f32 0.036000773, %v2877_v53  ;;  %v2894_v30 = vmul.f32 0.036000773, %v2878_v6 }
 0x2a5   :  { %15924 = vst [vmem:[#allocation80_spill] sm:$0xff] %v10408_v12  ;;  %v2831_v58 = vadd.f32 %v15928_v17, %v15927_v61  ;;  %v2895_v10 = vmul.f32 0.036000773, %v2879_v39  ;;  %v2912_v41 = vrot.slane %v2880_v54, 5  ;;  %v2913_v38 = vrot.slane %v2881_v47, 5  ;;  %v15954_v6 = vld [vmem:[#allocation77_spill] sm:$0xff] }
 0x2a6   :  { %v2914_v2 = vrot.slane %v2882_v27, 5  ;;  %v2915_v34 = vrot.slane %v2883_v11, 5  ;;  %v2916_v15 = vrot.slane %v2884_v8, 5  ;;  %v2917_v14 = vrot.slane %v2885_v44, 5  ;;  %v15956_v47 = vld [vmem:[#allocation79_spill] sm:$0xff]  ;;  %v15959_v44 = vld [vmem:[#allocation92_spill] sm:$0xff] }
 0x2a7   :  { %v2918_v7 = vrot.slane %v2886_v0, 5  ;;  %v2919_v24 = vrot.slane %v2887_v52, 5  ;;  %v2920_v56 = vrot.slane %v2888_v55, 5  ;;  %v2921_v48 = vrot.slane %v2889_v60, 5  ;;  %v15960_v55 = vld [vmem:[#allocation81_spill] sm:$0xff]  ;;  %v15962_v60 = vld [vmem:[#allocation82_spill] sm:$0xff] }
 0x2a8   :  { %v2922_v62 = vrot.slane %v2890_v59, 5  ;;  %v2923_v40 = vrot.slane %v2891_v51, 5  ;;  %v2924_v28 = vrot.slane %v2892_v1, 5  ;;  %v2925_v12 = vrot.slane %v2893_v63, 5  ;;  %v15964_v59 = vld [vmem:[#allocation8_spill] sm:$0xff] }
 0x2a9   :  { %v2926_v35 = vrot.slane %v2894_v30, 5  ;;  %v2927_v61 = vrot.slane %v2895_v10, 5  ;;  %v10417_v36 = vadd.f32 %v2912_v41, %v10285_v49  ;;  %v10420_v39 = vadd.f32 %v2912_v41, %v10288_v33  ;;  %v15958_v30 = vld [vmem:[#allocation91_spill] sm:$0xff]  ;;  %v15966_v17 = vld [vmem:[#allocation16_spill] sm:$0xff] }
 0x2aa   :  { %v10423_v27 = vadd.f32 %v2913_v38, %v10291_v42  ;;  %v10426_v8 = vadd.f32 %v2913_v38, %v10294_v18  ;;  %v10429_v52 = vadd.f32 %v2914_v2, %v10297_v46  ;;  %v10432_v54 = vadd.f32 %v2914_v2, %v10300_v16 }
 0x2ab   :  { %15929 = vst [vmem:[#allocation55_spill] sm:$0xff] %v10417_v36  ;;  %v10435_v53 = vadd.f32 %v2915_v34, %v10303_v9  ;;  %v10438_v49 = vadd.f32 %v2915_v34, %v10306_v4  ;;  %v10441_v33 = vadd.f32 %v2916_v15, %v10309_v3  ;;  %v10444_v42 = vadd.f32 %v2916_v15, %v10312_v50  ;;  %v15972_v15 = vld [vmem:[#allocation93_spill] sm:$0xff] }
 0x2ac   :  { %15930 = vst [vmem:[#allocation57_spill] sm:$0xff] %v10420_v39  ;;  %v10447_v18 = vadd.f32 %v2917_v14, %v10315_v26  ;;  %v10450_v46 = vadd.f32 %v2917_v14, %v10318_v20  ;;  %v10453_v16 = vadd.f32 %v2918_v7, %v10321_v21  ;;  %v10456_v9 = vadd.f32 %v2918_v7, %v10324_v45  ;;  %v15968_v63 = vld [vmem:[#allocation80_spill] sm:$0xff]  ;;  %v15997_v39 = vld [vmem:[#allocation25_spill] sm:$0xff] }
 0x2ad   :  { %15931 = vst [vmem:[#allocation74_spill] sm:$0xff] %v10423_v27  ;;  %v10459_v4 = vadd.f32 %v2919_v24, %v10327_v25  ;;  %v10462_v3 = vadd.f32 %v2919_v24, %v10330_v31  ;;  %v10465_v50 = vadd.f32 %v2920_v56, %v10333_v57  ;;  %v10468_v26 = vadd.f32 %v2920_v56, %v10336_v5  ;;  %v15952_v5 = vld [vmem:[#allocation62_spill] sm:$0xff] }
 0x2ae   :  { %15932 = vst [vmem:[#allocation75_spill] sm:$0xff] %v10426_v8  ;;  %v10471_v14 = vadd.f32 %v2921_v48, %v10339_v13  ;;  %v10474_v20 = vadd.f32 %v2921_v48, %v10342_v29  ;;  %v10477_v21 = vadd.f32 %v2922_v62, %v10345_v22  ;;  %v2992_v45 = vrot.slane %v15905_v37, 4  ;;  %v15953_v13 = vld [vmem:[#allocation65_spill] sm:$0xff]  ;;  %v15973_v48 = vld [vmem:[#allocation94_spill] sm:$0xff]  ;;  %v15996_v8 = vld [vmem:[#allocation11_spill] sm:$0xff] }
 0x2af   :  { %15933 = vst [vmem:[#allocation69_spill] sm:$0xff] %v10429_v52  ;;  %v2993_v25 = vrot.slane %v15891_v23, 4  ;;  %v10482_v31 = vadd.f32 %v2922_v62, %v10348_v43  ;;  %v10485_v57 = vadd.f32 %v2923_v40, %v10351_v19  ;;  %v2995_v7 = vrot.slane %v15952_v5, 4 }
 0x2b0   :  { %15934 = vst [vmem:[#allocation9_spill] sm:$0xff] %v10432_v54  ;;  %v2996_v24 = vrot.slane %v15953_v13, 4  ;;  %v10490_v29 = vadd.f32 %v2923_v40, %v15954_v6  ;;  %v10493_v22 = vadd.f32 %v2924_v28, %v15956_v47  ;;  %v2998_v11 = vrot.slane %v15958_v30, 4  ;;  %v15975_v6 = vld [vmem:[#allocation96_spill] sm:$0xff]  ;;  %v15995_v54 = vld [vmem:[#allocation10_spill] sm:$0xff] }
 0x2b1   :  { %15935 = vst [vmem:[#allocation78_spill] sm:$0xff] %v10435_v53  ;;  %v2999_v0 = vrot.slane %v15959_v44, 4  ;;  %v10498_v43 = vadd.f32 %v2924_v28, %v15960_v55  ;;  %v10501_v19 = vadd.f32 %v2925_v12, %v15962_v60  ;;  %v10504_v51 = vadd.f32 %v2925_v12, %v15964_v59  ;;  %v15974_v12 = vld [vmem:[#allocation95_spill] sm:$0xff]  ;;  %v15979_v59 = vld [vmem:[#allocation58_spill] sm:$0xff] }
 0x2b2   :  { %15936 = vst [vmem:[#allocation83_spill] sm:$0xff] %v10438_v49  ;;  %v10507_v1 = vadd.f32 %v2926_v35, %v15966_v17  ;;  %v10510_v10 = vadd.f32 %v2926_v35, %v15968_v63  ;;  %v10512_v41 = vadd.f32 %v2927_v61, %v2830_v32  ;;  %v10514_v38 = vadd.f32 %v2927_v61, %v2831_v58  ;;  %v15976_v35 = vld [vmem:[#allocation61_spill] sm:$0xff]  ;;  %v15978_v58 = vld [vmem:[#allocation66_spill] sm:$0xff]  ;;  %v15980_v17 = vld [vmem:[#allocation47_spill] sm:$0xff] }
 0x2b3   :  { %15937 = vst [vmem:[#allocation73_spill] sm:$0xff] %v10441_v33  ;;  %v2994_v2 = vsel %vm556_vm0, %v2992_v45, %v2993_v25  ;;  %v2997_v34 = vsel %vm556_vm0, %v2995_v7, %v2996_v24  ;;  %v3001_v56 = vrot.slane %v15972_v15, 4  ;;  %v3002_v62 = vrot.slane %v15973_v48, 4  ;;  %v15977_v32 = vld [vmem:[#allocation53_spill] sm:$0xff]  ;;  %v15981_v63 = vld [vmem:[#allocation40_spill] sm:$0xff]  ;;  %v15994_v49 = vld [vmem:[#allocation90_spill] sm:$0xff] }
 0x2b4   :  { %15938 = vst [vmem:[#allocation44_spill] sm:$0xff] %v10444_v42  ;;  %v3004_v40 = vrot.slane %v15974_v12, 4  ;;  %v3000_v28 = vsel %vm556_vm0, %v2998_v11, %v2999_v0  ;;  %v3005_v47 = vrot.slane %v15975_v6, 4  ;;  %v3007_v55 = vrot.slane %v15976_v35, 4  ;;  %v15993_v42 = vld [vmem:[#allocation89_spill] sm:$0xff] }
 0x2b5   :  { %15939 = vst [vmem:[#allocation12_spill] sm:$0xff] %v10447_v18  ;;  %v3008_v60 = vrot.slane %v15977_v32, 4  ;;  %v3010_v61 = vrot.slane %v15978_v58, 4  ;;  %v3011_v45 = vrot.slane %v15979_v59, 4  ;;  %v3013_v7 = vrot.slane %v15980_v17, 4 }
 0x2b6   :  { %15940 = vst [vmem:[#allocation24_spill] sm:$0xff] %v10450_v46  ;;  %v15992_v46 = vld [vmem:[#allocation88_spill] sm:$0xff]  ;;  %v3032_v33 = vrot.slane %v15993_v42, 4  ;;  %v3034_v53 = vrot.slane %v15994_v49, 4  ;;  %v3035_v52 = vrot.slane %v15995_v54, 4  ;;  %v3037_v27 = vrot.slane %v15996_v8, 4 }
 0x2b7   :  { %15941 = vst [vmem:[#allocation59_spill] sm:$0xff] %v10453_v16  ;;  %v3031_v18 = vrot.slane %v15992_v46, 4 }
 0x2b8   :  { %15942 = vst [vmem:[#allocation28_spill] sm:$0xff] %v10456_v9  ;;  %v15991_v9 = vld [vmem:[#allocation87_spill] sm:$0xff] }
 0x2b9   :  { %15943 = vst [vmem:[#allocation70_spill] sm:$0xff] %v10459_v4  ;;  %v3029_v16 = vrot.slane %v15991_v9, 4  ;;  %v3012_v9 = vsel %vm556_vm0, %v3010_v61, %v3011_v45  ;;  %v15998_v61 = vrot.slane %v15997_v39, 4 }
 0x2ba   :  { %15944 = vst [vmem:[#allocation71_spill] sm:$0xff] %v10462_v3  ;;  %v15990_v3 = vld [vmem:[#allocation86_spill] sm:$0xff] }
 0x2bb   :  { %15945 = vst [vmem:[#allocation105_spill] sm:$0xff] %v10465_v50  ;;  %v3028_v4 = vrot.slane %v15990_v3, 4  ;;  %v3009_v3 = vsel %vm556_vm0, %v3007_v55, %v3008_v60  ;;  %v3036_v55 = vsel %vm556_vm0, %v3034_v53, %v3035_v52 }
 0x2bc   :  { %15946 = vst [vmem:[#allocation106_spill] sm:$0xff] %v10468_v26  ;;  %v15989_v26 = vld [vmem:[#allocation85_spill] sm:$0xff] }
 0x2bd   :  { %15947 = vst [vmem:[#allocation107_spill] sm:$0xff] %v10471_v14  ;;  %v3026_v50 = vrot.slane %v15989_v26, 4  ;;  %v3006_v26 = vsel %vm556_vm0, %v3004_v40, %v3005_v47  ;;  %v3030_v36 = vsel %vm556_vm0, %v3028_v4, %v3029_v16  ;;  %v3072_v40 = vadd.f32 %v2994_v2, %v15905_v37 }
 0x2be   :  { %15948 = vst [vmem:[#allocation108_spill] sm:$0xff] %v10474_v20  ;;  %v15988_v20 = vld [vmem:[#allocation84_spill] sm:$0xff]  ;;  %v3077_v4 = vadd.f32 %v2999_v0, %v15959_v44  ;;  %v3079_v2 = vadd.f32 %v3002_v62, %v15973_v48  ;;  %v3080_v53 = vadd.f32 %v3006_v26, %v15974_v12  ;;  %v3081_v37 = vadd.f32 %v3005_v47, %v15975_v6 }
 0x2bf   :  { %15949 = vst [vmem:[#allocation109_spill] sm:$0xff] %v10477_v21  ;;  %v3025_v14 = vrot.slane %v15988_v20, 4  ;;  %v3003_v20 = vsel %vm556_vm0, %v3001_v56, %v3002_v62  ;;  %v3033_v56 = vsel %vm556_vm0, %v3031_v18, %v3032_v33  ;;  %v10585_v6 = vmul.f32 0.10936069, %v3072_v40 }
 0x2c0   :  { %15950 = vst [vmem:[#allocation110_spill] sm:$0xff] %v10482_v31  ;;  %v15987_v31 = vld [vmem:[#allocation52_spill] sm:$0xff]  ;;  %v3078_v18 = vadd.f32 %v3003_v20, %v15972_v15  ;;  %v10600_v40 = vmul.f32 0.10936069, %v3081_v37  ;;  %v16007_v37 = vld [vmem:[#allocation11_spill] sm:$0xff] }
 0x2c1   :  { %15951 = vst [vmem:[#allocation111_spill] sm:$0xff] %v10485_v57  ;;  %v3023_v21 = vrot.slane %v15987_v31, 4  ;;  %v3027_v8 = vsel %vm556_vm0, %v3025_v14, %v3026_v50  ;;  %v3076_v14 = vadd.f32 %v3000_v28, %v15958_v30 }
 0x2c2   :  { %15955 = vst [vmem:[#allocation62_spill] sm:$0xff] %v10490_v29  ;;  %v15986_v29 = vld [vmem:[#allocation56_spill] sm:$0xff] }
 0x2c3   :  { %15957 = vst [vmem:[#allocation65_spill] sm:$0xff] %v10493_v22  ;;  %v3022_v57 = vrot.slane %v15986_v29, 4 }
 0x2c4   :  { %15961 = vst [vmem:[#allocation77_spill] sm:$0xff] %v10498_v43  ;;  %v15985_v43 = vld [vmem:[#allocation48_spill] sm:$0xff] }
 0x2c5   :  { %15963 = vst [vmem:[#allocation79_spill] sm:$0xff] %v10501_v19  ;;  %v15984_v19 = vld [vmem:[#allocation38_spill] sm:$0xff]  ;;  %v3020_v22 = vrot.slane %v15985_v43, 4  ;;  %v3024_v54 = vsel %vm556_vm0, %v3022_v57, %v3023_v21  ;;  %v3075_v57 = vadd.f32 %v2996_v24, %v15953_v13  ;;  %v3085_v24 = vadd.f32 %v3011_v45, %v15979_v59 }
 0x2c6   :  { %15965 = vst [vmem:[#allocation91_spill] sm:$0xff] %v10504_v51  ;;  %v3019_v11 = vrot.slane %v15984_v19, 4  ;;  %v16001_v59 = vld [vmem:[#allocation86_spill] sm:$0xff] }
 0x2c7   :  { %15967 = vst [vmem:[#allocation92_spill] sm:$0xff] %v10507_v1  ;;  %v15983_v1 = vld [vmem:[#allocation30_spill] sm:$0xff]  ;;  %v3091_v47 = vadd.f32 %v3020_v22, %v15985_v43  ;;  %v3109_v43 = vmul.f32 0.10936069, %v3077_v4 }
 0x2c8   :  { %15969 = vst [vmem:[#allocation81_spill] sm:$0xff] %v10510_v10  ;;  %v3017_v51 = vrot.slane %v15983_v1, 4  ;;  %v3021_v49 = vsel %vm556_vm0, %v3019_v11, %v3020_v22  ;;  %v3074_v11 = vadd.f32 %v2997_v34, %v15952_v5  ;;  %v3084_v34 = vadd.f32 %v3012_v9, %v15978_v58  ;;  %v16003_v22 = vld [vmem:[#allocation88_spill] sm:$0xff]  ;;  %v16006_v4 = vld [vmem:[#allocation10_spill] sm:$0xff] }
 0x2c9   :  { %15970 = vst [vmem:[#allocation82_spill] sm:$0xff] %v10512_v41  ;;  %v15982_v41 = vld [vmem:[#allocation19_spill] sm:$0xff]  ;;  %v3090_v26 = vadd.f32 %v3021_v49, %v15984_v19  ;;  %v3107_v49 = vmul.f32 0.10936069, %v3075_v57 }
 0x2ca   :  { %15971 = vst [vmem:[#allocation8_spill] sm:$0xff] %v10514_v38  ;;  %v3014_v38 = vrot.slane %v15981_v63, 4  ;;  %v3016_v10 = vrot.slane %v15982_v41, 4  ;;  %v3089_v62 = vadd.f32 %v3017_v51, %v15983_v1  ;;  %v10590_v1 = vmul.f32 0.10936069, %v3076_v14 }
 0x2cb   :  { %v10607_v14 = vmul.f32 0.10936069, %v3084_v34 }
 0x2cc   :  { %v3015_v46 = vsel %vm556_vm0, %v3013_v7, %v3014_v38  ;;  %v3018_v42 = vsel %vm556_vm0, %v3016_v10, %v3017_v51  ;;  %v3039_v7 = vsel %vm556_vm0, %v3037_v27, %v15998_v61  ;;  %v3073_v10 = vadd.f32 %v2993_v25, %v15891_v23  ;;  %v15999_v61 = vld [vmem:[#allocation84_spill] sm:$0xff] }
 0x2cd   :  { %v3082_v27 = vadd.f32 %v3009_v3, %v15976_v35  ;;  %v3083_v25 = vadd.f32 %v3008_v60, %v15977_v32  ;;  %v3086_v28 = vadd.f32 %v3015_v46, %v15980_v17  ;;  %v3087_v0 = vadd.f32 %v3014_v38, %v15981_v63  ;;  %v16000_v32 = vld [vmem:[#allocation85_spill] sm:$0xff] }
 0x2ce   :  { %v3088_v20 = vadd.f32 %v3018_v42, %v15982_v41  ;;  %v3092_v3 = vadd.f32 %v3024_v54, %v15986_v29  ;;  %v3093_v60 = vadd.f32 %v3023_v21, %v15987_v31  ;;  %v3094_v9 = vadd.f32 %v3027_v8, %v15999_v61  ;;  %v16002_v42 = vld [vmem:[#allocation87_spill] sm:$0xff] }
 0x2cf   :  { %v3095_v45 = vadd.f32 %v3026_v50, %v16000_v32  ;;  %v3096_v46 = vadd.f32 %v3030_v36, %v16001_v59  ;;  %v3105_v38 = vmul.f32 0.10936069, %v3073_v10  ;;  %v3097_v63 = vadd.f32 %v3029_v16, %v16002_v42  ;;  %v16004_v50 = vld [vmem:[#allocation89_spill] sm:$0xff]  ;;  %v16005_v16 = vld [vmem:[#allocation90_spill] sm:$0xff] }
 0x2d0   :  { %v10588_v51 = vmul.f32 0.10936069, %v3074_v11  ;;  %v3098_v54 = vadd.f32 %v3033_v56, %v16003_v22  ;;  %v10593_v21 = vmul.f32 0.10936069, %v3078_v18  ;;  %v10595_v8 = vmul.f32 0.10936069, %v3079_v2 }
 0x2d1   :  { %v3099_v32 = vadd.f32 %v3032_v33, %v16004_v50  ;;  %v10598_v36 = vmul.f32 0.10936069, %v3080_v53  ;;  %v10602_v10 = vmul.f32 0.10936069, %v3082_v27  ;;  %v3100_v11 = vadd.f32 %v3036_v55, %v16005_v16 }
 0x2d2   :  { %v10605_v57 = vmul.f32 0.10936069, %v3083_v25  ;;  %v10609_v56 = vmul.f32 0.10936069, %v3085_v24  ;;  %v3101_v18 = vadd.f32 %v3035_v52, %v16006_v4  ;;  %v10612_v2 = vmul.f32 0.10936069, %v3086_v28 }
 0x2d3   :  { %v10614_v42 = vmul.f32 0.10936069, %v3087_v0  ;;  %v10616_v33 = vmul.f32 0.10936069, %v3088_v20  ;;  %v3102_v53 = vadd.f32 %v3039_v7, %v16007_v37  ;;  %v3121_v27 = vmul.f32 0.10936069, %v3089_v62 }
 0x2d4   :  { %v10619_v50 = vmul.f32 0.10936069, %v3090_v26  ;;  %v3123_v55 = vmul.f32 0.10936069, %v3091_v47  ;;  %v16008_v25 = vrot.slane %v15997_v39, 4  ;;  %v16009_v4 = vld [vmem:[#allocation49_spill] sm:$0xff] }
 0x2d5   :  { %v10624_v24 = vmul.f32 0.10936069, %v3092_v3  ;;  %v3125_v31 = vmul.f32 0.10936069, %v3093_v60  ;;  %v10626_v52 = vmul.f32 0.10936069, %v3094_v9  ;;  %v10632_v7 = vadd.f32 %v16009_v4, %v15891_v23 }
 0x2d6   :  { %v3103_v34 = vadd.f32 %v16008_v25, %v15997_v39  ;;  %v3127_v28 = vmul.f32 0.10936069, %v3095_v45  ;;  %v10628_v0 = vmul.f32 0.10936069, %v3096_v46  ;;  %v3129_v20 = vmul.f32 0.10936069, %v3097_v63 }
 0x2d7   :  { %v3168_v62 = vrot.slane %v10585_v6, 6  ;;  %v3169_v26 = vrot.slane %v3105_v38, 6  ;;  %v3171_v47 = vrot.slane %v10588_v51, 6  ;;  %v3172_v37 = vrot.slane %v3107_v49, 6  ;;  %v16010_v9 = vld [vmem:[#allocation39_spill] sm:$0xff]  ;;  %v16012_v39 = vld [vmem:[#allocation46_spill] sm:$0xff] }
 0x2d8   :  { %v10636_v25 = vmul.f32 0.10936069, %v3098_v54  ;;  %v3174_v3 = vrot.slane %v10590_v1, 6  ;;  %v3175_v60 = vrot.slane %v3109_v43, 6  ;;  %v10641_v45 = vadd.f32 %v16010_v9, %v15953_v13  ;;  %v16014_v1 = vld [vmem:[#allocation31_spill] sm:$0xff] }
 0x2d9   :  { %v3131_v63 = vmul.f32 0.10936069, %v3099_v32  ;;  %v10643_v46 = vmul.f32 0.10936069, %v3100_v11  ;;  %v3133_v23 = vmul.f32 0.10936069, %v3101_v18  ;;  %v10647_v6 = vadd.f32 %v16012_v39, %v15959_v44 }
 0x2da   :  { %16011 = vst [vmem:[#allocation16_spill] sm:$0xff] %v10641_v45  ;;  %v10649_v38 = vmul.f32 0.10936069, %v3102_v53  ;;  %v3135_v51 = vmul.f32 0.10936069, %v3103_v34  ;;  %v3177_v49 = vrot.slane %v10593_v21, 6  ;;  %v10654_v43 = vadd.f32 %v16014_v1, %v15973_v48 }
 0x2db   :  { %16013 = vst [vmem:[#allocation80_spill] sm:$0xff] %v10647_v6  ;;  %v3170_v13 = vsel %vm733_vm1, %v3168_v62, %v3169_v26  ;;  %v3173_v32 = vsel %vm733_vm1, %v3171_v47, %v3172_v37  ;;  %v3178_v54 = vrot.slane %v10595_v8, 6  ;;  %v3180_v11 = vrot.slane %v10598_v36, 6 }
 0x2dc   :  { %16015 = vst [vmem:[#allocation93_spill] sm:$0xff] %v10654_v43  ;;  %v3176_v44 = vsel %vm733_vm1, %v3174_v3, %v3175_v60  ;;  %v3181_v18 = vrot.slane %v10600_v40, 6  ;;  %v3183_v53 = vrot.slane %v10602_v10, 6  ;;  %v3184_v21 = vrot.slane %v10605_v57, 6 }
 0x2dd   :  { %v3186_v34 = vrot.slane %v10607_v14, 6  ;;  %v3187_v48 = vrot.slane %v10609_v56, 6  ;;  %v3189_v26 = vrot.slane %v10612_v2, 6  ;;  %v3190_v37 = vrot.slane %v10614_v42, 6 }
 0x2de   :  { %v3192_v8 = vrot.slane %v10616_v33, 6  ;;  %v3193_v43 = vrot.slane %v3121_v27, 6  ;;  %v3195_v36 = vrot.slane %v10619_v50, 6  ;;  %v3196_v60 = vrot.slane %v3123_v55, 6 }
 0x2df   :  { %v3198_v40 = vrot.slane %v10624_v24, 6  ;;  %v3199_v6 = vrot.slane %v3125_v31, 6  ;;  %v3201_v10 = vrot.slane %v10626_v52, 6  ;;  %v3202_v57 = vrot.slane %v3127_v28, 6 }
 0x2e0   :  { %v3204_v14 = vrot.slane %v10628_v0, 6  ;;  %v3205_v45 = vrot.slane %v3129_v20, 6  ;;  %v3207_v56 = vrot.slane %v10636_v25, 6  ;;  %v3208_v2 = vrot.slane %v3131_v63, 6 }
 0x2e1   :  { %v3179_v42 = vsel %vm733_vm1, %v3177_v49, %v3178_v54  ;;  %v3182_v33 = vsel %vm733_vm1, %v3180_v11, %v3181_v18  ;;  %v3210_v27 = vrot.slane %v10643_v46, 6  ;;  %v3211_v50 = vrot.slane %v3133_v23, 6  ;;  %v16016_v54 = vld [vmem:[#allocation55_spill] sm:$0xff] }
 0x2e2   :  { %v3185_v55 = vsel %vm733_vm1, %v3183_v53, %v3184_v21  ;;  %v3188_v31 = vsel %vm733_vm1, %v3186_v34, %v3187_v48  ;;  %v3213_v24 = vrot.slane %v10649_v38, 6  ;;  %v3214_v52 = vrot.slane %v3135_v51, 6  ;;  %v16017_v51 = vld [vmem:[#allocation57_spill] sm:$0xff]  ;;  %v16018_v48 = vld [vmem:[#allocation74_spill] sm:$0xff] }
 0x2e3   :  { %v3191_v28 = vsel %vm733_vm1, %v3189_v26, %v3190_v37  ;;  %v3194_v0 = vsel %vm733_vm1, %v3192_v8, %v3193_v43  ;;  %v3197_v20 = vsel %vm733_vm1, %v3195_v36, %v3196_v60  ;;  %v3200_v25 = vsel %vm733_vm1, %v3198_v40, %v3199_v6  ;;  %v16019_v37 = vld [vmem:[#allocation75_spill] sm:$0xff] }
 0x2e4   :  { %v3203_v63 = vsel %vm733_vm1, %v3201_v10, %v3202_v57  ;;  %v3206_v46 = vsel %vm733_vm1, %v3204_v14, %v3205_v45  ;;  %v3209_v23 = vsel %vm733_vm1, %v3207_v56, %v3208_v2  ;;  %v10688_v18 = vadd.f32 %v3168_v62, %v16016_v54  ;;  %v16021_v45 = vld [vmem:[#allocation69_spill] sm:$0xff]  ;;  %v16023_v54 = vld [vmem:[#allocation78_spill] sm:$0xff] }
 0x2e5   :  { %v3212_v38 = vsel %vm733_vm1, %v3210_v27, %v3211_v50  ;;  %v10692_v21 = vadd.f32 %v3170_v13, %v16017_v51  ;;  %v10695_v43 = vadd.f32 %v3171_v47, %v16018_v48  ;;  %v10698_v60 = vadd.f32 %v3173_v32, %v16019_v37  ;;  %v16022_v2 = vld [vmem:[#allocation9_spill] sm:$0xff]  ;;  %v16024_v13 = vld [vmem:[#allocation83_spill] sm:$0xff]  ;;  %v16028_v32 = vld [vmem:[#allocation44_spill] sm:$0xff] }
 0x2e6   :  { %v10701_v6 = vsel %vm733_vm1, %v3213_v24, %v3214_v52  ;;  %v10704_v57 = vadd.f32 %v3174_v3, %v16021_v45  ;;  %v10707_v62 = vadd.f32 %v3176_v44, %v16022_v2  ;;  %v10710_v50 = vadd.f32 %v3177_v49, %v16023_v54  ;;  %v16026_v47 = vld [vmem:[#allocation73_spill] sm:$0xff]  ;;  %v16030_v52 = vld [vmem:[#allocation12_spill] sm:$0xff]  ;;  %v16034_v44 = vld [vmem:[#allocation59_spill] sm:$0xff] }
 0x2e7   :  { %16020 = vst [vmem:[#allocation94_spill] sm:$0xff] %v10698_v60  ;;  %v10713_v51 = vadd.f32 %v3179_v42, %v16024_v13  ;;  %v10716_v48 = vadd.f32 %v3180_v11, %v16026_v47  ;;  %v10719_v37 = vadd.f32 %v3182_v33, %v16028_v32  ;;  %v10722_v60 = vadd.f32 %v3183_v53, %v16030_v52  ;;  %v16032_v3 = vld [vmem:[#allocation24_spill] sm:$0xff]  ;;  %v16038_v42 = vld [vmem:[#allocation70_spill] sm:$0xff]  ;;  %v16040_v11 = vld [vmem:[#allocation71_spill] sm:$0xff] }
 0x2e8   :  { %v10725_v45 = vadd.f32 %v3185_v55, %v16032_v3  ;;  %v10728_v2 = vadd.f32 %v3186_v34, %v16034_v44  ;;  %v16036_v49 = vld [vmem:[#allocation28_spill] sm:$0xff]  ;;  %v10734_v13 = vadd.f32 %v3189_v26, %v16038_v42  ;;  %v10737_v47 = vadd.f32 %v3191_v28, %v16040_v11  ;;  %v16042_v33 = vld [vmem:[#allocation105_spill] sm:$0xff]  ;;  %v16044_v53 = vld [vmem:[#allocation106_spill] sm:$0xff] }
 0x2e9   :  { %16025 = vst [vmem:[#allocation95_spill] sm:$0xff] %v10713_v51  ;;  %v10731_v54 = vadd.f32 %v3188_v31, %v16036_v49  ;;  %v10740_v32 = vadd.f32 %v3192_v8, %v16042_v33  ;;  %v10743_v52 = vadd.f32 %v3194_v0, %v16044_v53  ;;  %v16046_v55 = vld [vmem:[#allocation107_spill] sm:$0xff]  ;;  %v16048_v34 = vld [vmem:[#allocation108_spill] sm:$0xff]  ;;  %v16050_v31 = vld [vmem:[#allocation109_spill] sm:$0xff] }
 0x2ea   :  { %16027 = vst [vmem:[#allocation61_spill] sm:$0xff] %v10716_v48  ;;  %v10746_v3 = vadd.f32 %v3195_v36, %v16046_v55  ;;  %v10749_v44 = vadd.f32 %v3197_v20, %v16048_v34  ;;  %v10752_v49 = vadd.f32 %v3198_v40, %v16050_v31  ;;  %v16052_v26 = vld [vmem:[#allocation110_spill] sm:$0xff]  ;;  %v16054_v28 = vld [vmem:[#allocation111_spill] sm:$0xff]  ;;  %v16058_v0 = vld [vmem:[#allocation65_spill] sm:$0xff] }
 0x2eb   :  { %16029 = vst [vmem:[#allocation66_spill] sm:$0xff] %v10719_v37  ;;  %v10755_v42 = vadd.f32 %v3200_v25, %v16052_v26  ;;  %v10758_v11 = vadd.f32 %v3201_v10, %v16054_v28  ;;  %v16056_v8 = vld [vmem:[#allocation62_spill] sm:$0xff]  ;;  %v10764_v53 = vadd.f32 %v3204_v14, %v16058_v0  ;;  %v16060_v36 = vld [vmem:[#allocation77_spill] sm:$0xff]  ;;  %v16062_v20 = vld [vmem:[#allocation79_spill] sm:$0xff] }
 0x2ec   :  { %16031 = vst [vmem:[#allocation47_spill] sm:$0xff] %v10722_v60  ;;  %v10761_v33 = vadd.f32 %v3203_v63, %v16056_v8  ;;  %v10767_v55 = vadd.f32 %v3206_v46, %v16060_v36  ;;  %v10770_v34 = vadd.f32 %v3207_v56, %v16062_v20  ;;  %v16064_v40 = vld [vmem:[#allocation91_spill] sm:$0xff]  ;;  %v16066_v25 = vld [vmem:[#allocation92_spill] sm:$0xff]  ;;  %v16068_v10 = vld [vmem:[#allocation81_spill] sm:$0xff]  ;;  %v3282_v46 = vrot.slane %v15952_v5, 2 }
 0x2ed   :  { %16033 = vst [vmem:[#allocation19_spill] sm:$0xff] %v10725_v45  ;;  %v10773_v31 = vadd.f32 %v3209_v23, %v16064_v40  ;;  %v10776_v26 = vadd.f32 %v3210_v27, %v16066_v25  ;;  %v10779_v28 = vadd.f32 %v3212_v38, %v16068_v10  ;;  %v16070_v63 = vld [vmem:[#allocation82_spill] sm:$0xff]  ;;  %v16072_v14 = vld [vmem:[#allocation43_spill] sm:$0xff]  ;;  %v3284_v36 = vrot.slane %v15958_v30, 2  ;;  %v16087_v48 = vld [vmem:[#allocation53_spill] sm:$0xff] }
 0x2ee   :  { %16035 = vst [vmem:[#allocation38_spill] sm:$0xff] %v10728_v2  ;;  %v10782_v8 = vadd.f32 %v3213_v24, %v16070_v63  ;;  %v3280_v0 = vrot.slane %v16072_v14, 2  ;;  %v3286_v56 = vrot.slane %v15972_v15, 2  ;;  %v3288_v23 = vrot.slane %v15974_v12, 2  ;;  %v16085_v2 = vld [vmem:[#allocation104_spill] sm:$0xff]  ;;  %v16088_v51 = vld [vmem:[#allocation58_spill] sm:$0xff] }
 0x2ef   :  { %16037 = vst [vmem:[#allocation56_spill] sm:$0xff] %v10731_v54  ;;  %v3290_v20 = vrot.slane %v15976_v35, 2  ;;  %v3292_v27 = vrot.slane %v15978_v58, 2  ;;  %v3294_v38 = vrot.slane %v15980_v17, 2  ;;  %v3296_v40 = vrot.slane %v15982_v41, 2  ;;  %v16084_v54 = vld [vmem:[#allocation103_spill] sm:$0xff] }
 0x2f0   :  { %16039 = vst [vmem:[#allocation84_spill] sm:$0xff] %v10734_v13  ;;  %v3298_v24 = vrot.slane %v15984_v19, 2  ;;  %v3300_v25 = vrot.slane %v15986_v29, 2  ;;  %v3302_v10 = vrot.slane %v15999_v61, 2  ;;  %v3304_v63 = vrot.slane %v16001_v59, 2  ;;  %v16083_v13 = vld [vmem:[#allocation102_spill] sm:$0xff] }
 0x2f1   :  { %16041 = vst [vmem:[#allocation86_spill] sm:$0xff] %v10737_v47  ;;  %v16082_v47 = vld [vmem:[#allocation101_spill] sm:$0xff] }
 0x2f2   :  { %16043 = vst [vmem:[#allocation88_spill] sm:$0xff] %v10740_v32  ;;  %v16077_v32 = vld [vmem:[#allocation50_spill] sm:$0xff] }
 0x2f3   :  { %16045 = vst [vmem:[#allocation90_spill] sm:$0xff] %v10743_v52 }
 0x2f4   :  { %16047 = vst [vmem:[#allocation49_spill] sm:$0xff] %v10746_v3 }
 0x2f5   :  { %16049 = vst [vmem:[#allocation39_spill] sm:$0xff] %v10749_v44  ;;  %v16075_v44 = vld [vmem:[#allocation35_spill] sm:$0xff] }
 0x2f6   :  { %16051 = vst [vmem:[#allocation46_spill] sm:$0xff] %v10752_v49  ;;  %v3291_v3 = vsel %vm846_vm2, %v3290_v20, %v16075_v44  ;;  %v16076_v49 = vld [vmem:[#allocation23_spill] sm:$0xff]  ;;  %v3305_v20 = vsel %vm846_vm2, %v3304_v63, %v16082_v47  ;;  %v16086_v63 = vld [vmem:[#allocation96_spill] sm:$0xff] }
 0x2f7   :  { %16053 = vst [vmem:[#allocation31_spill] sm:$0xff] %v10755_v42  ;;  %v3293_v52 = vsel %vm846_vm2, %v3292_v27, %v16076_v49 }
 0x2f8   :  { %16055 = vst [vmem:[#allocation55_spill] sm:$0xff] %v10758_v11  ;;  %v16074_v11 = vld [vmem:[#allocation54_spill] sm:$0xff] }
 0x2f9   :  { %16057 = vst [vmem:[#allocation57_spill] sm:$0xff] %v10761_v33  ;;  %v3287_v33 = vsel %vm846_vm2, %v3286_v56, %v16014_v1  ;;  %v3289_v42 = vsel %vm846_vm2, %v3288_v23, %v16074_v11  ;;  %v16081_v56 = vld [vmem:[#allocation100_spill] sm:$0xff]  ;;  %v3337_v37 = vadd.f32 %v16074_v11, %v16086_v63 }
 0x2fa   :  { %16059 = vst [vmem:[#allocation74_spill] sm:$0xff] %v10764_v53  ;;  %v3285_v53 = vsel %vm846_vm2, %v3284_v36, %v16012_v39  ;;  %v16080_v36 = vld [vmem:[#allocation99_spill] sm:$0xff]  ;;  %v3303_v23 = vsel %vm846_vm2, %v3302_v10, %v16081_v56  ;;  %v3334_v10 = vadd.f32 %v3287_v33, %v15972_v15  ;;  %v3336_v60 = vadd.f32 %v3289_v42, %v15974_v12  ;;  %v16090_v42 = vld [vmem:[#allocation30_spill] sm:$0xff] }
 0x2fb   :  { %16061 = vst [vmem:[#allocation75_spill] sm:$0xff] %v10767_v55  ;;  %v3283_v55 = vsel %vm846_vm2, %v3282_v46, %v16010_v9  ;;  %v16079_v46 = vld [vmem:[#allocation98_spill] sm:$0xff]  ;;  %v3301_v1 = vsel %vm846_vm2, %v3300_v25, %v16080_v36  ;;  %v3332_v25 = vadd.f32 %v3285_v53, %v15958_v30  ;;  %v16089_v30 = vld [vmem:[#allocation40_spill] sm:$0xff] }
 0x2fc   :  { %16063 = vst [vmem:[#allocation69_spill] sm:$0xff] %v10770_v34  ;;  %v3281_v34 = vsel %vm846_vm2, %v3280_v0, %v16009_v4  ;;  %v3295_v4 = vsel %vm846_vm2, %v3294_v38, %v16077_v32  ;;  %v16078_v0 = vld [vmem:[#allocation97_spill] sm:$0xff]  ;;  %v3299_v39 = vsel %vm846_vm2, %v3298_v24, %v16079_v46  ;;  %v3330_v45 = vadd.f32 %v3283_v55, %v15952_v5 }
 0x2fd   :  { %16065 = vst [vmem:[#allocation9_spill] sm:$0xff] %v10773_v31  ;;  %v3297_v9 = vsel %vm846_vm2, %v3296_v40, %v16078_v0  ;;  %v3328_v24 = vadd.f32 %v3281_v34, %v16072_v14  ;;  %v3341_v34 = vadd.f32 %v16076_v49, %v16088_v51  ;;  %v3342_v5 = vadd.f32 %v3295_v4, %v15980_v17  ;;  %v16094_v49 = vld [vmem:[#allocation87_spill] sm:$0xff]  ;;  %v16095_v14 = vld [vmem:[#allocation16_spill] sm:$0xff] }
 0x2fe   :  { %16067 = vst [vmem:[#allocation78_spill] sm:$0xff] %v10776_v26  ;;  %v16073_v26 = vld [vmem:[#allocation11_spill] sm:$0xff]  ;;  %v3343_v15 = vadd.f32 %v16077_v32, %v16089_v30  ;;  %v3344_v12 = vadd.f32 %v3297_v9, %v15982_v41  ;;  %v3345_v11 = vadd.f32 %v16078_v0, %v16090_v42  ;;  %v3350_v17 = vadd.f32 %v3303_v23, %v15999_v61  ;;  %v16096_v61 = vld [vmem:[#allocation89_spill] sm:$0xff] }
 0x2ff   :  { %16069 = vst [vmem:[#allocation83_spill] sm:$0xff] %v10779_v28  ;;  %v3308_v28 = vrot.slane %v16005_v16, 2  ;;  %v3310_v31 = vrot.slane %v16073_v26, 2  ;;  %v3352_v41 = vadd.f32 %v3305_v20, %v16001_v59  ;;  %v3353_v33 = vadd.f32 %v16082_v47, %v16094_v49  ;;  %v16098_v47 = vld [vmem:[#allocation93_spill] sm:$0xff] }
 0x300   :  { %16071 = vst [vmem:[#allocation73_spill] sm:$0xff] %v10782_v8  ;;  %v3306_v8 = vrot.slane %v16003_v22, 2  ;;  %v10863_v53 = vmul.f32 0.21300554, %v3328_v24  ;;  %v3363_v4 = vmul.f32 0.21300554, %v16095_v14  ;;  %v3355_v9 = vadd.f32 %v16083_v13, %v16096_v61 }
 0x301   :  { %v3309_v38 = vsel %vm846_vm2, %v3308_v28, %v16084_v54  ;;  %v3311_v40 = vsel %vm846_vm2, %v3310_v31, %v16085_v2  ;;  %v3339_v28 = vadd.f32 %v16075_v44, %v16087_v48  ;;  %v3340_v31 = vadd.f32 %v3293_v52, %v15978_v58  ;;  %v16092_v52 = vld [vmem:[#allocation52_spill] sm:$0xff]  ;;  %v16093_v44 = vld [vmem:[#allocation85_spill] sm:$0xff] }
 0x302   :  { %v3307_v27 = vsel %vm846_vm2, %v3306_v8, %v16083_v13  ;;  %v3338_v8 = vadd.f32 %v3291_v3, %v15976_v35  ;;  %v3346_v35 = vadd.f32 %v3299_v39, %v15984_v19  ;;  %v16091_v3 = vld [vmem:[#allocation48_spill] sm:$0xff]  ;;  %v3348_v58 = vadd.f32 %v3301_v1, %v15986_v29 }
 0x303   :  { %v3347_v48 = vadd.f32 %v16079_v46, %v16091_v3  ;;  %v3349_v51 = vadd.f32 %v16080_v36, %v16092_v52  ;;  %v3351_v32 = vadd.f32 %v16081_v56, %v16093_v44  ;;  %v3361_v19 = vmul.f32 0.21300554, %v10632_v7  ;;  %v16097_v46 = vld [vmem:[#allocation80_spill] sm:$0xff]  ;;  %v16099_v56 = vld [vmem:[#allocation10_spill] sm:$0xff] }
 0x304   :  { %v3354_v55 = vadd.f32 %v3307_v27, %v16003_v22  ;;  %v10867_v29 = vmul.f32 0.21300554, %v3330_v45  ;;  %v10870_v0 = vmul.f32 0.21300554, %v3332_v25  ;;  %v3365_v59 = vmul.f32 0.21300554, %v16097_v46 }
 0x305   :  { %v10875_v39 = vmul.f32 0.21300554, %v3334_v10  ;;  %v10878_v36 = vmul.f32 0.21300554, %v16098_v47  ;;  %v3356_v7 = vadd.f32 %v3309_v38, %v16005_v16  ;;  %v10881_v1 = vmul.f32 0.21300554, %v3336_v60 }
 0x306   :  { %v10883_v22 = vmul.f32 0.21300554, %v3337_v37  ;;  %v10885_v45 = vmul.f32 0.21300554, %v3338_v8  ;;  %v3357_v23 = vadd.f32 %v16084_v54, %v16099_v56  ;;  %v10889_v20 = vmul.f32 0.21300554, %v3339_v28 }
 0x307   :  { %v10891_v13 = vmul.f32 0.21300554, %v3340_v31  ;;  %v3373_v27 = vmul.f32 0.21300554, %v3341_v34  ;;  %v3358_v24 = vadd.f32 %v3311_v40, %v16073_v26  ;;  %v10894_v25 = vmul.f32 0.21300554, %v3342_v5 }
 0x308   :  { %v3375_v10 = vmul.f32 0.21300554, %v3343_v15  ;;  %v10896_v16 = vmul.f32 0.21300554, %v3344_v12  ;;  %v16100_v60 = vld [vmem:[#allocation25_spill] sm:$0xff]  ;;  %v3424_v31 = vrot.slane %v10863_v53, 7 }
 0x309   :  { %v3359_v37 = vadd.f32 %v16085_v2, %v16100_v60  ;;  %v3377_v38 = vmul.f32 0.21300554, %v3345_v11  ;;  %v10900_v63 = vmul.f32 0.21300554, %v3346_v35  ;;  %v3379_v8 = vmul.f32 0.21300554, %v3347_v48 }
 0x30a   :  { %v10902_v54 = vmul.f32 0.21300554, %v3348_v58  ;;  %v3381_v28 = vmul.f32 0.21300554, %v3349_v51  ;;  %v3425_v34 = vrot.slane %v3361_v19, 7  ;;  %v3427_v40 = vrot.slane %v10867_v29, 7 }
 0x30b   :  { %v10905_v30 = vmul.f32 0.21300554, %v3350_v17  ;;  %v3383_v26 = vmul.f32 0.21300554, %v3351_v32  ;;  %v3428_v5 = vrot.slane %v3363_v4, 7  ;;  %v3430_v2 = vrot.slane %v10870_v0, 7 }
 0x30c   :  { %v10908_v15 = vmul.f32 0.21300554, %v3352_v41  ;;  %v3385_v12 = vmul.f32 0.21300554, %v3353_v33  ;;  %v3431_v42 = vrot.slane %v3365_v59, 7  ;;  %v16101_v11 = vld [vmem:[#allocation8_spill] sm:$0xff]  ;;  %v3426_v44 = vsel %vm991_vm3, %v3424_v31, %v3425_v34 }
 0x30d   :  { %v10913_v35 = vadd.f32 %v10701_v6, %v16101_v11  ;;  %v10915_v3 = vmul.f32 0.21300554, %v3354_v55  ;;  %v3387_v48 = vmul.f32 0.21300554, %v3355_v9  ;;  %v10917_v58 = vmul.f32 0.21300554, %v3356_v7 }
 0x30e   :  { %v3389_v52 = vmul.f32 0.21300554, %v3357_v23  ;;  %v10919_v51 = vmul.f32 0.21300554, %v3358_v24  ;;  %v3391_v17 = vmul.f32 0.21300554, %v3359_v37  ;;  %v3429_v32 = vsel %vm991_vm3, %v3427_v40, %v3428_v5 }
 0x30f   :  { %v3433_v41 = vrot.slane %v10875_v39, 7  ;;  %v3434_v49 = vrot.slane %v10878_v36, 7  ;;  %v3436_v6 = vrot.slane %v10881_v1, 7  ;;  %v3432_v33 = vsel %vm991_vm3, %v3430_v2, %v3431_v42 }
 0x310   :  { %v3437_v53 = vrot.slane %v10883_v22, 7  ;;  %v3439_v19 = vrot.slane %v10885_v45, 7  ;;  %v3440_v55 = vrot.slane %v10889_v20, 7  ;;  %v3442_v29 = vrot.slane %v10891_v13, 7 }
 0x311   :  { %v3443_v14 = vrot.slane %v3373_v27, 7  ;;  %v3445_v4 = vrot.slane %v10894_v25, 7  ;;  %v3446_v0 = vrot.slane %v3375_v10, 7  ;;  %v3448_v61 = vrot.slane %v10896_v16, 7 }
 0x312   :  { %v3449_v9 = vrot.slane %v3377_v38, 7  ;;  %v3451_v46 = vrot.slane %v10900_v63, 7  ;;  %v3452_v59 = vrot.slane %v3379_v8, 7  ;;  %v3454_v39 = vrot.slane %v10902_v54, 7 }
 0x313   :  { %v3455_v47 = vrot.slane %v3381_v28, 7  ;;  %v3457_v36 = vrot.slane %v10905_v30, 7  ;;  %v3458_v7 = vrot.slane %v3383_v26, 7  ;;  %v3460_v1 = vrot.slane %v10908_v15, 7 }
 0x314   :  { %v3461_v22 = vrot.slane %v3385_v12, 7  ;;  %v3463_v45 = vrot.slane %v10915_v3, 7  ;;  %v3464_v56 = vrot.slane %v3387_v48, 7  ;;  %v3466_v23 = vrot.slane %v10917_v58, 7  ;;  %v16102_v12 = vld [vmem:[#allocation94_spill] sm:$0xff]  ;;  %v16104_v58 = vld [vmem:[#allocation61_spill] sm:$0xff] }
 0x315   :  { %v3467_v20 = vrot.slane %v3389_v52, 7  ;;  %v3469_v13 = vrot.slane %v10919_v51, 7  ;;  %v3470_v27 = vrot.slane %v3391_v17, 7  ;;  %v3435_v24 = vsel %vm991_vm3, %v3433_v41, %v3434_v49  ;;  %v16106_v52 = vld [vmem:[#allocation47_spill] sm:$0xff]  ;;  %v16112_v49 = vld [vmem:[#allocation86_spill] sm:$0xff] }
 0x316   :  { %v3438_v25 = vsel %vm991_vm3, %v3436_v6, %v3437_v53  ;;  %v3441_v10 = vsel %vm991_vm3, %v3439_v19, %v3440_v55  ;;  %v3444_v16 = vsel %vm991_vm3, %v3442_v29, %v3443_v14  ;;  %v3447_v60 = vsel %vm991_vm3, %v3445_v4, %v3446_v0  ;;  %v16118_v14 = vld [vmem:[#allocation46_spill] sm:$0xff] }
 0x317   :  { %v3450_v37 = vsel %vm991_vm3, %v3448_v61, %v3449_v9  ;;  %v3453_v38 = vsel %vm991_vm3, %v3451_v46, %v3452_v59  ;;  %v3456_v63 = vsel %vm991_vm3, %v3454_v39, %v3455_v47  ;;  %v3459_v8 = vsel %vm991_vm3, %v3457_v36, %v3458_v7  ;;  %v16120_v59 = vld [vmem:[#allocation39_spill] sm:$0xff] }
 0x318   :  { %v3462_v54 = vsel %vm991_vm3, %v3460_v1, %v3461_v22  ;;  %v3465_v28 = vsel %vm991_vm3, %v3463_v45, %v3464_v56  ;;  %v3504_v34 = vadd.f32 %v3424_v31, %v10688_v18  ;;  %v3468_v30 = vsel %vm991_vm3, %v3466_v23, %v3467_v20  ;;  %v16103_v31 = vld [vmem:[#allocation95_spill] sm:$0xff] }
 0x319   :  { %v3471_v26 = vsel %vm991_vm3, %v3469_v13, %v3470_v27  ;;  %v3505_v5 = vadd.f32 %v3426_v44, %v10692_v21  ;;  %v10956_v15 = vadd.f32 %v3427_v40, %v10695_v43  ;;  %v10959_v42 = vadd.f32 %v3429_v32, %v16102_v12  ;;  %v16105_v43 = vld [vmem:[#allocation66_spill] sm:$0xff]  ;;  %v16110_v32 = vld [vmem:[#allocation84_spill] sm:$0xff]  ;;  %v16122_v22 = vld [vmem:[#allocation55_spill] sm:$0xff] }
 0x31a   :  { %v10962_v11 = vadd.f32 %v3430_v2, %v10704_v57  ;;  %v10965_v3 = vadd.f32 %v3432_v33, %v10707_v62  ;;  %v10968_v18 = vadd.f32 %v3433_v41, %v10710_v50  ;;  %v10971_v48 = vadd.f32 %v3435_v24, %v16103_v31  ;;  %v16107_v57 = vld [vmem:[#allocation19_spill] sm:$0xff]  ;;  %v16108_v62 = vld [vmem:[#allocation38_spill] sm:$0xff]  ;;  %v16109_v50 = vld [vmem:[#allocation56_spill] sm:$0xff] }
 0x31b   :  { %v10974_v21 = vadd.f32 %v3436_v6, %v16104_v58  ;;  %v10977_v40 = vadd.f32 %v3438_v25, %v16105_v43  ;;  %v10980_v51 = vadd.f32 %v3439_v19, %v16106_v52  ;;  %v10983_v2 = vadd.f32 %v3441_v10, %v16107_v57  ;;  %v16114_v33 = vld [vmem:[#allocation88_spill] sm:$0xff]  ;;  %v16116_v19 = vld [vmem:[#allocation90_spill] sm:$0xff]  ;;  %v16131_v12 = vld [vmem:[#allocation73_spill] sm:$0xff] }
 0x31c   :  { %v10986_v17 = vadd.f32 %v3442_v29, %v16108_v62  ;;  %v10989_v44 = vadd.f32 %v3444_v16, %v16109_v50  ;;  %v10992_v41 = vadd.f32 %v3445_v4, %v16110_v32  ;;  %v10995_v6 = vadd.f32 %v3447_v60, %v16112_v49  ;;  %v16119_v29 = vld [vmem:[#allocation49_spill] sm:$0xff]  ;;  %v16121_v4 = vld [vmem:[#allocation31_spill] sm:$0xff]  ;;  %v16124_v27 = vld [vmem:[#allocation74_spill] sm:$0xff] }
 0x31d   :  { %v10998_v53 = vadd.f32 %v3448_v61, %v16114_v33  ;;  %v11001_v55 = vadd.f32 %v3450_v37, %v16116_v19  ;;  %v11004_v0 = vadd.f32 %v3454_v39, %v16118_v14  ;;  %v11007_v9 = vadd.f32 %v3451_v46, %v16119_v29  ;;  %v16123_v61 = vld [vmem:[#allocation57_spill] sm:$0xff]  ;;  %v16125_v39 = vld [vmem:[#allocation75_spill] sm:$0xff]  ;;  %v16129_v37 = vld [vmem:[#allocation78_spill] sm:$0xff] }
 0x31e   :  { %16111 = vst [vmem:[#allocation44_spill] sm:$0xff] %v10992_v41  ;;  %v11010_v47 = vadd.f32 %v3453_v38, %v16120_v59  ;;  %v11013_v7 = vadd.f32 %v3456_v63, %v16121_v4  ;;  %v11016_v56 = vadd.f32 %v3457_v36, %v16122_v22  ;;  %v11019_v20 = vadd.f32 %v3459_v8, %v16123_v61  ;;  %v16126_v46 = vld [vmem:[#allocation69_spill] sm:$0xff]  ;;  %v16130_v63 = vld [vmem:[#allocation83_spill] sm:$0xff] }
 0x31f   :  { %16113 = vst [vmem:[#allocation12_spill] sm:$0xff] %v10995_v6  ;;  %v11022_v24 = vadd.f32 %v3460_v1, %v16124_v27  ;;  %v11025_v25 = vadd.f32 %v3462_v54, %v16125_v39  ;;  %v11028_v10 = vadd.f32 %v3463_v45, %v16126_v46  ;;  %v16127_v16 = vld [vmem:[#allocation9_spill] sm:$0xff]  ;;  %v3532_v38 = vadd.f32 %v3466_v23, %v16129_v37  ;;  %v16132_v27 = vld [vmem:[#allocation26_spill] sm:$0xff]  ;;  %v16133_v39 = vld [vmem:[#allocation36_spill] sm:$0xff] }
 0x320   :  { %16115 = vst [vmem:[#allocation24_spill] sm:$0xff] %v10998_v53  ;;  %v11031_v60 = vadd.f32 %v3465_v28, %v16127_v16  ;;  %v11035_v36 = vadd.f32 %v3468_v30, %v16130_v63  ;;  %v3534_v8 = vadd.f32 %v3469_v13, %v16131_v12  ;;  %v3535_v31 = vadd.f32 %v3471_v26, %v10913_v35 }
 0x321   :  { %16117 = vst [vmem:[#allocation59_spill] sm:$0xff] %v11001_v55  ;;  %v3536_v1 = vmul.f32 0.26601171, %v10980_v51  ;;  %v3537_v54 = vmul.f32 0.26601171, %v10983_v2  ;;  %v3548_v58 = vadd.f32 %v11004_v0, %v3504_v34  ;;  %v3549_v23 = vadd.f32 %v11013_v7, %v3505_v5 }
 0x322   :  { %16128 = vst [vmem:[#allocation28_spill] sm:$0xff] %v11031_v60  ;;  %v3538_v45 = vmul.f32 0.26601171, %v10986_v17  ;;  %v3539_v28 = vmul.f32 0.26601171, %v10989_v44  ;;  %v3550_v35 = vadd.f32 %v11016_v56, %v10956_v15  ;;  %v3551_v26 = vadd.f32 %v11019_v20, %v10959_v42 }
 0x323   :  { %v3540_v43 = vmul.f32 0.26601171, %v10992_v41  ;;  %v3541_v30 = vmul.f32 0.26601171, %v10995_v6  ;;  %v3542_v13 = vmul.f32 0.26601171, %v10998_v53  ;;  %v3552_v57 = vadd.f32 %v11022_v24, %v10962_v11 }
 0x324   :  { %v3543_v34 = vmul.f32 0.26601171, %v11001_v55  ;;  %v3544_v52 = vmul.f32 0.26601171, %v11007_v9  ;;  %v3553_v5 = vadd.f32 %v11025_v25, %v10965_v3  ;;  %v3545_v62 = vmul.f32 0.26601171, %v11010_v47 }
 0x325   :  { %v3554_v50 = vadd.f32 %v11028_v10, %v10968_v18  ;;  %v3555_v32 = vadd.f32 %v11031_v60, %v10971_v48  ;;  %v3560_v49 = vmul.f32 0.0010283801, %v3548_v58  ;;  %v3556_v33 = vadd.f32 %v3532_v38, %v10974_v21 }
 0x326   :  { %v3557_v19 = vadd.f32 %v11035_v36, %v10977_v40  ;;  %v3558_v14 = vadd.f32 %v3534_v8, %v10980_v51  ;;  %v3561_v29 = vmul.f32 0.0010283801, %v3549_v23  ;;  %v3546_v59 = vmul.f32 0.26601171, %v11004_v0 }
 0x327   :  { %v3559_v4 = vadd.f32 %v3535_v31, %v10983_v2  ;;  %v3562_v22 = vmul.f32 0.0010283801, %v3550_v35  ;;  %v3563_v61 = vmul.f32 0.0010283801, %v3551_v26  ;;  %v11071_v46 = vadd.f32 %v16133_v39, %v16132_v27 }
 0x328   :  { %v3547_v16 = vmul.f32 0.26601171, %v11013_v7  ;;  %v3564_v37 = vmul.f32 0.0010283801, %v3552_v57  ;;  %v3565_v63 = vmul.f32 0.0010283801, %v3553_v5  ;;  %v3572_v6 = vadd.f32 %v3560_v49, %v3536_v1 }
 0x329   :  { %16134 = vst [vmem:[#allocation70_spill] sm:$0xff] %v11071_v46  ;;  %v3566_v12 = vmul.f32 0.0010283801, %v3554_v50  ;;  %v3567_v58 = vmul.f32 0.0010283801, %v3555_v32  ;;  %v3584_v8 = vadd.f32 %v11007_v9, %v10956_v15  ;;  %v3573_v31 = vadd.f32 %v3561_v29, %v3537_v54 }
 0x32a   :  { %v3568_v23 = vmul.f32 0.0010283801, %v3556_v33  ;;  %v3569_v41 = vmul.f32 0.0010283801, %v3557_v19  ;;  %v3570_v55 = vmul.f32 0.0010283801, %v3558_v14  ;;  %v3574_v26 = vadd.f32 %v3562_v22, %v3538_v45 }
 0x32b   :  { %v3571_v35 = vmul.f32 0.0010283801, %v3559_v4  ;;  %v3575_v53 = vadd.f32 %v3563_v61, %v3539_v28  ;;  %v3585_v27 = vadd.f32 %v11010_v47, %v10959_v42  ;;  %v3576_v39 = vadd.f32 %v3564_v37, %v3540_v43 }
 0x32c   :  { %v3577_v46 = vadd.f32 %v3565_v63, %v3541_v30  ;;  %v3586_v57 = vadd.f32 %v11004_v0, %v10962_v11  ;;  %v3587_v1 = vadd.f32 %v11013_v7, %v10965_v3  ;;  %v3578_v5 = vadd.f32 %v3566_v12, %v3542_v13  ;;  %v16135_v12 = vld [vmem:[#allocation24_spill] sm:$0xff] }
 0x32d   :  { %v3579_v15 = vadd.f32 %v3567_v58, %v3543_v34  ;;  %v3588_v50 = vadd.f32 %v11016_v56, %v10968_v18  ;;  %v3589_v54 = vadd.f32 %v11019_v20, %v10971_v48  ;;  %v3580_v45 = vadd.f32 %v3568_v23, %v3544_v52 }
 0x32e   :  { %v3590_v42 = vadd.f32 %v11022_v24, %v10974_v21  ;;  %v3591_v28 = vadd.f32 %v11025_v25, %v10977_v40  ;;  %v3596_v43 = vmul.f32 0.007598758, %v3584_v8  ;;  %v3592_v30 = vadd.f32 %v11028_v10, %v10980_v51 }
 0x32f   :  { %v3593_v13 = vadd.f32 %v11031_v60, %v10983_v2  ;;  %v3594_v34 = vadd.f32 %v3532_v38, %v10986_v17  ;;  %v3597_v32 = vmul.f32 0.007598758, %v3585_v27  ;;  %v3581_v49 = vadd.f32 %v3569_v41, %v3545_v62 }
 0x330   :  { %v3595_v52 = vadd.f32 %v11035_v36, %v10989_v44  ;;  %v3598_v33 = vmul.f32 0.007598758, %v3586_v57  ;;  %v3599_v19 = vmul.f32 0.007598758, %v3587_v1  ;;  %v3582_v14 = vadd.f32 %v3570_v55, %v3546_v59  ;;  %v16136_v36 = vld [vmem:[#allocation59_spill] sm:$0xff] }
 0x331   :  { %v3583_v29 = vadd.f32 %v3571_v35, %v3547_v16  ;;  %v3600_v4 = vmul.f32 0.007598758, %v3588_v50  ;;  %v3601_v22 = vmul.f32 0.007598758, %v3589_v54  ;;  %v3602_v61 = vmul.f32 0.007598758, %v3590_v42 }
 0x332   :  { %v3603_v37 = vmul.f32 0.007598758, %v3591_v28  ;;  %v3608_v63 = vadd.f32 %v3596_v43, %v3572_v6  ;;  %v3620_v58 = vadd.f32 %v16135_v12, %v10962_v11  ;;  %v3604_v8 = vmul.f32 0.007598758, %v3592_v30  ;;  %v16138_v28 = vld [vmem:[#allocation12_spill] sm:$0xff] }
 0x333   :  { %v3605_v23 = vmul.f32 0.007598758, %v3593_v13  ;;  %v3606_v38 = vmul.f32 0.007598758, %v3594_v34  ;;  %v3609_v27 = vadd.f32 %v3597_v32, %v3573_v31  ;;  %v3607_v41 = vmul.f32 0.007598758, %v3595_v52 }
 0x334   :  { %v3610_v62 = vadd.f32 %v3598_v33, %v3574_v26  ;;  %v3611_v60 = vadd.f32 %v3599_v19, %v3575_v53  ;;  %v3621_v57 = vadd.f32 %v16136_v36, %v10965_v3  ;;  %v3612_v55 = vadd.f32 %v3600_v4, %v3576_v39 }
 0x335   :  { %v3613_v59 = vadd.f32 %v3601_v22, %v3577_v46  ;;  %v3622_v16 = vadd.f32 %v11007_v9, %v10968_v18  ;;  %v3623_v6 = vadd.f32 %v11010_v47, %v10971_v48  ;;  %v3614_v35 = vadd.f32 %v3602_v61, %v3578_v5  ;;  %v16137_v5 = vld [vmem:[#allocation44_spill] sm:$0xff] }
 0x336   :  { %v3615_v11 = vadd.f32 %v3603_v37, %v3579_v15  ;;  %v3624_v1 = vadd.f32 %v11004_v0, %v10974_v21  ;;  %v3625_v31 = vadd.f32 %v11013_v7, %v10977_v40  ;;  %v3616_v53 = vadd.f32 %v3604_v8, %v3580_v45  ;;  %v16139_v45 = vld [vmem:[#allocation28_spill] sm:$0xff] }
 0x337   :  { %v3626_v3 = vadd.f32 %v11016_v56, %v10980_v51  ;;  %v3627_v46 = vadd.f32 %v11019_v20, %v10983_v2  ;;  %v3628_v26 = vadd.f32 %v11022_v24, %v10986_v17  ;;  %v3629_v39 = vadd.f32 %v11025_v25, %v10989_v44 }
 0x338   :  { %v3630_v15 = vadd.f32 %v11028_v10, %v16137_v5  ;;  %v3632_v50 = vmul.f32 0.036000773, %v3620_v58  ;;  %v3633_v54 = vmul.f32 0.036000773, %v3621_v57  ;;  %v3617_v42 = vadd.f32 %v3605_v23, %v3581_v49 }
 0x339   :  { %v3631_v43 = vadd.f32 %v16139_v45, %v16138_v28  ;;  %v3634_v30 = vmul.f32 0.036000773, %v3622_v16  ;;  %v3635_v13 = vmul.f32 0.036000773, %v3623_v6  ;;  %v3618_v34 = vadd.f32 %v3606_v38, %v3582_v14 }
 0x33a   :  { %v3619_v32 = vadd.f32 %v3607_v41, %v3583_v29  ;;  %v3636_v52 = vmul.f32 0.036000773, %v3624_v1  ;;  %v3637_v33 = vmul.f32 0.036000773, %v3625_v31  ;;  %v3638_v19 = vmul.f32 0.036000773, %v3626_v3 }
 0x33b   :  { %v3639_v4 = vmul.f32 0.036000773, %v3627_v46  ;;  %v3640_v22 = vmul.f32 0.036000773, %v3628_v26  ;;  %v3656_v61 = vadd.f32 %v16137_v5, %v10968_v18  ;;  %v3641_v37 = vmul.f32 0.036000773, %v3629_v39 }
 0x33c   :  { %v3642_v10 = vmul.f32 0.036000773, %v3630_v15  ;;  %v3644_v58 = vadd.f32 %v3632_v50, %v3608_v63  ;;  %v3645_v8 = vadd.f32 %v3633_v54, %v3609_v27  ;;  %v3643_v49 = vmul.f32 0.036000773, %v3631_v43 }
 0x33d   :  { %v3646_v23 = vadd.f32 %v3634_v30, %v3610_v62  ;;  %v3647_v57 = vadd.f32 %v3635_v13, %v3611_v60  ;;  %v3657_v16 = vadd.f32 %v16138_v28, %v10971_v48  ;;  %v3648_v14 = vadd.f32 %v3636_v52, %v3612_v55 }
 0x33e   :  { %v3649_v29 = vadd.f32 %v3637_v33, %v3613_v59  ;;  %v3658_v38 = vadd.f32 %v16135_v12, %v10974_v21  ;;  %v3659_v41 = vadd.f32 %v16136_v36, %v10977_v40  ;;  %v3650_v6 = vadd.f32 %v3638_v19, %v3614_v35 }
 0x33f   :  { %v3651_v18 = vadd.f32 %v3639_v4, %v3615_v11  ;;  %v3652_v1 = vadd.f32 %v3640_v22, %v3616_v53  ;;  %v3660_v63 = vadd.f32 %v11007_v9, %v10980_v51  ;;  %v3661_v60 = vadd.f32 %v11010_v47, %v10983_v2 }
 0x340   :  { %v3662_v48 = vadd.f32 %v11004_v0, %v10986_v17  ;;  %v3663_v27 = vadd.f32 %v11013_v7, %v10989_v44  ;;  %v3668_v62 = vmul.f32 0.10936069, %v3656_v61  ;;  %v3664_v55 = vadd.f32 %v11016_v56, %v16137_v5 }
 0x341   :  { %v3665_v59 = vadd.f32 %v11019_v20, %v16138_v28  ;;  %v3666_v35 = vadd.f32 %v11022_v24, %v16135_v12  ;;  %v3669_v11 = vmul.f32 0.10936069, %v3657_v16  ;;  %v3653_v31 = vadd.f32 %v3641_v37, %v3617_v42 }
 0x342   :  { %v3667_v53 = vadd.f32 %v11025_v25, %v16136_v36  ;;  %v3670_v3 = vmul.f32 0.10936069, %v3658_v38  ;;  %v3671_v46 = vmul.f32 0.10936069, %v3659_v41  ;;  %v3654_v26 = vadd.f32 %v3642_v10, %v3618_v34 }
 0x343   :  { %v3655_v39 = vadd.f32 %v3643_v49, %v3619_v32  ;;  %v3672_v15 = vmul.f32 0.10936069, %v3660_v63  ;;  %v3692_v50 = vadd.f32 %v10986_v17, %v10974_v21  ;;  %v3673_v54 = vmul.f32 0.10936069, %v3661_v60 }
 0x344   :  { %v3674_v45 = vmul.f32 0.10936069, %v3662_v48  ;;  %v3675_v43 = vmul.f32 0.10936069, %v3663_v27  ;;  %v3680_v30 = vadd.f32 %v3668_v62, %v3644_v58  ;;  %v3676_v13 = vmul.f32 0.10936069, %v3664_v55 }
 0x345   :  { %v3677_v52 = vmul.f32 0.10936069, %v3665_v59  ;;  %v3678_v24 = vmul.f32 0.10936069, %v3666_v35  ;;  %v3681_v33 = vadd.f32 %v3669_v11, %v3645_v8  ;;  %v3679_v42 = vmul.f32 0.10936069, %v3667_v53 }
 0x346   :  { %v3682_v19 = vadd.f32 %v3670_v3, %v3646_v23  ;;  %v3683_v4 = vadd.f32 %v3671_v46, %v3647_v57  ;;  %v3693_v25 = vadd.f32 %v10989_v44, %v10977_v40  ;;  %v3684_v34 = vadd.f32 %v3672_v15, %v3648_v14 }
 0x347   :  { %v3694_v32 = vadd.f32 %v16137_v5, %v10980_v51  ;;  %v3695_v21 = vadd.f32 %v16138_v28, %v10983_v2  ;;  %v3696_v22 = vadd.f32 %v16135_v12, %v10986_v17  ;;  %v3685_v61 = vadd.f32 %v3673_v54, %v3649_v29 }
 0x348   :  { %v3697_v37 = vadd.f32 %v16136_v36, %v10989_v44  ;;  %v3698_v10 = vadd.f32 %v11007_v9, %v16137_v5  ;;  %v3699_v40 = vadd.f32 %v11010_v47, %v16138_v28  ;;  %v3686_v58 = vadd.f32 %v3674_v45, %v3650_v6  ;;  %v16140_v6 = vld [vmem:[#allocation34_spill] sm:$0xff] }
 0x349   :  { %v3700_v51 = vadd.f32 %v11004_v0, %v16135_v12  ;;  %v3701_v2 = vadd.f32 %v11013_v7, %v16136_v36  ;;  %v3702_v17 = vadd.f32 %v11016_v56, %v11007_v9  ;;  %v3687_v8 = vadd.f32 %v3675_v43, %v3651_v18  ;;  %v16141_v9 = vld [vmem:[#allocation14_spill] sm:$0xff]  ;;  %v16143_v18 = vld [vmem:[#allocation13_spill] sm:$0xff] }
 0x34a   :  { %v3688_v49 = vadd.f32 %v3676_v13, %v3652_v1  ;;  %v3704_v23 = vmul.f32 0.21300554, %v3692_v50  ;;  %v3705_v44 = vmul.f32 0.21300554, %v3693_v25  ;;  %v3703_v5 = vadd.f32 %v11019_v20, %v11010_v47  ;;  %v16144_v1 = vld [vmem:[#allocation51_spill] sm:$0xff]  ;;  %v6623_v50 = vld [vmem:[%s14509_s2 + $0x10] sm:$0xff] }
 0x34b   :  { %v3706_v57 = vmul.f32 0.21300554, %v3694_v32  ;;  %v3707_v16 = vmul.f32 0.21300554, %v3695_v21  ;;  %v3708_v28 = vmul.f32 0.21300554, %v3696_v22  ;;  %v3689_v14 = vadd.f32 %v3677_v52, %v3653_v31 }
 0x34c   :  { %v3709_v29 = vmul.f32 0.21300554, %v3697_v37  ;;  %v3710_v38 = vmul.f32 0.21300554, %v3698_v10  ;;  %v3711_v0 = vmul.f32 0.21300554, %v3699_v40  ;;  %v3690_v12 = vadd.f32 %v3678_v24, %v3654_v26 }
 0x34d   :  { %v3712_v41 = vmul.f32 0.21300554, %v3700_v51  ;;  %v3713_v7 = vmul.f32 0.21300554, %v3701_v2  ;;  %v3714_v36 = vmul.f32 0.21300554, %v3702_v17  ;;  %v11171_v56 = vadd.f32 %v16141_v9, %v16140_v6 }
 0x34e   :  { %v11175_v63 = vadd.f32 %v16144_v1, %v16143_v18  ;;  %v11177_v47 = vadd.f32 %v3679_v42, %v3655_v39  ;;  %v6621_v20 = vld [vmem:[%s14509_s2] sm:$0xff]  ;;  %v11184_v48 = vmul.f32 0.21300554, %v3703_v5  ;;  %v11186_v27 = vadd.f32 %v3704_v23, %v3680_v30  ;;  %v6622_v39 = vld [vmem:[%s14509_s2 + $0x8] sm:$0xff]  ;;  %v6624_v45 = vld [vmem:[%s14509_s2 + $0x18] sm:$0xff] }
 0x34f   :  { %16142 = vst [vmem:[#allocation71_spill] sm:$0xff] %v11171_v56  ;;  %v11182_v60 = vmul.f32 %v6621_v20, %v6621_v20  ;;  %v11188_v62 = vadd.f32 %v3705_v44, %v3681_v33  ;;  %v11190_v55 = vadd.f32 %v3706_v57, %v3682_v19  ;;  %v11192_v59 = vadd.f32 %v3707_v16, %v3683_v4  ;;  %v6625_v30 = vld [vmem:[%s14509_s2 + $0x20] sm:$0xff]  ;;  %v6626_v52 = vld [vmem:[%s14509_s2 + $0x28] sm:$0xff]  ;;  %v6627_v33 = vld [vmem:[%s14509_s2 + $0x30] sm:$0xff] }
 0x350   :  { %16145 = vst [vmem:[#allocation105_spill] sm:$0xff] %v11175_v63  ;;  %v11194_v35 = vadd.f32 %v3708_v28, %v3684_v34  ;;  %v11196_v11 = vadd.f32 %v3709_v29, %v3685_v61  ;;  %v11198_v31 = vadd.f32 %v3710_v38, %v3686_v58  ;;  %v11200_v53 = vadd.f32 %v3711_v0, %v3687_v8  ;;  %v6628_v19 = vld [vmem:[%s14509_s2 + $0x38] sm:$0xff]  ;;  %v6629_v25 = vld [vmem:[%s14509_s2 + $0x40] sm:$0xff]  ;;  %v6630_v32 = vld [vmem:[%s14509_s2 + $0x48] sm:$0xff] }
 0x351   :  { %16146 = vst [vmem:[#allocation106_spill] sm:$0xff] %v11177_v47  ;;  %v11202_v3 = vadd.f32 %v3712_v41, %v3688_v49  ;;  %v11204_v46 = vadd.f32 %v3713_v7, %v3689_v14  ;;  %v11206_v26 = vadd.f32 %v3714_v36, %v3690_v12  ;;  %v11211_v15 = vmul.f32 %v6622_v39, %v6622_v39  ;;  %v6631_v22 = vld [vmem:[%s14509_s2 + $0x50] sm:$0xff]  ;;  %v6632_v37 = vld [vmem:[%s14509_s2 + $0x58] sm:$0xff]  ;;  %v6633_v40 = vld [vmem:[%s14509_s2 + $0x60] sm:$0xff] }
 0x352   :  { %16147 = vst [vmem:[#allocation107_spill] sm:$0xff] %v11182_v60  ;;  %v11216_v54 = vmul.f32 %v6623_v50, %v6623_v50  ;;  %v11221_v43 = vmul.f32 %v6624_v45, %v6624_v45  ;;  %v11226_v13 = vmul.f32 %v6625_v30, %v6625_v30  ;;  %v11231_v24 = vmul.f32 %v6626_v52, %v6626_v52  ;;  %v6634_v51 = vld [vmem:[%s14509_s2 + $0x68] sm:$0xff]  ;;  %v6635_v17 = vld [vmem:[%s14509_s2 + $0x70] sm:$0xff]  ;;  %v6636_v49 = vld [vmem:[%s14509_s2 + $0x78] sm:$0xff] }
 0x353   :  { %16148 = vst [vmem:[#allocation108_spill] sm:$0xff] %v11184_v48  ;;  %v11236_v42 = vmul.f32 %v6627_v33, %v6627_v33  ;;  %v11241_v4 = vmul.f32 %v6628_v19, %v6628_v19  ;;  %v11246_v34 = vmul.f32 %v6629_v25, %v6629_v25  ;;  %v11251_v21 = vmul.f32 %v6630_v32, %v6630_v32  ;;  %v6637_v44 = vld [vmem:[%s14509_s2 + $0x80] sm:$0xff]  ;;  %v6638_v57 = vld [vmem:[%s14509_s2 + $0x88] sm:$0xff]  ;;  %v6639_v28 = vld [vmem:[%s14509_s2 + $0x90] sm:$0xff] }
 0x354   :  { %16149 = vst [vmem:[#allocation109_spill] sm:$0xff] %v11186_v27  ;;  %v11256_v61 = vmul.f32 %v6631_v22, %v6631_v22  ;;  %v11261_v10 = vmul.f32 %v6632_v37, %v6632_v37  ;;  %v11266_v58 = vmul.f32 %v6633_v40, %v6633_v40  ;;  %v11271_v2 = vmul.f32 %v6634_v51, %v6634_v51  ;;  %v6640_v29 = vld [vmem:[%s14509_s2 + $0x98] sm:$0xff]  ;;  %v6641_v0 = vld [vmem:[%s14509_s2 + $0xa0] sm:$0xff]  ;;  %v6642_v41 = vld [vmem:[%s14509_s2 + $0xa8] sm:$0xff] }
 0x355   :  { %16150 = vst [vmem:[#allocation110_spill] sm:$0xff] %v11188_v62  ;;  %v11276_v8 = vmul.f32 %v6635_v17, %v6635_v17  ;;  %v11281_v23 = vmul.f32 %v6636_v49, %v6636_v49  ;;  %v11286_v5 = vmul.f32 %v6637_v44, %v6637_v44  ;;  %v11291_v16 = vmul.f32 %v6638_v57, %v6638_v57  ;;  %v6643_v36 = vld [vmem:[%s14509_s2 + $0xb0] sm:$0xff]  ;;  %v6644_v9 = vld [vmem:[%s14509_s2 + $0xb8] sm:$0xff]  ;;  %v6645_v1 = vld [vmem:[%s14509_s2 + $0xc0] sm:$0xff] }
 0x356   :  { %16151 = vst [vmem:[#allocation111_spill] sm:$0xff] %v11190_v55  ;;  %v11296_v14 = vmul.f32 %v6639_v28, %v6639_v28  ;;  %v11301_v38 = vmul.f32 %v6640_v29, %v6640_v29  ;;  %v11306_v12 = vmul.f32 %v6641_v0, %v6641_v0  ;;  %v11311_v7 = vmul.f32 %v6642_v41, %v6642_v41  ;;  %v6646_v39 = vld [vmem:[%s14509_s2 + $0xc8] sm:$0xff]  ;;  %v6647_v45 = vld [vmem:[%s14509_s2 + $0xd0] sm:$0xff]  ;;  %v6648_v52 = vld [vmem:[%s14509_s2 + $0xd8] sm:$0xff] }
 0x357   :  { %16152 = vst [vmem:[#allocation62_spill] sm:$0xff] %v11192_v59  ;;  %v11316_v6 = vmul.f32 %v6643_v36, %v6643_v36  ;;  %v11321_v18 = vmul.f32 %v6644_v9, %v6644_v9  ;;  %v11326_v20 = vmul.f32 %v6645_v1, %v6645_v1  ;;  %v11331_v50 = vmul.f32 %v6646_v39, %v6646_v39  ;;  %v6649_v19 = vld [vmem:[%s14509_s2 + $0xe0] sm:$0xff]  ;;  %v6650_v32 = vld [vmem:[%s14509_s2 + $0xe8] sm:$0xff]  ;;  %v6651_v37 = vld [vmem:[%s14509_s2 + $0xf0] sm:$0xff] }
 0x358   :  { %16153 = vst [vmem:[#allocation65_spill] sm:$0xff] %v11194_v35  ;;  %v11336_v30 = vmul.f32 %v6647_v45, %v6647_v45  ;;  %v11341_v33 = vmul.f32 %v6648_v52, %v6648_v52  ;;  %v11346_v25 = vmul.f32 %v6649_v19, %v6649_v19  ;;  %v11351_v22 = vmul.f32 %v6650_v32, %v6650_v32  ;;  %v6652_v49 = vld [vmem:[%s14509_s2 + $0xf8] sm:$0xff] }
 0x359   :  { %16154 = vst [vmem:[#allocation77_spill] sm:$0xff] %v11196_v11  ;;  %v11356_v40 = vmul.f32 %v6651_v37, %v6651_v37  ;;  %v11359_v51 = vmul.f32 0.26601171, %v11182_v60  ;;  %v11362_v17 = vmul.f32 0.26601171, %v11211_v15  ;;  %v11367_v44 = vmul.f32 %v6652_v49, %v6652_v49 }
 0x35a   :  { %16155 = vst [vmem:[#allocation79_spill] sm:$0xff] %v11198_v31  ;;  %v11370_v57 = vmul.f32 0.26601171, %v11216_v54  ;;  %v11373_v28 = vmul.f32 0.26601171, %v11221_v43  ;;  %v11389_v9 = vadd.f32 %v11211_v15, %v11182_v60  ;;  %v11402_v52 = vadd.f32 %v11221_v43, %v11216_v54 }
 0x35b   :  { %16156 = vst [vmem:[#allocation91_spill] sm:$0xff] %v11200_v53  ;;  %v11376_v29 = vmul.f32 0.26601171, %v11226_v13  ;;  %v11379_v0 = vmul.f32 0.26601171, %v11231_v24  ;;  %v11415_v49 = vadd.f32 %v11231_v24, %v11226_v13  ;;  %v11428_v53 = vadd.f32 %v11241_v4, %v11236_v42 }
 0x35c   :  { %16157 = vst [vmem:[#allocation92_spill] sm:$0xff] %v11202_v3  ;;  %v11382_v41 = vmul.f32 0.26601171, %v11236_v42  ;;  %v11385_v36 = vmul.f32 0.26601171, %v11241_v4  ;;  %v11441_v59 = vadd.f32 %v11251_v21, %v11246_v34  ;;  %v11454_v63 = vadd.f32 %v11261_v10, %v11256_v61 }
 0x35d   :  { %16158 = vst [vmem:[#allocation81_spill] sm:$0xff] %v11204_v46  ;;  %v11392_v1 = vmul.f32 0.26601171, %v11246_v34  ;;  %v11395_v39 = vmul.f32 0.26601171, %v11251_v21 }
 0x35e   :  { %16159 = vst [vmem:[#allocation82_spill] sm:$0xff] %v11206_v26  ;;  %v11398_v45 = vmul.f32 0.26601171, %v11256_v61  ;;  %v11405_v19 = vmul.f32 0.26601171, %v11261_v10 }
 0x35f   :  { %16160 = vst [vmem:[#allocation43_spill] sm:$0xff] %v11211_v15  ;;  %v11408_v32 = vmul.f32 0.26601171, %v11266_v58  ;;  %v11411_v37 = vmul.f32 0.26601171, %v11271_v2 }
 0x360   :  { %16161 = vst [vmem:[#allocation11_spill] sm:$0xff] %v11216_v54  ;;  %v11418_v26 = vmul.f32 0.26601171, %v11276_v8  ;;  %v11421_v46 = vmul.f32 0.26601171, %v11281_v23 }
 0x361   :  { %16162 = vst [vmem:[#allocation54_spill] sm:$0xff] %v11221_v43  ;;  %v11424_v3 = vmul.f32 0.26601171, %v11286_v5  ;;  %v11431_v31 = vmul.f32 0.26601171, %v11291_v16 }
 0x362   :  { %16163 = vst [vmem:[#allocation35_spill] sm:$0xff] %v11226_v13  ;;  %v11434_v11 = vmul.f32 0.26601171, %v11296_v14  ;;  %v11437_v35 = vmul.f32 0.26601171, %v11301_v38 }
 0x363   :  { %16164 = vst [vmem:[#allocation23_spill] sm:$0xff] %v11231_v24  ;;  %v11444_v55 = vmul.f32 0.26601171, %v11306_v12  ;;  %v11447_v62 = vmul.f32 0.26601171, %v11311_v7 }
 0x364   :  { %16165 = vst [vmem:[#allocation50_spill] sm:$0xff] %v11236_v42  ;;  %v11450_v27 = vmul.f32 0.26601171, %v11316_v6  ;;  %v11457_v56 = vmul.f32 0.26601171, %v11321_v18 }
 0x365   :  { %16166 = vst [vmem:[#allocation97_spill] sm:$0xff] %v11241_v4  ;;  %v11460_v48 = vmul.f32 0.26601171, %v11326_v20  ;;  %v11463_v47 = vmul.f32 0.26601171, %v11331_v50 }
 0x366   :  { %16167 = vst [vmem:[#allocation98_spill] sm:$0xff] %v11246_v34 }
 0x367   :  { %16168 = vst [vmem:[#allocation99_spill] sm:$0xff] %v11251_v21 }
 0x368   :  { %16169 = vst [vmem:[#allocation100_spill] sm:$0xff] %v11256_v61 }
 0x369   :  { %16170 = vst [vmem:[#allocation101_spill] sm:$0xff] %v11261_v10 }
 0x36a   :  { %16171 = vst [vmem:[#allocation102_spill] sm:$0xff] %v11266_v58 }
 0x36b   :  { %16172 = vst [vmem:[#allocation103_spill] sm:$0xff] %v11271_v2 }
 0x36c   :  { %16173 = vst [vmem:[#allocation104_spill] sm:$0xff] %v11276_v8 }
 0x36d   :  { %16174 = vst [vmem:[#allocation96_spill] sm:$0xff] %v11281_v23 }
 0x36e   :  { %16175 = vst [vmem:[#allocation53_spill] sm:$0xff] %v11286_v5 }
 0x36f   :  { %16176 = vst [vmem:[#allocation58_spill] sm:$0xff] %v11291_v16 }
 0x370   :  { %16177 = vst [vmem:[#allocation40_spill] sm:$0xff] %v11296_v14 }
 0x371   :  { %16178 = vst [vmem:[#allocation30_spill] sm:$0xff] %v11301_v38 }
 0x372   :  { %16179 = vst [vmem:[#allocation48_spill] sm:$0xff] %v11306_v12 }
 0x373   :  { %16180 = vst [vmem:[#allocation52_spill] sm:$0xff] %v11311_v7 }
 0x374   :  { %16181 = vst [vmem:[#allocation85_spill] sm:$0xff] %v11316_v6 }
 0x375   :  { %16182 = vst [vmem:[#allocation87_spill] sm:$0xff] %v11321_v18 }
 0x376   :  { %16183 = vst [vmem:[#allocation16_spill] sm:$0xff] %v11326_v20 }
 0x377   :  { %16184 = vst [vmem:[#allocation89_spill] sm:$0xff] %v11331_v50 }
 0x378   :  { %16185 = vst [vmem:[#allocation80_spill] sm:$0xff] %v11336_v30 }
 0x379   :  { %16186 = vst [vmem:[#allocation93_spill] sm:$0xff] %v11341_v33 }
 0x37a   :  { %16187 = vst [vmem:[#allocation10_spill] sm:$0xff] %v11346_v25 }
 0x37b   :  { %16188 = vst [vmem:[#allocation25_spill] sm:$0xff] %v11351_v22 }
 0x37c   :  { %16189 = vst [vmem:[#allocation8_spill] sm:$0xff] %v11356_v40 }
 0x37d   :  { %16190 = vst [vmem:[#allocation94_spill] sm:$0xff] %v11367_v44 }
 0x37e   :  { %16191 = vst [vmem:[#allocation95_spill] sm:$0xff] %v11389_v9  ;;  %v11483_v9 = vmul.f32 0.26601171, %v11351_v22 }
 0x37f   :  { %16192 = vst [vmem:[#allocation61_spill] sm:$0xff] %v11402_v52  ;;  %v11480_v52 = vadd.f32 %v11281_v23, %v11276_v8 }
 0x380   :  { %16193 = vst [vmem:[#allocation66_spill] sm:$0xff] %v11415_v49  ;;  %v11473_v49 = vmul.f32 0.26601171, %v11341_v33 }
 0x381   :  { %16194 = vst [vmem:[#allocation47_spill] sm:$0xff] %v11428_v53  ;;  %v11470_v53 = vmul.f32 0.26601171, %v11336_v30 }
 0x382   :  { %16195 = vst [vmem:[#allocation19_spill] sm:$0xff] %v11441_v59  ;;  %v11467_v59 = vadd.f32 %v11271_v2, %v11266_v58 }
 0x383   :  { %16196 = vst [vmem:[#allocation38_spill] sm:$0xff] %v11444_v55 }
 0x384   :  { %16197 = vst [vmem:[#allocation56_spill] sm:$0xff] %v11447_v62 }
 0x385   :  { %16198 = vst [vmem:[#allocation84_spill] sm:$0xff] %v11450_v27 }
 0x386   :  { %16199 = vst [vmem:[#allocation86_spill] sm:$0xff] %v11454_v63  ;;  %v11476_v63 = vmul.f32 0.26601171, %v11346_v25 }
 0x387   :  { %16200 = vst [vmem:[#allocation88_spill] sm:$0xff] %v11457_v56 }
 0x388   :  { %16201 = vst [vmem:[#allocation90_spill] sm:$0xff] %v11460_v48 }
 0x389   :  { %16202 = vst [vmem:[#allocation46_spill] sm:$0xff] %v11463_v47  ;;  %v11486_v47 = vmul.f32 0.26601171, %v11356_v40 }
 0x38a   :  { %16203 = vst [vmem:[#allocation49_spill] sm:$0xff] %v11467_v59  ;;  %v11489_v59 = vmul.f32 0.26601171, %v11367_v44 }
 0x38b   :  { %16204 = vst [vmem:[#allocation39_spill] sm:$0xff] %v11470_v53  ;;  %v11493_v53 = vadd.f32 %v11291_v16, %v11286_v5 }
 0x38c   :  { %16205 = vst [vmem:[#allocation31_spill] sm:$0xff] %v11473_v49  ;;  %v11496_v49 = vrot.slane %v11211_v15, 2  ;;  %v11518_v15 = vrot.slane %v11271_v2, 2  ;;  %v11539_v2 = vrot.slane %v11341_v33, 2 }
 0x38d   :  { %16206 = vst [vmem:[#allocation55_spill] sm:$0xff] %v11476_v63  ;;  %v11499_v63 = vrot.slane %v11221_v43, 2  ;;  %v11521_v43 = vrot.slane %v11281_v23, 2  ;;  %v11542_v23 = vrot.slane %v11351_v22, 2 }
 0x38e   :  { %16207 = vst [vmem:[#allocation57_spill] sm:$0xff] %v11480_v52  ;;  %v11502_v52 = vrot.slane %v11231_v24, 2  ;;  %v11524_v24 = vrot.slane %v11291_v16, 2  ;;  %v11545_v16 = vrot.slane %v11367_v44, 2  ;;  %v3846_v44 = vadd.f32 %v11518_v15, %v11266_v58 }
 0x38f   :  { %16208 = vst [vmem:[#allocation74_spill] sm:$0xff] %v11483_v9  ;;  %v11506_v9 = vadd.f32 %v11301_v38, %v11296_v14  ;;  %v3841_v48 = vadd.f32 %v11499_v63, %v11216_v54 }
 0x390   :  { %16209 = vst [vmem:[#allocation75_spill] sm:$0xff] %v11486_v47  ;;  %v11509_v47 = vrot.slane %v11241_v4, 2  ;;  %v11530_v4 = vrot.slane %v11311_v7, 2  ;;  %v3842_v56 = vadd.f32 %v11502_v52, %v11226_v13 }
 0x391   :  { %16210 = vst [vmem:[#allocation69_spill] sm:$0xff] %v11489_v59  ;;  %v11512_v59 = vrot.slane %v11251_v21, 2  ;;  %v11533_v21 = vrot.slane %v11321_v18, 2 }
 0x392   :  { %16211 = vst [vmem:[#allocation9_spill] sm:$0xff] %v11493_v53  ;;  %v11515_v53 = vrot.slane %v11261_v10, 2  ;;  %v11536_v10 = vrot.slane %v11331_v50, 2  ;;  %v3843_v27 = vadd.f32 %v11509_v47, %v11236_v42 }
 0x393   :  { %16212 = vst [vmem:[#allocation78_spill] sm:$0xff] %v11496_v49  ;;  %v3844_v62 = vadd.f32 %v11512_v59, %v11246_v34 }
 0x394   :  { %16213 = vst [vmem:[#allocation83_spill] sm:$0xff] %v11499_v63  ;;  %v3845_v55 = vadd.f32 %v11515_v53, %v11256_v61  ;;  %v3848_v63 = vadd.f32 %v11524_v24, %v11286_v5 }
 0x395   :  { %16214 = vst [vmem:[#allocation73_spill] sm:$0xff] %v11502_v52 }
 0x396   :  { %16215 = vst [vmem:[#allocation26_spill] sm:$0xff] %v11506_v9  ;;  %v11527_v9 = vrot.slane %v11301_v38, 2  ;;  %v3840_v38 = vadd.f32 %v11496_v49, %v11182_v60  ;;  %v3847_v49 = vadd.f32 %v11521_v43, %v11276_v8  ;;  %v3859_v8 = vmul.f32 0.0010283801, %v3843_v27 }
 0x397   :  { %16216 = vst [vmem:[#allocation36_spill] sm:$0xff] %v11509_v47  ;;  %v3850_v47 = vadd.f32 %v11530_v4, %v11306_v12  ;;  %v3861_v58 = vmul.f32 0.0010283801, %v3845_v55  ;;  %v3864_v34 = vmul.f32 0.0010283801, %v3848_v63  ;;  %v11593_v55 = vadd.f32 %v11341_v33, %v11336_v30 }
 0x398   :  { %16217 = vst [vmem:[#allocation24_spill] sm:$0xff] %v11512_v59  ;;  %v3849_v52 = vadd.f32 %v11527_v9, %v11296_v14  ;;  %v3851_v59 = vadd.f32 %v11533_v21, %v11316_v6  ;;  %v3856_v5 = vmul.f32 0.0010283801, %v3840_v38  ;;  %v3858_v14 = vmul.f32 0.0010283801, %v3842_v56 }
 0x399   :  { %16218 = vst [vmem:[#allocation59_spill] sm:$0xff] %v11515_v53  ;;  %v3852_v53 = vadd.f32 %v11536_v10, %v11326_v20  ;;  %v3863_v61 = vmul.f32 0.0010283801, %v3847_v49  ;;  %v3866_v42 = vmul.f32 0.0010283801, %v3850_v47  ;;  %v11589_v56 = vadd.f32 %v11331_v50, %v11326_v20 }
 0x39a   :  { %16219 = vst [vmem:[#allocation44_spill] sm:$0xff] %v11518_v15  ;;  %v3853_v15 = vadd.f32 %v11539_v2, %v11336_v30  ;;  %v3888_v63 = vrot.slane %v3856_v5, 3  ;;  %v3890_v47 = vrot.slane %v3858_v14, 3 }
 0x39b   :  { %16220 = vst [vmem:[#allocation12_spill] sm:$0xff] %v11521_v43  ;;  %v3854_v43 = vadd.f32 %v11542_v23, %v11346_v25 }
 0x39c   :  { %16221 = vst [vmem:[#allocation28_spill] sm:$0xff] %v11524_v24  ;;  %v3855_v24 = vadd.f32 %v11545_v16, %v11356_v40  ;;  %v3869_v27 = vmul.f32 0.0010283801, %v3853_v15  ;;  %v11601_v5 = vadd.f32 %v3888_v63, %v11359_v51 }
 0x39d   :  { %16222 = vst [vmem:[#allocation34_spill] sm:$0xff] %v11527_v9  ;;  %v3857_v9 = vmul.f32 0.0010283801, %v3841_v48  ;;  %v3868_v48 = vmul.f32 0.0010283801, %v3852_v53  ;;  %v3896_v53 = vrot.slane %v3864_v34, 3  ;;  %v11616_v34 = vadd.f32 %v3890_v47, %v11379_v0 }
 0x39e   :  { %16223 = vst [vmem:[#allocation14_spill] sm:$0xff] %v11530_v4  ;;  %v3860_v4 = vmul.f32 0.0010283801, %v3844_v62  ;;  %v3870_v62 = vmul.f32 0.0010283801, %v3854_v43  ;;  %v3898_v43 = vrot.slane %v3866_v42, 3  ;;  %v11613_v42 = vadd.f32 %v3890_v47, %v11376_v29 }
 0x39f   :  { %16224 = vst [vmem:[#allocation13_spill] sm:$0xff] %v11533_v21  ;;  %v11581_v21 = vadd.f32 %v11311_v7, %v11306_v12  ;;  %v11595_v38 = vmul.f32 0.0010283801, %v3855_v24  ;;  %v3895_v12 = vrot.slane %v3863_v61, 3  ;;  %v3900_v54 = vrot.slane %v3868_v48, 3  ;;  %v16240_v47 = vld [vmem:[#allocation66_spill] sm:$0xff] }
 0x3a0   :  { %16225 = vst [vmem:[#allocation51_spill] sm:$0xff] %v11536_v10  ;;  %v3862_v10 = vmul.f32 0.0010283801, %v3846_v44  ;;  %v3889_v44 = vrot.slane %v3857_v9, 3  ;;  %v3892_v49 = vrot.slane %v3860_v4, 3  ;;  %v3901_v30 = vrot.slane %v3869_v27, 3 }
 0x3a1   :  { %16226 = vst [vmem:[#allocation112_spill] sm:$0xff] %v11539_v2  ;;  %v11585_v2 = vadd.f32 %v11321_v18, %v11316_v6  ;;  %v3893_v6 = vrot.slane %v3861_v58, 3  ;;  %v3902_v60 = vrot.slane %v3870_v62, 3  ;;  %v3903_v24 = vrot.slane %v11595_v38, 3  ;;  %v16237_v27 = vld [vmem:[#allocation95_spill] sm:$0xff]  ;;  %v16238_v38 = vld [vmem:[#allocation61_spill] sm:$0xff] }
 0x3a2   :  { %16227 = vst [vmem:[#allocation113_spill] sm:$0xff] %v11542_v23  ;;  %v3865_v23 = vmul.f32 0.0010283801, %v3849_v52  ;;  %v3966_v52 = vadd.f32 %v11351_v22, %v11346_v25  ;;  %v3894_v20 = vrot.slane %v3862_v10, 3  ;;  %v11604_v9 = vadd.f32 %v3888_v63, %v11362_v17  ;;  %v16252_v25 = vld [vmem:[#allocation75_spill] sm:$0xff] }
 0x3a3   :  { %16228 = vst [vmem:[#allocation114_spill] sm:$0xff] %v11545_v16  ;;  %v3867_v16 = vmul.f32 0.0010283801, %v3851_v59  ;;  %v3891_v59 = vrot.slane %v3859_v8, 3  ;;  %v11607_v4 = vadd.f32 %v3889_v44, %v11370_v57  ;;  %v11610_v61 = vadd.f32 %v3889_v44, %v11373_v28  ;;  %v16239_v44 = vld [vmem:[#allocation94_spill] sm:$0xff] }
 0x3a4   :  { %v3897_v15 = vrot.slane %v3865_v23, 3  ;;  %v11625_v8 = vadd.f32 %v3892_v49, %v11392_v1  ;;  %v11628_v23 = vadd.f32 %v3892_v49, %v11395_v39  ;;  %v11634_v14 = vadd.f32 %v3893_v6, %v11405_v19  ;;  %v16241_v49 = vld [vmem:[#allocation47_spill] sm:$0xff] }
 0x3a5   :  { %v3899_v13 = vrot.slane %v3867_v16, 3  ;;  %v11619_v10 = vadd.f32 %v3891_v59, %v11382_v41  ;;  %v11622_v58 = vadd.f32 %v3891_v59, %v11385_v36  ;;  %v11631_v16 = vadd.f32 %v3893_v6, %v11398_v45 }
 0x3a6   :  { %v11637_v51 = vadd.f32 %v3894_v20, %v11408_v32  ;;  %v11640_v17 = vadd.f32 %v3894_v20, %v11411_v37  ;;  %v11643_v57 = vadd.f32 %v3895_v12, %v11418_v26  ;;  %v11646_v28 = vadd.f32 %v3895_v12, %v11421_v46  ;;  %v16229_v20 = vld [vmem:[#allocation38_spill] sm:$0xff]  ;;  %v16230_v26 = vld [vmem:[#allocation56_spill] sm:$0xff]  ;;  %v16236_v37 = vld [vmem:[#allocation31_spill] sm:$0xff] }
 0x3a7   :  { %v11649_v29 = vadd.f32 %v3896_v53, %v11424_v3  ;;  %v11652_v0 = vadd.f32 %v3896_v53, %v11431_v31  ;;  %v11655_v6 = vadd.f32 %v3897_v15, %v11434_v11  ;;  %v11658_v41 = vadd.f32 %v3897_v15, %v11437_v35  ;;  %v16231_v46 = vld [vmem:[#allocation84_spill] sm:$0xff]  ;;  %v16233_v31 = vld [vmem:[#allocation90_spill] sm:$0xff]  ;;  %v16235_v35 = vld [vmem:[#allocation39_spill] sm:$0xff] }
 0x3a8   :  { %v11661_v36 = vadd.f32 %v3898_v43, %v16229_v20  ;;  %v11664_v1 = vadd.f32 %v3898_v43, %v16230_v26  ;;  %v11667_v12 = vadd.f32 %v3899_v13, %v16231_v46  ;;  %v16232_v3 = vld [vmem:[#allocation88_spill] sm:$0xff]  ;;  %v11673_v45 = vadd.f32 %v3900_v54, %v16233_v31  ;;  %v16234_v11 = vld [vmem:[#allocation46_spill] sm:$0xff]  ;;  %v16242_v15 = vld [vmem:[#allocation19_spill] sm:$0xff] }
 0x3a9   :  { %v11670_v39 = vadd.f32 %v3899_v13, %v16232_v3  ;;  %v11676_v19 = vadd.f32 %v3900_v54, %v16234_v11  ;;  %v11679_v32 = vadd.f32 %v3901_v30, %v16235_v35  ;;  %v11682_v48 = vadd.f32 %v3901_v30, %v16236_v37  ;;  %v16243_v43 = vld [vmem:[#allocation55_spill] sm:$0xff]  ;;  %v16245_v26 = vld [vmem:[#allocation86_spill] sm:$0xff]  ;;  %v16246_v30 = vld [vmem:[#allocation49_spill] sm:$0xff] }
 0x3aa   :  { %v3968_v62 = vmul.f32 0.007598758, %v16237_v27  ;;  %v3969_v63 = vmul.f32 0.007598758, %v16238_v38  ;;  %v3967_v13 = vadd.f32 %v16239_v44, %v11356_v40  ;;  %v3970_v59 = vmul.f32 0.007598758, %v16240_v47 }
 0x3ab   :  { %v3971_v53 = vmul.f32 0.007598758, %v16241_v49  ;;  %v3972_v54 = vmul.f32 0.007598758, %v16242_v15  ;;  %v11692_v20 = vadd.f32 %v3902_v60, %v16243_v43  ;;  %v3973_v46 = vmul.f32 0.007598758, %v16245_v26 }
 0x3ac   :  { %v3974_v3 = vmul.f32 0.007598758, %v16246_v30  ;;  %v16247_v31 = vld [vmem:[#allocation57_spill] sm:$0xff]  ;;  %v16248_v35 = vld [vmem:[#allocation74_spill] sm:$0xff]  ;;  %v3978_v49 = vmul.f32 0.007598758, %v11581_v21  ;;  %v11704_v15 = vadd.f32 %v3903_v24, %v16252_v25 }
 0x3ad   :  { %16244 = vst [vmem:[#allocation38_spill] sm:$0xff] %v11692_v20  ;;  %v3975_v11 = vmul.f32 0.007598758, %v16247_v31  ;;  %v11698_v37 = vadd.f32 %v3902_v60, %v16248_v35  ;;  %v16250_v27 = vld [vmem:[#allocation9_spill] sm:$0xff]  ;;  %v16251_v40 = vld [vmem:[#allocation26_spill] sm:$0xff]  ;;  %v4003_v21 = vrot.slane %v3971_v53, 4 }
 0x3ae   :  { %v3976_v38 = vmul.f32 0.007598758, %v16250_v27  ;;  %v3977_v47 = vmul.f32 0.007598758, %v16251_v40  ;;  %16253 = vst [vmem:[#allocation84_spill] sm:$0xff] %v11704_v15  ;;  %v16254_v20 = vld [vmem:[#allocation69_spill] sm:$0xff] }
 0x3af   :  { %16249 = vst [vmem:[#allocation56_spill] sm:$0xff] %v11698_v37  ;;  %v3979_v43 = vmul.f32 0.007598758, %v11585_v2  ;;  %v3980_v26 = vmul.f32 0.007598758, %v11589_v56  ;;  %v11710_v31 = vadd.f32 %v3903_v24, %v16254_v20  ;;  %v4000_v27 = vrot.slane %v3968_v62, 4 }
 0x3b0   :  { %v3981_v30 = vmul.f32 0.007598758, %v11593_v55  ;;  %v11712_v60 = vmul.f32 0.007598758, %v3966_v52  ;;  %v11714_v35 = vmul.f32 0.007598758, %v3967_v13  ;;  %v11737_v20 = vadd.f32 %v4003_v21, %v11619_v10 }
 0x3b1   :  { %v4001_v40 = vrot.slane %v3969_v63, 4  ;;  %v4002_v37 = vrot.slane %v3970_v59, 4  ;;  %v4004_v44 = vrot.slane %v3972_v54, 4  ;;  %v4005_v25 = vrot.slane %v3973_v46, 4  ;;  %v16275_v24 = vld [vmem:[#allocation11_spill] sm:$0xff] }
 0x3b2   :  { %v4006_v15 = vrot.slane %v3974_v3, 4  ;;  %v4007_v22 = vrot.slane %v3975_v11, 4  ;;  %v4008_v2 = vrot.slane %v3976_v38, 4  ;;  %v4009_v33 = vrot.slane %v3977_v47, 4  ;;  %v16264_v3 = vld [vmem:[#allocation99_spill] sm:$0xff]  ;;  %v16265_v11 = vld [vmem:[#allocation101_spill] sm:$0xff] }
 0x3b3   :  { %v4010_v56 = vrot.slane %v3978_v49, 4  ;;  %v4011_v50 = vrot.slane %v3979_v43, 4  ;;  %v4012_v55 = vrot.slane %v3980_v26, 4  ;;  %v4013_v18 = vrot.slane %v3981_v30, 4  ;;  %v16267_v47 = vld [vmem:[#allocation96_spill] sm:$0xff]  ;;  %v16268_v49 = vld [vmem:[#allocation58_spill] sm:$0xff] }
 0x3b4   :  { %v11719_v13 = vadd.f32 %v4000_v27, %v11601_v5  ;;  %v11722_v62 = vadd.f32 %v4000_v27, %v11604_v9  ;;  %v11725_v63 = vadd.f32 %v4001_v40, %v11607_v4  ;;  %v11728_v59 = vadd.f32 %v4001_v40, %v11610_v61  ;;  %v16269_v43 = vld [vmem:[#allocation30_spill] sm:$0xff]  ;;  %v16271_v27 = vld [vmem:[#allocation89_spill] sm:$0xff] }
 0x3b5   :  { %v11731_v53 = vadd.f32 %v4002_v37, %v11613_v42  ;;  %v11734_v54 = vadd.f32 %v4002_v37, %v11616_v34  ;;  %v11740_v5 = vadd.f32 %v4003_v21, %v11622_v58  ;;  %v11743_v9 = vadd.f32 %v4004_v44, %v11625_v8  ;;  %v16272_v21 = vld [vmem:[#allocation93_spill] sm:$0xff] }
 0x3b6   :  { %v11746_v4 = vadd.f32 %v4004_v44, %v11628_v23  ;;  %v11749_v61 = vadd.f32 %v4005_v25, %v11631_v16  ;;  %v11752_v42 = vadd.f32 %v4005_v25, %v11634_v14  ;;  %v11755_v34 = vadd.f32 %v4006_v15, %v11637_v51 }
 0x3b7   :  { %v11758_v10 = vadd.f32 %v4006_v15, %v11640_v17  ;;  %v11761_v58 = vadd.f32 %v4007_v22, %v11643_v57  ;;  %v11764_v8 = vadd.f32 %v4007_v22, %v11646_v28  ;;  %v11767_v23 = vadd.f32 %v4008_v2, %v11649_v29 }
 0x3b8   :  { %v11770_v16 = vadd.f32 %v4008_v2, %v11652_v0  ;;  %v11773_v14 = vadd.f32 %v4009_v33, %v11655_v6  ;;  %v11776_v51 = vadd.f32 %v4009_v33, %v11658_v41  ;;  %v11779_v17 = vadd.f32 %v4010_v56, %v11661_v36  ;;  %v16259_v6 = vld [vmem:[#allocation43_spill] sm:$0xff]  ;;  %v16260_v36 = vld [vmem:[#allocation54_spill] sm:$0xff]  ;;  %v16273_v2 = vld [vmem:[#allocation25_spill] sm:$0xff] }
 0x3b9   :  { %v11782_v57 = vadd.f32 %v4010_v56, %v11664_v1  ;;  %v11785_v22 = vadd.f32 %v4011_v50, %v11667_v12  ;;  %v11788_v28 = vadd.f32 %v4011_v50, %v11670_v39  ;;  %v11791_v29 = vadd.f32 %v4012_v55, %v11673_v45  ;;  %v16262_v12 = vld [vmem:[#allocation23_spill] sm:$0xff]  ;;  %v16263_v50 = vld [vmem:[#allocation97_spill] sm:$0xff] }
 0x3ba   :  { %v11794_v0 = vadd.f32 %v4012_v55, %v11676_v19  ;;  %v11797_v33 = vadd.f32 %v4013_v18, %v11679_v32  ;;  %v4064_v41 = vrot.slane %v16259_v6, 6  ;;  %v4065_v1 = vrot.slane %v16260_v36, 6  ;;  %v16266_v19 = vld [vmem:[#allocation103_spill] sm:$0xff]  ;;  %v16285_v36 = vld [vmem:[#allocation48_spill] sm:$0xff] }
 0x3bb   :  { %16255 = vst [vmem:[#allocation88_spill] sm:$0xff] %v11788_v28  ;;  %v11802_v44 = vadd.f32 %v4013_v18, %v11682_v48  ;;  %v4066_v46 = vrot.slane %v16262_v12, 6  ;;  %v4067_v39 = vrot.slane %v16263_v50, 6  ;;  %v4068_v45 = vrot.slane %v16264_v3, 6  ;;  %v16270_v18 = vld [vmem:[#allocation87_spill] sm:$0xff]  ;;  %v16278_v50 = vld [vmem:[#allocation50_spill] sm:$0xff] }
 0x3bc   :  { %16256 = vst [vmem:[#allocation90_spill] sm:$0xff] %v11791_v29  ;;  %v4069_v37 = vrot.slane %v16265_v11, 6  ;;  %v4070_v38 = vrot.slane %v16266_v19, 6  ;;  %v4071_v32 = vrot.slane %v16267_v47, 6  ;;  %v4072_v15 = vrot.slane %v16268_v49, 6  ;;  %v16274_v55 = vld [vmem:[#allocation107_spill] sm:$0xff] }
 0x3bd   :  { %16257 = vst [vmem:[#allocation46_spill] sm:$0xff] %v11794_v0  ;;  %v4073_v26 = vrot.slane %v16269_v43, 6  ;;  %v4074_v30 = vrot.slane %v11311_v7, 6  ;;  %v4075_v48 = vrot.slane %v16270_v18, 6  ;;  %v4076_v40 = vrot.slane %v16271_v27, 6  ;;  %v16276_v11 = vld [vmem:[#allocation94_spill] sm:$0xff] }
 0x3be   :  { %16258 = vst [vmem:[#allocation39_spill] sm:$0xff] %v11797_v33  ;;  %v4077_v25 = vrot.slane %v16272_v21, 6  ;;  %v4078_v56 = vrot.slane %v16273_v2, 6  ;;  %v4096_v52 = vadd.f32 %v4064_v41, %v16274_v55  ;;  %v4097_v19 = vadd.f32 %v4065_v1, %v16275_v24  ;;  %v16277_v3 = vld [vmem:[#allocation35_spill] sm:$0xff]  ;;  %v16280_v33 = vld [vmem:[#allocation100_spill] sm:$0xff]  ;;  %v16281_v0 = vld [vmem:[#allocation102_spill] sm:$0xff] }
 0x3bf   :  { %16261 = vst [vmem:[#allocation31_spill] sm:$0xff] %v11802_v44  ;;  %v4079_v47 = vrot.slane %v16276_v11, 6  ;;  %v4098_v49 = vadd.f32 %v4066_v46, %v16277_v3  ;;  %v4099_v43 = vadd.f32 %v4067_v39, %v16278_v50  ;;  %v16279_v44 = vld [vmem:[#allocation98_spill] sm:$0xff]  ;;  %v4101_v18 = vadd.f32 %v4069_v37, %v16280_v33  ;;  %v16282_v29 = vld [vmem:[#allocation104_spill] sm:$0xff]  ;;  %v16283_v28 = vld [vmem:[#allocation53_spill] sm:$0xff] }
 0x3c0   :  { %v4100_v7 = vadd.f32 %v4068_v45, %v16279_v44  ;;  %v4102_v27 = vadd.f32 %v4070_v38, %v16281_v0  ;;  %v4103_v21 = vadd.f32 %v4071_v32, %v16282_v29  ;;  %v4104_v2 = vadd.f32 %v4072_v15, %v16283_v28  ;;  %v16284_v12 = vld [vmem:[#allocation40_spill] sm:$0xff]  ;;  %v16286_v24 = vld [vmem:[#allocation85_spill] sm:$0xff]  ;;  %v16289_v50 = vld [vmem:[#allocation10_spill] sm:$0xff] }
 0x3c1   :  { %v4105_v41 = vadd.f32 %v4073_v26, %v16284_v12  ;;  %v4106_v1 = vadd.f32 %v4074_v30, %v16285_v36  ;;  %v4107_v11 = vadd.f32 %v4075_v48, %v16286_v24  ;;  %v16287_v6 = vld [vmem:[#allocation16_spill] sm:$0xff]  ;;  %v4110_v45 = vadd.f32 %v4078_v56, %v16289_v50  ;;  %v16291_v15 = vld [vmem:[#allocation38_spill] sm:$0xff] }
 0x3c2   :  { %v4108_v46 = vadd.f32 %v4076_v40, %v16287_v6  ;;  %v16288_v3 = vld [vmem:[#allocation80_spill] sm:$0xff]  ;;  %v4112_v44 = vmul.f32 0.036000773, %v4096_v52  ;;  %v4113_v37 = vmul.f32 0.036000773, %v4097_v19  ;;  %v16292_v26 = vrot.slane %v11712_v60, 4 }
 0x3c3   :  { %v4109_v39 = vadd.f32 %v4077_v25, %v16288_v3  ;;  %v16290_v33 = vld [vmem:[#allocation8_spill] sm:$0xff]  ;;  %v4114_v0 = vmul.f32 0.036000773, %v4098_v49  ;;  %v4115_v32 = vmul.f32 0.036000773, %v4099_v43 }
 0x3c4   :  { %v4111_v38 = vadd.f32 %v4079_v47, %v16290_v33  ;;  %v4116_v29 = vmul.f32 0.036000773, %v4100_v7  ;;  %v11837_v12 = vadd.f32 %v16292_v26, %v16291_v15  ;;  %v4117_v30 = vmul.f32 0.036000773, %v4101_v18  ;;  %v16294_v40 = vld [vmem:[#allocation56_spill] sm:$0xff] }
 0x3c5   :  { %v4118_v48 = vmul.f32 0.036000773, %v4102_v27  ;;  %v4119_v24 = vmul.f32 0.036000773, %v4103_v21  ;;  %v16295_v25 = vmov %v16292_v26  ;;  %v4120_v56 = vmul.f32 0.036000773, %v4104_v2 }
 0x3c6   :  { %16293 = vst [vmem:[#allocation95_spill] sm:$0xff] %v11837_v12  ;;  %v4061_v3 = vadd.f32 %v16295_v25, %v16294_v40  ;;  %v4121_v52 = vmul.f32 0.036000773, %v4105_v41  ;;  %v4122_v19 = vmul.f32 0.036000773, %v4106_v1  ;;  %v16296_v50 = vld [vmem:[#allocation84_spill] sm:$0xff] }
 0x3c7   :  { %v16297_v47 = vrot.slane %v11714_v35, 4  ;;  %v4123_v7 = vmul.f32 0.036000773, %v4107_v11  ;;  %v4124_v43 = vmul.f32 0.036000773, %v4108_v46  ;;  %v4144_v26 = vrot.slane %v4112_v44, 5 }
 0x3c8   :  { %v4125_v33 = vmul.f32 0.036000773, %v4109_v39  ;;  %v4126_v27 = vmul.f32 0.036000773, %v4110_v45  ;;  %v4127_v21 = vmul.f32 0.036000773, %v4111_v38 }
 0x3c9   :  { %v4062_v49 = vadd.f32 %v16297_v47, %v16296_v50  ;;  %v16298_v15 = vmov %v16297_v47  ;;  %v4145_v6 = vrot.slane %v4113_v37, 5  ;;  %v4146_v60 = vrot.slane %v4114_v0, 5  ;;  %v16325_v38 = vld [vmem:[#allocation35_spill] sm:$0xff] }
 0x3ca   :  { %v4063_v18 = vadd.f32 %v16298_v15, %v11710_v31  ;;  %v4147_v40 = vrot.slane %v4115_v32, 5  ;;  %v4148_v2 = vrot.slane %v4116_v29, 5  ;;  %v4149_v41 = vrot.slane %v4117_v30, 5 }
 0x3cb   :  { %v4150_v1 = vrot.slane %v4118_v48, 5  ;;  %v4151_v25 = vrot.slane %v4119_v24, 5  ;;  %v4152_v36 = vrot.slane %v4120_v56, 5  ;;  %v4153_v28 = vrot.slane %v4121_v52, 5  ;;  %v16333_v52 = vld [vmem:[#allocation39_spill] sm:$0xff] }
 0x3cc   :  { %v4154_v50 = vrot.slane %v4122_v19, 5  ;;  %v4155_v11 = vrot.slane %v4123_v7, 5  ;;  %v4156_v46 = vrot.slane %v4124_v43, 5  ;;  %v4157_v39 = vrot.slane %v4125_v33, 5  ;;  %v16335_v7 = vld [vmem:[#allocation31_spill] sm:$0xff] }
 0x3cd   :  { %v4158_v47 = vrot.slane %v4126_v27, 5  ;;  %v4159_v12 = vrot.slane %v4127_v21, 5  ;;  %v11849_v31 = vadd.f32 %v4144_v26, %v11719_v13  ;;  %v11852_v35 = vadd.f32 %v4144_v26, %v11722_v62  ;;  %v16337_v15 = vld [vmem:[#allocation95_spill] sm:$0xff] }
 0x3ce   :  { %v11855_v0 = vadd.f32 %v4145_v6, %v11725_v63  ;;  %v11858_v29 = vadd.f32 %v4145_v6, %v11728_v59  ;;  %v11861_v24 = vadd.f32 %v4146_v60, %v11731_v53  ;;  %v11864_v44 = vadd.f32 %v4146_v60, %v11734_v54  ;;  %v16322_v6 = vld [vmem:[#allocation43_spill] sm:$0xff] }
 0x3cf   :  { %16299 = vst [vmem:[#allocation61_spill] sm:$0xff] %v11849_v31  ;;  %v11867_v33 = vadd.f32 %v4147_v40, %v11737_v20  ;;  %v11870_v13 = vadd.f32 %v4147_v40, %v11740_v5  ;;  %v11873_v62 = vadd.f32 %v4148_v2, %v11743_v9  ;;  %v11876_v63 = vadd.f32 %v4148_v2, %v11746_v4  ;;  %v16342_v2 = vld [vmem:[#allocation50_spill] sm:$0xff] }
 0x3d0   :  { %16300 = vst [vmem:[#allocation66_spill] sm:$0xff] %v11852_v35  ;;  %v11879_v59 = vadd.f32 %v4149_v41, %v11749_v61  ;;  %v11882_v53 = vadd.f32 %v4149_v41, %v11752_v42  ;;  %v11885_v54 = vadd.f32 %v4150_v1, %v11755_v34  ;;  %v11888_v20 = vadd.f32 %v4150_v1, %v11758_v10  ;;  %v16343_v1 = vld [vmem:[#allocation97_spill] sm:$0xff]  ;;  %v16366_v35 = vld [vmem:[#allocation8_spill] sm:$0xff] }
 0x3d1   :  { %16301 = vst [vmem:[#allocation47_spill] sm:$0xff] %v11855_v0  ;;  %v11891_v5 = vadd.f32 %v4151_v25, %v11761_v58  ;;  %v11894_v9 = vadd.f32 %v4151_v25, %v11764_v8  ;;  %v11897_v4 = vadd.f32 %v4152_v36, %v11767_v23  ;;  %v11900_v61 = vadd.f32 %v4152_v36, %v11770_v16  ;;  %v16323_v36 = vld [vmem:[#allocation11_spill] sm:$0xff] }
 0x3d2   :  { %16302 = vst [vmem:[#allocation19_spill] sm:$0xff] %v11858_v29  ;;  %v11903_v42 = vadd.f32 %v4153_v28, %v11773_v14  ;;  %v11906_v34 = vadd.f32 %v4153_v28, %v11776_v51  ;;  %v11909_v10 = vadd.f32 %v4154_v50, %v11779_v17  ;;  %v11912_v58 = vadd.f32 %v4154_v50, %v11782_v57  ;;  %v16324_v14 = vld [vmem:[#allocation54_spill] sm:$0xff]  ;;  %v16326_v28 = vld [vmem:[#allocation23_spill] sm:$0xff]  ;;  %v16327_v17 = vld [vmem:[#allocation88_spill] sm:$0xff] }
 0x3d3   :  { %16303 = vst [vmem:[#allocation55_spill] sm:$0xff] %v11861_v24  ;;  %v11915_v8 = vadd.f32 %v4155_v11, %v11785_v22  ;;  %v4224_v23 = vrot.slane %v16274_v55, 4  ;;  %v4225_v16 = vrot.slane %v16322_v6, 4  ;;  %v4227_v45 = vrot.slane %v16323_v36, 4  ;;  %v16329_v57 = vld [vmem:[#allocation90_spill] sm:$0xff] }
 0x3d4   :  { %16304 = vst [vmem:[#allocation86_spill] sm:$0xff] %v11864_v44  ;;  %v4228_v37 = vrot.slane %v16324_v14, 4  ;;  %v4230_v51 = vrot.slane %v16325_v38, 4  ;;  %v4231_v32 = vrot.slane %v16326_v28, 4  ;;  %v11924_v30 = vadd.f32 %v4155_v11, %v16327_v17  ;;  %v16331_v22 = vld [vmem:[#allocation46_spill] sm:$0xff]  ;;  %v16345_v17 = vld [vmem:[#allocation99_spill] sm:$0xff] }
 0x3d5   :  { %16305 = vst [vmem:[#allocation49_spill] sm:$0xff] %v11867_v33  ;;  %v11927_v48 = vadd.f32 %v4156_v46, %v16329_v57  ;;  %v11930_v56 = vadd.f32 %v4156_v46, %v16331_v22  ;;  %v11933_v19 = vadd.f32 %v4157_v39, %v16333_v52  ;;  %v11936_v43 = vadd.f32 %v4157_v39, %v16335_v7  ;;  %v16344_v46 = vld [vmem:[#allocation98_spill] sm:$0xff]  ;;  %v16349_v52 = vld [vmem:[#allocation103_spill] sm:$0xff]  ;;  %v16350_v7 = vld [vmem:[#allocation104_spill] sm:$0xff] }
 0x3d6   :  { %16306 = vst [vmem:[#allocation57_spill] sm:$0xff] %v11870_v13  ;;  %v11939_v27 = vadd.f32 %v4158_v47, %v16337_v15  ;;  %v11941_v21 = vadd.f32 %v4158_v47, %v4061_v3  ;;  %v11943_v26 = vadd.f32 %v4159_v12, %v4062_v49  ;;  %v11945_v60 = vadd.f32 %v4159_v12, %v4063_v18  ;;  %v16346_v3 = vld [vmem:[#allocation100_spill] sm:$0xff]  ;;  %v16347_v49 = vld [vmem:[#allocation101_spill] sm:$0xff]  ;;  %v16348_v12 = vld [vmem:[#allocation102_spill] sm:$0xff] }
 0x3d7   :  { %16307 = vst [vmem:[#allocation74_spill] sm:$0xff] %v11873_v62  ;;  %v4226_v40 = vsel %vm556_vm0, %v4224_v23, %v4225_v16  ;;  %v4233_v41 = vrot.slane %v16342_v2, 4  ;;  %v4234_v25 = vrot.slane %v16343_v1, 4  ;;  %v4229_v50 = vsel %vm556_vm0, %v4227_v45, %v4228_v37  ;;  %v16364_v13 = vld [vmem:[#allocation10_spill] sm:$0xff]  ;;  %v16365_v44 = vld [vmem:[#allocation25_spill] sm:$0xff] }
 0x3d8   :  { %16308 = vst [vmem:[#allocation9_spill] sm:$0xff] %v11876_v63  ;;  %v4232_v11 = vsel %vm556_vm0, %v4230_v51, %v4231_v32  ;;  %v4236_v39 = vrot.slane %v16344_v46, 4  ;;  %v4237_v57 = vrot.slane %v16345_v17, 4  ;;  %v4239_v47 = vrot.slane %v16346_v3, 4  ;;  %v16363_v63 = vld [vmem:[#allocation93_spill] sm:$0xff] }
 0x3d9   :  { %16309 = vst [vmem:[#allocation26_spill] sm:$0xff] %v11879_v59  ;;  %v4240_v22 = vrot.slane %v16347_v49, 4  ;;  %v4242_v18 = vrot.slane %v16348_v12, 4  ;;  %v4243_v23 = vrot.slane %v16349_v52, 4  ;;  %v4245_v15 = vrot.slane %v16350_v7, 4 }
 0x3da   :  { %16310 = vst [vmem:[#allocation75_spill] sm:$0xff] %v11882_v53  ;;  %v16362_v53 = vld [vmem:[#allocation80_spill] sm:$0xff]  ;;  %v4264_v62 = vrot.slane %v16363_v63, 4  ;;  %v4266_v33 = vrot.slane %v16364_v13, 4  ;;  %v4267_v24 = vrot.slane %v16365_v44, 4  ;;  %v4235_v29 = vsel %vm556_vm0, %v4233_v41, %v4234_v25 }
 0x3db   :  { %16311 = vst [vmem:[#allocation69_spill] sm:$0xff] %v11885_v54  ;;  %v4263_v59 = vrot.slane %v16362_v53, 4  ;;  %v4238_v0 = vsel %vm556_vm0, %v4236_v39, %v4237_v57  ;;  %v4269_v31 = vrot.slane %v16366_v35, 4 }
 0x3dc   :  { %16312 = vst [vmem:[#allocation107_spill] sm:$0xff] %v11888_v20  ;;  %v16361_v20 = vld [vmem:[#allocation89_spill] sm:$0xff] }
 0x3dd   :  { %16313 = vst [vmem:[#allocation38_spill] sm:$0xff] %v11891_v5  ;;  %v4261_v54 = vrot.slane %v16361_v20, 4  ;;  %v4244_v20 = vsel %vm556_vm0, %v4242_v18, %v4243_v23  ;;  %v4265_v35 = vsel %vm556_vm0, %v4263_v59, %v4264_v62  ;;  %v4305_v18 = vadd.f32 %v4225_v16, %v16322_v6 }
 0x3de   :  { %16314 = vst [vmem:[#allocation56_spill] sm:$0xff] %v11894_v9  ;;  %v16360_v9 = vld [vmem:[#allocation16_spill] sm:$0xff]  ;;  %v4311_v59 = vadd.f32 %v4234_v25, %v16343_v1 }
 0x3df   :  { %16315 = vst [vmem:[#allocation84_spill] sm:$0xff] %v11897_v4  ;;  %v4260_v5 = vrot.slane %v16360_v9, 4  ;;  %v4241_v9 = vsel %vm556_vm0, %v4239_v47, %v4240_v22  ;;  %v4304_v47 = vadd.f32 %v4226_v40, %v16274_v55  ;;  %v4313_v40 = vadd.f32 %v4237_v57, %v16345_v17  ;;  %v16369_v17 = vld [vmem:[#allocation87_spill] sm:$0xff] }
 0x3e0   :  { %16316 = vst [vmem:[#allocation115_spill] sm:$0xff] %v11900_v61  ;;  %v16359_v61 = vld [vmem:[#allocation87_spill] sm:$0xff]  ;;  %v4314_v16 = vadd.f32 %v4241_v9, %v16346_v3 }
 0x3e1   :  { %16317 = vst [vmem:[#allocation116_spill] sm:$0xff] %v11903_v42  ;;  %v4258_v4 = vrot.slane %v16359_v61, 4  ;;  %v4262_v39 = vsel %vm556_vm0, %v4260_v5, %v4261_v54  ;;  %v4310_v5 = vadd.f32 %v4235_v29, %v16342_v2 }
 0x3e2   :  { %16318 = vst [vmem:[#allocation117_spill] sm:$0xff] %v11906_v34  ;;  %v16358_v34 = vld [vmem:[#allocation85_spill] sm:$0xff] }
 0x3e3   :  { %16319 = vst [vmem:[#allocation118_spill] sm:$0xff] %v11909_v10  ;;  %v4257_v42 = vrot.slane %v16358_v34, 4  ;;  %v16367_v34 = vld [vmem:[#allocation94_spill] sm:$0xff] }
 0x3e4   :  { %16320 = vst [vmem:[#allocation119_spill] sm:$0xff] %v11912_v58  ;;  %v16357_v58 = vld [vmem:[#allocation52_spill] sm:$0xff]  ;;  %v4270_v61 = vrot.slane %v16367_v34, 4  ;;  %v4268_v34 = vsel %vm556_vm0, %v4266_v33, %v4267_v24  ;;  %v4312_v33 = vadd.f32 %v4238_v0, %v16344_v46 }
 0x3e5   :  { %16321 = vst [vmem:[#allocation120_spill] sm:$0xff] %v11915_v8  ;;  %v4255_v10 = vrot.slane %v16357_v58, 4  ;;  %v4259_v41 = vsel %vm556_vm0, %v4257_v42, %v4258_v4  ;;  %v4309_v42 = vadd.f32 %v4231_v32, %v16326_v28 }
 0x3e6   :  { %16328 = vst [vmem:[#allocation43_spill] sm:$0xff] %v11924_v30  ;;  %v16356_v30 = vld [vmem:[#allocation48_spill] sm:$0xff] }
 0x3e7   :  { %16330 = vst [vmem:[#allocation11_spill] sm:$0xff] %v11927_v48  ;;  %v4254_v8 = vrot.slane %v16356_v30, 4 }
 0x3e8   :  { %16332 = vst [vmem:[#allocation54_spill] sm:$0xff] %v11930_v56  ;;  %v16355_v56 = vld [vmem:[#allocation30_spill] sm:$0xff] }
 0x3e9   :  { %16334 = vst [vmem:[#allocation35_spill] sm:$0xff] %v11933_v19  ;;  %v4252_v48 = vrot.slane %v16355_v56, 4  ;;  %v4256_v44 = vsel %vm556_vm0, %v4254_v8, %v4255_v10  ;;  %v4308_v8 = vadd.f32 %v4232_v11, %v16325_v38 }
 0x3ea   :  { %16336 = vst [vmem:[#allocation23_spill] sm:$0xff] %v11936_v43  ;;  %v16354_v43 = vld [vmem:[#allocation40_spill] sm:$0xff]  ;;  %v4324_v9 = vadd.f32 %v4256_v44, %v16356_v30  ;;  %v4341_v44 = vmul.f32 0.10936069, %v4309_v42 }
 0x3eb   :  { %16338 = vst [vmem:[#allocation88_spill] sm:$0xff] %v11939_v27  ;;  %v16353_v27 = vld [vmem:[#allocation58_spill] sm:$0xff]  ;;  %v4251_v19 = vrot.slane %v16354_v43, 4  ;;  %v4323_v57 = vadd.f32 %v4252_v48, %v16355_v56  ;;  %v12020_v56 = vmul.f32 0.10936069, %v4308_v8 }
 0x3ec   :  { %16339 = vst [vmem:[#allocation90_spill] sm:$0xff] %v11941_v21  ;;  %v16352_v21 = vld [vmem:[#allocation53_spill] sm:$0xff]  ;;  %v4249_v51 = vrot.slane %v16353_v27, 4 }
 0x3ed   :  { %16340 = vst [vmem:[#allocation46_spill] sm:$0xff] %v11943_v26  ;;  %v4248_v45 = vrot.slane %v16352_v21, 4  ;;  %v4253_v13 = vsel %vm556_vm0, %v4251_v19, %v4252_v48  ;;  %v4307_v19 = vadd.f32 %v4228_v37, %v16324_v14  ;;  %v4317_v37 = vadd.f32 %v4243_v23, %v16349_v52  ;;  %v16370_v52 = vld [vmem:[#allocation16_spill] sm:$0xff] }
 0x3ee   :  { %16341 = vst [vmem:[#allocation39_spill] sm:$0xff] %v11945_v60  ;;  %v16351_v60 = vld [vmem:[#allocation96_spill] sm:$0xff]  ;;  %v4321_v25 = vadd.f32 %v4249_v51, %v16353_v27  ;;  %v4322_v0 = vadd.f32 %v4253_v13, %v16354_v43  ;;  %v4327_v23 = vadd.f32 %v4258_v4, %v16369_v17  ;;  %v12025_v4 = vmul.f32 0.10936069, %v4311_v59 }
 0x3ef   :  { %v4246_v26 = vrot.slane %v16351_v60, 4  ;;  %v4250_v63 = vsel %vm556_vm0, %v4248_v45, %v4249_v51  ;;  %v4306_v45 = vadd.f32 %v4229_v50, %v16323_v36  ;;  %v4316_v50 = vadd.f32 %v4244_v20, %v16348_v12  ;;  %v16372_v13 = vld [vmem:[#allocation80_spill] sm:$0xff] }
 0x3f0   :  { %v4320_v29 = vadd.f32 %v4250_v63, %v16352_v21  ;;  %v4337_v63 = vmul.f32 0.10936069, %v4305_v18  ;;  %v4330_v27 = vadd.f32 %v4265_v35, %v16372_v13  ;;  %v4339_v48 = vmul.f32 0.10936069, %v4307_v19  ;;  %v16375_v35 = vld [vmem:[#allocation25_spill] sm:$0xff] }
 0x3f1   :  { %v4247_v53 = vsel %vm556_vm0, %v4245_v15, %v4246_v26  ;;  %v4271_v15 = vsel %vm556_vm0, %v4269_v31, %v4270_v61  ;;  %v4315_v31 = vadd.f32 %v4240_v22, %v16347_v49  ;;  %v4319_v32 = vadd.f32 %v4246_v26, %v16351_v60  ;;  %v16368_v49 = vld [vmem:[#allocation85_spill] sm:$0xff] }
 0x3f2   :  { %v4318_v11 = vadd.f32 %v4247_v53, %v16350_v7  ;;  %v4325_v22 = vadd.f32 %v4255_v10, %v16357_v58  ;;  %v4326_v20 = vadd.f32 %v4259_v41, %v16368_v49  ;;  %v4328_v53 = vadd.f32 %v4262_v39, %v16370_v52  ;;  %v16371_v7 = vld [vmem:[#allocation89_spill] sm:$0xff] }
 0x3f3   :  { %v4329_v26 = vadd.f32 %v4261_v54, %v16371_v7  ;;  %v12015_v60 = vmul.f32 0.10936069, %v4304_v47  ;;  %v12017_v51 = vmul.f32 0.10936069, %v4306_v45  ;;  %v16373_v10 = vld [vmem:[#allocation93_spill] sm:$0xff]  ;;  %v16374_v54 = vld [vmem:[#allocation10_spill] sm:$0xff]  ;;  %v4333_v19 = vadd.f32 %v4267_v24, %v16375_v35 }
 0x3f4   :  { %v4331_v58 = vadd.f32 %v4264_v62, %v16373_v10  ;;  %v12023_v41 = vmul.f32 0.10936069, %v4310_v5  ;;  %v12027_v39 = vmul.f32 0.10936069, %v4312_v33  ;;  %v4332_v47 = vadd.f32 %v4268_v34, %v16374_v54  ;;  %v16376_v5 = vld [vmem:[#allocation8_spill] sm:$0xff] }
 0x3f5   :  { %v12030_v7 = vmul.f32 0.10936069, %v4313_v40  ;;  %v12032_v18 = vmul.f32 0.10936069, %v4314_v16  ;;  %v12034_v45 = vmul.f32 0.10936069, %v4315_v31  ;;  %v4334_v59 = vadd.f32 %v4271_v15, %v16376_v5 }
 0x3f6   :  { %v12037_v8 = vmul.f32 0.10936069, %v4316_v50  ;;  %v12039_v42 = vmul.f32 0.10936069, %v4317_v37  ;;  %v12041_v62 = vmul.f32 0.10936069, %v4318_v11 }
 0x3f7   :  { %v12044_v33 = vmul.f32 0.10936069, %v4319_v32  ;;  %v12046_v10 = vmul.f32 0.10936069, %v4320_v29  ;;  %v4353_v34 = vmul.f32 0.10936069, %v4321_v25 }
 0x3f8   :  { %v16377_v40 = vld [vmem:[#allocation94_spill] sm:$0xff]  ;;  %v12049_v17 = vmul.f32 0.10936069, %v4322_v0  ;;  %v4355_v31 = vmul.f32 0.10936069, %v4323_v57  ;;  %v4400_v29 = vrot.slane %v12015_v60, 6 }
 0x3f9   :  { %v4335_v16 = vadd.f32 %v4270_v61, %v16377_v40  ;;  %v12051_v54 = vmul.f32 0.10936069, %v4324_v9  ;;  %v4357_v24 = vmul.f32 0.10936069, %v4325_v22  ;;  %v12053_v50 = vmul.f32 0.10936069, %v4326_v20 }
 0x3fa   :  { %v4359_v37 = vmul.f32 0.10936069, %v4327_v23  ;;  %v16378_v11 = vld [vmem:[#allocation78_spill] sm:$0xff]  ;;  %v12059_v15 = vmul.f32 0.10936069, %v4328_v53  ;;  %v4401_v25 = vrot.slane %v4337_v63, 6 }
 0x3fb   :  { %v12057_v35 = vadd.f32 %v16378_v11, %v16322_v6  ;;  %v4361_v32 = vmul.f32 0.10936069, %v4329_v26  ;;  %v4403_v61 = vrot.slane %v12017_v51, 6  ;;  %v4404_v0 = vrot.slane %v4339_v48, 6  ;;  %v16380_v6 = vld [vmem:[#allocation83_spill] sm:$0xff]  ;;  %v16382_v63 = vld [vmem:[#allocation73_spill] sm:$0xff] }
 0x3fc   :  { %v4406_v57 = vrot.slane %v12020_v56, 6  ;;  %v4407_v9 = vrot.slane %v4341_v44, 6  ;;  %v12064_v22 = vmul.f32 0.10936069, %v4330_v27  ;;  %v4363_v20 = vmul.f32 0.10936069, %v4331_v58 }
 0x3fd   :  { %16379 = vst [vmem:[#allocation31_spill] sm:$0xff] %v12057_v35  ;;  %v12066_v23 = vmul.f32 0.10936069, %v4332_v47  ;;  %v12070_v40 = vadd.f32 %v16380_v6, %v16324_v14  ;;  %v4365_v53 = vmul.f32 0.10936069, %v4333_v19  ;;  %v12076_v51 = vadd.f32 %v16382_v63, %v16326_v28  ;;  %v16384_v48 = vld [vmem:[#allocation36_spill] sm:$0xff] }
 0x3fe   :  { %v12072_v26 = vmul.f32 0.10936069, %v4334_v59  ;;  %v4367_v60 = vmul.f32 0.10936069, %v4335_v16  ;;  %v4402_v56 = vsel %vm733_vm1, %v4400_v29, %v4401_v25  ;;  %v4409_v27 = vrot.slane %v12023_v41, 6 }
 0x3ff   :  { %16381 = vst [vmem:[#allocation95_spill] sm:$0xff] %v12070_v40  ;;  %v4410_v58 = vrot.slane %v12025_v4, 6  ;;  %v12083_v44 = vadd.f32 %v16384_v48, %v16343_v1  ;;  %v4405_v14 = vsel %vm733_vm1, %v4403_v61, %v4404_v0  ;;  %v4408_v47 = vsel %vm733_vm1, %v4406_v57, %v4407_v9 }
 0x400   :  { %16383 = vst [vmem:[#allocation50_spill] sm:$0xff] %v12076_v51  ;;  %v4412_v19 = vrot.slane %v12027_v39, 6  ;;  %v4413_v59 = vrot.slane %v12030_v7, 6  ;;  %v4415_v28 = vrot.slane %v12032_v18, 6  ;;  %v4416_v16 = vrot.slane %v12034_v45, 6 }
 0x401   :  { %16385 = vst [vmem:[#allocation97_spill] sm:$0xff] %v12083_v44  ;;  %v4418_v41 = vrot.slane %v12037_v8, 6  ;;  %v4419_v4 = vrot.slane %v12039_v42, 6  ;;  %v4421_v25 = vrot.slane %v12041_v62, 6  ;;  %v4422_v1 = vrot.slane %v12044_v33, 6 }
 0x402   :  { %v4424_v0 = vrot.slane %v12046_v10, 6  ;;  %v4425_v44 = vrot.slane %v4353_v34, 6  ;;  %v4427_v9 = vrot.slane %v12049_v17, 6  ;;  %v4428_v39 = vrot.slane %v4355_v31, 6 }
 0x403   :  { %v4430_v7 = vrot.slane %v12051_v54, 6  ;;  %v4431_v51 = vrot.slane %v4357_v24, 6  ;;  %v4433_v18 = vrot.slane %v12053_v50, 6  ;;  %v4434_v45 = vrot.slane %v4359_v37, 6 }
 0x404   :  { %v4436_v8 = vrot.slane %v12059_v15, 6  ;;  %v4437_v40 = vrot.slane %v4361_v32, 6  ;;  %v4439_v42 = vrot.slane %v12064_v22, 6  ;;  %v4440_v62 = vrot.slane %v4363_v20, 6 }
 0x405   :  { %v4442_v33 = vrot.slane %v12066_v23, 6  ;;  %v4443_v35 = vrot.slane %v4365_v53, 6  ;;  %v4411_v10 = vsel %vm733_vm1, %v4409_v27, %v4410_v58  ;;  %v4414_v17 = vsel %vm733_vm1, %v4412_v19, %v4413_v59  ;;  %v16387_v59 = vld [vmem:[#allocation66_spill] sm:$0xff] }
 0x406   :  { %v14967_v34 = vrot.slane %v12072_v26, 6  ;;  %v4446_v54 = vrot.slane %v4367_v60, 6  ;;  %v4417_v31 = vsel %vm733_vm1, %v4415_v28, %v4416_v16  ;;  %v4420_v24 = vsel %vm733_vm1, %v4418_v41, %v4419_v4  ;;  %v16386_v60 = vld [vmem:[#allocation61_spill] sm:$0xff] }
 0x407   :  { %v4423_v50 = vsel %vm733_vm1, %v4421_v25, %v4422_v1  ;;  %v4426_v37 = vsel %vm733_vm1, %v4424_v0, %v4425_v44  ;;  %v4429_v15 = vsel %vm733_vm1, %v4427_v9, %v4428_v39  ;;  %v4432_v32 = vsel %vm733_vm1, %v4430_v7, %v4431_v51  ;;  %v16388_v51 = vld [vmem:[#allocation47_spill] sm:$0xff] }
 0x408   :  { %v4435_v22 = vsel %vm733_vm1, %v4433_v18, %v4434_v45  ;;  %v4438_v20 = vsel %vm733_vm1, %v4436_v8, %v4437_v40  ;;  %v4441_v23 = vsel %vm733_vm1, %v4439_v42, %v4440_v62  ;;  %v4444_v53 = vsel %vm733_vm1, %v4442_v33, %v4443_v35  ;;  %v16389_v1 = vld [vmem:[#allocation19_spill] sm:$0xff]  ;;  %v16391_v35 = vld [vmem:[#allocation86_spill] sm:$0xff]  ;;  %v16392_v62 = vld [vmem:[#allocation49_spill] sm:$0xff] }
 0x409   :  { %v12116_v58 = vadd.f32 %v4400_v29, %v16386_v60  ;;  %v12119_v16 = vadd.f32 %v4402_v56, %v16387_v59  ;;  %v12124_v44 = vsel %vm733_vm1, %v14967_v34, %v4446_v54  ;;  %v12127_v4 = vadd.f32 %v4403_v61, %v16388_v51  ;;  %v16390_v39 = vld [vmem:[#allocation55_spill] sm:$0xff]  ;;  %v16394_v60 = vld [vmem:[#allocation57_spill] sm:$0xff]  ;;  %v16396_v54 = vld [vmem:[#allocation74_spill] sm:$0xff] }
 0x40a   :  { %v12130_v40 = vadd.f32 %v4405_v14, %v16389_v1  ;;  %v12133_v45 = vadd.f32 %v4406_v57, %v16390_v39  ;;  %v12136_v29 = vadd.f32 %v4408_v47, %v16391_v35  ;;  %v12139_v56 = vadd.f32 %v4409_v27, %v16392_v62  ;;  %v16398_v61 = vld [vmem:[#allocation9_spill] sm:$0xff]  ;;  %v16400_v14 = vld [vmem:[#allocation26_spill] sm:$0xff]  ;;  %v16402_v57 = vld [vmem:[#allocation75_spill] sm:$0xff] }
 0x40b   :  { %v12142_v59 = vadd.f32 %v4411_v10, %v16394_v60  ;;  %v12145_v34 = vadd.f32 %v4412_v19, %v16396_v54  ;;  %v12148_v51 = vadd.f32 %v4414_v17, %v16398_v61  ;;  %v12151_v1 = vadd.f32 %v4415_v28, %v16400_v14  ;;  %v16404_v47 = vld [vmem:[#allocation69_spill] sm:$0xff]  ;;  %v16406_v27 = vld [vmem:[#allocation107_spill] sm:$0xff]  ;;  %v16408_v10 = vld [vmem:[#allocation38_spill] sm:$0xff] }
 0x40c   :  { %16393 = vst [vmem:[#allocation98_spill] sm:$0xff] %v12139_v56  ;;  %v12154_v39 = vadd.f32 %v4417_v31, %v16402_v57  ;;  %v12157_v35 = vadd.f32 %v4418_v41, %v16404_v47  ;;  %v12160_v62 = vadd.f32 %v4420_v24, %v16406_v27  ;;  %v12163_v60 = vadd.f32 %v4421_v25, %v16408_v10  ;;  %v16410_v19 = vld [vmem:[#allocation56_spill] sm:$0xff]  ;;  %v16414_v28 = vld [vmem:[#allocation115_spill] sm:$0xff]  ;;  %v16418_v41 = vld [vmem:[#allocation117_spill] sm:$0xff] }
 0x40d   :  { %16395 = vst [vmem:[#allocation100_spill] sm:$0xff] %v12142_v59  ;;  %v12166_v54 = vadd.f32 %v4423_v50, %v16410_v19  ;;  %v16412_v17 = vld [vmem:[#allocation84_spill] sm:$0xff]  ;;  %v12172_v14 = vadd.f32 %v4426_v37, %v16414_v28  ;;  %v12178_v47 = vadd.f32 %v4429_v15, %v16418_v41  ;;  %v16420_v24 = vld [vmem:[#allocation118_spill] sm:$0xff]  ;;  %v16422_v25 = vld [vmem:[#allocation119_spill] sm:$0xff] }
 0x40e   :  { %16397 = vst [vmem:[#allocation102_spill] sm:$0xff] %v12145_v34  ;;  %v12169_v61 = vadd.f32 %v4424_v0, %v16412_v17  ;;  %v16416_v31 = vld [vmem:[#allocation116_spill] sm:$0xff]  ;;  %v12181_v27 = vadd.f32 %v4430_v7, %v16420_v24  ;;  %v12184_v10 = vadd.f32 %v4432_v32, %v16422_v25  ;;  %v16426_v0 = vld [vmem:[#allocation43_spill] sm:$0xff]  ;;  %v16455_v59 = vld [vmem:[#allocation101_spill] sm:$0xff] }
 0x40f   :  { %16399 = vst [vmem:[#allocation53_spill] sm:$0xff] %v12148_v51  ;;  %v12175_v57 = vadd.f32 %v4427_v9, %v16416_v31  ;;  %v16424_v50 = vld [vmem:[#allocation120_spill] sm:$0xff]  ;;  %v12190_v17 = vadd.f32 %v4435_v22, %v16426_v0  ;;  %v16428_v37 = vld [vmem:[#allocation11_spill] sm:$0xff]  ;;  %v16430_v9 = vld [vmem:[#allocation54_spill] sm:$0xff]  ;;  %v4512_v22 = vrot.slane %v16274_v55, 2  ;;  %v4516_v0 = vrot.slane %v16325_v38, 2 }
 0x410   :  { %16401 = vst [vmem:[#allocation40_spill] sm:$0xff] %v12151_v1  ;;  %v12187_v19 = vadd.f32 %v4433_v18, %v16424_v50  ;;  %v12193_v28 = vadd.f32 %v4436_v8, %v16428_v37  ;;  %v12196_v31 = vadd.f32 %v4438_v20, %v16430_v9  ;;  %v16432_v15 = vld [vmem:[#allocation35_spill] sm:$0xff]  ;;  %v16436_v32 = vld [vmem:[#allocation88_spill] sm:$0xff]  ;;  %v16438_v18 = vld [vmem:[#allocation90_spill] sm:$0xff]  ;;  %v4514_v8 = vrot.slane %v16323_v36, 2 }
 0x411   :  { %16403 = vst [vmem:[#allocation48_spill] sm:$0xff] %v12154_v39  ;;  %v12199_v41 = vadd.f32 %v4439_v42, %v16432_v15  ;;  %v16434_v7 = vld [vmem:[#allocation23_spill] sm:$0xff]  ;;  %v12205_v25 = vadd.f32 %v4442_v33, %v16436_v32  ;;  %v12208_v50 = vadd.f32 %v4444_v53, %v16438_v18  ;;  %v4518_v20 = vrot.slane %v16342_v2, 2  ;;  %v16440_v9 = vld [vmem:[#allocation104_spill] sm:$0xff]  ;;  %v16453_v39 = vld [vmem:[#allocation114_spill] sm:$0xff] }
 0x412   :  { %16405 = vst [vmem:[#allocation85_spill] sm:$0xff] %v12157_v35  ;;  %v12202_v24 = vadd.f32 %v4441_v23, %v16434_v7  ;;  %v4520_v42 = vrot.slane %v16344_v46, 2  ;;  %v4522_v37 = vrot.slane %v16346_v3, 2  ;;  %v4524_v23 = vrot.slane %v16348_v12, 2  ;;  %v16452_v35 = vld [vmem:[#allocation113_spill] sm:$0xff]  ;;  %v16456_v56 = vld [vmem:[#allocation103_spill] sm:$0xff] }
 0x413   :  { %16407 = vst [vmem:[#allocation16_spill] sm:$0xff] %v12160_v62  ;;  %v4526_v33 = vrot.slane %v16440_v9, 2  ;;  %v4528_v15 = vrot.slane %v16352_v21, 2  ;;  %v4530_v53 = vrot.slane %v16354_v43, 2  ;;  %v4532_v7 = vrot.slane %v16356_v30, 2  ;;  %v16451_v62 = vld [vmem:[#allocation112_spill] sm:$0xff] }
 0x414   :  { %16409 = vst [vmem:[#allocation80_spill] sm:$0xff] %v12163_v60  ;;  %v4534_v32 = vrot.slane %v16368_v49, 2  ;;  %v4536_v18 = vrot.slane %v16370_v52, 2  ;;  %v16450_v60 = vld [vmem:[#allocation51_spill] sm:$0xff] }
 0x415   :  { %16411 = vst [vmem:[#allocation8_spill] sm:$0xff] %v12166_v54  ;;  %v16448_v54 = vld [vmem:[#allocation14_spill] sm:$0xff] }
 0x416   :  { %16413 = vst [vmem:[#allocation78_spill] sm:$0xff] %v12169_v61 }
 0x417   :  { %16415 = vst [vmem:[#allocation83_spill] sm:$0xff] %v12172_v14  ;;  %v16444_v14 = vld [vmem:[#allocation44_spill] sm:$0xff] }
 0x418   :  { %16417 = vst [vmem:[#allocation73_spill] sm:$0xff] %v12175_v57 }
 0x419   :  { %16419 = vst [vmem:[#allocation36_spill] sm:$0xff] %v12178_v47  ;;  %v16443_v47 = vld [vmem:[#allocation59_spill] sm:$0xff] }
 0x41a   :  { %16421 = vst [vmem:[#allocation61_spill] sm:$0xff] %v12181_v27  ;;  %v4523_v57 = vsel %vm846_vm2, %v4522_v37, %v16443_v47  ;;  %v4537_v37 = vsel %vm846_vm2, %v4536_v18, %v16450_v60  ;;  %v16454_v18 = vld [vmem:[#allocation99_spill] sm:$0xff] }
 0x41b   :  { %16423 = vst [vmem:[#allocation66_spill] sm:$0xff] %v12184_v10  ;;  %v16442_v10 = vld [vmem:[#allocation24_spill] sm:$0xff] }
 0x41c   :  { %16425 = vst [vmem:[#allocation47_spill] sm:$0xff] %v12187_v19  ;;  %v4519_v19 = vsel %vm846_vm2, %v4518_v20, %v16384_v48  ;;  %v4521_v27 = vsel %vm846_vm2, %v4520_v42, %v16442_v10  ;;  %v4533_v48 = vsel %vm846_vm2, %v4532_v7, %v16448_v54  ;;  %v16449_v20 = vld [vmem:[#allocation13_spill] sm:$0xff]  ;;  %v4569_v34 = vadd.f32 %v16442_v10, %v16454_v18 }
 0x41d   :  { %16427 = vst [vmem:[#allocation19_spill] sm:$0xff] %v12190_v17  ;;  %v4542_v17 = vrot.slane %v16376_v5, 2  ;;  %v4535_v42 = vsel %vm846_vm2, %v4534_v32, %v16449_v20  ;;  %v4566_v32 = vadd.f32 %v4519_v19, %v16342_v2  ;;  %v4568_v51 = vadd.f32 %v4521_v27, %v16344_v46  ;;  %v16458_v27 = vld [vmem:[#allocation58_spill] sm:$0xff]  ;;  %v16461_v19 = vld [vmem:[#allocation87_spill] sm:$0xff] }
 0x41e   :  { %16429 = vst [vmem:[#allocation55_spill] sm:$0xff] %v12193_v28  ;;  %v4517_v28 = vsel %vm846_vm2, %v4516_v0, %v16382_v63  ;;  %v16447_v0 = vld [vmem:[#allocation34_spill] sm:$0xff] }
 0x41f   :  { %16431 = vst [vmem:[#allocation86_spill] sm:$0xff] %v12196_v31  ;;  %v4515_v31 = vsel %vm846_vm2, %v4514_v8, %v16380_v6  ;;  %v16446_v8 = vld [vmem:[#allocation28_spill] sm:$0xff]  ;;  %v4531_v61 = vsel %vm846_vm2, %v4530_v53, %v16447_v0  ;;  %v4564_v7 = vadd.f32 %v4517_v28, %v16325_v38  ;;  %v4583_v28 = vadd.f32 %v16449_v20, %v16461_v19 }
 0x420   :  { %16433 = vst [vmem:[#allocation49_spill] sm:$0xff] %v12199_v41  ;;  %v4513_v41 = vsel %vm846_vm2, %v4512_v22, %v16378_v11  ;;  %v4525_v11 = vsel %vm846_vm2, %v4524_v23, %v16444_v14  ;;  %v16445_v22 = vld [vmem:[#allocation12_spill] sm:$0xff]  ;;  %v4529_v63 = vsel %vm846_vm2, %v4528_v15, %v16446_v8  ;;  %v4543_v15 = vsel %vm846_vm2, %v4542_v17, %v16453_v39 }
 0x421   :  { %16435 = vst [vmem:[#allocation57_spill] sm:$0xff] %v12202_v24  ;;  %v4527_v6 = vsel %vm846_vm2, %v4526_v33, %v16445_v22  ;;  %v4560_v53 = vadd.f32 %v4513_v41, %v16274_v55  ;;  %v4562_v1 = vadd.f32 %v4515_v31, %v16323_v36  ;;  %v4572_v17 = vadd.f32 %v4525_v11, %v16348_v12  ;;  %v16457_v38 = vld [vmem:[#allocation96_spill] sm:$0xff]  ;;  %v16462_v41 = vld [vmem:[#allocation31_spill] sm:$0xff] }
 0x422   :  { %16437 = vst [vmem:[#allocation74_spill] sm:$0xff] %v12205_v25  ;;  %v16441_v25 = vld [vmem:[#allocation10_spill] sm:$0xff]  ;;  %v4573_v55 = vadd.f32 %v16444_v14, %v16456_v56  ;;  %v4574_v36 = vadd.f32 %v4527_v6, %v16440_v9  ;;  %v4575_v2 = vadd.f32 %v16445_v22, %v16457_v38  ;;  %v4576_v46 = vadd.f32 %v4529_v63, %v16352_v21 }
 0x423   :  { %16439 = vst [vmem:[#allocation9_spill] sm:$0xff] %v12208_v50  ;;  %v4538_v50 = vrot.slane %v16372_v13, 2  ;;  %v4540_v24 = vrot.slane %v16441_v25, 2  ;;  %v4577_v10 = vadd.f32 %v16446_v8, %v16458_v27  ;;  %v4580_v12 = vadd.f32 %v4533_v48, %v16356_v30  ;;  %v16464_v30 = vld [vmem:[#allocation95_spill] sm:$0xff]  ;;  %v16467_v48 = vld [vmem:[#allocation93_spill] sm:$0xff] }
 0x424   :  { %v4582_v14 = vadd.f32 %v4535_v42, %v16368_v49  ;;  %v4584_v21 = vadd.f32 %v4537_v37, %v16370_v52  ;;  %v12287_v31 = vmul.f32 0.21300554, %v4560_v53  ;;  %v4593_v9 = vmul.f32 0.21300554, %v16462_v41  ;;  %v16466_v52 = vld [vmem:[#allocation97_spill] sm:$0xff] }
 0x425   :  { %v4539_v23 = vsel %vm846_vm2, %v4538_v50, %v16451_v62  ;;  %v4541_v33 = vsel %vm846_vm2, %v4540_v24, %v16452_v35  ;;  %v4570_v50 = vadd.f32 %v4523_v57, %v16346_v3  ;;  %v4571_v24 = vadd.f32 %v16443_v47, %v16455_v59  ;;  %v16459_v57 = vld [vmem:[#allocation30_spill] sm:$0xff]  ;;  %v16460_v47 = vld [vmem:[#allocation52_spill] sm:$0xff] }
 0x426   :  { %v4578_v3 = vadd.f32 %v4531_v61, %v16354_v43  ;;  %v4579_v59 = vadd.f32 %v16447_v0, %v16459_v57  ;;  %v4581_v56 = vadd.f32 %v16448_v54, %v16460_v47  ;;  %v16463_v43 = vld [vmem:[#allocation89_spill] sm:$0xff]  ;;  %v12292_v11 = vmul.f32 0.21300554, %v4562_v1  ;;  %v16465_v54 = vld [vmem:[#allocation50_spill] sm:$0xff] }
 0x427   :  { %v4585_v61 = vadd.f32 %v16450_v60, %v16463_v43  ;;  %v4595_v22 = vmul.f32 0.21300554, %v16464_v30  ;;  %v12295_v6 = vmul.f32 0.21300554, %v4564_v7  ;;  %v4586_v49 = vadd.f32 %v4539_v23, %v16372_v13  ;;  %v16468_v7 = vld [vmem:[#allocation25_spill] sm:$0xff]  ;;  %v16470_v57 = vld [vmem:[#allocation46_spill] sm:$0xff] }
 0x428   :  { %v4597_v8 = vmul.f32 0.21300554, %v16465_v54  ;;  %v12299_v63 = vmul.f32 0.21300554, %v4566_v32  ;;  %v12302_v0 = vmul.f32 0.21300554, %v16466_v52  ;;  %v4587_v20 = vadd.f32 %v16451_v62, %v16467_v48 }
 0x429   :  { %v12306_v42 = vmul.f32 0.21300554, %v4568_v51  ;;  %v12308_v1 = vmul.f32 0.21300554, %v4569_v34  ;;  %v12310_v60 = vmul.f32 0.21300554, %v4570_v50  ;;  %v4588_v37 = vadd.f32 %v4541_v33, %v16441_v25 }
 0x42a   :  { %v12313_v53 = vmul.f32 0.21300554, %v4571_v24  ;;  %v12315_v13 = vmul.f32 0.21300554, %v4572_v17  ;;  %v12317_v23 = vmul.f32 0.21300554, %v4573_v55  ;;  %v4589_v32 = vadd.f32 %v16452_v35, %v16468_v7 }
 0x42b   :  { %v12321_v18 = vmul.f32 0.21300554, %v4574_v36  ;;  %v4607_v62 = vmul.f32 0.21300554, %v4575_v2  ;;  %v12323_v51 = vmul.f32 0.21300554, %v4576_v46  ;;  %v4590_v34 = vadd.f32 %v4543_v15, %v16376_v5 }
 0x42c   :  { %v4609_v50 = vmul.f32 0.21300554, %v4577_v10  ;;  %v12326_v38 = vmul.f32 0.21300554, %v4578_v3  ;;  %v4611_v25 = vmul.f32 0.21300554, %v4579_v59 }
 0x42d   :  { %v16469_v33 = vld [vmem:[#allocation94_spill] sm:$0xff]  ;;  %v12330_v17 = vmul.f32 0.21300554, %v4580_v12  ;;  %v4613_v55 = vmul.f32 0.21300554, %v4581_v56  ;;  %v4656_v2 = vrot.slane %v12287_v31, 7 }
 0x42e   :  { %v4591_v24 = vadd.f32 %v16453_v39, %v16469_v33  ;;  %v12332_v27 = vmul.f32 0.21300554, %v4582_v14  ;;  %v4615_v35 = vmul.f32 0.21300554, %v4583_v28  ;;  %v12334_v36 = vmul.f32 0.21300554, %v4584_v21 }
 0x42f   :  { %v4657_v46 = vrot.slane %v4593_v9, 7  ;;  %v4659_v5 = vrot.slane %v12292_v11, 7  ;;  %v4660_v15 = vrot.slane %v4595_v22, 7  ;;  %v4662_v10 = vrot.slane %v12295_v6, 7  ;;  %v16472_v14 = vld [vmem:[#allocation39_spill] sm:$0xff] }
 0x430   :  { %v4663_v3 = vrot.slane %v4597_v8, 7  ;;  %v16471_v39 = vrot.slane %v12072_v26, 6  ;;  %v4617_v12 = vmul.f32 0.21300554, %v4585_v61  ;;  %v12344_v47 = vmul.f32 0.21300554, %v4586_v49 }
 0x431   :  { %v4619_v56 = vmul.f32 0.21300554, %v4587_v20  ;;  %v12348_v19 = vadd.f32 %v12124_v44, %v16472_v14  ;;  %v12350_v28 = vmul.f32 0.21300554, %v4588_v37  ;;  %v4621_v21 = vmul.f32 0.21300554, %v4589_v32 }
 0x432   :  { %v12342_v59 = vadd.f32 %v16471_v39, %v16470_v57  ;;  %v12352_v31 = vmul.f32 0.21300554, %v4590_v34  ;;  %v4623_v41 = vmul.f32 0.21300554, %v4591_v24  ;;  %v4658_v9 = vsel %vm991_vm3, %v4656_v2, %v4657_v46  ;;  %v16473_v14 = vld [vmem:[#allocation98_spill] sm:$0xff] }
 0x433   :  { %v4665_v26 = vrot.slane %v12299_v63, 7  ;;  %v4666_v43 = vrot.slane %v12302_v0, 7  ;;  %v4661_v61 = vsel %vm991_vm3, %v4659_v5, %v4660_v15  ;;  %v4664_v11 = vsel %vm991_vm3, %v4662_v10, %v4663_v3 }
 0x434   :  { %v4668_v30 = vrot.slane %v12306_v42, 7  ;;  %v4669_v44 = vrot.slane %v12308_v1, 7  ;;  %v4671_v22 = vrot.slane %v12310_v60, 7  ;;  %v4672_v6 = vrot.slane %v12313_v53, 7 }
 0x435   :  { %v4674_v49 = vrot.slane %v12315_v13, 7  ;;  %v4675_v54 = vrot.slane %v12317_v23, 7  ;;  %v4677_v8 = vrot.slane %v12321_v18, 7  ;;  %v4678_v63 = vrot.slane %v4607_v62, 7 }
 0x436   :  { %v4680_v52 = vrot.slane %v12323_v51, 7  ;;  %v4681_v0 = vrot.slane %v4609_v50, 7  ;;  %v4683_v48 = vrot.slane %v12326_v38, 7  ;;  %v4684_v20 = vrot.slane %v4611_v25, 7 }
 0x437   :  { %v4686_v42 = vrot.slane %v12330_v17, 7  ;;  %v4687_v1 = vrot.slane %v4613_v55, 7  ;;  %v4689_v60 = vrot.slane %v12332_v27, 7  ;;  %v4690_v37 = vrot.slane %v4615_v35, 7 }
 0x438   :  { %v4692_v53 = vrot.slane %v12334_v36, 7  ;;  %v4693_v13 = vrot.slane %v4617_v12, 7  ;;  %v4695_v23 = vrot.slane %v12344_v47, 7  ;;  %v4696_v7 = vrot.slane %v4619_v56, 7 }
 0x439   :  { %v4698_v32 = vrot.slane %v12350_v28, 7  ;;  %v4699_v18 = vrot.slane %v4621_v21, 7  ;;  %v4667_v62 = vsel %vm991_vm3, %v4665_v26, %v4666_v43  ;;  %v4670_v51 = vsel %vm991_vm3, %v4668_v30, %v4669_v44  ;;  %v16474_v21 = vld [vmem:[#allocation100_spill] sm:$0xff]  ;;  %v16485_v44 = vld [vmem:[#allocation78_spill] sm:$0xff] }
 0x43a   :  { %v4701_v34 = vrot.slane %v12352_v31, 7  ;;  %v4702_v50 = vrot.slane %v4623_v41, 7  ;;  %v4673_v38 = vsel %vm991_vm3, %v4671_v22, %v4672_v6  ;;  %v4676_v25 = vsel %vm991_vm3, %v4674_v49, %v4675_v54  ;;  %v16476_v31 = vld [vmem:[#allocation53_spill] sm:$0xff]  ;;  %v16481_v43 = vld [vmem:[#allocation80_spill] sm:$0xff] }
 0x43b   :  { %v4679_v33 = vsel %vm991_vm3, %v4677_v8, %v4678_v63  ;;  %v4682_v24 = vsel %vm991_vm3, %v4680_v52, %v4681_v0  ;;  %v4685_v17 = vsel %vm991_vm3, %v4683_v48, %v4684_v20  ;;  %v4688_v55 = vsel %vm991_vm3, %v4686_v42, %v4687_v1  ;;  %v16489_v63 = vld [vmem:[#allocation73_spill] sm:$0xff] }
 0x43c   :  { %v4691_v27 = vsel %vm991_vm3, %v4689_v60, %v4690_v37  ;;  %v4694_v35 = vsel %vm991_vm3, %v4692_v53, %v4693_v13  ;;  %v4697_v36 = vsel %vm991_vm3, %v4695_v23, %v4696_v7  ;;  %v4700_v46 = vsel %vm991_vm3, %v4698_v32, %v4699_v18  ;;  %v16491_v1 = vld [vmem:[#allocation61_spill] sm:$0xff]  ;;  %v16493_v7 = vld [vmem:[#allocation47_spill] sm:$0xff] }
 0x43d   :  { %v4736_v15 = vadd.f32 %v4656_v2, %v12116_v58  ;;  %v4737_v3 = vadd.f32 %v4658_v9, %v12119_v16  ;;  %v4703_v57 = vsel %vm991_vm3, %v4701_v34, %v4702_v50  ;;  %v4738_v39 = vadd.f32 %v4659_v5, %v12127_v4  ;;  %v16475_v16 = vld [vmem:[#allocation102_spill] sm:$0xff]  ;;  %v16480_v9 = vld [vmem:[#allocation16_spill] sm:$0xff] }
 0x43e   :  { %v12391_v12 = vadd.f32 %v4661_v61, %v12130_v40  ;;  %v12394_v47 = vadd.f32 %v4662_v10, %v12133_v45  ;;  %v12397_v56 = vadd.f32 %v4664_v11, %v12136_v29  ;;  %v12400_v28 = vadd.f32 %v4665_v26, %v16473_v14  ;;  %v16477_v40 = vld [vmem:[#allocation40_spill] sm:$0xff]  ;;  %v16479_v29 = vld [vmem:[#allocation85_spill] sm:$0xff] }
 0x43f   :  { %v12403_v58 = vadd.f32 %v4667_v62, %v16474_v21  ;;  %v12406_v2 = vadd.f32 %v4668_v30, %v16475_v16  ;;  %v12409_v4 = vadd.f32 %v4670_v51, %v16476_v31  ;;  %v12412_v5 = vadd.f32 %v4671_v22, %v16477_v40  ;;  %v16478_v45 = vld [vmem:[#allocation48_spill] sm:$0xff]  ;;  %v16487_v22 = vld [vmem:[#allocation83_spill] sm:$0xff]  ;;  %v16503_v14 = vld [vmem:[#allocation9_spill] sm:$0xff] }
 0x440   :  { %v12415_v10 = vadd.f32 %v4673_v38, %v16478_v45  ;;  %v12418_v41 = vadd.f32 %v4674_v49, %v16479_v29  ;;  %v12421_v26 = vadd.f32 %v4676_v25, %v16480_v9  ;;  %v12424_v61 = vadd.f32 %v4677_v8, %v16481_v43  ;;  %v16483_v11 = vld [vmem:[#allocation8_spill] sm:$0xff]  ;;  %v16492_v8 = vld [vmem:[#allocation66_spill] sm:$0xff]  ;;  %v16495_v51 = vld [vmem:[#allocation55_spill] sm:$0xff] }
 0x441   :  { %v12427_v30 = vadd.f32 %v4679_v33, %v16483_v11  ;;  %v12430_v6 = vadd.f32 %v4680_v52, %v16485_v44  ;;  %v12433_v54 = vadd.f32 %v4682_v24, %v16487_v22  ;;  %v12436_v0 = vadd.f32 %v4683_v48, %v16489_v63  ;;  %v16490_v49 = vld [vmem:[#allocation36_spill] sm:$0xff]  ;;  %v16494_v52 = vld [vmem:[#allocation19_spill] sm:$0xff]  ;;  %v16496_v48 = vld [vmem:[#allocation86_spill] sm:$0xff] }
 0x442   :  { %16482 = vst [vmem:[#allocation26_spill] sm:$0xff] %v12424_v61  ;;  %v12439_v20 = vadd.f32 %v4685_v17, %v16490_v49  ;;  %v12442_v37 = vadd.f32 %v4686_v42, %v16491_v1  ;;  %v12445_v13 = vadd.f32 %v4688_v55, %v16492_v8  ;;  %v12448_v18 = vadd.f32 %v4689_v60, %v16493_v7  ;;  %v16498_v25 = vld [vmem:[#allocation49_spill] sm:$0xff]  ;;  %v16502_v17 = vld [vmem:[#allocation74_spill] sm:$0xff]  ;;  %v16505_v7 = vld [vmem:[#allocation108_spill] sm:$0xff] }
 0x443   :  { %16484 = vst [vmem:[#allocation75_spill] sm:$0xff] %v12427_v30  ;;  %v12451_v62 = vadd.f32 %v4691_v27, %v16494_v52  ;;  %v12454_v50 = vadd.f32 %v4692_v53, %v16495_v51  ;;  %v12457_v38 = vadd.f32 %v4694_v35, %v16496_v48  ;;  %v12460_v33 = vadd.f32 %v4695_v23, %v16498_v25  ;;  %v16500_v42 = vld [vmem:[#allocation57_spill] sm:$0xff]  ;;  %v16504_v8 = vld [vmem:[#allocation106_spill] sm:$0xff] }
 0x444   :  { %16486 = vst [vmem:[#allocation69_spill] sm:$0xff] %v12430_v6  ;;  %v12463_v24 = vadd.f32 %v4697_v36, %v16500_v42  ;;  %v4764_v55 = vadd.f32 %v4698_v32, %v16502_v17  ;;  %v4765_v60 = vadd.f32 %v4700_v46, %v16503_v14  ;;  %v4766_v21 = vadd.f32 %v4701_v34, %v12342_v59 }
 0x445   :  { %16488 = vst [vmem:[#allocation107_spill] sm:$0xff] %v12433_v54  ;;  %v4767_v27 = vadd.f32 %v4703_v57, %v12348_v19  ;;  %v4768_v53 = vmul.f32 0.26601171, %v12412_v5  ;;  %v4769_v16 = vmul.f32 0.26601171, %v12415_v10  ;;  %v4780_v31 = vadd.f32 %v12442_v37, %v4736_v15 }
 0x446   :  { %16497 = vst [vmem:[#allocation38_spill] sm:$0xff] %v12457_v38  ;;  %v4770_v35 = vmul.f32 0.26601171, %v12418_v41  ;;  %v4771_v23 = vmul.f32 0.26601171, %v12421_v26  ;;  %v4781_v46 = vadd.f32 %v12445_v13, %v4737_v3  ;;  %v4782_v59 = vadd.f32 %v12448_v18, %v4738_v39 }
 0x447   :  { %16499 = vst [vmem:[#allocation56_spill] sm:$0xff] %v12460_v33  ;;  %v4772_v36 = vmul.f32 0.26601171, %v12424_v61  ;;  %v4773_v32 = vmul.f32 0.26601171, %v12427_v30  ;;  %v4783_v57 = vadd.f32 %v12451_v62, %v12391_v12  ;;  %v4784_v40 = vadd.f32 %v12454_v50, %v12394_v47 }
 0x448   :  { %16501 = vst [vmem:[#allocation84_spill] sm:$0xff] %v12463_v24  ;;  %v4774_v19 = vmul.f32 0.26601171, %v12430_v6  ;;  %v4775_v34 = vmul.f32 0.26601171, %v12433_v54  ;;  %v4785_v29 = vadd.f32 %v12457_v38, %v12397_v56  ;;  %v4786_v3 = vadd.f32 %v12460_v33, %v12400_v28 }
 0x449   :  { %v4776_v15 = vmul.f32 0.26601171, %v12436_v0  ;;  %v4777_v45 = vmul.f32 0.26601171, %v12439_v20  ;;  %v4787_v9 = vadd.f32 %v12463_v24, %v12403_v58  ;;  %v4788_v43 = vadd.f32 %v4764_v55, %v12406_v2 }
 0x44a   :  { %v4789_v11 = vadd.f32 %v4765_v60, %v12409_v4  ;;  %v4792_v44 = vmul.f32 0.0010283801, %v4780_v31  ;;  %v4790_v22 = vadd.f32 %v4766_v21, %v12412_v5  ;;  %v4791_v63 = vadd.f32 %v4767_v27, %v12415_v10 }
 0x44b   :  { %v4793_v49 = vmul.f32 0.0010283801, %v4781_v46  ;;  %v4794_v1 = vmul.f32 0.0010283801, %v4782_v59  ;;  %v12498_v52 = vadd.f32 %v16505_v7, %v16504_v8  ;;  %v4778_v51 = vmul.f32 0.26601171, %v12442_v37 }
 0x44c   :  { %v4795_v48 = vmul.f32 0.0010283801, %v4783_v57  ;;  %v4796_v25 = vmul.f32 0.0010283801, %v4784_v40  ;;  %v4779_v42 = vmul.f32 0.26601171, %v12445_v13  ;;  %v4816_v31 = vadd.f32 %v12436_v0, %v4738_v39 }
 0x44d   :  { %16506 = vst [vmem:[#allocation115_spill] sm:$0xff] %v12498_v52  ;;  %v4797_v17 = vmul.f32 0.0010283801, %v4785_v29  ;;  %v4798_v14 = vmul.f32 0.0010283801, %v4786_v3  ;;  %v4804_v27 = vadd.f32 %v4792_v44, %v4768_v53  ;;  %v4805_v54 = vadd.f32 %v4793_v49, %v4769_v16 }
 0x44e   :  { %v4799_v30 = vmul.f32 0.0010283801, %v4787_v9  ;;  %v4800_v21 = vmul.f32 0.0010283801, %v4788_v43  ;;  %v4801_v61 = vmul.f32 0.0010283801, %v4789_v11  ;;  %v4806_v6 = vadd.f32 %v4794_v1, %v4770_v35 }
 0x44f   :  { %v4802_v46 = vmul.f32 0.0010283801, %v4790_v22  ;;  %v4803_v59 = vmul.f32 0.0010283801, %v4791_v63  ;;  %v4807_v8 = vadd.f32 %v4795_v48, %v4771_v23  ;;  %v4808_v7 = vadd.f32 %v4796_v25, %v4772_v36  ;;  %v16507_v25 = vld [vmem:[#allocation69_spill] sm:$0xff] }
 0x450   :  { %v4817_v57 = vadd.f32 %v12439_v20, %v12391_v12  ;;  %v4818_v40 = vadd.f32 %v12442_v37, %v12394_v47  ;;  %v4809_v29 = vadd.f32 %v4797_v17, %v4773_v32  ;;  %v4810_v3 = vadd.f32 %v4798_v14, %v4774_v19 }
 0x451   :  { %v4819_v39 = vadd.f32 %v12445_v13, %v12397_v56  ;;  %v4820_v53 = vadd.f32 %v12448_v18, %v12400_v28  ;;  %v4811_v9 = vadd.f32 %v4799_v30, %v4775_v34  ;;  %v4812_v43 = vadd.f32 %v4800_v21, %v4776_v15 }
 0x452   :  { %v4821_v16 = vadd.f32 %v12451_v62, %v12403_v58  ;;  %v4822_v35 = vadd.f32 %v12454_v50, %v12406_v2  ;;  %v4823_v12 = vadd.f32 %v12457_v38, %v12409_v4  ;;  %v4824_v23 = vadd.f32 %v12460_v33, %v12412_v5 }
 0x453   :  { %v4825_v36 = vadd.f32 %v12463_v24, %v12415_v10  ;;  %v4828_v32 = vmul.f32 0.007598758, %v4816_v31  ;;  %v4826_v19 = vadd.f32 %v4764_v55, %v12418_v41  ;;  %v4827_v30 = vadd.f32 %v4765_v60, %v12421_v26 }
 0x454   :  { %v4829_v34 = vmul.f32 0.007598758, %v4817_v57  ;;  %v4830_v15 = vmul.f32 0.007598758, %v4818_v40  ;;  %v4813_v11 = vadd.f32 %v4801_v61, %v4777_v45  ;;  %v4814_v44 = vadd.f32 %v4802_v46, %v4778_v51  ;;  %v16508_v61 = vld [vmem:[#allocation107_spill] sm:$0xff] }
 0x455   :  { %v4831_v22 = vmul.f32 0.007598758, %v4819_v39  ;;  %v4832_v63 = vmul.f32 0.007598758, %v4820_v53  ;;  %v4815_v49 = vadd.f32 %v4803_v59, %v4779_v42  ;;  %v4833_v1 = vmul.f32 0.007598758, %v4821_v16 }
 0x456   :  { %v4834_v48 = vmul.f32 0.007598758, %v4822_v35  ;;  %v4852_v17 = vadd.f32 %v16507_v25, %v12394_v47  ;;  %v4835_v14 = vmul.f32 0.007598758, %v4823_v12  ;;  %v4836_v21 = vmul.f32 0.007598758, %v4824_v23 }
 0x457   :  { %v4837_v52 = vmul.f32 0.007598758, %v4825_v36  ;;  %v4840_v31 = vadd.f32 %v4828_v32, %v4804_v27  ;;  %v4838_v24 = vmul.f32 0.007598758, %v4826_v19  ;;  %v4839_v55 = vmul.f32 0.007598758, %v4827_v30 }
 0x458   :  { %v4841_v33 = vadd.f32 %v4829_v34, %v4805_v54  ;;  %v4842_v60 = vadd.f32 %v4830_v15, %v4806_v6  ;;  %v4843_v57 = vadd.f32 %v4831_v22, %v4807_v8  ;;  %v4844_v40 = vadd.f32 %v4832_v63, %v4808_v7  ;;  %v16509_v39 = vld [vmem:[#allocation26_spill] sm:$0xff]  ;;  %v16510_v53 = vld [vmem:[#allocation56_spill] sm:$0xff]  ;;  %v16511_v16 = vld [vmem:[#allocation75_spill] sm:$0xff] }
 0x459   :  { %v4853_v45 = vadd.f32 %v16508_v61, %v12397_v56  ;;  %v4854_v51 = vadd.f32 %v12436_v0, %v12400_v28  ;;  %v4845_v42 = vadd.f32 %v4833_v1, %v4809_v29  ;;  %v4846_v46 = vadd.f32 %v4834_v48, %v4810_v3  ;;  %v16512_v35 = vld [vmem:[#allocation84_spill] sm:$0xff] }
 0x45a   :  { %v4855_v47 = vadd.f32 %v12439_v20, %v12403_v58  ;;  %v4856_v27 = vadd.f32 %v12442_v37, %v12406_v2  ;;  %v4847_v59 = vadd.f32 %v4835_v14, %v4811_v9  ;;  %v4857_v6 = vadd.f32 %v12445_v13, %v12409_v4 }
 0x45b   :  { %v4858_v54 = vadd.f32 %v12448_v18, %v12412_v5  ;;  %v4859_v56 = vadd.f32 %v12451_v62, %v12415_v10  ;;  %v4848_v8 = vadd.f32 %v4836_v21, %v4812_v43  ;;  %v4860_v7 = vadd.f32 %v12454_v50, %v12418_v41 }
 0x45c   :  { %v4861_v29 = vadd.f32 %v12457_v38, %v12421_v26  ;;  %v4864_v3 = vmul.f32 0.036000773, %v4852_v17  ;;  %v4862_v9 = vadd.f32 %v16510_v53, %v16509_v39  ;;  %v4863_v12 = vadd.f32 %v16512_v35, %v16511_v16 }
 0x45d   :  { %v4865_v23 = vmul.f32 0.036000773, %v4853_v45  ;;  %v4866_v36 = vmul.f32 0.036000773, %v4854_v51  ;;  %v4849_v32 = vadd.f32 %v4837_v52, %v4813_v11  ;;  %v4850_v19 = vadd.f32 %v4838_v24, %v4814_v44 }
 0x45e   :  { %v4867_v30 = vmul.f32 0.036000773, %v4855_v47  ;;  %v4868_v34 = vmul.f32 0.036000773, %v4856_v27  ;;  %v4851_v43 = vadd.f32 %v4839_v55, %v4815_v49  ;;  %v4869_v15 = vmul.f32 0.036000773, %v4857_v6 }
 0x45f   :  { %v4870_v22 = vmul.f32 0.036000773, %v4858_v54  ;;  %v4871_v63 = vmul.f32 0.036000773, %v4859_v56  ;;  %v4872_v1 = vmul.f32 0.036000773, %v4860_v7  ;;  %v4876_v14 = vadd.f32 %v4864_v3, %v4840_v31 }
 0x460   :  { %v4873_v48 = vmul.f32 0.036000773, %v4861_v29  ;;  %v4888_v17 = vadd.f32 %v16509_v39, %v12400_v28  ;;  %v4874_v21 = vmul.f32 0.036000773, %v4862_v9  ;;  %v4875_v53 = vmul.f32 0.036000773, %v4863_v12 }
 0x461   :  { %v4877_v38 = vadd.f32 %v4865_v23, %v4841_v33  ;;  %v4878_v35 = vadd.f32 %v4866_v36, %v4842_v60  ;;  %v4879_v45 = vadd.f32 %v4867_v30, %v4843_v57  ;;  %v4880_v51 = vadd.f32 %v4868_v34, %v4844_v40  ;;  %v16513_v47 = vld [vmem:[#allocation38_spill] sm:$0xff] }
 0x462   :  { %v4889_v24 = vadd.f32 %v16511_v16, %v12403_v58  ;;  %v4890_v52 = vadd.f32 %v16507_v25, %v12406_v2  ;;  %v4881_v11 = vadd.f32 %v4869_v15, %v4845_v42  ;;  %v4882_v44 = vadd.f32 %v4870_v22, %v4846_v46 }
 0x463   :  { %v4883_v49 = vadd.f32 %v4871_v63, %v4847_v59  ;;  %v4891_v31 = vadd.f32 %v16508_v61, %v12409_v4  ;;  %v4884_v55 = vadd.f32 %v4872_v1, %v4848_v8  ;;  %v4892_v28 = vadd.f32 %v12436_v0, %v12412_v5 }
 0x464   :  { %v4893_v33 = vadd.f32 %v12439_v20, %v12415_v10  ;;  %v4894_v60 = vadd.f32 %v12442_v37, %v12418_v41  ;;  %v4895_v58 = vadd.f32 %v12445_v13, %v12421_v26  ;;  %v4896_v57 = vadd.f32 %v12448_v18, %v16509_v39 }
 0x465   :  { %v4897_v40 = vadd.f32 %v12451_v62, %v16511_v16  ;;  %v4900_v42 = vmul.f32 0.10936069, %v4888_v17  ;;  %v4898_v46 = vadd.f32 %v12454_v50, %v16507_v25  ;;  %v4899_v27 = vadd.f32 %v16513_v47, %v16508_v61  ;;  %v6655_v47 = vld [vmem:[%s14508_s1 + $0x8] sm:$0xff] }
 0x466   :  { %v4901_v59 = vmul.f32 0.10936069, %v4889_v24  ;;  %v4902_v6 = vmul.f32 0.10936069, %v4890_v52  ;;  %v4885_v54 = vadd.f32 %v4873_v48, %v4849_v32  ;;  %v4886_v56 = vadd.f32 %v4874_v21, %v4850_v19 }
 0x467   :  { %v4887_v8 = vadd.f32 %v4875_v53, %v4851_v43  ;;  %v4903_v7 = vmul.f32 0.10936069, %v4891_v31  ;;  %v4904_v29 = vmul.f32 0.10936069, %v4892_v28  ;;  %v4905_v3 = vmul.f32 0.10936069, %v4893_v33 }
 0x468   :  { %v4906_v9 = vmul.f32 0.10936069, %v4894_v60  ;;  %v4924_v12 = vadd.f32 %v12418_v41, %v12406_v2  ;;  %v4907_v23 = vmul.f32 0.10936069, %v4895_v58  ;;  %v4908_v36 = vmul.f32 0.10936069, %v4896_v57 }
 0x469   :  { %v4909_v30 = vmul.f32 0.10936069, %v4897_v40  ;;  %v4912_v34 = vadd.f32 %v4900_v42, %v4876_v14  ;;  %v4910_v50 = vmul.f32 0.10936069, %v4898_v46  ;;  %v4911_v15 = vmul.f32 0.10936069, %v4899_v27 }
 0x46a   :  { %v4913_v22 = vadd.f32 %v4901_v59, %v4877_v38  ;;  %v4914_v63 = vadd.f32 %v4902_v6, %v4878_v35  ;;  %v4915_v1 = vadd.f32 %v4903_v7, %v4879_v45  ;;  %v4925_v32 = vadd.f32 %v12421_v26, %v12409_v4  ;;  %v6656_v27 = vld [vmem:[%s14509_s2 + $0x8] sm:$0xff]  ;;  %v6657_v6 = vld [vmem:[%s14508_s1 + $0x10] sm:$0xff]  ;;  %v6660_v7 = vld [vmem:[%s14509_s2 + $0x18] sm:$0xff] }
 0x46b   :  { %v4926_v19 = vadd.f32 %v16509_v39, %v12412_v5  ;;  %v4927_v43 = vadd.f32 %v16511_v16, %v12415_v10  ;;  %v4916_v48 = vadd.f32 %v4904_v29, %v4880_v51  ;;  %v4928_v2 = vadd.f32 %v16507_v25, %v12418_v41 }
 0x46c   :  { %v4929_v14 = vadd.f32 %v16508_v61, %v12421_v26  ;;  %v4930_v38 = vadd.f32 %v12436_v0, %v16509_v39  ;;  %v4917_v17 = vadd.f32 %v4905_v3, %v4881_v11  ;;  %v4918_v21 = vadd.f32 %v4906_v9, %v4882_v44  ;;  %v6661_v3 = vld [vmem:[%s14508_s1 + $0x20] sm:$0xff] }
 0x46d   :  { %v4931_v4 = vadd.f32 %v12439_v20, %v16511_v16  ;;  %v4932_v5 = vadd.f32 %v12442_v37, %v16507_v25  ;;  %v4919_v53 = vadd.f32 %v4907_v23, %v4883_v49  ;;  %v4933_v10 = vadd.f32 %v12445_v13, %v16508_v61  ;;  %v6662_v9 = vld [vmem:[%s14509_s2 + $0x20] sm:$0xff]  ;;  %v6663_v23 = vld [vmem:[%s14508_s1 + $0x28] sm:$0xff] }
 0x46e   :  { %v4934_v41 = vadd.f32 %v12448_v18, %v12436_v0  ;;  %v4936_v35 = vmul.f32 0.21300554, %v4924_v12  ;;  %v4935_v26 = vadd.f32 %v12451_v62, %v12439_v20  ;;  %v4937_v39 = vmul.f32 0.21300554, %v4925_v32  ;;  %v6653_v20 = vld [vmem:[%s14508_s1] sm:$0xff] }
 0x46f   :  { %v4938_v45 = vmul.f32 0.21300554, %v4926_v19  ;;  %v4939_v51 = vmul.f32 0.21300554, %v4927_v43  ;;  %v4920_v24 = vadd.f32 %v4908_v36, %v4884_v55  ;;  %v4940_v52 = vmul.f32 0.21300554, %v4928_v2 }
 0x470   :  { %v4941_v16 = vmul.f32 0.21300554, %v4929_v14  ;;  %v4942_v11 = vmul.f32 0.21300554, %v4930_v38  ;;  %v12595_v44 = vadd.f32 %v4909_v30, %v4885_v54  ;;  %v12597_v37 = vadd.f32 %v4910_v50, %v4886_v56  ;;  %v6654_v62 = vld [vmem:[%s14509_s2] sm:$0xff]  ;;  %v6658_v54 = vld [vmem:[%s14509_s2 + $0x10] sm:$0xff] }
 0x471   :  { %v4943_v25 = vmul.f32 0.21300554, %v4931_v4  ;;  %v4944_v13 = vmul.f32 0.21300554, %v4932_v5  ;;  %v12599_v61 = vadd.f32 %v4911_v15, %v4887_v8  ;;  %v12601_v0 = vmul.f32 0.21300554, %v4933_v10 }
 0x472   :  { %16514 = vst [vmem:[#allocation116_spill] sm:$0xff] %v12595_v44  ;;  %v12603_v18 = vadd.f32 %v4936_v35, %v4912_v34  ;;  %v12611_v49 = vmul.f32 %v6654_v62, %v6653_v20  ;;  %v12613_v31 = vmul.f32 0.21300554, %v4934_v41  ;;  %v12615_v55 = vmul.f32 0.21300554, %v4935_v26  ;;  %v6659_v8 = vld [vmem:[%s14508_s1 + $0x18] sm:$0xff] }
 0x473   :  { %16515 = vst [vmem:[#allocation117_spill] sm:$0xff] %v12597_v37  ;;  %v12617_v28 = vadd.f32 %v4937_v39, %v4913_v22  ;;  %v12619_v33 = vadd.f32 %v4938_v45, %v4914_v63  ;;  %v12621_v60 = vadd.f32 %v4939_v51, %v4915_v1  ;;  %v12623_v58 = vadd.f32 %v4940_v52, %v4916_v48  ;;  %v6664_v36 = vld [vmem:[%s14509_s2 + $0x28] sm:$0xff]  ;;  %v6665_v34 = vld [vmem:[%s14508_s1 + $0x30] sm:$0xff]  ;;  %v6667_v22 = vld [vmem:[%s14508_s1 + $0x38] sm:$0xff] }
 0x474   :  { %16516 = vst [vmem:[#allocation118_spill] sm:$0xff] %v12599_v61  ;;  %v12625_v57 = vadd.f32 %v4941_v16, %v4917_v17  ;;  %v12627_v40 = vadd.f32 %v4942_v11, %v4918_v21  ;;  %v12629_v42 = vadd.f32 %v4943_v25, %v4919_v53  ;;  %v12631_v46 = vadd.f32 %v4944_v13, %v4920_v24  ;;  %v6666_v50 = vld [vmem:[%s14509_s2 + $0x30] sm:$0xff]  ;;  %v6668_v63 = vld [vmem:[%s14509_s2 + $0x38] sm:$0xff]  ;;  %v6669_v32 = vld [vmem:[%s14508_s1 + $0x40] sm:$0xff] }
 0x475   :  { %16517 = vst [vmem:[#allocation119_spill] sm:$0xff] %v12601_v0  ;;  %v12639_v59 = vmul.f32 %v6656_v27, %v6655_v47  ;;  %v12647_v56 = vmul.f32 %v6658_v54, %v6657_v6  ;;  %v12655_v29 = vmul.f32 %v6660_v7, %v6659_v8  ;;  %v12663_v12 = vmul.f32 %v6662_v9, %v6661_v3  ;;  %v6670_v19 = vld [vmem:[%s14509_s2 + $0x40] sm:$0xff]  ;;  %v6671_v48 = vld [vmem:[%s14508_s1 + $0x48] sm:$0xff]  ;;  %v6673_v38 = vld [vmem:[%s14508_s1 + $0x50] sm:$0xff] }
 0x476   :  { %16518 = vst [vmem:[#allocation120_spill] sm:$0xff] %v12603_v18  ;;  %v12671_v30 = vmul.f32 %v6664_v36, %v6663_v23  ;;  %v12679_v15 = vmul.f32 %v6666_v50, %v6665_v34  ;;  %v12687_v1 = vmul.f32 %v6668_v63, %v6667_v22  ;;  %v12695_v43 = vmul.f32 %v6670_v19, %v6669_v32  ;;  %v6672_v2 = vld [vmem:[%s14509_s2 + $0x48] sm:$0xff]  ;;  %v6674_v17 = vld [vmem:[%s14509_s2 + $0x50] sm:$0xff]  ;;  %v6675_v4 = vld [vmem:[%s14508_s1 + $0x58] sm:$0xff] }
 0x477   :  { %16519 = vst [vmem:[#allocation43_spill] sm:$0xff] %v12611_v49  ;;  %v12703_v14 = vmul.f32 %v6672_v2, %v6671_v48  ;;  %v12711_v21 = vmul.f32 %v6674_v17, %v6673_v38  ;;  %v6676_v5 = vld [vmem:[%s14509_s2 + $0x58] sm:$0xff]  ;;  %v6677_v10 = vld [vmem:[%s14508_s1 + $0x60] sm:$0xff]  ;;  %v6679_v26 = vld [vmem:[%s14508_s1 + $0x68] sm:$0xff] }
 0x478   :  { %16520 = vst [vmem:[#allocation11_spill] sm:$0xff] %v12613_v31  ;;  %v12719_v53 = vmul.f32 %v6676_v5, %v6675_v4  ;;  %v6678_v41 = vld [vmem:[%s14509_s2 + $0x60] sm:$0xff]  ;;  %v6680_v39 = vld [vmem:[%s14509_s2 + $0x68] sm:$0xff]  ;;  %v6681_v51 = vld [vmem:[%s14508_s1 + $0x70] sm:$0xff] }
 0x479   :  { %16521 = vst [vmem:[#allocation54_spill] sm:$0xff] %v12615_v55  ;;  %v12727_v35 = vmul.f32 %v6678_v41, %v6677_v10  ;;  %v12735_v45 = vmul.f32 %v6680_v39, %v6679_v26  ;;  %v6682_v24 = vld [vmem:[%s14509_s2 + $0x70] sm:$0xff]  ;;  %v6683_v16 = vld [vmem:[%s14508_s1 + $0x78] sm:$0xff]  ;;  %v6685_v13 = vld [vmem:[%s14508_s1 + $0x80] sm:$0xff] }
 0x47a   :  { %16522 = vst [vmem:[#allocation35_spill] sm:$0xff] %v12617_v28  ;;  %v12743_v52 = vmul.f32 %v6682_v24, %v6681_v51  ;;  %v6684_v11 = vld [vmem:[%s14509_s2 + $0x78] sm:$0xff]  ;;  %v6686_v20 = vld [vmem:[%s14509_s2 + $0x80] sm:$0xff]  ;;  %v6687_v47 = vld [vmem:[%s14508_s1 + $0x88] sm:$0xff]  ;;  %v12966_v55 = vadd.f32 %v12719_v53, %v12711_v21 }
 0x47b   :  { %16523 = vst [vmem:[#allocation23_spill] sm:$0xff] %v12619_v33  ;;  %v12751_v25 = vmul.f32 %v6684_v11, %v6683_v16  ;;  %v12759_v62 = vmul.f32 %v6686_v20, %v6685_v13  ;;  %v6688_v27 = vld [vmem:[%s14509_s2 + $0x88] sm:$0xff]  ;;  %v6689_v54 = vld [vmem:[%s14508_s1 + $0x90] sm:$0xff]  ;;  %v6691_v3 = vld [vmem:[%s14508_s1 + $0x98] sm:$0xff]  ;;  %v12979_v0 = vadd.f32 %v12735_v45, %v12727_v35 }
 0x47c   :  { %16524 = vst [vmem:[#allocation88_spill] sm:$0xff] %v12621_v60  ;;  %v12767_v6 = vmul.f32 %v6688_v27, %v6687_v47  ;;  %v6690_v8 = vld [vmem:[%s14509_s2 + $0x90] sm:$0xff]  ;;  %v6692_v9 = vld [vmem:[%s14509_s2 + $0x98] sm:$0xff]  ;;  %v6693_v36 = vld [vmem:[%s14508_s1 + $0xa0] sm:$0xff]  ;;  %v12953_v60 = vadd.f32 %v12703_v14, %v12695_v43 }
 0x47d   :  { %16525 = vst [vmem:[#allocation90_spill] sm:$0xff] %v12623_v58  ;;  %v12775_v7 = vmul.f32 %v6690_v8, %v6689_v54  ;;  %v12783_v23 = vmul.f32 %v6692_v9, %v6691_v3  ;;  %v6694_v34 = vld [vmem:[%s14509_s2 + $0xa0] sm:$0xff]  ;;  %v6695_v22 = vld [vmem:[%s14508_s1 + $0xa8] sm:$0xff]  ;;  %v6697_v19 = vld [vmem:[%s14508_s1 + $0xb0] sm:$0xff] }
 0x47e   :  { %16526 = vst [vmem:[#allocation104_spill] sm:$0xff] %v12625_v57  ;;  %v12791_v50 = vmul.f32 %v6694_v34, %v6693_v36  ;;  %v6696_v63 = vld [vmem:[%s14509_s2 + $0xa8] sm:$0xff]  ;;  %v6698_v48 = vld [vmem:[%s14509_s2 + $0xb0] sm:$0xff]  ;;  %v6699_v38 = vld [vmem:[%s14508_s1 + $0xb8] sm:$0xff]  ;;  %v12946_v57 = vmul.f32 0.26601171, %v12759_v62 }
 0x47f   :  { %16527 = vst [vmem:[#allocation10_spill] sm:$0xff] %v12627_v40  ;;  %v12799_v32 = vmul.f32 %v6696_v63, %v6695_v22  ;;  %v12807_v2 = vmul.f32 %v6698_v48, %v6697_v19  ;;  %v6700_v17 = vld [vmem:[%s14509_s2 + $0xb8] sm:$0xff]  ;;  %v6701_v5 = vld [vmem:[%s14508_s1 + $0xc0] sm:$0xff]  ;;  %v6703_v26 = vld [vmem:[%s14508_s1 + $0xc8] sm:$0xff]  ;;  %v12943_v40 = vmul.f32 0.26601171, %v12751_v25 }
 0x480   :  { %16528 = vst [vmem:[#allocation24_spill] sm:$0xff] %v12629_v42  ;;  %v12815_v4 = vmul.f32 %v6700_v17, %v6699_v38  ;;  %v6702_v10 = vld [vmem:[%s14509_s2 + $0xc0] sm:$0xff]  ;;  %v6704_v39 = vld [vmem:[%s14509_s2 + $0xc8] sm:$0xff]  ;;  %v6705_v24 = vld [vmem:[%s14508_s1 + $0xd0] sm:$0xff]  ;;  %v12882_v17 = vmul.f32 0.26601171, %v12611_v49  ;;  %v12940_v42 = vadd.f32 %v12687_v1, %v12679_v15 }
 0x481   :  { %16529 = vst [vmem:[#allocation59_spill] sm:$0xff] %v12631_v46  ;;  %v12823_v41 = vmul.f32 %v6702_v10, %v6701_v5  ;;  %v12831_v51 = vmul.f32 %v6704_v39, %v6703_v26  ;;  %v6706_v16 = vld [vmem:[%s14509_s2 + $0xd0] sm:$0xff]  ;;  %v6707_v13 = vld [vmem:[%s14508_s1 + $0xd8] sm:$0xff]  ;;  %v6709_v27 = vld [vmem:[%s14508_s1 + $0xe0] sm:$0xff]  ;;  %v12885_v5 = vmul.f32 0.26601171, %v12639_v59 }
 0x482   :  { %16530 = vst [vmem:[#allocation44_spill] sm:$0xff] %v12639_v59  ;;  %v12839_v11 = vmul.f32 %v6706_v16, %v6705_v24  ;;  %v6708_v20 = vld [vmem:[%s14509_s2 + $0xd8] sm:$0xff]  ;;  %v6710_v54 = vld [vmem:[%s14509_s2 + $0xe0] sm:$0xff]  ;;  %v6711_v3 = vld [vmem:[%s14508_s1 + $0xe8] sm:$0xff]  ;;  %v12888_v10 = vmul.f32 0.26601171, %v12647_v56  ;;  %v12901_v16 = vadd.f32 %v12639_v59, %v12611_v49 }
 0x483   :  { %16531 = vst [vmem:[#allocation12_spill] sm:$0xff] %v12647_v56  ;;  %v12847_v47 = vmul.f32 %v6708_v20, %v6707_v13  ;;  %v12855_v8 = vmul.f32 %v6710_v54, %v6709_v27  ;;  %v6712_v9 = vld [vmem:[%s14509_s2 + $0xe8] sm:$0xff]  ;;  %v6713_v34 = vld [vmem:[%s14508_s1 + $0xf0] sm:$0xff]  ;;  %v6715_v19 = vld [vmem:[%s14508_s1 + $0xf8] sm:$0xff]  ;;  %v12891_v26 = vmul.f32 0.26601171, %v12655_v29  ;;  %v12914_v54 = vadd.f32 %v12655_v29, %v12647_v56 }
 0x484   :  { %16532 = vst [vmem:[#allocation28_spill] sm:$0xff] %v12655_v29  ;;  %v12863_v36 = vmul.f32 %v6712_v9, %v6711_v3  ;;  %v6714_v22 = vld [vmem:[%s14509_s2 + $0xf0] sm:$0xff]  ;;  %v6716_v48 = vld [vmem:[%s14509_s2 + $0xf8] sm:$0xff]  ;;  %v12894_v39 = vmul.f32 0.26601171, %v12663_v12  ;;  %s14332_s1 = sld [smem:[#allocation2 + $0x1]] }
 0x485   :  { %16533 = vst [vmem:[#allocation34_spill] sm:$0xff] %v12663_v12  ;;  %v12871_v63 = vmul.f32 %v6714_v22, %v6713_v34  ;;  %v12879_v38 = vmul.f32 %v6716_v48, %v6715_v19  ;;  %v12897_v24 = vmul.f32 0.26601171, %v12671_v30  ;;  %v12904_v13 = vmul.f32 0.26601171, %v12679_v15  ;;  %s14391_s2 = sld [smem:[#allocation2]] }
 0x486   :  { %16534 = vst [vmem:[#allocation14_spill] sm:$0xff] %v12671_v30  ;;  %v12907_v20 = vmul.f32 0.26601171, %v12687_v1  ;;  %v12910_v27 = vmul.f32 0.26601171, %v12695_v43  ;;  %v12927_v22 = vadd.f32 %v12671_v30, %v12663_v12 }
 0x487   :  { %16535 = vst [vmem:[#allocation13_spill] sm:$0xff] %v12679_v15  ;;  %v12917_v3 = vmul.f32 0.26601171, %v12703_v14  ;;  %v12920_v9 = vmul.f32 0.26601171, %v12711_v21 }
 0x488   :  { %16536 = vst [vmem:[#allocation51_spill] sm:$0xff] %v12687_v1  ;;  %v12923_v34 = vmul.f32 0.26601171, %v12719_v53  ;;  %v12930_v19 = vmul.f32 0.26601171, %v12727_v35 }
 0x489   :  { %16537 = vst [vmem:[#allocation112_spill] sm:$0xff] %v12695_v43  ;;  %v12933_v48 = vmul.f32 0.26601171, %v12735_v45  ;;  %v12936_v46 = vmul.f32 0.26601171, %v12743_v52 }
 0x48a   :  { %16538 = vst [vmem:[#allocation113_spill] sm:$0xff] %v12703_v14  ;;  %v12949_v58 = vmul.f32 0.26601171, %v12767_v6  ;;  %v12956_v33 = vmul.f32 0.26601171, %v12775_v7 }
 0x48b   :  { %16539 = vst [vmem:[#allocation114_spill] sm:$0xff] %v12711_v21  ;;  %v12959_v28 = vmul.f32 0.26601171, %v12783_v23  ;;  %v12962_v18 = vmul.f32 0.26601171, %v12791_v50 }
 0x48c   :  { %16540 = vst [vmem:[#allocation99_spill] sm:$0xff] %v12719_v53  ;;  %v12969_v61 = vmul.f32 0.26601171, %v12799_v32  ;;  %v12972_v31 = vmul.f32 0.26601171, %v12807_v2 }
 0x48d   :  { %16541 = vst [vmem:[#allocation101_spill] sm:$0xff] %v12727_v35  ;;  %v12975_v37 = vmul.f32 0.26601171, %v12815_v4  ;;  %v12982_v44 = vmul.f32 0.26601171, %v12823_v41 }
 0x48e   :  { %16542 = vst [vmem:[#allocation103_spill] sm:$0xff] %v12735_v45 }
 0x48f   :  { %16543 = vst [vmem:[#allocation96_spill] sm:$0xff] %v12743_v52 }
 0x490   :  { %16544 = vst [vmem:[#allocation58_spill] sm:$0xff] %v12751_v25 }
 0x491   :  { %16545 = vst [vmem:[#allocation30_spill] sm:$0xff] %v12759_v62 }
 0x492   :  { %16546 = vst [vmem:[#allocation52_spill] sm:$0xff] %v12767_v6 }
 0x493   :  { %16547 = vst [vmem:[#allocation87_spill] sm:$0xff] %v12775_v7 }
 0x494   :  { %16548 = vst [vmem:[#allocation31_spill] sm:$0xff] %v12783_v23 }
 0x495   :  { %16549 = vst [vmem:[#allocation89_spill] sm:$0xff] %v12791_v50 }
 0x496   :  { %16550 = vst [vmem:[#allocation95_spill] sm:$0xff] %v12799_v32 }
 0x497   :  { %16551 = vst [vmem:[#allocation50_spill] sm:$0xff] %v12807_v2 }
 0x498   :  { %16552 = vst [vmem:[#allocation97_spill] sm:$0xff] %v12815_v4 }
 0x499   :  { %16553 = vst [vmem:[#allocation93_spill] sm:$0xff] %v12823_v41 }
 0x49a   :  { %16554 = vst [vmem:[#allocation25_spill] sm:$0xff] %v12831_v51 }
 0x49b   :  { %16555 = vst [vmem:[#allocation94_spill] sm:$0xff] %v12839_v11 }
 0x49c   :  { %16556 = vst [vmem:[#allocation46_spill] sm:$0xff] %v12847_v47 }
 0x49d   :  { %16557 = vst [vmem:[#allocation39_spill] sm:$0xff] %v12855_v8 }
 0x49e   :  { %16558 = vst [vmem:[#allocation98_spill] sm:$0xff] %v12863_v36 }
 0x49f   :  { %16559 = vst [vmem:[#allocation100_spill] sm:$0xff] %v12871_v63 }
 0x4a0   :  { %16560 = vst [vmem:[#allocation102_spill] sm:$0xff] %v12879_v38 }
 0x4a1   :  { %16561 = vst [vmem:[#allocation53_spill] sm:$0xff] %v12901_v16  ;;  %v13005_v16 = vadd.f32 %v12767_v6, %v12759_v62 }
 0x4a2   :  { %16562 = vst [vmem:[#allocation40_spill] sm:$0xff] %v12914_v54  ;;  %v12998_v54 = vmul.f32 0.26601171, %v12855_v8 }
 0x4a3   :  { %16563 = vst [vmem:[#allocation48_spill] sm:$0xff] %v12927_v22  ;;  %v12995_v22 = vmul.f32 0.26601171, %v12847_v47 }
 0x4a4   :  { %16564 = vst [vmem:[#allocation85_spill] sm:$0xff] %v12940_v42  ;;  %v12992_v42 = vadd.f32 %v12751_v25, %v12743_v52 }
 0x4a5   :  { %16565 = vst [vmem:[#allocation16_spill] sm:$0xff] %v12953_v60  ;;  %v12985_v60 = vmul.f32 0.26601171, %v12831_v51 }
 0x4a6   :  { %16566 = vst [vmem:[#allocation80_spill] sm:$0xff] %v12962_v18 }
 0x4a7   :  { %16567 = vst [vmem:[#allocation8_spill] sm:$0xff] %v12966_v55  ;;  %v12988_v55 = vmul.f32 0.26601171, %v12839_v11 }
 0x4a8   :  { %16568 = vst [vmem:[#allocation78_spill] sm:$0xff] %v12969_v61 }
 0x4a9   :  { %16569 = vst [vmem:[#allocation83_spill] sm:$0xff] %v12972_v31 }
 0x4aa   :  { %16570 = vst [vmem:[#allocation73_spill] sm:$0xff] %v12975_v37 }
 0x4ab   :  { %16571 = vst [vmem:[#allocation36_spill] sm:$0xff] %v12979_v0  ;;  %v13001_v0 = vmul.f32 0.26601171, %v12863_v36 }
 0x4ac   :  { %16572 = vst [vmem:[#allocation61_spill] sm:$0xff] %v12982_v44 }
 0x4ad   :  { %16573 = vst [vmem:[#allocation66_spill] sm:$0xff] %v12985_v60  ;;  %v13008_v60 = vmul.f32 0.26601171, %v12871_v63 }
 0x4ae   :  { %16574 = vst [vmem:[#allocation47_spill] sm:$0xff] %v12988_v55  ;;  %v13011_v55 = vmul.f32 0.26601171, %v12879_v38 }
 0x4af   :  { %16575 = vst [vmem:[#allocation19_spill] sm:$0xff] %v12992_v42  ;;  %v13014_v42 = vrot.slane %v12639_v59, 2  ;;  %v13036_v59 = vrot.slane %v12735_v45, 2  ;;  %v13057_v45 = vrot.slane %v12847_v47, 2 }
 0x4b0   :  { %16576 = vst [vmem:[#allocation55_spill] sm:$0xff] %v12995_v22  ;;  %v13018_v22 = vadd.f32 %v12783_v23, %v12775_v7 }
 0x4b1   :  { %16577 = vst [vmem:[#allocation86_spill] sm:$0xff] %v12998_v54  ;;  %v13021_v54 = vrot.slane %v12655_v29, 2  ;;  %v13042_v29 = vrot.slane %v12767_v6, 2  ;;  %v13063_v6 = vrot.slane %v12879_v38, 2  ;;  %v5078_v38 = vadd.f32 %v13036_v59, %v12727_v35 }
 0x4b2   :  { %16578 = vst [vmem:[#allocation49_spill] sm:$0xff] %v13001_v0  ;;  %v13024_v0 = vrot.slane %v12671_v30, 2  ;;  %v13045_v30 = vrot.slane %v12783_v23, 2  ;;  %v5072_v23 = vadd.f32 %v13014_v42, %v12611_v49 }
 0x4b3   :  { %16579 = vst [vmem:[#allocation57_spill] sm:$0xff] %v13005_v16  ;;  %v13027_v16 = vrot.slane %v12687_v1, 2  ;;  %v13048_v1 = vrot.slane %v12799_v32, 2  ;;  %v5073_v44 = vadd.f32 %v13021_v54, %v12647_v56 }
 0x4b4   :  { %16580 = vst [vmem:[#allocation74_spill] sm:$0xff] %v13008_v60  ;;  %v13030_v60 = vrot.slane %v12703_v14, 2  ;;  %v13051_v14 = vrot.slane %v12815_v4, 2  ;;  %v5074_v37 = vadd.f32 %v13024_v0, %v12663_v12 }
 0x4b5   :  { %16581 = vst [vmem:[#allocation9_spill] sm:$0xff] %v13011_v55  ;;  %v13033_v55 = vrot.slane %v12719_v53, 2  ;;  %v13054_v53 = vrot.slane %v12831_v51, 2  ;;  %v5075_v31 = vadd.f32 %v13027_v16, %v12679_v15 }
 0x4b6   :  { %16582 = vst [vmem:[#allocation106_spill] sm:$0xff] %v13014_v42  ;;  %v5076_v61 = vadd.f32 %v13030_v60, %v12695_v43 }
 0x4b7   :  { %16583 = vst [vmem:[#allocation108_spill] sm:$0xff] %v13018_v22  ;;  %v13039_v22 = vrot.slane %v12751_v25, 2  ;;  %v13060_v25 = vrot.slane %v12863_v36, 2  ;;  %v5077_v18 = vadd.f32 %v13033_v55, %v12711_v21 }
 0x4b8   :  { %16584 = vst [vmem:[#allocation69_spill] sm:$0xff] %v13021_v54  ;;  %v5080_v54 = vadd.f32 %v13042_v29, %v12759_v62  ;;  %v5088_v62 = vmul.f32 0.0010283801, %v5072_v23  ;;  %v13107_v23 = vadd.f32 %v12831_v51, %v12823_v41 }
 0x4b9   :  { %16585 = vst [vmem:[#allocation107_spill] sm:$0xff] %v13024_v0  ;;  %v5079_v42 = vadd.f32 %v13039_v22, %v12743_v52  ;;  %v5081_v0 = vadd.f32 %v13045_v30, %v12775_v7  ;;  %v5090_v7 = vmul.f32 0.0010283801, %v5074_v37  ;;  %v5091_v52 = vmul.f32 0.0010283801, %v5075_v31 }
 0x4ba   :  { %16586 = vst [vmem:[#allocation26_spill] sm:$0xff] %v13027_v16  ;;  %v5082_v16 = vadd.f32 %v13048_v1, %v12791_v50  ;;  %v5093_v35 = vmul.f32 0.0010283801, %v5077_v18 }
 0x4bb   :  { %16587 = vst [vmem:[#allocation56_spill] sm:$0xff] %v13030_v60  ;;  %v5083_v60 = vadd.f32 %v13051_v14, %v12807_v2  ;;  %v5095_v21 = vmul.f32 0.0010283801, %v5079_v42  ;;  %v5097_v43 = vmul.f32 0.0010283801, %v5081_v0  ;;  %v13117_v42 = vadd.f32 %v12863_v36, %v12855_v8 }
 0x4bc   :  { %16588 = vst [vmem:[#allocation75_spill] sm:$0xff] %v13033_v55  ;;  %v5084_v55 = vadd.f32 %v13054_v53, %v12823_v41  ;;  %v5120_v0 = vrot.slane %v5088_v62, 3  ;;  %v5123_v41 = vrot.slane %v5091_v52, 3 }
 0x4bd   :  { %16589 = vst [vmem:[#allocation84_spill] sm:$0xff] %v13036_v59  ;;  %v5085_v59 = vadd.f32 %v13057_v45, %v12839_v11  ;;  %v5099_v37 = vmul.f32 0.0010283801, %v5083_v60  ;;  %v5129_v12 = vrot.slane %v5097_v43, 3 }
 0x4be   :  { %16590 = vst [vmem:[#allocation38_spill] sm:$0xff] %v13039_v22  ;;  %v5086_v22 = vadd.f32 %v13060_v25, %v12855_v8  ;;  %v5100_v31 = vmul.f32 0.0010283801, %v5084_v55  ;;  %v5127_v55 = vrot.slane %v5095_v21, 3  ;;  %v13121_v8 = vadd.f32 %v5120_v0, %v12882_v17 }
 0x4bf   :  { %16591 = vst [vmem:[#allocation121_spill] sm:$0xff] %v13042_v29  ;;  %v5087_v29 = vadd.f32 %v13063_v6, %v12871_v63  ;;  %v5131_v56 = vrot.slane %v5099_v37, 3  ;;  %v13142_v52 = vadd.f32 %v5123_v41, %v12907_v20  ;;  %v16608_v37 = vld [vmem:[#allocation53_spill] sm:$0xff] }
 0x4c0   :  { %16592 = vst [vmem:[#allocation122_spill] sm:$0xff] %v13045_v30  ;;  %v5089_v30 = vmul.f32 0.0010283801, %v5073_v44  ;;  %v5098_v44 = vmul.f32 0.0010283801, %v5082_v16  ;;  %v5125_v16 = vrot.slane %v5093_v35, 3  ;;  %v13139_v35 = vadd.f32 %v5123_v41, %v12904_v13 }
 0x4c1   :  { %16593 = vst [vmem:[#allocation123_spill] sm:$0xff] %v13048_v1  ;;  %v13099_v1 = vadd.f32 %v12799_v32, %v12791_v50  ;;  %v5102_v18 = vmul.f32 0.0010283801, %v5086_v22  ;;  %v13163_v41 = vadd.f32 %v5127_v55, %v12936_v46  ;;  %v16599_v13 = vld [vmem:[#allocation80_spill] sm:$0xff]  ;;  %v16600_v46 = vld [vmem:[#allocation78_spill] sm:$0xff] }
 0x4c2   :  { %16594 = vst [vmem:[#allocation124_spill] sm:$0xff] %v13051_v14  ;;  %v5092_v14 = vmul.f32 0.0010283801, %v5076_v61  ;;  %v5101_v61 = vmul.f32 0.0010283801, %v5085_v59  ;;  %v5132_v59 = vrot.slane %v5100_v31, 3  ;;  %v13154_v17 = vadd.f32 %v5125_v16, %v12923_v34 }
 0x4c3   :  { %16595 = vst [vmem:[#allocation125_spill] sm:$0xff] %v13054_v53  ;;  %v5094_v53 = vmul.f32 0.0010283801, %v5078_v38  ;;  %v13113_v38 = vmul.f32 0.0010283801, %v5087_v29  ;;  %v5134_v29 = vrot.slane %v5102_v18, 3 }
 0x4c4   :  { %16596 = vst [vmem:[#allocation126_spill] sm:$0xff] %v13057_v45  ;;  %v13103_v45 = vadd.f32 %v12815_v4, %v12807_v2  ;;  %v5122_v2 = vrot.slane %v5090_v7, 3  ;;  %v5124_v50 = vrot.slane %v5092_v14, 3  ;;  %v5133_v22 = vrot.slane %v5101_v61, 3  ;;  %v16609_v61 = vld [vmem:[#allocation40_spill] sm:$0xff] }
 0x4c5   :  { %16597 = vst [vmem:[#allocation127_spill] sm:$0xff] %v13060_v25  ;;  %v5096_v25 = vmul.f32 0.0010283801, %v5080_v54  ;;  %v5121_v54 = vrot.slane %v5089_v30, 3  ;;  %v5126_v60 = vrot.slane %v5094_v53, 3  ;;  %v5135_v49 = vrot.slane %v13113_v38, 3 }
 0x4c6   :  { %16598 = vst [vmem:[#allocation128_spill] sm:$0xff] %v13063_v6  ;;  %v13111_v6 = vadd.f32 %v12847_v47, %v12839_v11  ;;  %v5130_v11 = vrot.slane %v5098_v44, 3  ;;  %v13124_v30 = vadd.f32 %v5120_v0, %v12885_v5  ;;  %v13133_v43 = vadd.f32 %v5122_v2, %v12894_v39  ;;  %v16610_v18 = vld [vmem:[#allocation48_spill] sm:$0xff]  ;;  %v16611_v0 = vld [vmem:[#allocation102_spill] sm:$0xff] }
 0x4c7   :  { %v5128_v15 = vrot.slane %v5096_v25, 3  ;;  %v13127_v14 = vadd.f32 %v5121_v54, %v12888_v10  ;;  %v13130_v21 = vadd.f32 %v5121_v54, %v12891_v26  ;;  %v13136_v53 = vadd.f32 %v5122_v2, %v12897_v24 }
 0x4c8   :  { %v13145_v25 = vadd.f32 %v5124_v50, %v12910_v27  ;;  %v13148_v62 = vadd.f32 %v5124_v50, %v12917_v3  ;;  %v13151_v7 = vadd.f32 %v5125_v16, %v12920_v9  ;;  %v13157_v2 = vadd.f32 %v5126_v60, %v12930_v19  ;;  %v16606_v19 = vld [vmem:[#allocation55_spill] sm:$0xff]  ;;  %v16612_v16 = vld [vmem:[#allocation85_spill] sm:$0xff] }
 0x4c9   :  { %v13160_v5 = vadd.f32 %v5126_v60, %v12933_v48  ;;  %v13166_v10 = vadd.f32 %v5127_v55, %v12943_v40  ;;  %v13169_v50 = vadd.f32 %v5128_v15, %v12946_v57  ;;  %v13172_v26 = vadd.f32 %v5128_v15, %v12949_v58  ;;  %v16601_v40 = vld [vmem:[#allocation83_spill] sm:$0xff]  ;;  %v16602_v57 = vld [vmem:[#allocation73_spill] sm:$0xff]  ;;  %v16613_v55 = vld [vmem:[#allocation16_spill] sm:$0xff] }
 0x4ca   :  { %v13175_v39 = vadd.f32 %v5129_v12, %v12956_v33  ;;  %v13178_v24 = vadd.f32 %v5129_v12, %v12959_v28  ;;  %v13181_v20 = vadd.f32 %v5130_v11, %v16599_v13  ;;  %v13184_v27 = vadd.f32 %v5130_v11, %v16600_v46  ;;  %v16603_v58 = vld [vmem:[#allocation61_spill] sm:$0xff]  ;;  %v16604_v33 = vld [vmem:[#allocation66_spill] sm:$0xff]  ;;  %v16605_v28 = vld [vmem:[#allocation47_spill] sm:$0xff] }
 0x4cb   :  { %v13187_v3 = vadd.f32 %v5131_v56, %v16601_v40  ;;  %v13190_v9 = vadd.f32 %v5131_v56, %v16602_v57  ;;  %v13193_v15 = vadd.f32 %v5132_v59, %v16603_v58  ;;  %v13196_v34 = vadd.f32 %v5132_v59, %v16604_v33  ;;  %v16607_v11 = vld [vmem:[#allocation86_spill] sm:$0xff]  ;;  %v16614_v13 = vld [vmem:[#allocation8_spill] sm:$0xff]  ;;  %v16618_v33 = vld [vmem:[#allocation19_spill] sm:$0xff] }
 0x4cc   :  { %v13199_v12 = vadd.f32 %v5133_v22, %v16605_v28  ;;  %v13202_v48 = vadd.f32 %v5133_v22, %v16606_v19  ;;  %v13205_v44 = vadd.f32 %v5134_v29, %v16607_v11  ;;  %v5200_v31 = vmul.f32 0.007598758, %v16608_v37  ;;  %v16615_v22 = vld [vmem:[#allocation49_spill] sm:$0xff]  ;;  %v16617_v57 = vld [vmem:[#allocation36_spill] sm:$0xff]  ;;  %v16620_v37 = vld [vmem:[#allocation74_spill] sm:$0xff] }
 0x4cd   :  { %v5201_v56 = vmul.f32 0.007598758, %v16609_v61  ;;  %v5202_v38 = vmul.f32 0.007598758, %v16610_v18  ;;  %v5199_v54 = vadd.f32 %v16611_v0, %v12871_v63  ;;  %v5203_v60 = vmul.f32 0.007598758, %v16612_v16 }
 0x4ce   :  { %v5204_v59 = vmul.f32 0.007598758, %v16613_v55  ;;  %v5205_v46 = vmul.f32 0.007598758, %v16614_v13  ;;  %v13216_v40 = vadd.f32 %v5134_v29, %v16615_v22  ;;  %v5206_v58 = vmul.f32 0.007598758, %v16617_v57 }
 0x4cf   :  { %v5207_v28 = vmul.f32 0.007598758, %v16618_v33  ;;  %v16619_v19 = vld [vmem:[#allocation57_spill] sm:$0xff]  ;;  %v13222_v61 = vadd.f32 %v5135_v49, %v16620_v37  ;;  %v16622_v18 = vld [vmem:[#allocation108_spill] sm:$0xff]  ;;  %v5210_v16 = vmul.f32 0.007598758, %v13099_v1 }
 0x4d0   :  { %16616 = vst [vmem:[#allocation80_spill] sm:$0xff] %v13216_v40  ;;  %v5208_v11 = vmul.f32 0.007598758, %v16619_v19  ;;  %v5209_v63 = vmul.f32 0.007598758, %v16622_v18  ;;  %v16623_v0 = vld [vmem:[#allocation9_spill] sm:$0xff] }
 0x4d1   :  { %16621 = vst [vmem:[#allocation78_spill] sm:$0xff] %v13222_v61  ;;  %v5211_v55 = vmul.f32 0.007598758, %v13103_v45  ;;  %v13228_v13 = vadd.f32 %v5135_v49, %v16623_v0  ;;  %v5212_v29 = vmul.f32 0.007598758, %v13107_v23  ;;  %v5232_v19 = vrot.slane %v5200_v31, 4 }
 0x4d2   :  { %v5213_v22 = vmul.f32 0.007598758, %v13111_v6  ;;  %v13233_v57 = vmul.f32 0.007598758, %v13117_v42  ;;  %v13235_v33 = vmul.f32 0.007598758, %v5199_v54 }
 0x4d3   :  { %16624 = vst [vmem:[#allocation83_spill] sm:$0xff] %v13228_v13  ;;  %v5233_v37 = vrot.slane %v5201_v56, 4  ;;  %v5234_v61 = vrot.slane %v5202_v38, 4  ;;  %v5235_v18 = vrot.slane %v5203_v60, 4  ;;  %v5236_v40 = vrot.slane %v5204_v59, 4 }
 0x4d4   :  { %v5237_v1 = vrot.slane %v5205_v46, 4  ;;  %v5238_v36 = vrot.slane %v5206_v58, 4  ;;  %v5239_v45 = vrot.slane %v5207_v28, 4  ;;  %v5240_v47 = vrot.slane %v5208_v11, 4  ;;  %v16632_v46 = vld [vmem:[#allocation14_spill] sm:$0xff]  ;;  %v16635_v58 = vld [vmem:[#allocation113_spill] sm:$0xff] }
 0x4d5   :  { %v5241_v49 = vrot.slane %v5209_v63, 4  ;;  %v5242_v0 = vrot.slane %v5210_v16, 4  ;;  %v5243_v13 = vrot.slane %v5211_v55, 4  ;;  %v5244_v23 = vrot.slane %v5212_v29, 4  ;;  %v16639_v55 = vld [vmem:[#allocation52_spill] sm:$0xff]  ;;  %v16640_v29 = vld [vmem:[#allocation31_spill] sm:$0xff] }
 0x4d6   :  { %v5245_v51 = vrot.slane %v5213_v22, 4  ;;  %v15071_v6 = vrot.slane %v13233_v57, 4  ;;  %v13240_v54 = vadd.f32 %v5232_v19, %v13121_v8  ;;  %v13243_v31 = vadd.f32 %v5232_v19, %v13124_v30 }
 0x4d7   :  { %v13246_v56 = vadd.f32 %v5233_v37, %v13127_v14  ;;  %v13249_v38 = vadd.f32 %v5233_v37, %v13130_v21  ;;  %v13252_v63 = vadd.f32 %v5234_v61, %v13133_v43  ;;  %v13255_v60 = vadd.f32 %v5234_v61, %v13136_v53  ;;  %v16637_v61 = vld [vmem:[#allocation103_spill] sm:$0xff] }
 0x4d8   :  { %v13258_v59 = vadd.f32 %v5235_v18, %v13139_v35  ;;  %v13261_v8 = vadd.f32 %v5235_v18, %v13142_v52  ;;  %v13264_v30 = vadd.f32 %v5236_v40, %v13145_v25  ;;  %v13267_v14 = vadd.f32 %v5236_v40, %v13148_v62 }
 0x4d9   :  { %v13270_v21 = vadd.f32 %v5237_v1, %v13151_v7  ;;  %v13273_v43 = vadd.f32 %v5237_v1, %v13154_v17  ;;  %v13276_v53 = vadd.f32 %v5238_v36, %v13157_v2  ;;  %v13279_v35 = vadd.f32 %v5238_v36, %v13160_v5  ;;  %v16642_v1 = vld [vmem:[#allocation46_spill] sm:$0xff] }
 0x4da   :  { %v13282_v52 = vadd.f32 %v5239_v45, %v13163_v41  ;;  %v13285_v25 = vadd.f32 %v5239_v45, %v13166_v10  ;;  %v13288_v62 = vadd.f32 %v5240_v47, %v13169_v50  ;;  %v13291_v7 = vadd.f32 %v5240_v47, %v13172_v26 }
 0x4db   :  { %v13294_v17 = vadd.f32 %v5241_v49, %v13175_v39  ;;  %v13297_v2 = vadd.f32 %v5241_v49, %v13178_v24  ;;  %v13300_v36 = vadd.f32 %v5242_v0, %v13181_v20  ;;  %v13303_v5 = vadd.f32 %v5242_v0, %v13184_v27  ;;  %v16630_v24 = vld [vmem:[#allocation44_spill] sm:$0xff]  ;;  %v16643_v49 = vld [vmem:[#allocation98_spill] sm:$0xff] }
 0x4dc   :  { %v13306_v41 = vadd.f32 %v5243_v13, %v13187_v3  ;;  %v13309_v10 = vadd.f32 %v5243_v13, %v13190_v9  ;;  %v13312_v47 = vadd.f32 %v5244_v23, %v13193_v15  ;;  %v13315_v50 = vadd.f32 %v5244_v23, %v13196_v34  ;;  %v16631_v27 = vld [vmem:[#allocation28_spill] sm:$0xff]  ;;  %v16634_v15 = vld [vmem:[#allocation51_spill] sm:$0xff] }
 0x4dd   :  { %v13318_v26 = vadd.f32 %v5245_v51, %v13199_v12  ;;  %v13321_v39 = vadd.f32 %v5245_v51, %v13202_v48  ;;  %v5296_v20 = vrot.slane %v16630_v24, 6  ;;  %v5297_v3 = vrot.slane %v16631_v27, 6  ;;  %v16636_v12 = vld [vmem:[#allocation99_spill] sm:$0xff]  ;;  %v16638_v48 = vld [vmem:[#allocation58_spill] sm:$0xff] }
 0x4de   :  { %16625 = vst [vmem:[#allocation73_spill] sm:$0xff] %v13309_v10  ;;  %v5298_v40 = vrot.slane %v16632_v46, 6  ;;  %v13329_v9 = vadd.f32 %v15071_v6, %v13205_v44  ;;  %v5299_v34 = vrot.slane %v16634_v15, 6  ;;  %v5300_v28 = vrot.slane %v16635_v58, 6  ;;  %v16641_v44 = vld [vmem:[#allocation25_spill] sm:$0xff]  ;;  %v16644_v23 = vld [vmem:[#allocation43_spill] sm:$0xff] }
 0x4df   :  { %16626 = vst [vmem:[#allocation61_spill] sm:$0xff] %v13312_v47  ;;  %v5301_v11 = vrot.slane %v16636_v12, 6  ;;  %v5302_v51 = vrot.slane %v16637_v61, 6  ;;  %v5303_v16 = vrot.slane %v16638_v48, 6  ;;  %v5304_v13 = vrot.slane %v16639_v55, 6  ;;  %v16645_v6 = vld [vmem:[#allocation12_spill] sm:$0xff] }
 0x4e0   :  { %16627 = vst [vmem:[#allocation66_spill] sm:$0xff] %v13315_v50  ;;  %v5305_v22 = vrot.slane %v16640_v29, 6  ;;  %v5306_v19 = vrot.slane %v12799_v32, 6  ;;  %v5307_v37 = vrot.slane %v12815_v4, 6  ;;  %v5308_v18 = vrot.slane %v16641_v44, 6  ;;  %v16646_v12 = vld [vmem:[#allocation34_spill] sm:$0xff] }
 0x4e1   :  { %16628 = vst [vmem:[#allocation47_spill] sm:$0xff] %v13318_v26  ;;  %v5309_v45 = vrot.slane %v16642_v1, 6  ;;  %v5310_v0 = vrot.slane %v16643_v49, 6  ;;  %v5328_v42 = vadd.f32 %v5296_v20, %v16644_v23  ;;  %v5329_v61 = vadd.f32 %v5297_v3, %v16645_v6  ;;  %v16647_v58 = vld [vmem:[#allocation102_spill] sm:$0xff]  ;;  %v16648_v15 = vld [vmem:[#allocation13_spill] sm:$0xff]  ;;  %v16652_v50 = vld [vmem:[#allocation96_spill] sm:$0xff] }
 0x4e2   :  { %16629 = vst [vmem:[#allocation55_spill] sm:$0xff] %v13321_v39  ;;  %v5330_v48 = vadd.f32 %v5298_v40, %v16646_v12  ;;  %v5311_v55 = vrot.slane %v16647_v58, 6  ;;  %v5331_v29 = vadd.f32 %v5299_v34, %v16648_v15  ;;  %v16650_v39 = vld [vmem:[#allocation114_spill] sm:$0xff]  ;;  %v16651_v26 = vld [vmem:[#allocation101_spill] sm:$0xff]  ;;  %v5335_v1 = vadd.f32 %v5303_v16, %v16652_v50  ;;  %v16654_v47 = vld [vmem:[#allocation87_spill] sm:$0xff] }
 0x4e3   :  { %16633 = vst [vmem:[#allocation86_spill] sm:$0xff] %v13329_v9  ;;  %v16649_v9 = vld [vmem:[#allocation112_spill] sm:$0xff]  ;;  %v5333_v4 = vadd.f32 %v5301_v11, %v16650_v39  ;;  %v5334_v44 = vadd.f32 %v5302_v51, %v16651_v26  ;;  %v16653_v46 = vld [vmem:[#allocation30_spill] sm:$0xff]  ;;  %v5337_v20 = vadd.f32 %v5305_v22, %v16654_v47  ;;  %v16655_v10 = vld [vmem:[#allocation89_spill] sm:$0xff]  ;;  %v5345_v11 = vmul.f32 0.036000773, %v5329_v61 }
 0x4e4   :  { %v5332_v32 = vadd.f32 %v5300_v28, %v16649_v9  ;;  %v5336_v49 = vadd.f32 %v5304_v13, %v16653_v46  ;;  %v5338_v3 = vadd.f32 %v5306_v19, %v16655_v10  ;;  %v16656_v27 = vld [vmem:[#allocation50_spill] sm:$0xff]  ;;  %v16657_v12 = vld [vmem:[#allocation93_spill] sm:$0xff]  ;;  %v16659_v15 = vld [vmem:[#allocation39_spill] sm:$0xff]  ;;  %v5344_v9 = vmul.f32 0.036000773, %v5328_v42 }
 0x4e5   :  { %v5339_v40 = vadd.f32 %v5307_v37, %v16656_v27  ;;  %v5340_v58 = vadd.f32 %v5308_v18, %v16657_v12  ;;  %v16658_v6 = vld [vmem:[#allocation94_spill] sm:$0xff]  ;;  %v5342_v28 = vadd.f32 %v5310_v0, %v16659_v15  ;;  %v5346_v39 = vmul.f32 0.036000773, %v5330_v48  ;;  %v16660_v51 = vld [vmem:[#allocation100_spill] sm:$0xff]  ;;  %v16666_v15 = vld [vmem:[#allocation83_spill] sm:$0xff] }
 0x4e6   :  { %v5341_v34 = vadd.f32 %v5309_v45, %v16658_v6  ;;  %v5343_v26 = vadd.f32 %v5311_v55, %v16660_v51  ;;  %v5347_v16 = vmul.f32 0.036000773, %v5331_v29  ;;  %v5348_v50 = vmul.f32 0.036000773, %v5332_v32  ;;  %v16661_v46 = vld [vmem:[#allocation80_spill] sm:$0xff]  ;;  %v16664_v12 = vld [vmem:[#allocation78_spill] sm:$0xff] }
 0x4e7   :  { %v5349_v13 = vmul.f32 0.036000773, %v5333_v4  ;;  %v16662_v22 = vrot.slane %v13233_v57, 4  ;;  %v5350_v37 = vmul.f32 0.036000773, %v5334_v44  ;;  %v16665_v45 = vrot.slane %v13235_v33, 4 }
 0x4e8   :  { %v5351_v27 = vmul.f32 0.036000773, %v5335_v1  ;;  %v5352_v18 = vmul.f32 0.036000773, %v5336_v49  ;;  %v5353_v42 = vmul.f32 0.036000773, %v5337_v20 }
 0x4e9   :  { %v13363_v19 = vadd.f32 %v16662_v22, %v16661_v46  ;;  %v5294_v0 = vadd.f32 %v16665_v45, %v16664_v12  ;;  %v5354_v61 = vmul.f32 0.036000773, %v5338_v3  ;;  %v5355_v48 = vmul.f32 0.036000773, %v5339_v40 }
 0x4ea   :  { %v16667_v55 = vmov %v16665_v45  ;;  %v5356_v4 = vmul.f32 0.036000773, %v5340_v58  ;;  %v5357_v29 = vmul.f32 0.036000773, %v5341_v34  ;;  %v5358_v51 = vmul.f32 0.036000773, %v5342_v28 }
 0x4eb   :  { %16663 = vst [vmem:[#allocation53_spill] sm:$0xff] %v13363_v19  ;;  %v5295_v32 = vadd.f32 %v16667_v55, %v16666_v15  ;;  %v5359_v57 = vmul.f32 0.036000773, %v5343_v26  ;;  %v5376_v46 = vrot.slane %v5344_v9, 5  ;;  %v5377_v22 = vrot.slane %v5345_v11, 5  ;;  %v16693_v28 = vld [vmem:[#allocation73_spill] sm:$0xff] }
 0x4ec   :  { %v5378_v44 = vrot.slane %v5346_v39, 5  ;;  %v5379_v1 = vrot.slane %v5347_v16, 5  ;;  %v5380_v49 = vrot.slane %v5348_v50, 5  ;;  %v5381_v6 = vrot.slane %v5349_v13, 5  ;;  %v16695_v11 = vld [vmem:[#allocation61_spill] sm:$0xff]  ;;  %v16698_v13 = vld [vmem:[#allocation14_spill] sm:$0xff] }
 0x4ed   :  { %v5382_v10 = vrot.slane %v5350_v37, 5  ;;  %v5383_v47 = vrot.slane %v5351_v27, 5  ;;  %v5384_v12 = vrot.slane %v5352_v18, 5  ;;  %v5385_v20 = vrot.slane %v5353_v42, 5  ;;  %v16699_v18 = vld [vmem:[#allocation66_spill] sm:$0xff]  ;;  %v16701_v42 = vld [vmem:[#allocation47_spill] sm:$0xff] }
 0x4ee   :  { %v5386_v3 = vrot.slane %v5354_v61, 5  ;;  %v5387_v40 = vrot.slane %v5355_v48, 5  ;;  %v5388_v45 = vrot.slane %v5356_v4, 5  ;;  %v5389_v19 = vrot.slane %v5357_v29, 5  ;;  %v16703_v61 = vld [vmem:[#allocation55_spill] sm:$0xff]  ;;  %v16705_v55 = vld [vmem:[#allocation86_spill] sm:$0xff] }
 0x4ef   :  { %v5390_v33 = vrot.slane %v5358_v51, 5  ;;  %v5391_v15 = vrot.slane %v5359_v57, 5  ;;  %v13372_v58 = vadd.f32 %v5376_v46, %v13240_v54  ;;  %v13375_v26 = vadd.f32 %v5376_v46, %v13243_v31  ;;  %v16697_v51 = vld [vmem:[#allocation34_spill] sm:$0xff] }
 0x4f0   :  { %v13378_v39 = vadd.f32 %v5377_v22, %v13246_v56  ;;  %v13381_v50 = vadd.f32 %v5377_v22, %v13249_v38  ;;  %v13384_v27 = vadd.f32 %v5378_v44, %v13252_v63  ;;  %v13387_v9 = vadd.f32 %v5378_v44, %v13255_v60 }
 0x4f1   :  { %16668 = vst [vmem:[#allocation40_spill] sm:$0xff] %v13372_v58  ;;  %v13390_v34 = vadd.f32 %v5379_v1, %v13258_v59  ;;  %v13393_v54 = vadd.f32 %v5379_v1, %v13261_v8  ;;  %v13396_v31 = vadd.f32 %v5380_v49, %v13264_v30  ;;  %v13399_v56 = vadd.f32 %v5380_v49, %v13267_v14  ;;  %v16711_v49 = vld [vmem:[#allocation13_spill] sm:$0xff] }
 0x4f2   :  { %16669 = vst [vmem:[#allocation48_spill] sm:$0xff] %v13375_v26  ;;  %v13402_v38 = vadd.f32 %v5381_v6, %v13270_v21  ;;  %v13405_v63 = vadd.f32 %v5381_v6, %v13273_v43  ;;  %v13408_v60 = vadd.f32 %v5382_v10, %v13276_v53  ;;  %v13411_v59 = vadd.f32 %v5382_v10, %v13279_v35  ;;  %v16707_v29 = vld [vmem:[#allocation53_spill] sm:$0xff]  ;;  %v16736_v26 = vld [vmem:[#allocation102_spill] sm:$0xff] }
 0x4f3   :  { %16670 = vst [vmem:[#allocation85_spill] sm:$0xff] %v13378_v39  ;;  %v13414_v8 = vadd.f32 %v5383_v47, %v13282_v52  ;;  %v13417_v30 = vadd.f32 %v5383_v47, %v13285_v25  ;;  %v13420_v14 = vadd.f32 %v5384_v12, %v13288_v62  ;;  %v13423_v21 = vadd.f32 %v5384_v12, %v13291_v7  ;;  %v16691_v7 = vld [vmem:[#allocation12_spill] sm:$0xff] }
 0x4f4   :  { %16671 = vst [vmem:[#allocation16_spill] sm:$0xff] %v13381_v50  ;;  %v13426_v6 = vadd.f32 %v5385_v20, %v13294_v17  ;;  %v13429_v43 = vadd.f32 %v5385_v20, %v13297_v2  ;;  %v13432_v53 = vadd.f32 %v5386_v3, %v13300_v36  ;;  %v5456_v35 = vrot.slane %v16644_v23, 4  ;;  %v16692_v17 = vld [vmem:[#allocation28_spill] sm:$0xff]  ;;  %v16712_v20 = vld [vmem:[#allocation51_spill] sm:$0xff] }
 0x4f5   :  { %16672 = vst [vmem:[#allocation8_spill] sm:$0xff] %v13384_v27  ;;  %v5457_v52 = vrot.slane %v16630_v24, 4  ;;  %v13437_v25 = vadd.f32 %v5386_v3, %v13303_v5  ;;  %v13440_v62 = vadd.f32 %v5387_v40, %v13306_v41  ;;  %v5459_v10 = vrot.slane %v16691_v7, 4  ;;  %v16735_v50 = vld [vmem:[#allocation100_spill] sm:$0xff] }
 0x4f6   :  { %16673 = vst [vmem:[#allocation49_spill] sm:$0xff] %v13387_v9  ;;  %v5460_v47 = vrot.slane %v16692_v17, 4  ;;  %v13445_v2 = vadd.f32 %v5387_v40, %v16693_v28  ;;  %v13448_v36 = vadd.f32 %v5388_v45, %v16695_v11  ;;  %v5462_v16 = vrot.slane %v16697_v51, 4  ;;  %v16714_v28 = vld [vmem:[#allocation113_spill] sm:$0xff]  ;;  %v16734_v9 = vld [vmem:[#allocation98_spill] sm:$0xff] }
 0x4f7   :  { %16674 = vst [vmem:[#allocation36_spill] sm:$0xff] %v13390_v34  ;;  %v5463_v37 = vrot.slane %v16698_v13, 4  ;;  %v13453_v5 = vadd.f32 %v5388_v45, %v16699_v18  ;;  %v13456_v41 = vadd.f32 %v5389_v19, %v16701_v42  ;;  %v13459_v48 = vadd.f32 %v5389_v19, %v16703_v61  ;;  %v16713_v19 = vld [vmem:[#allocation112_spill] sm:$0xff]  ;;  %v16718_v61 = vld [vmem:[#allocation103_spill] sm:$0xff] }
 0x4f8   :  { %16675 = vst [vmem:[#allocation19_spill] sm:$0xff] %v13393_v54  ;;  %v13462_v4 = vadd.f32 %v5390_v33, %v16705_v55  ;;  %v13465_v57 = vadd.f32 %v5390_v33, %v16707_v29  ;;  %v13467_v46 = vadd.f32 %v5391_v15, %v5294_v0  ;;  %v13469_v22 = vadd.f32 %v5391_v15, %v5295_v32  ;;  %v16715_v33 = vld [vmem:[#allocation114_spill] sm:$0xff]  ;;  %v16716_v0 = vld [vmem:[#allocation99_spill] sm:$0xff]  ;;  %v16717_v32 = vld [vmem:[#allocation101_spill] sm:$0xff] }
 0x4f9   :  { %16676 = vst [vmem:[#allocation57_spill] sm:$0xff] %v13396_v31  ;;  %v5458_v44 = vsel %vm556_vm0, %v5456_v35, %v5457_v52  ;;  %v5461_v1 = vsel %vm556_vm0, %v5459_v10, %v5460_v47  ;;  %v5465_v12 = vrot.slane %v16711_v49, 4  ;;  %v5466_v3 = vrot.slane %v16712_v20, 4  ;;  %v16719_v55 = vld [vmem:[#allocation96_spill] sm:$0xff]  ;;  %v16720_v29 = vld [vmem:[#allocation58_spill] sm:$0xff]  ;;  %v16733_v54 = vld [vmem:[#allocation39_spill] sm:$0xff] }
 0x4fa   :  { %16677 = vst [vmem:[#allocation74_spill] sm:$0xff] %v13399_v56  ;;  %v5468_v40 = vrot.slane %v16713_v19, 4  ;;  %v5464_v45 = vsel %vm556_vm0, %v5462_v16, %v5463_v37  ;;  %v5469_v11 = vrot.slane %v16714_v28, 4  ;;  %v5471_v18 = vrot.slane %v16715_v33, 4  ;;  %v16732_v56 = vld [vmem:[#allocation46_spill] sm:$0xff] }
 0x4fb   :  { %16678 = vst [vmem:[#allocation108_spill] sm:$0xff] %v13402_v38  ;;  %v5472_v42 = vrot.slane %v16716_v0, 4  ;;  %v5474_v15 = vrot.slane %v16717_v32, 4  ;;  %v5475_v35 = vrot.slane %v16718_v61, 4  ;;  %v5477_v10 = vrot.slane %v16719_v55, 4 }
 0x4fc   :  { %16679 = vst [vmem:[#allocation9_spill] sm:$0xff] %v13405_v63  ;;  %v16731_v63 = vld [vmem:[#allocation94_spill] sm:$0xff]  ;;  %v5496_v31 = vrot.slane %v16732_v56, 4  ;;  %v5498_v34 = vrot.slane %v16733_v54, 4  ;;  %v5499_v27 = vrot.slane %v16734_v9, 4  ;;  %v5501_v39 = vrot.slane %v16735_v50, 4 }
 0x4fd   :  { %16680 = vst [vmem:[#allocation44_spill] sm:$0xff] %v13408_v60  ;;  %v5495_v38 = vrot.slane %v16731_v63, 4 }
 0x4fe   :  { %16681 = vst [vmem:[#allocation80_spill] sm:$0xff] %v13411_v59  ;;  %v16730_v59 = vld [vmem:[#allocation25_spill] sm:$0xff] }
 0x4ff   :  { %16682 = vst [vmem:[#allocation78_spill] sm:$0xff] %v13414_v8  ;;  %v5493_v60 = vrot.slane %v16730_v59, 4  ;;  %v5476_v59 = vsel %vm556_vm0, %v5474_v15, %v5475_v35  ;;  %v16737_v15 = vrot.slane %v16736_v26, 4 }
 0x500   :  { %16683 = vst [vmem:[#allocation83_spill] sm:$0xff] %v13417_v30  ;;  %v16729_v30 = vld [vmem:[#allocation93_spill] sm:$0xff] }
 0x501   :  { %16684 = vst [vmem:[#allocation129_spill] sm:$0xff] %v13420_v14  ;;  %v5492_v8 = vrot.slane %v16729_v30, 4  ;;  %v5473_v30 = vsel %vm556_vm0, %v5471_v18, %v5472_v42  ;;  %v5500_v18 = vsel %vm556_vm0, %v5498_v34, %v5499_v27 }
 0x502   :  { %16685 = vst [vmem:[#allocation130_spill] sm:$0xff] %v13423_v21  ;;  %v16728_v21 = vld [vmem:[#allocation97_spill] sm:$0xff] }
 0x503   :  { %16686 = vst [vmem:[#allocation131_spill] sm:$0xff] %v13426_v6  ;;  %v5490_v14 = vrot.slane %v16728_v21, 4  ;;  %v5470_v21 = vsel %vm556_vm0, %v5468_v40, %v5469_v11  ;;  %v5494_v58 = vsel %vm556_vm0, %v5492_v8, %v5493_v60  ;;  %v5536_v40 = vadd.f32 %v5458_v44, %v16644_v23 }
 0x504   :  { %16687 = vst [vmem:[#allocation132_spill] sm:$0xff] %v13429_v43  ;;  %v16727_v43 = vld [vmem:[#allocation50_spill] sm:$0xff]  ;;  %v5541_v8 = vadd.f32 %v5463_v37, %v16698_v13  ;;  %v5543_v44 = vadd.f32 %v5466_v3, %v16712_v20  ;;  %v5544_v34 = vadd.f32 %v5470_v21, %v16713_v19  ;;  %v5545_v23 = vadd.f32 %v5469_v11, %v16714_v28 }
 0x505   :  { %16688 = vst [vmem:[#allocation133_spill] sm:$0xff] %v13432_v53  ;;  %v5489_v6 = vrot.slane %v16727_v43, 4  ;;  %v5467_v43 = vsel %vm556_vm0, %v5465_v12, %v5466_v3  ;;  %v5497_v12 = vsel %vm556_vm0, %v5495_v38, %v5496_v31  ;;  %v13540_v28 = vmul.f32 0.10936069, %v5536_v40 }
 0x506   :  { %16689 = vst [vmem:[#allocation134_spill] sm:$0xff] %v13437_v25  ;;  %v16726_v25 = vld [vmem:[#allocation95_spill] sm:$0xff]  ;;  %v5542_v38 = vadd.f32 %v5467_v43, %v16711_v49  ;;  %v13555_v40 = vmul.f32 0.10936069, %v5545_v23  ;;  %v16746_v23 = vld [vmem:[#allocation100_spill] sm:$0xff] }
 0x507   :  { %16690 = vst [vmem:[#allocation135_spill] sm:$0xff] %v13440_v62  ;;  %v5487_v53 = vrot.slane %v16726_v25, 4  ;;  %v5491_v50 = vsel %vm556_vm0, %v5489_v6, %v5490_v14  ;;  %v5540_v6 = vadd.f32 %v5464_v45, %v16697_v51 }
 0x508   :  { %16694 = vst [vmem:[#allocation12_spill] sm:$0xff] %v13445_v2  ;;  %v16725_v2 = vld [vmem:[#allocation89_spill] sm:$0xff] }
 0x509   :  { %16696 = vst [vmem:[#allocation28_spill] sm:$0xff] %v13448_v36  ;;  %v5486_v62 = vrot.slane %v16725_v2, 4 }
 0x50a   :  { %16700 = vst [vmem:[#allocation73_spill] sm:$0xff] %v13453_v5  ;;  %v16724_v5 = vld [vmem:[#allocation31_spill] sm:$0xff] }
 0x50b   :  { %16702 = vst [vmem:[#allocation61_spill] sm:$0xff] %v13456_v41  ;;  %v16723_v41 = vld [vmem:[#allocation87_spill] sm:$0xff]  ;;  %v5484_v36 = vrot.slane %v16724_v5, 4  ;;  %v5488_v9 = vsel %vm556_vm0, %v5486_v62, %v5487_v53  ;;  %v5539_v62 = vadd.f32 %v5460_v47, %v16692_v17  ;;  %v5549_v47 = vadd.f32 %v5475_v35, %v16718_v61  ;;  %v16740_v61 = vld [vmem:[#allocation93_spill] sm:$0xff] }
 0x50c   :  { %16704 = vst [vmem:[#allocation34_spill] sm:$0xff] %v13459_v48  ;;  %v5483_v16 = vrot.slane %v16723_v41, 4 }
 0x50d   :  { %16706 = vst [vmem:[#allocation14_spill] sm:$0xff] %v13462_v4  ;;  %v16722_v4 = vld [vmem:[#allocation52_spill] sm:$0xff]  ;;  %v5555_v11 = vadd.f32 %v5484_v36, %v16724_v5  ;;  %v5573_v5 = vmul.f32 0.10936069, %v5541_v8  ;;  %v16745_v8 = vld [vmem:[#allocation98_spill] sm:$0xff] }
 0x50e   :  { %16708 = vst [vmem:[#allocation66_spill] sm:$0xff] %v13465_v57  ;;  %v5481_v48 = vrot.slane %v16722_v4, 4  ;;  %v5485_v54 = vsel %vm556_vm0, %v5483_v16, %v5484_v36  ;;  %v5538_v16 = vadd.f32 %v5461_v1, %v16691_v7  ;;  %v5548_v1 = vadd.f32 %v5476_v59, %v16717_v32  ;;  %v16742_v36 = vld [vmem:[#allocation94_spill] sm:$0xff] }
 0x50f   :  { %16709 = vst [vmem:[#allocation47_spill] sm:$0xff] %v13467_v46  ;;  %v16721_v46 = vld [vmem:[#allocation30_spill] sm:$0xff]  ;;  %v5554_v21 = vadd.f32 %v5485_v54, %v16723_v41  ;;  %v5571_v54 = vmul.f32 0.10936069, %v5539_v62 }
 0x510   :  { %16710 = vst [vmem:[#allocation55_spill] sm:$0xff] %v13469_v22  ;;  %v5478_v22 = vrot.slane %v16720_v29, 4  ;;  %v5480_v57 = vrot.slane %v16721_v46, 4  ;;  %v5553_v3 = vadd.f32 %v5481_v48, %v16722_v4  ;;  %v13545_v4 = vmul.f32 0.10936069, %v5540_v6 }
 0x511   :  { %v13562_v6 = vmul.f32 0.10936069, %v5548_v1 }
 0x512   :  { %v5479_v63 = vsel %vm556_vm0, %v5477_v10, %v5478_v22  ;;  %v5482_v56 = vsel %vm556_vm0, %v5480_v57, %v5481_v48  ;;  %v5503_v10 = vsel %vm556_vm0, %v5501_v39, %v16737_v15  ;;  %v5537_v57 = vadd.f32 %v5457_v52, %v16630_v24  ;;  %v16738_v15 = vld [vmem:[#allocation50_spill] sm:$0xff] }
 0x513   :  { %v5546_v39 = vadd.f32 %v5473_v30, %v16715_v33  ;;  %v5547_v52 = vadd.f32 %v5472_v42, %v16716_v0  ;;  %v5550_v45 = vadd.f32 %v5479_v63, %v16719_v55  ;;  %v5551_v37 = vadd.f32 %v5478_v22, %v16720_v29  ;;  %v16739_v0 = vld [vmem:[#allocation97_spill] sm:$0xff] }
 0x514   :  { %v5552_v43 = vadd.f32 %v5482_v56, %v16721_v46  ;;  %v5556_v30 = vadd.f32 %v5488_v9, %v16725_v2  ;;  %v5557_v42 = vadd.f32 %v5487_v53, %v16726_v25  ;;  %v5558_v59 = vadd.f32 %v5491_v50, %v16738_v15  ;;  %v16741_v56 = vld [vmem:[#allocation25_spill] sm:$0xff] }
 0x515   :  { %v5559_v35 = vadd.f32 %v5490_v14, %v16739_v0  ;;  %v5560_v63 = vadd.f32 %v5494_v58, %v16740_v61  ;;  %v5569_v22 = vmul.f32 0.10936069, %v5537_v57  ;;  %v5561_v29 = vadd.f32 %v5493_v60, %v16741_v56  ;;  %v16743_v14 = vld [vmem:[#allocation46_spill] sm:$0xff]  ;;  %v16744_v60 = vld [vmem:[#allocation39_spill] sm:$0xff] }
 0x516   :  { %v13543_v48 = vmul.f32 0.10936069, %v5538_v16  ;;  %v5562_v9 = vadd.f32 %v5497_v12, %v16742_v36  ;;  %v13548_v53 = vmul.f32 0.10936069, %v5542_v38  ;;  %v13550_v50 = vmul.f32 0.10936069, %v5543_v44 }
 0x517   :  { %v5563_v0 = vadd.f32 %v5496_v31, %v16743_v14  ;;  %v13553_v58 = vmul.f32 0.10936069, %v5544_v34  ;;  %v13557_v57 = vmul.f32 0.10936069, %v5546_v39  ;;  %v5564_v16 = vadd.f32 %v5500_v18, %v16744_v60 }
 0x518   :  { %v13560_v62 = vmul.f32 0.10936069, %v5547_v52  ;;  %v13564_v12 = vmul.f32 0.10936069, %v5549_v47  ;;  %v5565_v38 = vadd.f32 %v5499_v27, %v16745_v8  ;;  %v13567_v44 = vmul.f32 0.10936069, %v5550_v45 }
 0x519   :  { %v13569_v56 = vmul.f32 0.10936069, %v5551_v37  ;;  %v13571_v31 = vmul.f32 0.10936069, %v5552_v43  ;;  %v5566_v34 = vadd.f32 %v5503_v10, %v16746_v23  ;;  %v5585_v39 = vmul.f32 0.10936069, %v5553_v3 }
 0x51a   :  { %v13574_v14 = vmul.f32 0.10936069, %v5554_v21  ;;  %v5587_v18 = vmul.f32 0.10936069, %v5555_v11  ;;  %v16747_v52 = vrot.slane %v16736_v26, 4  ;;  %v16748_v8 = vld [vmem:[#allocation106_spill] sm:$0xff] }
 0x51b   :  { %v13579_v47 = vmul.f32 0.10936069, %v5556_v30  ;;  %v5589_v25 = vmul.f32 0.10936069, %v5557_v42  ;;  %v13581_v27 = vmul.f32 0.10936069, %v5558_v59  ;;  %v13587_v10 = vadd.f32 %v16748_v8, %v16630_v24 }
 0x51c   :  { %v5567_v1 = vadd.f32 %v16747_v52, %v16736_v26  ;;  %v5591_v45 = vmul.f32 0.10936069, %v5559_v35  ;;  %v13583_v37 = vmul.f32 0.10936069, %v5560_v63  ;;  %v5593_v43 = vmul.f32 0.10936069, %v5561_v29 }
 0x51d   :  { %v5632_v3 = vrot.slane %v13540_v28, 6  ;;  %v5633_v21 = vrot.slane %v5569_v22, 6  ;;  %v5635_v11 = vrot.slane %v13543_v48, 6  ;;  %v5636_v23 = vrot.slane %v5571_v54, 6  ;;  %v16749_v59 = vld [vmem:[#allocation69_spill] sm:$0xff]  ;;  %v16751_v26 = vld [vmem:[#allocation107_spill] sm:$0xff] }
 0x51e   :  { %v13591_v52 = vmul.f32 0.10936069, %v5562_v9  ;;  %v5638_v30 = vrot.slane %v13545_v4, 6  ;;  %v5639_v42 = vrot.slane %v5573_v5, 6  ;;  %v13596_v35 = vadd.f32 %v16749_v59, %v16692_v17  ;;  %v16753_v4 = vld [vmem:[#allocation26_spill] sm:$0xff] }
 0x51f   :  { %v5595_v29 = vmul.f32 0.10936069, %v5563_v0  ;;  %v13598_v63 = vmul.f32 0.10936069, %v5564_v16  ;;  %v5597_v24 = vmul.f32 0.10936069, %v5565_v38  ;;  %v13602_v28 = vadd.f32 %v16751_v26, %v16698_v13 }
 0x520   :  { %16750 = vst [vmem:[#allocation86_spill] sm:$0xff] %v13596_v35  ;;  %v13604_v22 = vmul.f32 0.10936069, %v5566_v34  ;;  %v5599_v48 = vmul.f32 0.10936069, %v5567_v1  ;;  %v5641_v54 = vrot.slane %v13548_v53, 6  ;;  %v13609_v5 = vadd.f32 %v16753_v4, %v16712_v20 }
 0x521   :  { %16752 = vst [vmem:[#allocation53_spill] sm:$0xff] %v13602_v28  ;;  %v5634_v17 = vsel %vm733_vm1, %v5632_v3, %v5633_v21  ;;  %v5637_v0 = vsel %vm733_vm1, %v5635_v11, %v5636_v23  ;;  %v5642_v9 = vrot.slane %v13550_v50, 6  ;;  %v5644_v16 = vrot.slane %v13553_v58, 6 }
 0x522   :  { %16754 = vst [vmem:[#allocation13_spill] sm:$0xff] %v13609_v5  ;;  %v5640_v13 = vsel %vm733_vm1, %v5638_v30, %v5639_v42  ;;  %v5645_v38 = vrot.slane %v13555_v40, 6  ;;  %v5647_v34 = vrot.slane %v13557_v57, 6  ;;  %v5648_v53 = vrot.slane %v13560_v62, 6 }
 0x523   :  { %v5650_v1 = vrot.slane %v13562_v6, 6  ;;  %v5651_v20 = vrot.slane %v13564_v12, 6  ;;  %v5653_v21 = vrot.slane %v13567_v44, 6  ;;  %v5654_v23 = vrot.slane %v13569_v56, 6 }
 0x524   :  { %v5656_v50 = vrot.slane %v13571_v31, 6  ;;  %v5657_v5 = vrot.slane %v5585_v39, 6  ;;  %v5659_v58 = vrot.slane %v13574_v14, 6  ;;  %v5660_v42 = vrot.slane %v5587_v18, 6 }
 0x525   :  { %v5662_v40 = vrot.slane %v13579_v47, 6  ;;  %v5663_v28 = vrot.slane %v5589_v25, 6  ;;  %v5665_v57 = vrot.slane %v13581_v27, 6  ;;  %v5666_v62 = vrot.slane %v5591_v45, 6 }
 0x526   :  { %v5668_v6 = vrot.slane %v13583_v37, 6  ;;  %v5669_v35 = vrot.slane %v5593_v43, 6  ;;  %v5671_v12 = vrot.slane %v13591_v52, 6  ;;  %v5672_v44 = vrot.slane %v5595_v29, 6 }
 0x527   :  { %v5643_v56 = vsel %vm733_vm1, %v5641_v54, %v5642_v9  ;;  %v5646_v31 = vsel %vm733_vm1, %v5644_v16, %v5645_v38  ;;  %v5674_v39 = vrot.slane %v13598_v63, 6  ;;  %v5675_v14 = vrot.slane %v5597_v24, 6  ;;  %v16755_v9 = vld [vmem:[#allocation40_spill] sm:$0xff] }
 0x528   :  { %v5649_v18 = vsel %vm733_vm1, %v5647_v34, %v5648_v53  ;;  %v5652_v25 = vsel %vm733_vm1, %v5650_v1, %v5651_v20  ;;  %v5677_v47 = vrot.slane %v13604_v22, 6  ;;  %v5678_v27 = vrot.slane %v5599_v48, 6  ;;  %v16756_v48 = vld [vmem:[#allocation48_spill] sm:$0xff]  ;;  %v16757_v20 = vld [vmem:[#allocation85_spill] sm:$0xff] }
 0x529   :  { %v5655_v45 = vsel %vm733_vm1, %v5653_v21, %v5654_v23  ;;  %v5658_v37 = vsel %vm733_vm1, %v5656_v50, %v5657_v5  ;;  %v5661_v43 = vsel %vm733_vm1, %v5659_v58, %v5660_v42  ;;  %v5664_v52 = vsel %vm733_vm1, %v5662_v40, %v5663_v28  ;;  %v16758_v23 = vld [vmem:[#allocation16_spill] sm:$0xff] }
 0x52a   :  { %v5667_v29 = vsel %vm733_vm1, %v5665_v57, %v5666_v62  ;;  %v5670_v63 = vsel %vm733_vm1, %v5668_v6, %v5669_v35  ;;  %v5673_v24 = vsel %vm733_vm1, %v5671_v12, %v5672_v44  ;;  %v13643_v38 = vadd.f32 %v5632_v3, %v16755_v9  ;;  %v16760_v35 = vld [vmem:[#allocation8_spill] sm:$0xff]  ;;  %v16761_v44 = vld [vmem:[#allocation49_spill] sm:$0xff] }
 0x52b   :  { %v5676_v22 = vsel %vm733_vm1, %v5674_v39, %v5675_v14  ;;  %v13647_v53 = vadd.f32 %v5634_v17, %v16756_v48  ;;  %v13650_v5 = vadd.f32 %v5635_v11, %v16757_v20  ;;  %v13653_v42 = vadd.f32 %v5637_v0, %v16758_v23  ;;  %v16762_v9 = vld [vmem:[#allocation36_spill] sm:$0xff]  ;;  %v16763_v17 = vld [vmem:[#allocation19_spill] sm:$0xff]  ;;  %v16765_v11 = vld [vmem:[#allocation57_spill] sm:$0xff] }
 0x52c   :  { %v13656_v28 = vsel %vm733_vm1, %v5677_v47, %v5678_v27  ;;  %v13659_v62 = vadd.f32 %v5638_v30, %v16760_v35  ;;  %v13662_v3 = vadd.f32 %v5640_v13, %v16761_v44  ;;  %v13665_v14 = vadd.f32 %v5641_v54, %v16762_v9  ;;  %v16767_v0 = vld [vmem:[#allocation74_spill] sm:$0xff]  ;;  %v16769_v27 = vld [vmem:[#allocation108_spill] sm:$0xff]  ;;  %v16771_v30 = vld [vmem:[#allocation9_spill] sm:$0xff] }
 0x52d   :  { %16759 = vst [vmem:[#allocation51_spill] sm:$0xff] %v13653_v42  ;;  %v13668_v48 = vadd.f32 %v5643_v56, %v16763_v17  ;;  %v13671_v20 = vadd.f32 %v5644_v16, %v16765_v11  ;;  %v13674_v23 = vadd.f32 %v5646_v31, %v16767_v0  ;;  %v13677_v42 = vadd.f32 %v5647_v34, %v16769_v27  ;;  %v16773_v13 = vld [vmem:[#allocation44_spill] sm:$0xff]  ;;  %v16777_v56 = vld [vmem:[#allocation78_spill] sm:$0xff]  ;;  %v16779_v16 = vld [vmem:[#allocation83_spill] sm:$0xff] }
 0x52e   :  { %v13680_v35 = vadd.f32 %v5649_v18, %v16771_v30  ;;  %v13683_v44 = vadd.f32 %v5650_v1, %v16773_v13  ;;  %v16775_v54 = vld [vmem:[#allocation80_spill] sm:$0xff]  ;;  %v13689_v17 = vadd.f32 %v5653_v21, %v16777_v56  ;;  %v13692_v11 = vadd.f32 %v5655_v45, %v16779_v16  ;;  %v16781_v31 = vld [vmem:[#allocation129_spill] sm:$0xff]  ;;  %v16783_v34 = vld [vmem:[#allocation130_spill] sm:$0xff] }
 0x52f   :  { %16764 = vst [vmem:[#allocation112_spill] sm:$0xff] %v13668_v48  ;;  %v13686_v9 = vadd.f32 %v5652_v25, %v16775_v54  ;;  %v13695_v0 = vadd.f32 %v5656_v50, %v16781_v31  ;;  %v13698_v27 = vadd.f32 %v5658_v37, %v16783_v34  ;;  %v16785_v18 = vld [vmem:[#allocation131_spill] sm:$0xff]  ;;  %v16787_v1 = vld [vmem:[#allocation132_spill] sm:$0xff]  ;;  %v16789_v25 = vld [vmem:[#allocation133_spill] sm:$0xff] }
 0x530   :  { %16766 = vst [vmem:[#allocation114_spill] sm:$0xff] %v13671_v20  ;;  %v13701_v30 = vadd.f32 %v5659_v58, %v16785_v18  ;;  %v13704_v13 = vadd.f32 %v5661_v43, %v16787_v1  ;;  %v13707_v54 = vadd.f32 %v5662_v40, %v16789_v25  ;;  %v16791_v21 = vld [vmem:[#allocation134_spill] sm:$0xff]  ;;  %v16793_v45 = vld [vmem:[#allocation135_spill] sm:$0xff]  ;;  %v16795_v50 = vld [vmem:[#allocation12_spill] sm:$0xff] }
 0x531   :  { %16768 = vst [vmem:[#allocation101_spill] sm:$0xff] %v13674_v23  ;;  %v13710_v56 = vadd.f32 %v5664_v52, %v16791_v21  ;;  %v13713_v16 = vadd.f32 %v5665_v57, %v16793_v45  ;;  %v13716_v31 = vadd.f32 %v5667_v29, %v16795_v50  ;;  %v16797_v37 = vld [vmem:[#allocation28_spill] sm:$0xff]  ;;  %v16799_v58 = vld [vmem:[#allocation73_spill] sm:$0xff]  ;;  %v16803_v40 = vld [vmem:[#allocation34_spill] sm:$0xff] }
 0x532   :  { %16770 = vst [vmem:[#allocation96_spill] sm:$0xff] %v13677_v42  ;;  %v13719_v34 = vadd.f32 %v5668_v6, %v16797_v37  ;;  %v13722_v18 = vadd.f32 %v5670_v63, %v16799_v58  ;;  %v16801_v43 = vld [vmem:[#allocation61_spill] sm:$0xff]  ;;  %v13728_v25 = vadd.f32 %v5673_v24, %v16803_v40  ;;  %v16805_v52 = vld [vmem:[#allocation14_spill] sm:$0xff]  ;;  %v16809_v29 = vld [vmem:[#allocation47_spill] sm:$0xff]  ;;  %v5746_v63 = vrot.slane %v16691_v7, 2 }
 0x533   :  { %16772 = vst [vmem:[#allocation30_spill] sm:$0xff] %v13680_v35  ;;  %v13725_v1 = vadd.f32 %v5671_v12, %v16801_v43  ;;  %v13731_v21 = vadd.f32 %v5674_v39, %v16805_v52  ;;  %v16807_v57 = vld [vmem:[#allocation66_spill] sm:$0xff]  ;;  %v13737_v50 = vadd.f32 %v5677_v47, %v16809_v29  ;;  %v16811_v6 = vld [vmem:[#allocation43_spill] sm:$0xff]  ;;  %v5748_v58 = vrot.slane %v16697_v51, 2 }
 0x534   :  { %16774 = vst [vmem:[#allocation87_spill] sm:$0xff] %v13683_v44  ;;  %v13734_v45 = vadd.f32 %v5676_v22, %v16807_v57  ;;  %v5744_v37 = vrot.slane %v16811_v6, 2  ;;  %v5750_v12 = vrot.slane %v16711_v49, 2  ;;  %v5752_v24 = vrot.slane %v16713_v19, 2  ;;  %v16824_v44 = vld [vmem:[#allocation128_spill] sm:$0xff]  ;;  %v16826_v20 = vld [vmem:[#allocation99_spill] sm:$0xff] }
 0x535   :  { %16776 = vst [vmem:[#allocation89_spill] sm:$0xff] %v13686_v9  ;;  %v5754_v43 = vrot.slane %v16715_v33, 2  ;;  %v5756_v39 = vrot.slane %v16717_v32, 2  ;;  %v5758_v22 = vrot.slane %v16719_v55, 2  ;;  %v5760_v40 = vrot.slane %v16721_v46, 2  ;;  %v16823_v9 = vld [vmem:[#allocation127_spill] sm:$0xff] }
 0x536   :  { %16778 = vst [vmem:[#allocation50_spill] sm:$0xff] %v13689_v17  ;;  %v5762_v47 = vrot.slane %v16723_v41, 2  ;;  %v5764_v52 = vrot.slane %v16725_v2, 2  ;;  %v5766_v57 = vrot.slane %v16738_v15, 2  ;;  %v5768_v29 = vrot.slane %v16740_v61, 2  ;;  %v16822_v17 = vld [vmem:[#allocation126_spill] sm:$0xff] }
 0x537   :  { %16780 = vst [vmem:[#allocation93_spill] sm:$0xff] %v13692_v11  ;;  %v16821_v11 = vld [vmem:[#allocation125_spill] sm:$0xff]  ;;  %v16827_v48 = vld [vmem:[#allocation103_spill] sm:$0xff] }
 0x538   :  { %16782 = vst [vmem:[#allocation94_spill] sm:$0xff] %v13695_v0  ;;  %v16816_v0 = vld [vmem:[#allocation38_spill] sm:$0xff] }
 0x539   :  { %16784 = vst [vmem:[#allocation39_spill] sm:$0xff] %v13698_v27 }
 0x53a   :  { %16786 = vst [vmem:[#allocation106_spill] sm:$0xff] %v13701_v30 }
 0x53b   :  { %16788 = vst [vmem:[#allocation69_spill] sm:$0xff] %v13704_v13  ;;  %v16814_v13 = vld [vmem:[#allocation75_spill] sm:$0xff] }
 0x53c   :  { %16790 = vst [vmem:[#allocation107_spill] sm:$0xff] %v13707_v54  ;;  %v5755_v30 = vsel %vm846_vm2, %v5754_v43, %v16814_v13  ;;  %v16815_v54 = vld [vmem:[#allocation84_spill] sm:$0xff]  ;;  %v5769_v43 = vsel %vm846_vm2, %v5768_v29, %v16821_v11  ;;  %v16825_v29 = vld [vmem:[#allocation113_spill] sm:$0xff] }
 0x53d   :  { %16792 = vst [vmem:[#allocation26_spill] sm:$0xff] %v13710_v56  ;;  %v5757_v27 = vsel %vm846_vm2, %v5756_v39, %v16815_v54 }
 0x53e   :  { %16794 = vst [vmem:[#allocation40_spill] sm:$0xff] %v13713_v16  ;;  %v16813_v16 = vld [vmem:[#allocation56_spill] sm:$0xff] }
 0x53f   :  { %16796 = vst [vmem:[#allocation48_spill] sm:$0xff] %v13716_v31  ;;  %v5751_v31 = vsel %vm846_vm2, %v5750_v12, %v16753_v4  ;;  %v5753_v56 = vsel %vm846_vm2, %v5752_v24, %v16813_v16  ;;  %v16820_v12 = vld [vmem:[#allocation124_spill] sm:$0xff]  ;;  %v5801_v23 = vadd.f32 %v16813_v16, %v16825_v29 }
 0x540   :  { %16798 = vst [vmem:[#allocation85_spill] sm:$0xff] %v13719_v34  ;;  %v5749_v34 = vsel %vm846_vm2, %v5748_v58, %v16751_v26  ;;  %v16819_v58 = vld [vmem:[#allocation123_spill] sm:$0xff]  ;;  %v5767_v24 = vsel %vm846_vm2, %v5766_v57, %v16820_v12  ;;  %v5798_v57 = vadd.f32 %v5751_v31, %v16711_v49  ;;  %v5800_v42 = vadd.f32 %v5753_v56, %v16713_v19  ;;  %v16829_v56 = vld [vmem:[#allocation52_spill] sm:$0xff] }
 0x541   :  { %16800 = vst [vmem:[#allocation16_spill] sm:$0xff] %v13722_v18  ;;  %v5747_v18 = vsel %vm846_vm2, %v5746_v63, %v16749_v59  ;;  %v16818_v63 = vld [vmem:[#allocation122_spill] sm:$0xff]  ;;  %v5765_v4 = vsel %vm846_vm2, %v5764_v52, %v16819_v58  ;;  %v5796_v52 = vadd.f32 %v5749_v34, %v16697_v51 }
 0x542   :  { %16802 = vst [vmem:[#allocation8_spill] sm:$0xff] %v13725_v1  ;;  %v5745_v1 = vsel %vm846_vm2, %v5744_v37, %v16748_v8  ;;  %v5759_v8 = vsel %vm846_vm2, %v5758_v22, %v16816_v0  ;;  %v16817_v37 = vld [vmem:[#allocation121_spill] sm:$0xff]  ;;  %v5763_v26 = vsel %vm846_vm2, %v5762_v47, %v16818_v63  ;;  %v5794_v35 = vadd.f32 %v5747_v18, %v16691_v7  ;;  %v16828_v51 = vld [vmem:[#allocation58_spill] sm:$0xff] }
 0x543   :  { %16804 = vst [vmem:[#allocation49_spill] sm:$0xff] %v13728_v25  ;;  %v5761_v59 = vsel %vm846_vm2, %v5760_v40, %v16817_v37  ;;  %v5792_v47 = vadd.f32 %v5745_v1, %v16811_v6  ;;  %v5805_v1 = vadd.f32 %v16815_v54, %v16827_v48  ;;  %v5806_v7 = vadd.f32 %v5759_v8, %v16719_v55  ;;  %v16833_v54 = vld [vmem:[#allocation25_spill] sm:$0xff]  ;;  %v16834_v6 = vld [vmem:[#allocation86_spill] sm:$0xff] }
 0x544   :  { %16806 = vst [vmem:[#allocation36_spill] sm:$0xff] %v13731_v21  ;;  %v16812_v21 = vld [vmem:[#allocation100_spill] sm:$0xff]  ;;  %v5807_v49 = vadd.f32 %v16816_v0, %v16828_v51  ;;  %v5808_v19 = vadd.f32 %v5761_v59, %v16721_v46  ;;  %v5809_v16 = vadd.f32 %v16817_v37, %v16829_v56  ;;  %v5814_v55 = vadd.f32 %v5767_v24, %v16738_v15  ;;  %v16835_v15 = vld [vmem:[#allocation46_spill] sm:$0xff] }
 0x545   :  { %16808 = vst [vmem:[#allocation19_spill] sm:$0xff] %v13734_v45  ;;  %v5772_v45 = vrot.slane %v16744_v60, 2  ;;  %v5774_v25 = vrot.slane %v16812_v21, 2  ;;  %v5816_v46 = vadd.f32 %v5769_v43, %v16740_v61  ;;  %v5817_v31 = vadd.f32 %v16821_v11, %v16833_v54  ;;  %v16837_v11 = vld [vmem:[#allocation13_spill] sm:$0xff] }
 0x546   :  { %16810 = vst [vmem:[#allocation57_spill] sm:$0xff] %v13737_v50  ;;  %v5770_v50 = vrot.slane %v16742_v36, 2  ;;  %v13818_v34 = vmul.f32 0.21300554, %v5792_v47  ;;  %v5827_v8 = vmul.f32 0.21300554, %v16834_v6  ;;  %v5819_v59 = vadd.f32 %v16822_v17, %v16835_v15 }
 0x547   :  { %v5773_v22 = vsel %vm846_vm2, %v5772_v45, %v16823_v9  ;;  %v5775_v40 = vsel %vm846_vm2, %v5774_v25, %v16824_v44  ;;  %v5803_v45 = vadd.f32 %v16814_v13, %v16826_v20  ;;  %v5804_v25 = vadd.f32 %v5757_v27, %v16717_v32  ;;  %v16831_v27 = vld [vmem:[#allocation95_spill] sm:$0xff]  ;;  %v16832_v13 = vld [vmem:[#allocation97_spill] sm:$0xff] }
 0x548   :  { %v5771_v39 = vsel %vm846_vm2, %v5770_v50, %v16822_v17  ;;  %v5802_v50 = vadd.f32 %v5755_v30, %v16715_v33  ;;  %v5810_v33 = vadd.f32 %v5763_v26, %v16723_v41  ;;  %v16830_v30 = vld [vmem:[#allocation31_spill] sm:$0xff]  ;;  %v5812_v32 = vadd.f32 %v5765_v4, %v16725_v2 }
 0x549   :  { %v5811_v20 = vadd.f32 %v16818_v63, %v16830_v30  ;;  %v5813_v48 = vadd.f32 %v16819_v58, %v16831_v27  ;;  %v5815_v0 = vadd.f32 %v16820_v12, %v16832_v13  ;;  %v5825_v41 = vmul.f32 0.21300554, %v13587_v10  ;;  %v16836_v63 = vld [vmem:[#allocation53_spill] sm:$0xff]  ;;  %v16838_v12 = vld [vmem:[#allocation98_spill] sm:$0xff] }
 0x54a   :  { %v5818_v18 = vadd.f32 %v5771_v39, %v16742_v36  ;;  %v13822_v2 = vmul.f32 0.21300554, %v5794_v35  ;;  %v13825_v37 = vmul.f32 0.21300554, %v5796_v52  ;;  %v5829_v61 = vmul.f32 0.21300554, %v16836_v63 }
 0x54b   :  { %v13830_v26 = vmul.f32 0.21300554, %v5798_v57  ;;  %v13833_v58 = vmul.f32 0.21300554, %v16837_v11  ;;  %v5820_v10 = vadd.f32 %v5773_v22, %v16744_v60  ;;  %v13836_v4 = vmul.f32 0.21300554, %v5800_v42 }
 0x54c   :  { %v13838_v36 = vmul.f32 0.21300554, %v5801_v23  ;;  %v13840_v35 = vmul.f32 0.21300554, %v5802_v50  ;;  %v5821_v24 = vadd.f32 %v16823_v9, %v16838_v12  ;;  %v13844_v43 = vmul.f32 0.21300554, %v5803_v45 }
 0x54d   :  { %v13846_v17 = vmul.f32 0.21300554, %v5804_v25  ;;  %v5837_v39 = vmul.f32 0.21300554, %v5805_v1  ;;  %v5822_v47 = vadd.f32 %v5775_v40, %v16812_v21  ;;  %v13849_v52 = vmul.f32 0.21300554, %v5806_v7 }
 0x54e   :  { %v5839_v57 = vmul.f32 0.21300554, %v5807_v49  ;;  %v13851_v60 = vmul.f32 0.21300554, %v5808_v19  ;;  %v16839_v42 = vld [vmem:[#allocation102_spill] sm:$0xff]  ;;  %v5888_v25 = vrot.slane %v13818_v34, 7 }
 0x54f   :  { %v5823_v23 = vadd.f32 %v16824_v44, %v16839_v42  ;;  %v5841_v22 = vmul.f32 0.21300554, %v5809_v16  ;;  %v13855_v29 = vmul.f32 0.21300554, %v5810_v33  ;;  %v5843_v50 = vmul.f32 0.21300554, %v5811_v20 }
 0x550   :  { %v13857_v9 = vmul.f32 0.21300554, %v5812_v32  ;;  %v5845_v45 = vmul.f32 0.21300554, %v5813_v48  ;;  %v5889_v1 = vrot.slane %v5825_v41, 7  ;;  %v5891_v40 = vrot.slane %v13822_v2, 7 }
 0x551   :  { %v13860_v51 = vmul.f32 0.21300554, %v5814_v55  ;;  %v5847_v21 = vmul.f32 0.21300554, %v5815_v0  ;;  %v5892_v7 = vrot.slane %v5827_v8, 7  ;;  %v5894_v44 = vrot.slane %v13825_v37, 7 }
 0x552   :  { %v13863_v49 = vmul.f32 0.21300554, %v5816_v46  ;;  %v5849_v19 = vmul.f32 0.21300554, %v5817_v31  ;;  %v5895_v56 = vrot.slane %v5829_v61, 7  ;;  %v16840_v16 = vld [vmem:[#allocation55_spill] sm:$0xff]  ;;  %v5890_v13 = vsel %vm991_vm3, %v5888_v25, %v5889_v1 }
 0x553   :  { %v13868_v33 = vadd.f32 %v13656_v28, %v16840_v16  ;;  %v13870_v30 = vmul.f32 0.21300554, %v5818_v18  ;;  %v5851_v20 = vmul.f32 0.21300554, %v5819_v59  ;;  %v13872_v32 = vmul.f32 0.21300554, %v5820_v10 }
 0x554   :  { %v5853_v27 = vmul.f32 0.21300554, %v5821_v24  ;;  %v13874_v48 = vmul.f32 0.21300554, %v5822_v47  ;;  %v5855_v55 = vmul.f32 0.21300554, %v5823_v23  ;;  %v5893_v0 = vsel %vm991_vm3, %v5891_v40, %v5892_v7 }
 0x555   :  { %v5897_v46 = vrot.slane %v13830_v26, 7  ;;  %v5898_v54 = vrot.slane %v13833_v58, 7  ;;  %v5900_v28 = vrot.slane %v13836_v4, 7  ;;  %v5896_v31 = vsel %vm991_vm3, %v5894_v44, %v5895_v56 }
 0x556   :  { %v5901_v34 = vrot.slane %v13838_v36, 7  ;;  %v5903_v41 = vrot.slane %v13840_v35, 7  ;;  %v5904_v18 = vrot.slane %v13844_v43, 7  ;;  %v5906_v2 = vrot.slane %v13846_v17, 7 }
 0x557   :  { %v5907_v6 = vrot.slane %v5837_v39, 7  ;;  %v5909_v8 = vrot.slane %v13849_v52, 7  ;;  %v5910_v37 = vrot.slane %v5839_v57, 7  ;;  %v5912_v15 = vrot.slane %v13851_v60, 7 }
 0x558   :  { %v5913_v59 = vrot.slane %v5841_v22, 7  ;;  %v5915_v63 = vrot.slane %v13855_v29, 7  ;;  %v5916_v61 = vrot.slane %v5843_v50, 7  ;;  %v5918_v26 = vrot.slane %v13857_v9, 7 }
 0x559   :  { %v5919_v11 = vrot.slane %v5845_v45, 7  ;;  %v5921_v58 = vrot.slane %v13860_v51, 7  ;;  %v5922_v10 = vrot.slane %v5847_v21, 7  ;;  %v5924_v4 = vrot.slane %v13863_v49, 7 }
 0x55a   :  { %v5925_v36 = vrot.slane %v5849_v19, 7  ;;  %v5927_v35 = vrot.slane %v13870_v30, 7  ;;  %v5928_v12 = vrot.slane %v5851_v20, 7  ;;  %v5930_v24 = vrot.slane %v13872_v32, 7  ;;  %v16841_v19 = vld [vmem:[#allocation51_spill] sm:$0xff]  ;;  %v16843_v32 = vld [vmem:[#allocation114_spill] sm:$0xff] }
 0x55b   :  { %v5931_v43 = vrot.slane %v5853_v27, 7  ;;  %v5933_v17 = vrot.slane %v13874_v48, 7  ;;  %v5934_v39 = vrot.slane %v5855_v55, 7  ;;  %v5899_v47 = vsel %vm991_vm3, %v5897_v46, %v5898_v54  ;;  %v16845_v27 = vld [vmem:[#allocation96_spill] sm:$0xff]  ;;  %v16851_v54 = vld [vmem:[#allocation93_spill] sm:$0xff] }
 0x55c   :  { %v5902_v52 = vsel %vm991_vm3, %v5900_v28, %v5901_v34  ;;  %v5905_v57 = vsel %vm991_vm3, %v5903_v41, %v5904_v18  ;;  %v5908_v60 = vsel %vm991_vm3, %v5906_v2, %v5907_v6  ;;  %v5911_v42 = vsel %vm991_vm3, %v5909_v8, %v5910_v37  ;;  %v16857_v6 = vld [vmem:[#allocation107_spill] sm:$0xff] }
 0x55d   :  { %v5914_v23 = vsel %vm991_vm3, %v5912_v15, %v5913_v59  ;;  %v5917_v22 = vsel %vm991_vm3, %v5915_v63, %v5916_v61  ;;  %v5920_v29 = vsel %vm991_vm3, %v5918_v26, %v5919_v11  ;;  %v5923_v50 = vsel %vm991_vm3, %v5921_v58, %v5922_v10  ;;  %v16859_v61 = vld [vmem:[#allocation69_spill] sm:$0xff] }
 0x55e   :  { %v5926_v9 = vsel %vm991_vm3, %v5924_v4, %v5925_v36  ;;  %v5929_v45 = vsel %vm991_vm3, %v5927_v35, %v5928_v12  ;;  %v5968_v1 = vadd.f32 %v5888_v25, %v13643_v38  ;;  %v5932_v51 = vsel %vm991_vm3, %v5930_v24, %v5931_v43  ;;  %v16842_v25 = vld [vmem:[#allocation112_spill] sm:$0xff] }
 0x55f   :  { %v5935_v21 = vsel %vm991_vm3, %v5933_v17, %v5934_v39  ;;  %v5969_v7 = vadd.f32 %v5890_v13, %v13647_v53  ;;  %v13911_v49 = vadd.f32 %v5891_v40, %v13650_v5  ;;  %v13914_v56 = vadd.f32 %v5893_v0, %v16841_v19  ;;  %v16844_v5 = vld [vmem:[#allocation101_spill] sm:$0xff]  ;;  %v16849_v0 = vld [vmem:[#allocation50_spill] sm:$0xff]  ;;  %v16861_v36 = vld [vmem:[#allocation40_spill] sm:$0xff] }
 0x560   :  { %v13917_v16 = vadd.f32 %v5894_v44, %v13659_v62  ;;  %v13920_v30 = vadd.f32 %v5896_v31, %v13662_v3  ;;  %v13923_v38 = vadd.f32 %v5897_v46, %v13665_v14  ;;  %v13926_v20 = vadd.f32 %v5899_v47, %v16842_v25  ;;  %v16846_v62 = vld [vmem:[#allocation30_spill] sm:$0xff]  ;;  %v16847_v3 = vld [vmem:[#allocation87_spill] sm:$0xff]  ;;  %v16848_v14 = vld [vmem:[#allocation89_spill] sm:$0xff] }
 0x561   :  { %v13929_v53 = vadd.f32 %v5900_v28, %v16843_v32  ;;  %v13932_v40 = vadd.f32 %v5902_v52, %v16844_v5  ;;  %v13935_v48 = vadd.f32 %v5903_v41, %v16845_v27  ;;  %v13938_v44 = vadd.f32 %v5905_v57, %v16846_v62  ;;  %v16853_v31 = vld [vmem:[#allocation94_spill] sm:$0xff]  ;;  %v16855_v41 = vld [vmem:[#allocation39_spill] sm:$0xff]  ;;  %v16863_v39 = vld [vmem:[#allocation85_spill] sm:$0xff] }
 0x562   :  { %v13941_v55 = vadd.f32 %v5906_v2, %v16847_v3  ;;  %v13944_v13 = vadd.f32 %v5908_v60, %v16848_v14  ;;  %v13947_v46 = vadd.f32 %v5909_v8, %v16849_v0  ;;  %v13950_v28 = vadd.f32 %v5911_v42, %v16851_v54  ;;  %v16858_v2 = vld [vmem:[#allocation106_spill] sm:$0xff]  ;;  %v16866_v60 = vld [vmem:[#allocation49_spill] sm:$0xff] }
 0x563   :  { %v13953_v34 = vadd.f32 %v5912_v15, %v16853_v31  ;;  %v13956_v18 = vadd.f32 %v5914_v23, %v16855_v41  ;;  %v13959_v37 = vadd.f32 %v5918_v26, %v16857_v6  ;;  %v13962_v59 = vadd.f32 %v5915_v63, %v16858_v2  ;;  %v16860_v8 = vld [vmem:[#allocation26_spill] sm:$0xff]  ;;  %v16862_v15 = vld [vmem:[#allocation48_spill] sm:$0xff]  ;;  %v16870_v19 = vld [vmem:[#allocation57_spill] sm:$0xff] }
 0x564   :  { %16850 = vst [vmem:[#allocation74_spill] sm:$0xff] %v13947_v46  ;;  %v13965_v11 = vadd.f32 %v5917_v22, %v16859_v61  ;;  %v13968_v10 = vadd.f32 %v5920_v29, %v16860_v8  ;;  %v13971_v12 = vadd.f32 %v5921_v58, %v16861_v36  ;;  %v13974_v43 = vadd.f32 %v5923_v50, %v16862_v15  ;;  %v16864_v26 = vld [vmem:[#allocation16_spill] sm:$0xff]  ;;  %v16869_v29 = vld [vmem:[#allocation19_spill] sm:$0xff] }
 0x565   :  { %16852 = vst [vmem:[#allocation108_spill] sm:$0xff] %v13950_v28  ;;  %v13977_v47 = vadd.f32 %v5924_v4, %v16863_v39  ;;  %v13980_v52 = vadd.f32 %v5926_v9, %v16864_v26  ;;  %v16865_v63 = vld [vmem:[#allocation8_spill] sm:$0xff]  ;;  %v13986_v42 = vadd.f32 %v5929_v45, %v16866_v60  ;;  %v13990_v58 = vadd.f32 %v5932_v51, %v16869_v29  ;;  %v16872_v26 = vld [vmem:[#allocation119_spill] sm:$0xff] }
 0x566   :  { %16854 = vst [vmem:[#allocation9_spill] sm:$0xff] %v13953_v34  ;;  %v13983_v57 = vadd.f32 %v5927_v35, %v16865_v63  ;;  %v16868_v23 = vld [vmem:[#allocation36_spill] sm:$0xff]  ;;  %v5998_v50 = vadd.f32 %v5933_v17, %v16870_v19  ;;  %v5999_v25 = vadd.f32 %v5935_v21, %v13868_v33  ;;  %v6000_v4 = vmul.f32 0.26601171, %v13935_v48 }
 0x567   :  { %16856 = vst [vmem:[#allocation44_spill] sm:$0xff] %v13956_v18  ;;  %v5996_v22 = vadd.f32 %v5930_v24, %v16868_v23  ;;  %v6001_v9 = vmul.f32 0.26601171, %v13938_v44  ;;  %v6012_v32 = vadd.f32 %v13959_v37, %v5968_v1  ;;  %v6002_v35 = vmul.f32 0.26601171, %v13941_v55  ;;  %v16871_v39 = vld [vmem:[#allocation116_spill] sm:$0xff] }
 0x568   :  { %16867 = vst [vmem:[#allocation80_spill] sm:$0xff] %v13986_v42  ;;  %v6003_v45 = vmul.f32 0.26601171, %v13944_v13  ;;  %v6004_v5 = vmul.f32 0.26601171, %v13947_v46  ;;  %v6013_v24 = vadd.f32 %v13968_v10, %v5969_v7  ;;  %v6014_v33 = vadd.f32 %v13971_v12, %v13911_v49 }
 0x569   :  { %v6005_v51 = vmul.f32 0.26601171, %v13950_v28  ;;  %v6006_v17 = vmul.f32 0.26601171, %v13953_v34  ;;  %v6015_v21 = vadd.f32 %v13974_v43, %v13914_v56  ;;  %v6007_v1 = vmul.f32 0.26601171, %v13956_v18 }
 0x56a   :  { %v6008_v27 = vmul.f32 0.26601171, %v13962_v59  ;;  %v6016_v62 = vadd.f32 %v13977_v47, %v13917_v16  ;;  %v6017_v7 = vadd.f32 %v13980_v52, %v13920_v30  ;;  %v6009_v3 = vmul.f32 0.26601171, %v13965_v11 }
 0x56b   :  { %v6018_v14 = vadd.f32 %v13983_v57, %v13923_v38  ;;  %v6019_v0 = vadd.f32 %v13986_v42, %v13926_v20  ;;  %v6024_v54 = vmul.f32 0.0010283801, %v6012_v32  ;;  %v6020_v31 = vadd.f32 %v5996_v22, %v13929_v53 }
 0x56c   :  { %v6021_v41 = vadd.f32 %v13990_v58, %v13932_v40  ;;  %v6022_v6 = vadd.f32 %v5998_v50, %v13935_v48  ;;  %v6025_v2 = vmul.f32 0.0010283801, %v6013_v24  ;;  %v6010_v61 = vmul.f32 0.26601171, %v13959_v37 }
 0x56d   :  { %v6023_v8 = vadd.f32 %v5999_v25, %v13938_v44  ;;  %v6026_v36 = vmul.f32 0.0010283801, %v6014_v33  ;;  %v6027_v15 = vmul.f32 0.0010283801, %v6015_v21  ;;  %v14026_v63 = vadd.f32 %v16872_v26, %v16871_v39 }
 0x56e   :  { %v6011_v60 = vmul.f32 0.26601171, %v13968_v10  ;;  %v6028_v23 = vmul.f32 0.0010283801, %v6016_v62  ;;  %v6029_v29 = vmul.f32 0.0010283801, %v6017_v7  ;;  %v6036_v28 = vadd.f32 %v6024_v54, %v6000_v4 }
 0x56f   :  { %16873 = vst [vmem:[#allocation78_spill] sm:$0xff] %v14026_v63  ;;  %v6030_v19 = vmul.f32 0.0010283801, %v6018_v14  ;;  %v6031_v32 = vmul.f32 0.0010283801, %v6019_v0  ;;  %v6048_v50 = vadd.f32 %v13962_v59, %v13911_v49  ;;  %v6037_v25 = vadd.f32 %v6025_v2, %v6001_v9 }
 0x570   :  { %v6032_v24 = vmul.f32 0.0010283801, %v6020_v31  ;;  %v6033_v46 = vmul.f32 0.0010283801, %v6021_v41  ;;  %v6034_v18 = vmul.f32 0.0010283801, %v6022_v6  ;;  %v6038_v21 = vadd.f32 %v6026_v36, %v6002_v35 }
 0x571   :  { %v6035_v33 = vmul.f32 0.0010283801, %v6023_v8  ;;  %v6039_v34 = vadd.f32 %v6027_v15, %v6003_v45  ;;  %v6049_v39 = vadd.f32 %v13965_v11, %v13914_v56  ;;  %v6040_v26 = vadd.f32 %v6028_v23, %v6004_v5 }
 0x572   :  { %v6041_v63 = vadd.f32 %v6029_v29, %v6005_v51  ;;  %v6050_v62 = vadd.f32 %v13959_v37, %v13917_v16  ;;  %v6051_v4 = vadd.f32 %v13968_v10, %v13920_v30  ;;  %v6042_v7 = vadd.f32 %v6030_v19, %v6006_v17  ;;  %v16874_v19 = vld [vmem:[#allocation9_spill] sm:$0xff] }
 0x573   :  { %v6043_v49 = vadd.f32 %v6031_v32, %v6007_v1  ;;  %v6052_v14 = vadd.f32 %v13971_v12, %v13923_v38  ;;  %v6053_v9 = vadd.f32 %v13974_v43, %v13926_v20  ;;  %v6044_v35 = vadd.f32 %v6032_v24, %v6008_v27 }
 0x574   :  { %v6054_v56 = vadd.f32 %v13977_v47, %v13929_v53  ;;  %v6055_v45 = vadd.f32 %v13980_v52, %v13932_v40  ;;  %v6060_v5 = vmul.f32 0.007598758, %v6048_v50  ;;  %v6056_v51 = vadd.f32 %v13983_v57, %v13935_v48 }
 0x575   :  { %v6057_v17 = vadd.f32 %v13986_v42, %v13938_v44  ;;  %v6058_v1 = vadd.f32 %v5996_v22, %v13941_v55  ;;  %v6061_v0 = vmul.f32 0.007598758, %v6049_v39  ;;  %v6045_v54 = vadd.f32 %v6033_v46, %v6009_v3 }
 0x576   :  { %v6059_v27 = vadd.f32 %v13990_v58, %v13944_v13  ;;  %v6062_v31 = vmul.f32 0.007598758, %v6050_v62  ;;  %v6063_v41 = vmul.f32 0.007598758, %v6051_v4  ;;  %v6046_v6 = vadd.f32 %v6034_v18, %v6010_v61  ;;  %v16875_v58 = vld [vmem:[#allocation44_spill] sm:$0xff] }
 0x577   :  { %v6047_v2 = vadd.f32 %v6035_v33, %v6011_v60  ;;  %v6064_v8 = vmul.f32 0.007598758, %v6052_v14  ;;  %v6065_v36 = vmul.f32 0.007598758, %v6053_v9  ;;  %v6066_v15 = vmul.f32 0.007598758, %v6054_v56 }
 0x578   :  { %v6067_v23 = vmul.f32 0.007598758, %v6055_v45  ;;  %v6072_v29 = vadd.f32 %v6060_v5, %v6036_v28  ;;  %v6084_v32 = vadd.f32 %v16874_v19, %v13917_v16  ;;  %v6068_v50 = vmul.f32 0.007598758, %v6056_v51  ;;  %v16877_v45 = vld [vmem:[#allocation108_spill] sm:$0xff] }
 0x579   :  { %v6069_v24 = vmul.f32 0.007598758, %v6057_v17  ;;  %v6070_v22 = vmul.f32 0.007598758, %v6058_v1  ;;  %v6073_v39 = vadd.f32 %v6061_v0, %v6037_v25  ;;  %v6071_v46 = vmul.f32 0.007598758, %v6059_v27 }
 0x57a   :  { %v6074_v3 = vadd.f32 %v6062_v31, %v6038_v21  ;;  %v6075_v42 = vadd.f32 %v6063_v41, %v6039_v34  ;;  %v6085_v62 = vadd.f32 %v16875_v58, %v13920_v30  ;;  %v6076_v18 = vadd.f32 %v6064_v8, %v6040_v26 }
 0x57b   :  { %v6077_v61 = vadd.f32 %v6065_v36, %v6041_v63  ;;  %v6086_v60 = vadd.f32 %v13962_v59, %v13923_v38  ;;  %v6087_v28 = vadd.f32 %v13965_v11, %v13926_v20  ;;  %v6078_v33 = vadd.f32 %v6066_v15, %v6042_v7  ;;  %v16876_v7 = vld [vmem:[#allocation74_spill] sm:$0xff] }
 0x57c   :  { %v6079_v16 = vadd.f32 %v6067_v23, %v6043_v49  ;;  %v6088_v4 = vadd.f32 %v13959_v37, %v13929_v53  ;;  %v6089_v25 = vadd.f32 %v13968_v10, %v13932_v40  ;;  %v6080_v34 = vadd.f32 %v6068_v50, %v6044_v35  ;;  %v16878_v35 = vld [vmem:[#allocation80_spill] sm:$0xff] }
 0x57d   :  { %v6090_v30 = vadd.f32 %v13971_v12, %v13935_v48  ;;  %v6091_v63 = vadd.f32 %v13974_v43, %v13938_v44  ;;  %v6092_v21 = vadd.f32 %v13977_v47, %v13941_v55  ;;  %v6093_v26 = vadd.f32 %v13980_v52, %v13944_v13 }
 0x57e   :  { %v6094_v49 = vadd.f32 %v13983_v57, %v16876_v7  ;;  %v6096_v14 = vmul.f32 0.036000773, %v6084_v32  ;;  %v6097_v9 = vmul.f32 0.036000773, %v6085_v62  ;;  %v6081_v56 = vadd.f32 %v6069_v24, %v6045_v54 }
 0x57f   :  { %v6095_v5 = vadd.f32 %v16878_v35, %v16877_v45  ;;  %v6098_v51 = vmul.f32 0.036000773, %v6086_v60  ;;  %v6099_v17 = vmul.f32 0.036000773, %v6087_v28  ;;  %v6082_v1 = vadd.f32 %v6070_v22, %v6046_v6 }
 0x580   :  { %v6083_v0 = vadd.f32 %v6071_v46, %v6047_v2  ;;  %v6100_v27 = vmul.f32 0.036000773, %v6088_v4  ;;  %v6101_v31 = vmul.f32 0.036000773, %v6089_v25  ;;  %v6102_v41 = vmul.f32 0.036000773, %v6090_v30 }
 0x581   :  { %v6103_v8 = vmul.f32 0.036000773, %v6091_v63  ;;  %v6104_v36 = vmul.f32 0.036000773, %v6092_v21  ;;  %v6120_v15 = vadd.f32 %v16876_v7, %v13923_v38  ;;  %v6105_v23 = vmul.f32 0.036000773, %v6093_v26 }
 0x582   :  { %v6106_v57 = vmul.f32 0.036000773, %v6094_v49  ;;  %v6108_v32 = vadd.f32 %v6096_v14, %v6072_v29  ;;  %v6109_v50 = vadd.f32 %v6097_v9, %v6073_v39  ;;  %v6107_v54 = vmul.f32 0.036000773, %v6095_v5 }
 0x583   :  { %v6110_v24 = vadd.f32 %v6098_v51, %v6074_v3  ;;  %v6111_v62 = vadd.f32 %v6099_v17, %v6075_v42  ;;  %v6121_v60 = vadd.f32 %v16877_v45, %v13926_v20  ;;  %v6112_v6 = vadd.f32 %v6100_v27, %v6076_v18 }
 0x584   :  { %v6113_v2 = vadd.f32 %v6101_v31, %v6077_v61  ;;  %v6122_v22 = vadd.f32 %v16874_v19, %v13929_v53  ;;  %v6123_v46 = vadd.f32 %v16875_v58, %v13932_v40  ;;  %v6114_v28 = vadd.f32 %v6102_v41, %v6078_v33 }
 0x585   :  { %v6115_v38 = vadd.f32 %v6103_v8, %v6079_v16  ;;  %v6116_v4 = vadd.f32 %v6104_v36, %v6080_v34  ;;  %v6124_v29 = vadd.f32 %v13962_v59, %v13935_v48  ;;  %v6125_v42 = vadd.f32 %v13965_v11, %v13938_v44 }
 0x586   :  { %v6126_v20 = vadd.f32 %v13959_v37, %v13941_v55  ;;  %v6127_v39 = vadd.f32 %v13968_v10, %v13944_v13  ;;  %v6132_v3 = vmul.f32 0.10936069, %v6120_v15  ;;  %v6128_v18 = vadd.f32 %v13971_v12, %v16876_v7 }
 0x587   :  { %v6129_v61 = vadd.f32 %v13974_v43, %v16877_v45  ;;  %v6130_v33 = vadd.f32 %v13977_v47, %v16874_v19  ;;  %v6133_v16 = vmul.f32 0.10936069, %v6121_v60  ;;  %v6117_v25 = vadd.f32 %v6105_v23, %v6081_v56 }
 0x588   :  { %v6131_v34 = vadd.f32 %v13980_v52, %v16875_v58  ;;  %v6134_v30 = vmul.f32 0.10936069, %v6122_v22  ;;  %v6135_v63 = vmul.f32 0.10936069, %v6123_v46  ;;  %v6118_v21 = vadd.f32 %v6106_v57, %v6082_v1 }
 0x589   :  { %v6119_v26 = vadd.f32 %v6107_v54, %v6083_v0  ;;  %v6136_v49 = vmul.f32 0.10936069, %v6124_v29  ;;  %v6156_v14 = vadd.f32 %v13941_v55, %v13929_v53  ;;  %v6137_v9 = vmul.f32 0.10936069, %v6125_v42 }
 0x58a   :  { %v6138_v35 = vmul.f32 0.10936069, %v6126_v20  ;;  %v6139_v5 = vmul.f32 0.10936069, %v6127_v39  ;;  %v6144_v51 = vadd.f32 %v6132_v3, %v6108_v32  ;;  %v6140_v17 = vmul.f32 0.10936069, %v6128_v18 }
 0x58b   :  { %v6141_v27 = vmul.f32 0.10936069, %v6129_v61  ;;  %v6142_v47 = vmul.f32 0.10936069, %v6130_v33  ;;  %v6145_v31 = vadd.f32 %v6133_v16, %v6109_v50  ;;  %v6143_v56 = vmul.f32 0.10936069, %v6131_v34 }
 0x58c   :  { %v6146_v41 = vadd.f32 %v6134_v30, %v6110_v24  ;;  %v6147_v8 = vadd.f32 %v6135_v63, %v6111_v62  ;;  %v6157_v52 = vadd.f32 %v13944_v13, %v13932_v40  ;;  %v6148_v1 = vadd.f32 %v6136_v49, %v6112_v6  ;;  %v16885_v3 = vld [vmem:[#allocation64_spill] sm:$0xff]  ;;  %v16887_v49 = vld [vmem:[#allocation15_spill] sm:$0xff] }
 0x58d   :  { %v6158_v0 = vadd.f32 %v16876_v7, %v13935_v48  ;;  %v6159_v53 = vadd.f32 %v16877_v45, %v13938_v44  ;;  %v6160_v36 = vadd.f32 %v16874_v19, %v13941_v55  ;;  %v6149_v15 = vadd.f32 %v6137_v9, %v6113_v2  ;;  %v16889_v9 = vld [vmem:[#allocation18_spill] sm:$0xff] }
 0x58e   :  { %v6161_v23 = vadd.f32 %v16875_v58, %v13944_v13  ;;  %v6162_v57 = vadd.f32 %v13962_v59, %v16876_v7  ;;  %v6163_v40 = vadd.f32 %v13965_v11, %v16877_v45  ;;  %v6150_v32 = vadd.f32 %v6138_v35, %v6114_v28  ;;  %v16879_v28 = vld [vmem:[#allocation117_spill] sm:$0xff] }
 0x58f   :  { %v6164_v48 = vadd.f32 %v13959_v37, %v16874_v19  ;;  %v6165_v44 = vadd.f32 %v13968_v10, %v16875_v58  ;;  %v6166_v55 = vadd.f32 %v13971_v12, %v13962_v59  ;;  %v6151_v50 = vadd.f32 %v6139_v5, %v6115_v38  ;;  %v16880_v59 = vld [vmem:[#allocation11_spill] sm:$0xff]  ;;  %v16882_v38 = vld [vmem:[#allocation118_spill] sm:$0xff] }
 0x590   :  { %v6167_v13 = vadd.f32 %v13974_v43, %v13965_v11  ;;  %v6168_v54 = vmul.f32 0.21300554, %v6156_v14  ;;  %v6169_v24 = vmul.f32 0.21300554, %v6157_v52  ;;  %v6152_v7 = vadd.f32 %v6140_v17, %v6116_v4  ;;  %v16883_v11 = vld [vmem:[#allocation54_spill] sm:$0xff]  ;;  %v16893_v17 = vld [vmem:[#allocation60_spill] sm:$0xff] }
 0x591   :  { %v6170_v62 = vmul.f32 0.21300554, %v6158_v0  ;;  %v6171_v60 = vmul.f32 0.21300554, %v6159_v53  ;;  %v6172_v45 = vmul.f32 0.21300554, %v6160_v36  ;;  %v6153_v6 = vadd.f32 %v6141_v27, %v6117_v25 }
 0x592   :  { %v6173_v2 = vmul.f32 0.21300554, %v6161_v23  ;;  %v6174_v22 = vmul.f32 0.21300554, %v6162_v57  ;;  %v6175_v37 = vmul.f32 0.21300554, %v6163_v40  ;;  %v6154_v19 = vadd.f32 %v6142_v47, %v6118_v21 }
 0x593   :  { %v6176_v46 = vmul.f32 0.21300554, %v6164_v48  ;;  %v6177_v10 = vmul.f32 0.21300554, %v6165_v44  ;;  %v6178_v58 = vmul.f32 0.21300554, %v6166_v55  ;;  %v14126_v12 = vadd.f32 %v16880_v59, %v16879_v28 }
 0x594   :  { %v14130_v43 = vadd.f32 %v16883_v11, %v16882_v38  ;;  %v6155_v4 = vadd.f32 %v6143_v56, %v6119_v26  ;;  %v6179_v29 = vmul.f32 0.21300554, %v6167_v13  ;;  %v14132_v42 = vadd.f32 %v6168_v54, %v6144_v51  ;;  %v16891_v5 = vld [vmem:[#allocation22_spill] sm:$0xff]  ;;  %v16895_v47 = vld [vmem:[#allocation63_spill] sm:$0xff]  ;;  %v16903_v53 = vld [vmem:[#allocation68_spill] sm:$0xff] }
 0x595   :  { %16881 = vst [vmem:[#allocation83_spill] sm:$0xff] %v14126_v12  ;;  %v14134_v20 = vadd.f32 %v6169_v24, %v6145_v31  ;;  %v14136_v39 = vadd.f32 %v6170_v62, %v6146_v41  ;;  %v14140_v18 = vmul.f32 %v16885_v3, %v16885_v3  ;;  %v14142_v61 = vadd.f32 %v6171_v60, %v6147_v8  ;;  %v16897_v56 = vld [vmem:[#allocation67_spill] sm:$0xff]  ;;  %v16899_v8 = vld [vmem:[#allocation72_spill] sm:$0xff]  ;;  %v16907_v57 = vld [vmem:[#allocation41_spill] sm:$0xff] }
 0x596   :  { %16884 = vst [vmem:[#allocation129_spill] sm:$0xff] %v14130_v43  ;;  %v14144_v33 = vadd.f32 %v6172_v45, %v6148_v1  ;;  %v14146_v16 = vadd.f32 %v6173_v2, %v6149_v15  ;;  %v14148_v25 = vadd.f32 %v6174_v22, %v6150_v32  ;;  %v14150_v34 = vadd.f32 %v6175_v37, %v6151_v50  ;;  %v16901_v1 = vld [vmem:[#allocation32_spill] sm:$0xff]  ;;  %v16909_v32 = vld [vmem:[#allocation27_spill] sm:$0xff]  ;;  %v16913_v50 = vld [vmem:[#allocation29_spill] sm:$0xff] }
 0x597   :  { %16886 = vst [vmem:[#allocation130_spill] sm:$0xff] %v14140_v18  ;;  %v14152_v30 = vadd.f32 %v6176_v46, %v6152_v7  ;;  %v14154_v63 = vadd.f32 %v6177_v10, %v6153_v6  ;;  %v14156_v21 = vadd.f32 %v6178_v58, %v6154_v19  ;;  %v14158_v26 = vadd.f32 %v6179_v29, %v6155_v4  ;;  %v16905_v15 = vld [vmem:[#allocation76_spill] sm:$0xff]  ;;  %v16915_v54 = vld [vmem:[#allocation17_spill] sm:$0xff]  ;;  %v16925_v19 = vld [vmem:[#allocation42_spill] sm:$0xff] }
 0x598   :  { %v14162_v14 = vmul.f32 %v16887_v49, %v16887_v49  ;;  %v14166_v35 = vmul.f32 %v16889_v9, %v16889_v9  ;;  %v14170_v51 = vmul.f32 %v16891_v5, %v16891_v5  ;;  %v14174_v27 = vmul.f32 %v16893_v17, %v16893_v17  ;;  %v16911_v44 = vld [vmem:[#allocation20_spill] sm:$0xff]  ;;  %v16917_v7 = vld [vmem:[#allocation37_spill] sm:$0xff]  ;;  %v16927_v10 = vld [vmem:[#allocation70_spill] sm:$0xff] }
 0x599   :  { %v14178_v31 = vmul.f32 %v16895_v47, %v16895_v47  ;;  %v14182_v41 = vmul.f32 %v16897_v56, %v16897_v56  ;;  %v14186_v52 = vmul.f32 %v16899_v8, %v16899_v8  ;;  %v14190_v0 = vmul.f32 %v16901_v1, %v16901_v1  ;;  %v16919_v60 = vld [vmem:[#allocation45_spill] sm:$0xff]  ;;  %v16929_v28 = vld [vmem:[#allocation71_spill] sm:$0xff] }
 0x59a   :  { %16888 = vst [vmem:[#allocation131_spill] sm:$0xff] %v14162_v14  ;;  %v14194_v36 = vmul.f32 %v16903_v53, %v16903_v53  ;;  %v14198_v23 = vmul.f32 %v16905_v15, %v16905_v15  ;;  %v14202_v40 = vmul.f32 %v16907_v57, %v16907_v57  ;;  %v14206_v48 = vmul.f32 %v16909_v32, %v16909_v32  ;;  %v16921_v6 = vld [vmem:[#allocation33_spill] sm:$0xff] }
 0x59b   :  { %16890 = vst [vmem:[#allocation132_spill] sm:$0xff] %v14166_v35  ;;  %v14210_v55 = vmul.f32 %v16911_v44, %v16911_v44  ;;  %v14214_v13 = vmul.f32 %v16913_v50, %v16913_v50  ;;  %v14218_v24 = vmul.f32 %v16915_v54, %v16915_v54  ;;  %v14222_v62 = vmul.f32 %v16917_v7, %v16917_v7  ;;  %v16923_v22 = vld [vmem:[#allocation21_spill] sm:$0xff] }
 0x59c   :  { %16892 = vst [vmem:[#allocation133_spill] sm:$0xff] %v14170_v51  ;;  %v14226_v45 = vmul.f32 %v16919_v60, %v16919_v60  ;;  %v14230_v2 = vmul.f32 %v16921_v6, %v16921_v6  ;;  %v14234_v37 = vmul.f32 %v16923_v22, %v16923_v22  ;;  %v14238_v46 = vmul.f32 %v16925_v19, %v16925_v19  ;;  %v16931_v38 = vld [vmem:[#allocation105_spill] sm:$0xff] }
 0x59d   :  { %16894 = vst [vmem:[#allocation134_spill] sm:$0xff] %v14174_v27  ;;  %v14242_v58 = vmul.f32 %v16927_v10, %v16927_v10  ;;  %v14246_v59 = vmul.f32 %v16929_v28, %v16929_v28  ;;  %v14250_v11 = vmul.f32 %v16931_v38, %v16931_v38  ;;  %v14254_v4 = vmul.f32 %v16909_v32, %v16885_v3  ;;  %v16934_v32 = vld [vmem:[#allocation109_spill] sm:$0xff] }
 0x59e   :  { %16896 = vst [vmem:[#allocation135_spill] sm:$0xff] %v14178_v31  ;;  %v14258_v29 = vmul.f32 %v16911_v44, %v16887_v49  ;;  %v14262_v43 = vmul.f32 %v16913_v50, %v16889_v9  ;;  %v14266_v12 = vmul.f32 %v16915_v54, %v16891_v5  ;;  %v14274_v3 = vmul.f32 %v16919_v60, %v16895_v47  ;;  %v16935_v44 = vld [vmem:[#allocation110_spill] sm:$0xff]  ;;  %v16938_v60 = vld [vmem:[#allocation65_spill] sm:$0xff] }
 0x59f   :  { %16898 = vst [vmem:[#allocation12_spill] sm:$0xff] %v14182_v41  ;;  %v14278_v49 = vmul.f32 %v16921_v6, %v16897_v56  ;;  %v14282_v9 = vmul.f32 %v16923_v22, %v16899_v8  ;;  %v14286_v5 = vmul.f32 %v16925_v19, %v16901_v1  ;;  %v14294_v47 = vmul.f32 %v16929_v28, %v16905_v15  ;;  %v16936_v1 = vld [vmem:[#allocation111_spill] sm:$0xff]  ;;  %v16939_v6 = vld [vmem:[#allocation77_spill] sm:$0xff] }
 0x5a0   :  { %16900 = vst [vmem:[#allocation28_spill] sm:$0xff] %v14186_v52  ;;  %v14298_v56 = vmul.f32 %v16931_v38, %v16907_v57  ;;  %v6228_v8 = vsub.f32 %v16934_v32, %v14140_v18  ;;  %v6229_v50 = vsub.f32 %v16935_v44, %v14162_v14  ;;  %v6230_v54 = vsub.f32 %v16936_v1, %v14166_v35  ;;  %v16940_v57 = vld [vmem:[#allocation79_spill] sm:$0xff]  ;;  %v16942_v38 = vld [vmem:[#allocation92_spill] sm:$0xff]  ;;  %v16943_v44 = vld [vmem:[#allocation81_spill] sm:$0xff] }
 0x5a1   :  { %16902 = vst [vmem:[#allocation73_spill] sm:$0xff] %v14190_v0  ;;  %v6232_v15 = vsub.f32 %v16938_v60, %v14174_v27  ;;  %v6233_v22 = vsub.f32 %v16939_v6, %v14178_v31  ;;  %v6234_v19 = vsub.f32 %v16940_v57, %v14182_v41  ;;  %v6236_v32 = vsub.f32 %v16942_v38, %v14190_v0  ;;  %v16945_v60 = vld [vmem:[#allocation115_spill] sm:$0xff]  ;;  %v16946_v6 = vld [vmem:[#allocation120_spill] sm:$0xff] }
 0x5a2   :  { %16904 = vst [vmem:[#allocation61_spill] sm:$0xff] %v14194_v36  ;;  %v6237_v1 = vsub.f32 %v16943_v44, %v14194_v36  ;;  %v6239_v27 = vsub.f32 %v16945_v60, %v14202_v40  ;;  %v6240_v31 = vsub.f32 %v16946_v6, %v14206_v48  ;;  %v16947_v57 = vld [vmem:[#allocation35_spill] sm:$0xff]  ;;  %v16949_v38 = vld [vmem:[#allocation88_spill] sm:$0xff]  ;;  %v16950_v44 = vld [vmem:[#allocation90_spill] sm:$0xff]  ;;  %v6252_v6 = vsub.f32 %v14132_v42, %v14254_v4 }
 0x5a3   :  { %16906 = vst [vmem:[#allocation34_spill] sm:$0xff] %v14198_v23  ;;  %v6241_v41 = vsub.f32 %v16947_v57, %v14210_v55  ;;  %v6243_v0 = vsub.f32 %v16949_v38, %v14218_v24  ;;  %v6253_v57 = vsub.f32 %v14134_v20, %v14258_v29  ;;  %v6255_v38 = vsub.f32 %v14142_v61, %v14266_v12  ;;  %v16953_v42 = vld [vmem:[#allocation24_spill] sm:$0xff]  ;;  %v16954_v61 = vld [vmem:[#allocation59_spill] sm:$0xff] }
 0x5a4   :  { %16908 = vst [vmem:[#allocation14_spill] sm:$0xff] %v14202_v40  ;;  %v6258_v20 = vsub.f32 %v14148_v25, %v14278_v49  ;;  %v6263_v25 = vsub.f32 %v14158_v26, %v14298_v56  ;;  %v16957_v35 = vld [vmem:[#allocation83_spill] sm:$0xff] }
 0x5a5   :  { %16910 = vst [vmem:[#allocation66_spill] sm:$0xff] %v14206_v48 }
 0x5a6   :  { %16912 = vst [vmem:[#allocation47_spill] sm:$0xff] %v14210_v55 }
 0x5a7   :  { %16914 = vst [vmem:[#allocation43_spill] sm:$0xff] %v14214_v13 }
 0x5a8   :  { %16916 = vst [vmem:[#allocation100_spill] sm:$0xff] %v14218_v24 }
 0x5a9   :  { %16918 = vst [vmem:[#allocation56_spill] sm:$0xff] %v14222_v62 }
 0x5aa   :  { %16920 = vst [vmem:[#allocation75_spill] sm:$0xff] %v14226_v45 }
 0x5ab   :  { %16922 = vst [vmem:[#allocation84_spill] sm:$0xff] %v14230_v2 }
 0x5ac   :  { %16924 = vst [vmem:[#allocation38_spill] sm:$0xff] %v14234_v37 }
 0x5ad   :  { %16926 = vst [vmem:[#allocation121_spill] sm:$0xff] %v14238_v46 }
 0x5ae   :  { %16928 = vst [vmem:[#allocation122_spill] sm:$0xff] %v14242_v58 }
 0x5af   :  { %16930 = vst [vmem:[#allocation123_spill] sm:$0xff] %v14246_v59  ;;  %v14270_v59 = vmul.f32 %v16917_v7, %v16893_v17  ;;  %v14290_v17 = vmul.f32 %v16927_v10, %v16903_v53  ;;  %v16937_v53 = vld [vmem:[#allocation62_spill] sm:$0xff]  ;;  %v16941_v10 = vld [vmem:[#allocation91_spill] sm:$0xff] }
 0x5b0   :  { %16933 = vst [vmem:[#allocation125_spill] sm:$0xff] %v14294_v47  ;;  %v6231_v7 = vsub.f32 %v16937_v53, %v14170_v51  ;;  %v6235_v28 = vsub.f32 %v16941_v10, %v14186_v52  ;;  %v16944_v53 = vld [vmem:[#allocation82_spill] sm:$0xff]  ;;  %v16948_v10 = vld [vmem:[#allocation23_spill] sm:$0xff] }
 0x5b1   :  { %16932 = vst [vmem:[#allocation124_spill] sm:$0xff] %v14290_v17  ;;  %v6238_v51 = vsub.f32 %v16944_v53, %v14198_v23  ;;  %v6242_v52 = vsub.f32 %v16948_v10, %v14214_v13  ;;  %v6244_v53 = vsub.f32 %v16950_v44, %v14222_v62  ;;  %v16951_v23 = vld [vmem:[#allocation104_spill] sm:$0xff]  ;;  %v6254_v10 = vsub.f32 %v14136_v39, %v14262_v43 }
 0x5b2   :  { %v6245_v60 = vsub.f32 %v16951_v23, %v14226_v45  ;;  %v6256_v40 = vsub.f32 %v14144_v33, %v14270_v59  ;;  %v6257_v44 = vsub.f32 %v14146_v16, %v14274_v3  ;;  %v16952_v23 = vld [vmem:[#allocation10_spill] sm:$0xff]  ;;  %v6247_v45 = vsub.f32 %v16953_v42, %v14234_v37 }
 0x5b3   :  { %v6246_v36 = vsub.f32 %v16952_v23, %v14230_v2  ;;  %v6259_v39 = vsub.f32 %v14150_v34, %v14282_v9  ;;  %v6248_v62 = vsub.f32 %v16954_v61, %v14238_v46  ;;  %v6260_v33 = vsub.f32 %v14152_v30, %v14286_v5  ;;  %v16955_v42 = vld [vmem:[#allocation78_spill] sm:$0xff] }
 0x5b4   :  { %v6261_v16 = vsub.f32 %v14154_v63, %v14290_v17  ;;  %v6262_v23 = vsub.f32 %v14156_v21, %v14294_v47  ;;  %v6249_v37 = vsub.f32 %v16955_v42, %v14242_v58  ;;  %v6266_v34 = vmul.f32 2.0, %v6252_v6  ;;  %v16958_v63 = vld [vmem:[#allocation129_spill] sm:$0xff] }
 0x5b5   :  { %v6267_v2 = vmul.f32 2.0, %v6253_v57  ;;  %v6268_v24 = vmul.f32 2.0, %v6254_v10  ;;  %v6269_v61 = vmul.f32 2.0, %v6255_v38  ;;  %v6270_v46 = vmul.f32 2.0, %v6256_v40 }
 0x5b6   :  { %v6271_v13 = vmul.f32 2.0, %v6257_v44  ;;  %v16956_v30 = vld [vmem:[#allocation123_spill] sm:$0xff]  ;;  %v6251_v14 = vsub.f32 %v16958_v63, %v14250_v11  ;;  %v6272_v21 = vmul.f32 2.0, %v6258_v20  ;;  %v6273_v47 = vmul.f32 2.0, %v6259_v39 }
 0x5b7   :  { %v6250_v55 = vsub.f32 %v16957_v35, %v16956_v30  ;;  %v6274_v48 = vmul.f32 2.0, %v6260_v33  ;;  %v6275_v18 = vmul.f32 2.0, %v6261_v16  ;;  %v6276_v42 = vmul.f32 2.0, %v6262_v23 }
 0x5b8   :  { %v6278_v58 = vstv %s14332_s1  ;;  %v6277_v17 = vmul.f32 2.0, %v6263_v25  ;;  %v6291_v57 = vadd.f32 %v6240_v31, %v6228_v8  ;;  %v6292_v39 = vadd.f32 %v6241_v41, %v6229_v50 }
 0x5b9   :  { %v14375_v26 = vadd.f32 %v6278_v58, %v6266_v34  ;;  %v14377_v6 = vadd.f32 %v6278_v58, %v6267_v2  ;;  %v14379_v40 = vadd.f32 %v6278_v58, %v6268_v24  ;;  %v14381_v10 = vadd.f32 %v6278_v58, %v6269_v61 }
 0x5ba   :  { %v14383_v35 = vadd.f32 %v6278_v58, %v6270_v46  ;;  %v14385_v38 = vadd.f32 %v6278_v58, %v6271_v13  ;;  %v14387_v44 = vadd.f32 %v6278_v58, %v6272_v21  ;;  %v14389_v20 = vadd.f32 %v6278_v58, %v6273_v47 }
 0x5bb   :  { %v6293_v33 = vadd.f32 %v6242_v52, %v6230_v54  ;;  %v6294_v16 = vadd.f32 %v6243_v0, %v6231_v7  ;;  %v6295_v2 = vadd.f32 %v6244_v53, %v6232_v15  ;;  %v6296_v23 = vadd.f32 %v6245_v60, %v6233_v22  ;;  %v16964_v53 = vld [vmem:[#allocation66_spill] sm:$0xff]  ;;  %v16965_v60 = vld [vmem:[#allocation131_spill] sm:$0xff] }
 0x5bc   :  { %v6297_v31 = vadd.f32 %v6246_v36, %v6234_v19  ;;  %v6298_v24 = vadd.f32 %v6247_v45, %v6235_v28  ;;  %v6299_v8 = vadd.f32 %v6248_v62, %v6236_v32  ;;  %v6300_v25 = vadd.f32 %v6249_v37, %v6237_v1 }
 0x5bd   :  { %v6301_v34 = vadd.f32 %v6250_v55, %v6238_v51  ;;  %v14393_v46 = vadd.f32 %v6278_v58, %v6274_v48  ;;  %v14395_v13 = vadd.f32 %v6278_v58, %v6275_v18  ;;  %v14397_v61 = vadd.f32 %v6278_v58, %v6276_v42  ;;  %v16968_v42 = vld [vmem:[#allocation43_spill] sm:$0xff] }
 0x5be   :  { %v6302_v47 = vadd.f32 %v6251_v14, %v6239_v27  ;;  %v14399_v63 = vadd.f32 %v6278_v58, %v6277_v17  ;;  %v6303_v41 = vadd.f32 %v6291_v57, %v6278_v58  ;;  %v6304_v52 = vadd.f32 %v6292_v39, %v6278_v58  ;;  %v16969_v57 = vld [vmem:[#allocation133_spill] sm:$0xff] }
 0x5bf   :  { %16959 = vst [vmem:[#allocation126_spill] sm:$0xff] %v14395_v13  ;;  %v6305_v50 = vadd.f32 %v6293_v33, %v6278_v58  ;;  %v6306_v0 = vadd.f32 %v6294_v16, %v6278_v58  ;;  %v6307_v54 = vadd.f32 %v6295_v2, %v6278_v58  ;;  %v6308_v7 = vadd.f32 %v6296_v23, %v6278_v58  ;;  %v16972_v16 = vld [vmem:[#allocation134_spill] sm:$0xff]  ;;  %v16973_v2 = vld [vmem:[#allocation56_spill] sm:$0xff] }
 0x5c0   :  { %16960 = vst [vmem:[#allocation127_spill] sm:$0xff] %v14397_v61  ;;  %v14401_v36 = vadd.f32 %v6297_v31, %v6278_v58  ;;  %v14403_v62 = vadd.f32 %v6298_v24, %v6278_v58  ;;  %v14405_v51 = vadd.f32 %v6299_v8, %v6278_v58  ;;  %v14407_v18 = vadd.f32 %v6300_v25, %v6278_v58  ;;  %v16974_v25 = vld [vmem:[#allocation135_spill] sm:$0xff]  ;;  %v16982_v61 = vld [vmem:[#allocation61_spill] sm:$0xff] }
 0x5c1   :  { %16961 = vst [vmem:[#allocation128_spill] sm:$0xff] %v14399_v63  ;;  %v14409_v48 = vadd.f32 %v6301_v34, %v6278_v58  ;;  %v14411_v14 = vadd.f32 %v6302_v47, %v6278_v58  ;;  %v6315_v27 = vmul.f32 2.0, %v14254_v4  ;;  %v6316_v55 = vmul.f32 2.0, %v14258_v29  ;;  %v16962_v58 = vld [vmem:[#allocation124_spill] sm:$0xff]  ;;  %v16963_v4 = vld [vmem:[#allocation130_spill] sm:$0xff]  ;;  %v16975_v34 = vld [vmem:[#allocation75_spill] sm:$0xff] }
 0x5c2   :  { %v6317_v45 = vmul.f32 2.0, %v14262_v43  ;;  %v6318_v37 = vmul.f32 2.0, %v14266_v12  ;;  %v6319_v17 = vmul.f32 2.0, %v14270_v59  ;;  %v6320_v15 = vmul.f32 2.0, %v14274_v3  ;;  %v16966_v43 = vld [vmem:[#allocation47_spill] sm:$0xff]  ;;  %v16967_v12 = vld [vmem:[#allocation132_spill] sm:$0xff] }
 0x5c3   :  { %v6321_v22 = vmul.f32 2.0, %v14278_v49  ;;  %v6322_v19 = vmul.f32 2.0, %v14282_v9  ;;  %v6323_v28 = vmul.f32 2.0, %v14286_v5  ;;  %v6324_v32 = vmul.f32 2.0, %v16962_v58  ;;  %v16970_v3 = vld [vmem:[#allocation100_spill] sm:$0xff]  ;;  %v16971_v49 = vld [vmem:[#allocation125_spill] sm:$0xff] }
 0x5c4   :  { %v6327_v1 = vstv %s14391_s2  ;;  %v6352_v29 = vadd.f32 %v16964_v53, %v16963_v4  ;;  %v6353_v21 = vadd.f32 %v16966_v43, %v16965_v60  ;;  %v6354_v59 = vadd.f32 %v16968_v42, %v16967_v12  ;;  %v16976_v58 = vld [vmem:[#allocation12_spill] sm:$0xff] }
 0x5c5   :  { %v6355_v39 = vadd.f32 %v16970_v3, %v16969_v57  ;;  %v6325_v33 = vmul.f32 2.0, %v16971_v49  ;;  %v6326_v9 = vmul.f32 2.0, %v14298_v56  ;;  %v6328_v5 = vadd.f32 %v6327_v1, %v6315_v27  ;;  %v16977_v4 = vld [vmem:[#allocation84_spill] sm:$0xff]  ;;  %v16979_v56 = vld [vmem:[#allocation38_spill] sm:$0xff] }
 0x5c6   :  { %v6356_v23 = vadd.f32 %v16973_v2, %v16972_v16  ;;  %v6329_v31 = vadd.f32 %v6327_v1, %v6316_v55  ;;  %v6330_v24 = vadd.f32 %v6327_v1, %v6317_v45  ;;  %v6331_v8 = vadd.f32 %v6327_v1, %v6318_v37  ;;  %v16978_v3 = vld [vmem:[#allocation28_spill] sm:$0xff]  ;;  %v16980_v55 = vld [vmem:[#allocation73_spill] sm:$0xff] }
 0x5c7   :  { %v6357_v47 = vadd.f32 %v16975_v34, %v16974_v25  ;;  %v6358_v53 = vadd.f32 %v16977_v4, %v16976_v58  ;;  %v6364_v60 = vadd.f32 %v6352_v29, %v6327_v1  ;;  %v6365_v43 = vadd.f32 %v6353_v21, %v6327_v1  ;;  %v16981_v45 = vld [vmem:[#allocation121_spill] sm:$0xff]  ;;  %v16983_v25 = vld [vmem:[#allocation122_spill] sm:$0xff] }
 0x5c8   :  { %v6366_v12 = vadd.f32 %v6354_v59, %v6327_v1  ;;  %v6332_v42 = vadd.f32 %v6327_v1, %v6319_v17  ;;  %v6333_v57 = vadd.f32 %v6327_v1, %v6320_v15  ;;  %v6359_v27 = vadd.f32 %v16979_v56, %v16978_v3  ;;  %v16984_v59 = vld [vmem:[#allocation34_spill] sm:$0xff] }
 0x5c9   :  { %v6367_v49 = vadd.f32 %v6355_v39, %v6327_v1  ;;  %v6334_v63 = vadd.f32 %v6327_v1, %v6321_v22  ;;  %v6335_v16 = vadd.f32 %v6327_v1, %v6322_v19  ;;  %v6360_v37 = vadd.f32 %v16981_v45, %v16980_v55  ;;  %v16985_v39 = vld [vmem:[#allocation14_spill] sm:$0xff] }
 0x5ca   :  { %v6368_v2 = vadd.f32 %v6356_v23, %v6327_v1  ;;  %v6361_v34 = vadd.f32 %v16983_v25, %v16982_v61  ;;  %v6369_v13 = vadd.f32 %v6357_v47, %v6327_v1  ;;  %v6376_v58 = vmul.f32 %v6364_v60, %v6303_v41 }
 0x5cb   :  { %v6377_v29 = vmul.f32 %v6365_v43, %v6304_v52  ;;  %v6336_v21 = vadd.f32 %v6327_v1, %v6323_v28  ;;  %v6362_v17 = vadd.f32 %v16956_v30, %v16984_v59  ;;  %v6370_v15 = vadd.f32 %v6358_v53, %v6327_v1 }
 0x5cc   :  { %v6378_v4 = vmul.f32 %v6366_v12, %v6305_v50  ;;  %v6337_v3 = vadd.f32 %v6327_v1, %v6324_v32  ;;  %v6363_v22 = vadd.f32 %v14250_v11, %v16985_v39  ;;  %v6371_v19 = vadd.f32 %v6359_v27, %v6327_v1 }
 0x5cd   :  { %v6379_v56 = vmul.f32 %v6367_v49, %v6306_v0  ;;  %v6338_v55 = vadd.f32 %v6327_v1, %v6325_v33  ;;  %v6372_v23 = vadd.f32 %v6360_v37, %v6327_v1  ;;  %v6380_v45 = vmul.f32 %v6368_v2, %v6307_v54 }
 0x5ce   :  { %6509 = vrcp.f32 %v6376_v58  ;;  %v6339_v61 = vadd.f32 %v6327_v1, %v6326_v9  ;;  %v6373_v47 = vadd.f32 %v6361_v34, %v6327_v1  ;;  %v6381_v41 = vmul.f32 %v6369_v13, %v6308_v7 }
 0x5cf   :  { %6511 = vrcp.f32 %v6377_v29  ;;  %v6340_v52 = vmul.f32 %v6328_v5, %v14375_v26  ;;  %v6374_v28 = vadd.f32 %v6362_v17, %v6327_v1  ;;  %v6382_v30 = vmul.f32 %v6370_v15, %v14401_v36 }
 0x5d0   :  { %6513 = vrcp.f32 %v6378_v4  ;;  %v6341_v50 = vmul.f32 %v6329_v31, %v14377_v6  ;;  %v6375_v32 = vadd.f32 %v6363_v22, %v6327_v1  ;;  %v6383_v11 = vmul.f32 %v6371_v19, %v14403_v62  ;;  %v16986_v1 = vld [vmem:[#allocation126_spill] sm:$0xff] }
 0x5d1   :  { %6515 = vrcp.f32 %v6379_v56  ;;  %v6342_v0 = vmul.f32 %v6330_v24, %v14379_v40  ;;  %v6343_v54 = vmul.f32 %v6331_v8, %v14381_v10  ;;  %v6384_v33 = vmul.f32 %v6372_v23, %v14405_v51 }
 0x5d2   :  { %6517 = vrcp.f32 %v6380_v45  ;;  %v14458_v13 = vmul.f32 %v6332_v42, %v14383_v35  ;;  %v14461_v26 = vmul.f32 %v6333_v57, %v14385_v38  ;;  %v6385_v7 = vmul.f32 %v6373_v47, %v14407_v18 }
 0x5d3   :  { %6519 = vrcp.f32 %v6381_v41  ;;  %v14465_v36 = vmul.f32 %v6334_v63, %v14387_v44  ;;  %v14468_v40 = vmul.f32 %v6335_v16, %v14389_v20  ;;  %v6386_v10 = vmul.f32 %v6374_v28, %v14409_v48  ;;  %v16987_v44 = vld [vmem:[#allocation127_spill] sm:$0xff]  ;;  %v16988_v48 = vld [vmem:[#allocation128_spill] sm:$0xff] }
 0x5d4   :  { %v6510_v6 = vpop.eup %6509  ;;  %6521 = vrcp.f32 %v6382_v30  ;;  %v14472_v35 = vmul.f32 %v6336_v21, %v14393_v46  ;;  %v6387_v38 = vmul.f32 %v6375_v32, %v14411_v14  ;;  %v14476_v9 = vmul.f32 %v6337_v3, %v16986_v1 }
 0x5d5   :  { %v6512_v62 = vpop.eup %6511  ;;  %6523 = vrcp.f32 %v6383_v11  ;;  %v6400_v51 = vmul.f32 %v6510_v6, %v6376_v58  ;;  %v14479_v63 = vmul.f32 %v6338_v55, %v16987_v44  ;;  %v14482_v31 = vmul.f32 %v6339_v61, %v16988_v48 }
 0x5d6   :  { %v6514_v18 = vpop.eup %6513  ;;  %6525 = vrcp.f32 %v6384_v33  ;;  %v6401_v20 = vmul.f32 %v6512_v62, %v6377_v29 }
 0x5d7   :  { %v6516_v5 = vpop.eup %6515  ;;  %6527 = vrcp.f32 %v6385_v7  ;;  %v6402_v46 = vmul.f32 %v6514_v18, %v6378_v4  ;;  %v6412_v24 = vsub.f32 2.0, %v6400_v51 }
 0x5d8   :  { %v6518_v8 = vpop.eup %6517  ;;  %6529 = vrcp.f32 %v6386_v10  ;;  %v6403_v14 = vmul.f32 %v6516_v5, %v6379_v56  ;;  %v6413_v53 = vsub.f32 2.0, %v6401_v20 }
 0x5d9   :  { %v6520_v60 = vpop.eup %6519  ;;  %6531 = vrcp.f32 %v6387_v38  ;;  %v6404_v43 = vmul.f32 %v6518_v8, %v6380_v45  ;;  %v6414_v12 = vsub.f32 2.0, %v6402_v46  ;;  %v6424_v42 = vmul.f32 %v6510_v6, %v6412_v24 }
 0x5da   :  { %v6522_v57 = vpop.eup %6521  ;;  %v6405_v27 = vmul.f32 %v6520_v60, %v6381_v41  ;;  %v6415_v49 = vsub.f32 2.0, %v6403_v14  ;;  %v6425_v16 = vmul.f32 %v6512_v62, %v6413_v53 }
 0x5db   :  { %v6524_v37 = vpop.eup %6523  ;;  %v6406_v2 = vmul.f32 %v6522_v57, %v6382_v30  ;;  %v6416_v25 = vsub.f32 2.0, %v6404_v43  ;;  %v6426_v34 = vmul.f32 %v6514_v18, %v6414_v12  ;;  %v6436_v58 = vmul.f32 %v6424_v42, %v6340_v52 }
 0x5dc   :  { %v6526_v29 = vpop.eup %6525  ;;  %v6407_v21 = vmul.f32 %v6524_v37, %v6383_v11  ;;  %v6417_v59 = vsub.f32 2.0, %v6405_v27  ;;  %v6427_v17 = vmul.f32 %v6516_v5, %v6415_v49  ;;  %v6437_v15 = vmul.f32 %v6425_v16, %v6341_v50 }
 0x5dd   :  { %v6528_v4 = vpop.eup %6527  ;;  %v6408_v3 = vmul.f32 %v6526_v29, %v6384_v33  ;;  %v6418_v39 = vsub.f32 2.0, %v6406_v2  ;;  %v6428_v22 = vmul.f32 %v6518_v8, %v6416_v25  ;;  %v6438_v19 = vmul.f32 %v6426_v34, %v6342_v0 }
 0x5de   :  { %v6530_v56 = vpop.eup %6529  ;;  %v6409_v55 = vmul.f32 %v6528_v4, %v6385_v7  ;;  %v6419_v23 = vsub.f32 2.0, %v6407_v21  ;;  %v6429_v45 = vmul.f32 %v6520_v60, %v6417_v59  ;;  %v6439_v61 = vmul.f32 %v6427_v17, %v6343_v54 }
 0x5df   :  { %v6532_v47 = vpop.eup %6531  ;;  %v6410_v41 = vmul.f32 %v6530_v56, %v6386_v10  ;;  %v6420_v28 = vsub.f32 2.0, %v6408_v3  ;;  %v6430_v30 = vmul.f32 %v6522_v57, %v6418_v39  ;;  %v6440_v52 = vmul.f32 %v6428_v22, %v14458_v13 }
 0x5e0   :  { %v6411_v32 = vmul.f32 %v6532_v47, %v6387_v38  ;;  %v6421_v11 = vsub.f32 2.0, %v6409_v55  ;;  %v6431_v6 = vmul.f32 %v6524_v37, %v6419_v23  ;;  %v6441_v50 = vmul.f32 %v6429_v45, %v14461_v26 }
 0x5e1   :  { %v6422_v33 = vsub.f32 2.0, %v6410_v41  ;;  %v6432_v62 = vmul.f32 %v6526_v29, %v6420_v28  ;;  %v6442_v0 = vmul.f32 %v6430_v30, %v14465_v36  ;;  %v6449_v7 = vsel %vm6448_vm4, %v6436_v58, 0.0 }
 0x5e2   :  { %v6423_v51 = vsub.f32 2.0, %v6411_v32  ;;  %v6433_v18 = vmul.f32 %v6528_v4, %v6421_v11  ;;  %v6443_v54 = vmul.f32 %v6431_v6, %v14468_v40  ;;  %v6450_v10 = vsel %vm6448_vm4, %v6438_v19, 0.0 }
 0x5e3   :  { %v6434_v1 = vmul.f32 %v6530_v56, %v6422_v33  ;;  %v6444_v13 = vmul.f32 %v6432_v62, %v14472_v35  ;;  %v6451_v38 = vadd.f32 %v6450_v10, %v6449_v7  ;;  %v6452_v44 = vsel %vm6448_vm4, %v6440_v52, 0.0 }
 0x5e4   :  { %v6435_v20 = vmul.f32 %v6532_v47, %v6423_v51  ;;  %v6454_v26 = vsel %vm6448_vm4, %v6442_v0, 0.0  ;;  %v6461_v5 = vsel %vm6460_vm5, %v6437_v15, 0.0  ;;  %v6445_v36 = vmul.f32 %v6433_v18, %v14476_v9 }
 0x5e5   :  { %v6446_v48 = vmul.f32 %v6434_v1, %v14479_v63  ;;  %v6453_v46 = vadd.f32 %v6452_v44, %v6451_v38  ;;  %v6462_v40 = vsel %vm6460_vm5, %v6439_v61, 0.0  ;;  %v6456_v24 = vsel %vm6448_vm4, %v6444_v13, 0.0 }
 0x5e6   :  { %v6463_v8 = vadd.f32 %v6462_v40, %v6461_v5  ;;  %v6464_v35 = vsel %vm6460_vm5, %v6441_v50, 0.0  ;;  %v6447_v14 = vmul.f32 %v6435_v20, %v14482_v31  ;;  %v6466_v60 = vsel %vm6460_vm5, %v6443_v54, 0.0 }
 0x5e7   :  { %v6455_v53 = vadd.f32 %v6454_v26, %v6453_v46  ;;  %v6458_v43 = vsel %vm6448_vm4, %v6446_v48, 0.0  ;;  %v6468_v9 = vsel %vm6460_vm5, %v6445_v36, 0.0 }
 0x5e8   :  { %v6465_v12 = vadd.f32 %v6464_v35, %v6463_v8  ;;  %v6470_v27 = vsel %vm6460_vm5, %v6447_v14, 0.0 }
 0x5e9   :  { %v6457_v42 = vadd.f32 %v6456_v24, %v6455_v53 }
 0x5ea   :  { %v6467_v63 = vadd.f32 %v6466_v60, %v6465_v12 }
 0x5eb   :  { %v6459_v57 = vadd.f32 %v6458_v43, %v6457_v42 }
 0x5ec   :  { %v6469_v49 = vadd.f32 %v6468_v9, %v6467_v63 }
 0x5ed   :  { %v6475_v37 = vrot.slane %v6459_v57, 5 }
 0x5ee   :  { %v6471_v16 = vadd.f32 %v6470_v27, %v6469_v49 }
 0x5f0   :  { %v6476_v2 = vrot.slane %v6471_v16, 5 }
 0x5f2   :  { %v6477_v31 = vsel %vm6474_vm6, %v6475_v37, %v6476_v2 }
 0x5f3   :  { %v6480_v25 = vsel %vm6479_vm7, %v6477_v31, 0.0 }
 0x5f4   :  { %v6481_v34 = vrot.slane %v6480_v25, 4 }
 0x5f6   :  { %v6482_v58 = vadd.f32 %v6481_v34, %v6480_v25 }
 0x5f8   :  { %v6483_v29 = vrot.slane %v6482_v58, 2 }
 0x5fa   :  { %v6484_v21 = vadd.f32 %v6483_v29, %v6482_v58 }
 0x5fc   :  { %v6485_v59 = vrot.slane %v6484_v21, 1 }
 0x5fe   :  { %v6486_v17 = vadd.f32 %v6485_v59, %v6484_v21 }
 0x600   :  { %6488 = vst.msk [vmem:[#allocation5] sm:$0x1] %vm6487_vm8, %v6486_v17 }
 0x601   :  { %6499 = dma.vmem_to_hbm [thread:$0]  %s6495_s9, 16, %s6497_s12, [#allocation3]  }
 0x602   :  { %6755 = dma.done.wait [#allocation3], 16  }
 0x603   :  { %6756 = vsyncadd [#allocation3], 4294967280 }
 0x604   :  { %6504 = vsyncpa [#allocation3], 1 }
 0x605   :  { %6505 = vsyncpa [#allocation4], 1 }

</bundles_post_ra>
